<compile_context>
chip_gen: v5e
topology: v5e:2x2
jax: 0.10.0
libtpu: 0.0.40
codegen_flags: <defaults>
</compile_context>

<pallas_src>
from functools import partial

import jax
import jax.numpy as jnp
from jax.experimental import pallas as pl
from jax.experimental.pallas import tpu as pltpu

EPS = 1e-5                    # nn.BatchNorm2d default eps
C_IN = 256                    # architecture-fixed outer channel count
_MiB = 1024 * 1024


# --------------------------------------------------------------------------
# Hardware detection / tuning knobs (trace-time Python constants)
# --------------------------------------------------------------------------
def _detect_vmem_capacity():
    try:
        info = pltpu.get_tpu_info()
        for attr in ("vmem_capacity_bytes", "vmem_bytes", "vmem_size_bytes"):
            v = getattr(info, attr, None)
            if v:
                return int(v), True
    except Exception:
        pass
    try:
        kind = jax.devices()[0].device_kind.lower()
    except Exception:
        kind = ""
    if ("v5 lite" in kind) or ("v5e" in kind) or ("v6" in kind):
        return 128 * _MiB, True          # v5e / v6e: 128 MiB per core
    if "7" in kind:
        return 64 * _MiB, True           # v7x: 64 MiB per TensorCore
    return 64 * _MiB, False              # unknown -> conservative


def _detect_multicore():
    try:
        kind = jax.devices()[0].device_kind.lower()
    except Exception:
        return False
    return "7" in kind                   # v7x: 2 TensorCores per chip


_VMEM_PHYS, _VMEM_KNOWN = _detect_vmem_capacity()
_MULTI_CORE = _detect_multicore()
# Scoped VMEM limit: ~3/4 of physical (48 MiB on v7x, 96 MiB on v5e/v6e),
# known-safe 32 MiB when detection failed.
_VMEM_LIMIT = min(3 * _VMEM_PHYS // 4, 96 * _MiB) if _VMEM_KNOWN else 32 * _MiB
# Fused (single pallas_call, zero HBM round trips) budget.  Smaller on v7x so
# mid-size inputs reach the 2-TensorCore tiled grid instead of 1 core.
_FUSED_BUDGET = min(_VMEM_LIMIT // 3, 24 * _MiB)
if _MULTI_CORE:
    _FUSED_BUDGET = min(_FUSED_BUDGET, 8 * _MiB)
_MAX_TILE = 8192 if _VMEM_LIMIT >= 64 * _MiB else 4096


# --------------------------------------------------------------------------
# Fused single-call path (small inputs): everything lives in VMEM.
# --------------------------------------------------------------------------
def _fused_kernel(x_ref, w1_ref, w2_ref, w3_ref, w4_ref, bn_ref, o_ref):
    n_batch = x_ref.shape[0]
    hw = x_ref.shape[2]
    count = n_batch * hw                      # elements per channel for BN
    bn = bn_ref[...]                          # (256, 8): [g1,b1,g3,b3,gd1,bd1,gd3,bd3]

    concat = (hw % 128 == 0) and n_batch > 1
    if concat:                                # one wide (C, N*HW) slab per layer
        hs = [jnp.concatenate([x_ref[n] for n in range(n_batch)], axis=1)]
    else:
        hs = [x_ref[n] for n in range(n_batch)]

    def layer(hs, w_ref_, idx):
        cout = w_ref_.shape[0]
        w = w_ref_[...]                       # (Cout, Cin) bf16
        ys = [jnp.dot(w, h.astype(jnp.bfloat16),
                      preferred_element_type=jnp.float32) for h in hs]
        # single-pass per-channel statistics (sum, sum of squares)
        s = sum(jnp.sum(y, axis=1, keepdims=True) for y in ys)        # (Cout,1)
        q = sum(jnp.sum(y * y, axis=1, keepdims=True) for y in ys)    # (Cout,1)
        mean = s / count
        var = jnp.maximum(q / count - mean * mean, 0.0)
        gamma = bn[:cout, 2 * idx:2 * idx + 1]
        beta = bn[:cout, 2 * idx + 1:2 * idx + 2]
        scale = gamma * jax.lax.rsqrt(var + EPS)
        shift = beta - mean * scale
        return [jnp.maximum(y * scale + shift, 0.0) for y in ys]

    hs = layer(hs, w1_ref, 0)
    hs = layer(hs, w2_ref, 1)
    hs = layer(hs, w3_ref, 2)
    hs = layer(hs, w4_ref, 3)
    if concat:
        h = hs[0]
        for n in range(n_batch):
            o_ref[n] = h[:, n * hw:(n + 1) * hw]
    else:
        for n in range(n_batch):
            o_ref[n] = hs[n]


def _fused_forward(x3, prep):
    N, C, HW = x3.shape
    args = (x3, prep["w"][0], prep["w"][1], prep["w"][2], prep["w"][3], prep["bn"])
    return pl.pallas_call(
        _fused_kernel,
        out_shape=jax.ShapeDtypeStruct((N, C, HW), jnp.float32),
        in_specs=[pl.BlockSpec(memory_space=pltpu.MemorySpace.VMEM)] * len(args),
        out_specs=pl.BlockSpec(memory_space=pltpu.MemorySpace.VMEM),
        compiler_params=pltpu.CompilerParams(vmem_limit_bytes=_VMEM_LIMIT),
    )(*args)


def _fused_fits(n, hw):
    # conservative live-bytes estimate: f32 activations of all 4 layers +
    # bf16 casts, plus the weight slabs
    px = n * hw
    act = px * (4 * (4 * 256 + 2 * 64) + 2 * (2 * 256 + 2 * 64))
    wgt = 2 * (256 * 256 + 64 * 256 + 64 * 64 + 256 * 64) + 256 * 8 * 4
    return act + wgt <= _FUSED_BUDGET


# --------------------------------------------------------------------------
# Tiled path (default for large inputs): grid over (batch, spatial tiles).
# Per layer: normalize+ReLU the previous layer's bf16 activations (f32 math),
# matmul on the MXU, store bf16, emit lane-dense partial stats.
# --------------------------------------------------------------------------
def _mm_stats_kernel(x_ref, w_ref, y_ref, s_ref, q_ref):
    # first layer: matmul + per-tile stats (no input normalization)
    y = jnp.dot(w_ref[...], x_ref[0].astype(jnp.bfloat16),
                preferred_element_type=jnp.float32)        # (Cout, T) f32
    y_ref[0] = y.astype(jnp.bfloat16)
    s_ref[0, 0] = jnp.sum(y, axis=1)[None, :]              # (1, Cout) lane-dense
    q_ref[0, 0] = jnp.sum(y * y, axis=1)[None, :]


def _bn_mm_stats_kernel(x_ref, ss_ref, w_ref, y_ref, s_ref, q_ref):
    # fused: normalize+ReLU previous layer (f32), matmul, per-tile stats
    ss = ss_ref[...]                                        # (Cin, 2) f32
    h = jnp.maximum(x_ref[0].astype(jnp.float32) * ss[:, 0:1] + ss[:, 1:2], 0.0)
    y = jnp.dot(w_ref[...], h.astype(jnp.bfloat16),
                preferred_element_type=jnp.float32)
    y_ref[0] = y.astype(jnp.bfloat16)
    s_ref[0, 0] = jnp.sum(y, axis=1)[None, :]
    q_ref[0, 0] = jnp.sum(y * y, axis=1)[None, :]


def _bn_relu_kernel(x_ref, ss_ref, o_ref):
    ss = ss_ref[...]
    o_ref[0] = jnp.maximum(x_ref[0].astype(jnp.float32) * ss[:, 0:1] + ss[:, 1:2],
                           0.0)


def _pick_tile(hw, n):
    cands = [t for t in (8192, 4096, 2048, 1024, 512, 256, 128) if t <= _MAX_TILE]
    divisors = [t for t in cands if hw % t == 0]
    if not divisors:
        # TODO(synk): HW not a multiple of 128 falls back to one full-row
        # block; masked spatial tiling would be needed for huge ragged HW.
        return hw, 1
    if _MULTI_CORE and n % 2 == 1:
        # v7x megacore: make the number of "parallel" grid steps even (>= 2)
        for t in divisors:
            if ((hw // t) * n) % 2 == 0:
                return t, hw // t
        for t in divisors:
            if hw // t >= 2:
                return t, hw // t
    t = divisors[0]
    return t, hw // t


def _tiled_layer(x, w_bf16, ss, first, t_hw, n_t):
    N, Cin, HW = x.shape
    Cout = w_bf16.shape[0]
    grid = (N, n_t)
    x_spec = pl.BlockSpec((1, Cin, t_hw), lambda n, t: (n, 0, t))
    w_spec = pl.BlockSpec((Cout, Cin), lambda n, t: (0, 0))
    y_spec = pl.BlockSpec((1, Cout, t_hw), lambda n, t: (n, 0, t))
    st_spec = pl.BlockSpec((1, 1, 1, Cout), lambda n, t: (n, t, 0, 0))
    out_shape = (jax.ShapeDtypeStruct((N, Cout, HW), jnp.bfloat16),
                 jax.ShapeDtypeStruct((N, n_t, 1, Cout), jnp.float32),
                 jax.ShapeDtypeStruct((N, n_t, 1, Cout), jnp.float32))
    if first:
        kernel = _mm_stats_kernel
        in_specs = [x_spec, w_spec]
        args = (x, w_bf16)
    else:
        kernel = _bn_mm_stats_kernel
        ss_spec = pl.BlockSpec((Cin, 2), lambda n, t: (0, 0))
        in_specs = [x_spec, ss_spec, w_spec]
        args = (x, ss, w_bf16)
    return pl.pallas_call(
        kernel,
        grid=grid,
        in_specs=in_specs,
        out_specs=(y_spec, st_spec, st_spec),
        out_shape=out_shape,
        compiler_params=pltpu.CompilerParams(
            dimension_semantics=("parallel", "parallel"),
            vmem_limit_bytes=_VMEM_LIMIT),
    )(*args)


def _tiled_bn_out(x, ss, t_hw, n_t):
    N, C, HW = x.shape
    return pl.pallas_call(
        _bn_relu_kernel,
        grid=(N, n_t),
        in_specs=[pl.BlockSpec((1, C, t_hw), lambda n, t: (n, 0, t)),
                  pl.BlockSpec((C, 2), lambda n, t: (0, 0))],
        out_specs=pl.BlockSpec((1, C, t_hw), lambda n, t: (n, 0, t)),
        out_shape=jax.ShapeDtypeStruct((N, C, HW), jnp.float32),
        compiler_params=pltpu.CompilerParams(
            dimension_semantics=("parallel", "parallel"),
            vmem_limit_bytes=_VMEM_LIMIT),
    )(x, ss)


def _scale_shift(sum_, sumsq, gamma, beta, count):
    # tiny (Cout,) math outside the kernels: fold BN into one scale/shift slab
    s = jnp.sum(sum_, axis=(0, 1, 2))         # (Cout,)
    q = jnp.sum(sumsq, axis=(0, 1, 2))        # (Cout,)
    mean = s / count
    var = jnp.maximum(q / count - mean * mean, 0.0)
    scale = gamma * jax.lax.rsqrt(var + EPS)
    shift = beta - mean * scale
    return jnp.stack([scale, shift], axis=1)  # (Cout, 2)


def _tiled_forward(x3, prep):
    N, C, HW = x3.shape
    t_hw, n_t = _pick_tile(HW, N)
    count = float(N * HW)
    h, ss = x3, None
    for i, (w, g, b) in enumerate(zip(prep["w"], prep["g"], prep["b"])):
        h, s, q = _tiled_layer(h, w, ss, first=(i == 0), t_hw=t_hw, n_t=n_t)
        ss = _scale_shift(s, q, g, b, count)
    return _tiled_bn_out(h, ss, t_hw=t_hw, n_t=n_t)


# --------------------------------------------------------------------------
# Parameter prep + top-level forward
# --------------------------------------------------------------------------
def _prepare(params):
    bf16 = jnp.bfloat16
    ws = [params["w1"].astype(bf16), params["w3"].astype(bf16),
          params["wd1"].astype(bf16), params["wd3"].astype(bf16)]
    gammas = [params["g1"], params["g3"], params["gd1"], params["gd3"]]
    betas = [params["b1"], params["b3"], params["bd1"], params["bd3"]]
    # pack the 8 BN vectors into one (256, 8) slab for the fused kernel; the
    # unused rows of the 64-channel layers are never read (sliced to :cout)
    bn = jnp.zeros((C_IN, 8), jnp.float32)
    for i, (g, b) in enumerate(zip(gammas, betas)):
        c = g.shape[0]
        bn = bn.at[:c, 2 * i].set(g).at[:c, 2 * i + 1].set(b)
    return {"w": ws, "g": gammas, "b": betas, "bn": bn}


@partial(jax.jit, static_argnames=("force_tiled",))
def autoencoder0_forward(x_nchw, params, force_tiled=False):
    N, C, H, W = x_nchw.shape
    assert C == 256, "AutoEncoder0 expects 256 input channels"
    x3 = x_nchw.reshape(N, C, H * W)          # free view, no transpose
    prep = _prepare(params)
    if (not force_tiled) and _fused_fits(N, H * W):
        out3 = _fused_forward(x3, prep)
    else:
        out3 = _tiled_forward(x3, prep)
    return out3.reshape(N, C, H, W)


# --------------------------------------------------------------------------
# Pure-JAX reference (f32) and synthetic parameters
# --------------------------------------------------------------------------
def reference_forward(x_nchw, params):
    N, C, H, W = x_nchw.shape
    h = jnp.transpose(x_nchw, (0, 2, 3, 1)).reshape(-1, C)

    def block(h, w, g, b):                    # w: (Cout, Cin)
        y = h @ w.T
        mean = y.mean(axis=0)
        var = ((y - mean) ** 2).mean(axis=0)  # biased, training-mode BN
        yhat = (y - mean) / jnp.sqrt(var + EPS)
        return jnp.maximum(yhat * g + b, 0.0)

    h = block(h, params["w1"], params["g1"], params["b1"])
    h = block(h, params["w3"], params["g3"], params["b3"])
    h = block(h, params["wd1"], params["gd1"], params["bd1"])
    h = block(h, params["wd3"], params["gd3"], params["bd3"])
    return jnp.transpose(h.reshape(N, H, W, 256), (0, 3, 1, 2))


def init_params(key):
    """Synthetic weights, stored as (Cout, Cin) matmul matrices.

    Mapping from PyTorch: Conv2d weight (out,in,1,1) -> squeeze to (out,in);
    ConvTranspose2d weight (in,out,1,1) -> transpose to (out,in).
    """
    ks = jax.random.split(key, 12)
    f32 = jnp.float32
    return {
        "w1":  0.05 * jax.random.normal(ks[0], (256, 256), f32),
        "w3":  0.05 * jax.random.normal(ks[1], (64, 256), f32),
        "wd1": 0.05 * jax.random.normal(ks[2], (64, 64), f32),
        "wd3": 0.05 * jax.random.normal(ks[3], (256, 64), f32),
        "g1":  1.0 + 0.1 * jax.random.normal(ks[4], (256,), f32),
        "b1":  0.1 * jax.random.normal(ks[5], (256,), f32),
        "g3":  1.0 + 0.1 * jax.random.normal(ks[6], (64,), f32),
        "b3":  0.1 * jax.random.normal(ks[7], (64,), f32),
        "gd1": 1.0 + 0.1 * jax.random.normal(ks[8], (64,), f32),
        "bd1": 0.1 * jax.random.normal(ks[9], (64,), f32),
        "gd3": 1.0 + 0.1 * jax.random.normal(ks[10], (256,), f32),
        "bd3": 0.1 * jax.random.normal(ks[11], (256,), f32),
    }


if __name__ == "__main__":
    key = jax.random.PRNGKey(0)
    k_x, k_p, k_x2 = jax.random.split(key, 3)

    # Channels are fixed at 256 by the architecture; small batch/spatial.
    N, C, H, W = 2, 256, 16, 16
    x = jax.random.normal(k_x, (N, C, H, W), jnp.float32)
    params = init_params(k_p)

    ref = reference_forward(x, params)
    out_fused = jax.block_until_ready(autoencoder0_forward(x, params))
    out_tiled = jax.block_until_ready(
        autoencoder0_forward(x, params, force_tiled=True))

    for out in (out_fused, out_tiled):
        assert out.shape == (N, 256, H, W), out.shape
        assert out.dtype == jnp.float32
        assert bool(jnp.all(jnp.isfinite(out)))
        assert bool(jnp.all(out >= 0.0))      # final ReLU

    # generous tolerance: bf16 matmuls / bf16 intermediates vs f32 reference
    err_f = float(jnp.max(jnp.abs(out_fused - ref)))
    err_t = float(jnp.max(jnp.abs(out_tiled - ref)))
    err_p = float(jnp.max(jnp.abs(out_fused - out_tiled)))
    assert err_f < 0.25 and err_t < 0.25 and err_p < 0.15, (err_f, err_t, err_p)

    # second shape exercising a multi-tile tiled grid (odd batch on v7x)
    x2 = jax.random.normal(k_x2, (1, 256, 32, 32), jnp.float32)
    ref2 = reference_forward(x2, params)
    out2 = jax.block_until_ready(
        autoencoder0_forward(x2, params, force_tiled=True))
    assert out2.shape == (1, 256, 32, 32) and out2.dtype == jnp.float32
    assert bool(jnp.all(jnp.isfinite(out2)))
    err2 = float(jnp.max(jnp.abs(out2 - ref2)))
    assert err2 < 0.25, err2

    print("KERNEL_OK")
</pallas_src>

<mosaic_0001>
module attributes {stable_mosaic.version = 11 : i64} {
  func.func @_fused_kernel(%arg0: memref<2x256x256xf32, #tpu.memory_space<vmem>>, %arg1: memref<256x256xbf16, #tpu.memory_space<vmem>>, %arg2: memref<64x256xbf16, #tpu.memory_space<vmem>>, %arg3: memref<64x64xbf16, #tpu.memory_space<vmem>>, %arg4: memref<256x64xbf16, #tpu.memory_space<vmem>>, %arg5: memref<256x8xf32, #tpu.memory_space<vmem>>, %arg6: memref<2x256x256xf32, #tpu.memory_space<vmem>>) attributes {dimension_semantics = [], scalar_prefetch = 0 : i64, scratch_operands = 0 : i64, tpu.core_type = #tpu.core_type<tc>} {
    %c0 = arith.constant 0 : index
    %c0_0 = arith.constant 0 : index
    %0 = vector.load %arg5[%c0, %c0_0] : memref<256x8xf32, #tpu.memory_space<vmem>>, vector<256x8xf32>
    %c0_1 = arith.constant 0 : index
    %c0_2 = arith.constant 0 : index
    %c0_3 = arith.constant 0 : index
    %1 = vector.load %arg0[%c0_1, %c0_2, %c0_3] : memref<2x256x256xf32, #tpu.memory_space<vmem>>, vector<1x256x256xf32>
    %2 = vector.shape_cast %1 : vector<1x256x256xf32> to vector<256x256xf32>
    %c1 = arith.constant 1 : index
    %c0_4 = arith.constant 0 : index
    %c0_5 = arith.constant 0 : index
    %3 = vector.load %arg0[%c1, %c0_4, %c0_5] : memref<2x256x256xf32, #tpu.memory_space<vmem>>, vector<1x256x256xf32>
    %4 = vector.shape_cast %3 : vector<1x256x256xf32> to vector<256x256xf32>
    %5 = tpu.concatenate %2, %4 in 1 : vector<256x256xf32>, vector<256x256xf32> -> vector<256x512xf32>
    %c0_6 = arith.constant 0 : index
    %c0_7 = arith.constant 0 : index
    %6 = vector.load %arg1[%c0_6, %c0_7] : memref<256x256xbf16, #tpu.memory_space<vmem>>, vector<256x256xbf16>
    %7 = arith.truncf %5 : vector<256x512xf32> to vector<256x512xbf16>
    %cst = arith.constant dense<0.000000e+00> : vector<256x512xf32>
    %8 = tpu.matmul %6, %7, %cst {dimension_numbers = #tpu.dot_dimension_numbers<[1], [0], [0], [1], [0, 0, 1, 1], [], []>} : vector<256x256xbf16>, vector<256x512xbf16>, vector<256x512xf32> -> vector<256x512xf32>
    %cst_8 = arith.constant dense<0.000000e+00> : vector<256xf32>
    %9 = vector.multi_reduction <add>, %8, %cst_8 [1] : vector<256x512xf32> to vector<256xf32>
    %10 = vector.shape_cast %9 : vector<256xf32> to vector<256x1xf32>
    %cst_9 = arith.constant 0.000000e+00 : f32
    %11 = vector.broadcast %cst_9 : f32 to vector<256x1xf32>
    %12 = arith.addf %11, %10 : vector<256x1xf32>
    %13 = arith.mulf %8, %8 : vector<256x512xf32>
    %cst_10 = arith.constant dense<0.000000e+00> : vector<256xf32>
    %14 = vector.multi_reduction <add>, %13, %cst_10 [1] : vector<256x512xf32> to vector<256xf32>
    %15 = vector.shape_cast %14 : vector<256xf32> to vector<256x1xf32>
    %cst_11 = arith.constant 0.000000e+00 : f32
    %16 = vector.broadcast %cst_11 : f32 to vector<256x1xf32>
    %17 = arith.addf %16, %15 : vector<256x1xf32>
    %cst_12 = arith.constant 5.120000e+02 : f32
    %18 = vector.broadcast %cst_12 : f32 to vector<256x1xf32>
    %19 = arith.divf %12, %18 : vector<256x1xf32>
    %cst_13 = arith.constant 5.120000e+02 : f32
    %20 = vector.broadcast %cst_13 : f32 to vector<256x1xf32>
    %21 = arith.divf %17, %20 : vector<256x1xf32>
    %22 = arith.mulf %19, %19 : vector<256x1xf32>
    %23 = arith.subf %21, %22 : vector<256x1xf32>
    %cst_14 = arith.constant 0.000000e+00 : f32
    %24 = vector.broadcast %cst_14 : f32 to vector<256x1xf32>
    %25 = arith.maximumf %23, %24 : vector<256x1xf32>
    %26 = vector.extract_strided_slice %0 {offsets = [0, 0], sizes = [256, 1], strides = [1, 1]} : vector<256x8xf32> to vector<256x1xf32>
    %27 = vector.extract_strided_slice %0 {offsets = [0, 1], sizes = [256, 1], strides = [1, 1]} : vector<256x8xf32> to vector<256x1xf32>
    %cst_15 = arith.constant 9.99999974E-6 : f32
    %28 = vector.broadcast %cst_15 : f32 to vector<256x1xf32>
    %29 = arith.addf %25, %28 : vector<256x1xf32>
    %30 = math.rsqrt %29 : vector<256x1xf32>
    %31 = arith.mulf %26, %30 : vector<256x1xf32>
    %32 = arith.mulf %19, %31 : vector<256x1xf32>
    %33 = arith.subf %27, %32 : vector<256x1xf32>
    %34 = vector.broadcast %31 : vector<256x1xf32> to vector<256x512xf32>
    %35 = arith.mulf %8, %34 : vector<256x512xf32>
    %36 = vector.broadcast %33 : vector<256x1xf32> to vector<256x512xf32>
    %37 = arith.addf %35, %36 : vector<256x512xf32>
    %cst_16 = arith.constant 0.000000e+00 : f32
    %38 = vector.broadcast %cst_16 : f32 to vector<256x512xf32>
    %39 = arith.maximumf %37, %38 : vector<256x512xf32>
    %c0_17 = arith.constant 0 : index
    %c0_18 = arith.constant 0 : index
    %40 = vector.load %arg2[%c0_17, %c0_18] : memref<64x256xbf16, #tpu.memory_space<vmem>>, vector<64x256xbf16>
    %41 = arith.truncf %39 : vector<256x512xf32> to vector<256x512xbf16>
    %cst_19 = arith.constant dense<0.000000e+00> : vector<64x512xf32>
    %42 = tpu.matmul %40, %41, %cst_19 {dimension_numbers = #tpu.dot_dimension_numbers<[1], [0], [0], [1], [0, 0, 1, 1], [], []>} : vector<64x256xbf16>, vector<256x512xbf16>, vector<64x512xf32> -> vector<64x512xf32>
    %cst_20 = arith.constant dense<0.000000e+00> : vector<64xf32>
    %43 = vector.multi_reduction <add>, %42, %cst_20 [1] : vector<64x512xf32> to vector<64xf32>
    %44 = vector.shape_cast %43 : vector<64xf32> to vector<64x1xf32>
    %cst_21 = arith.constant 0.000000e+00 : f32
    %45 = vector.broadcast %cst_21 : f32 to vector<64x1xf32>
    %46 = arith.addf %45, %44 : vector<64x1xf32>
    %47 = arith.mulf %42, %42 : vector<64x512xf32>
    %cst_22 = arith.constant dense<0.000000e+00> : vector<64xf32>
    %48 = vector.multi_reduction <add>, %47, %cst_22 [1] : vector<64x512xf32> to vector<64xf32>
    %49 = vector.shape_cast %48 : vector<64xf32> to vector<64x1xf32>
    %cst_23 = arith.constant 0.000000e+00 : f32
    %50 = vector.broadcast %cst_23 : f32 to vector<64x1xf32>
    %51 = arith.addf %50, %49 : vector<64x1xf32>
    %cst_24 = arith.constant 5.120000e+02 : f32
    %52 = vector.broadcast %cst_24 : f32 to vector<64x1xf32>
    %53 = arith.divf %46, %52 : vector<64x1xf32>
    %cst_25 = arith.constant 5.120000e+02 : f32
    %54 = vector.broadcast %cst_25 : f32 to vector<64x1xf32>
    %55 = arith.divf %51, %54 : vector<64x1xf32>
    %56 = arith.mulf %53, %53 : vector<64x1xf32>
    %57 = arith.subf %55, %56 : vector<64x1xf32>
    %cst_26 = arith.constant 0.000000e+00 : f32
    %58 = vector.broadcast %cst_26 : f32 to vector<64x1xf32>
    %59 = arith.maximumf %57, %58 : vector<64x1xf32>
    %60 = vector.extract_strided_slice %0 {offsets = [0, 2], sizes = [64, 1], strides = [1, 1]} : vector<256x8xf32> to vector<64x1xf32>
    %61 = vector.extract_strided_slice %0 {offsets = [0, 3], sizes = [64, 1], strides = [1, 1]} : vector<256x8xf32> to vector<64x1xf32>
    %cst_27 = arith.constant 9.99999974E-6 : f32
    %62 = vector.broadcast %cst_27 : f32 to vector<64x1xf32>
    %63 = arith.addf %59, %62 : vector<64x1xf32>
    %64 = math.rsqrt %63 : vector<64x1xf32>
    %65 = arith.mulf %60, %64 : vector<64x1xf32>
    %66 = arith.mulf %53, %65 : vector<64x1xf32>
    %67 = arith.subf %61, %66 : vector<64x1xf32>
    %68 = vector.broadcast %65 : vector<64x1xf32> to vector<64x512xf32>
    %69 = arith.mulf %42, %68 : vector<64x512xf32>
    %70 = vector.broadcast %67 : vector<64x1xf32> to vector<64x512xf32>
    %71 = arith.addf %69, %70 : vector<64x512xf32>
    %cst_28 = arith.constant 0.000000e+00 : f32
    %72 = vector.broadcast %cst_28 : f32 to vector<64x512xf32>
    %73 = arith.maximumf %71, %72 : vector<64x512xf32>
    %c0_29 = arith.constant 0 : index
    %c0_30 = arith.constant 0 : index
    %74 = vector.load %arg3[%c0_29, %c0_30] : memref<64x64xbf16, #tpu.memory_space<vmem>>, vector<64x64xbf16>
    %75 = arith.truncf %73 : vector<64x512xf32> to vector<64x512xbf16>
    %cst_31 = arith.constant dense<0.000000e+00> : vector<64x512xf32>
    %76 = tpu.matmul %74, %75, %cst_31 {dimension_numbers = #tpu.dot_dimension_numbers<[1], [0], [0], [1], [0, 0, 1, 1], [], []>} : vector<64x64xbf16>, vector<64x512xbf16>, vector<64x512xf32> -> vector<64x512xf32>
    %cst_32 = arith.constant dense<0.000000e+00> : vector<64xf32>
    %77 = vector.multi_reduction <add>, %76, %cst_32 [1] : vector<64x512xf32> to vector<64xf32>
    %78 = vector.shape_cast %77 : vector<64xf32> to vector<64x1xf32>
    %cst_33 = arith.constant 0.000000e+00 : f32
    %79 = vector.broadcast %cst_33 : f32 to vector<64x1xf32>
    %80 = arith.addf %79, %78 : vector<64x1xf32>
    %81 = arith.mulf %76, %76 : vector<64x512xf32>
    %cst_34 = arith.constant dense<0.000000e+00> : vector<64xf32>
    %82 = vector.multi_reduction <add>, %81, %cst_34 [1] : vector<64x512xf32> to vector<64xf32>
    %83 = vector.shape_cast %82 : vector<64xf32> to vector<64x1xf32>
    %cst_35 = arith.constant 0.000000e+00 : f32
    %84 = vector.broadcast %cst_35 : f32 to vector<64x1xf32>
    %85 = arith.addf %84, %83 : vector<64x1xf32>
    %cst_36 = arith.constant 5.120000e+02 : f32
    %86 = vector.broadcast %cst_36 : f32 to vector<64x1xf32>
    %87 = arith.divf %80, %86 : vector<64x1xf32>
    %cst_37 = arith.constant 5.120000e+02 : f32
    %88 = vector.broadcast %cst_37 : f32 to vector<64x1xf32>
    %89 = arith.divf %85, %88 : vector<64x1xf32>
    %90 = arith.mulf %87, %87 : vector<64x1xf32>
    %91 = arith.subf %89, %90 : vector<64x1xf32>
    %cst_38 = arith.constant 0.000000e+00 : f32
    %92 = vector.broadcast %cst_38 : f32 to vector<64x1xf32>
    %93 = arith.maximumf %91, %92 : vector<64x1xf32>
    %94 = vector.extract_strided_slice %0 {offsets = [0, 4], sizes = [64, 1], strides = [1, 1]} : vector<256x8xf32> to vector<64x1xf32>
    %95 = vector.extract_strided_slice %0 {offsets = [0, 5], sizes = [64, 1], strides = [1, 1]} : vector<256x8xf32> to vector<64x1xf32>
    %cst_39 = arith.constant 9.99999974E-6 : f32
    %96 = vector.broadcast %cst_39 : f32 to vector<64x1xf32>
    %97 = arith.addf %93, %96 : vector<64x1xf32>
    %98 = math.rsqrt %97 : vector<64x1xf32>
    %99 = arith.mulf %94, %98 : vector<64x1xf32>
    %100 = arith.mulf %87, %99 : vector<64x1xf32>
    %101 = arith.subf %95, %100 : vector<64x1xf32>
    %102 = vector.broadcast %99 : vector<64x1xf32> to vector<64x512xf32>
    %103 = arith.mulf %76, %102 : vector<64x512xf32>
    %104 = vector.broadcast %101 : vector<64x1xf32> to vector<64x512xf32>
    %105 = arith.addf %103, %104 : vector<64x512xf32>
    %cst_40 = arith.constant 0.000000e+00 : f32
    %106 = vector.broadcast %cst_40 : f32 to vector<64x512xf32>
    %107 = arith.maximumf %105, %106 : vector<64x512xf32>
    %c0_41 = arith.constant 0 : index
    %c0_42 = arith.constant 0 : index
    %108 = vector.load %arg4[%c0_41, %c0_42] : memref<256x64xbf16, #tpu.memory_space<vmem>>, vector<256x64xbf16>
    %109 = arith.truncf %107 : vector<64x512xf32> to vector<64x512xbf16>
    %cst_43 = arith.constant dense<0.000000e+00> : vector<256x512xf32>
    %110 = tpu.matmul %108, %109, %cst_43 {dimension_numbers = #tpu.dot_dimension_numbers<[1], [0], [0], [1], [0, 0, 1, 1], [], []>} : vector<256x64xbf16>, vector<64x512xbf16>, vector<256x512xf32> -> vector<256x512xf32>
    %cst_44 = arith.constant dense<0.000000e+00> : vector<256xf32>
    %111 = vector.multi_reduction <add>, %110, %cst_44 [1] : vector<256x512xf32> to vector<256xf32>
    %112 = vector.shape_cast %111 : vector<256xf32> to vector<256x1xf32>
    %cst_45 = arith.constant 0.000000e+00 : f32
    %113 = vector.broadcast %cst_45 : f32 to vector<256x1xf32>
    %114 = arith.addf %113, %112 : vector<256x1xf32>
    %115 = arith.mulf %110, %110 : vector<256x512xf32>
    %cst_46 = arith.constant dense<0.000000e+00> : vector<256xf32>
    %116 = vector.multi_reduction <add>, %115, %cst_46 [1] : vector<256x512xf32> to vector<256xf32>
    %117 = vector.shape_cast %116 : vector<256xf32> to vector<256x1xf32>
    %cst_47 = arith.constant 0.000000e+00 : f32
    %118 = vector.broadcast %cst_47 : f32 to vector<256x1xf32>
    %119 = arith.addf %118, %117 : vector<256x1xf32>
    %cst_48 = arith.constant 5.120000e+02 : f32
    %120 = vector.broadcast %cst_48 : f32 to vector<256x1xf32>
    %121 = arith.divf %114, %120 : vector<256x1xf32>
    %cst_49 = arith.constant 5.120000e+02 : f32
    %122 = vector.broadcast %cst_49 : f32 to vector<256x1xf32>
    %123 = arith.divf %119, %122 : vector<256x1xf32>
    %124 = arith.mulf %121, %121 : vector<256x1xf32>
    %125 = arith.subf %123, %124 : vector<256x1xf32>
    %cst_50 = arith.constant 0.000000e+00 : f32
    %126 = vector.broadcast %cst_50 : f32 to vector<256x1xf32>
    %127 = arith.maximumf %125, %126 : vector<256x1xf32>
    %128 = vector.extract_strided_slice %0 {offsets = [0, 6], sizes = [256, 1], strides = [1, 1]} : vector<256x8xf32> to vector<256x1xf32>
    %129 = vector.extract_strided_slice %0 {offsets = [0, 7], sizes = [256, 1], strides = [1, 1]} : vector<256x8xf32> to vector<256x1xf32>
    %cst_51 = arith.constant 9.99999974E-6 : f32
    %130 = vector.broadcast %cst_51 : f32 to vector<256x1xf32>
    %131 = arith.addf %127, %130 : vector<256x1xf32>
    %132 = math.rsqrt %131 : vector<256x1xf32>
    %133 = arith.mulf %128, %132 : vector<256x1xf32>
    %134 = arith.mulf %121, %133 : vector<256x1xf32>
    %135 = arith.subf %129, %134 : vector<256x1xf32>
    %136 = vector.broadcast %133 : vector<256x1xf32> to vector<256x512xf32>
    %137 = arith.mulf %110, %136 : vector<256x512xf32>
    %138 = vector.broadcast %135 : vector<256x1xf32> to vector<256x512xf32>
    %139 = arith.addf %137, %138 : vector<256x512xf32>
    %cst_52 = arith.constant 0.000000e+00 : f32
    %140 = vector.broadcast %cst_52 : f32 to vector<256x512xf32>
    %141 = arith.maximumf %139, %140 : vector<256x512xf32>
    %142 = vector.extract_strided_slice %141 {offsets = [0, 0], sizes = [256, 256], strides = [1, 1]} : vector<256x512xf32> to vector<256x256xf32>
    %c0_53 = arith.constant 0 : index
    %c0_54 = arith.constant 0 : index
    %c0_55 = arith.constant 0 : index
    %143 = vector.load %arg6[%c0_53, %c0_54, %c0_55] : memref<2x256x256xf32, #tpu.memory_space<vmem>>, vector<1x256x256xf32>
    %144 = vector.shape_cast %143 : vector<1x256x256xf32> to vector<256x256xf32>
    %145 = vector.shape_cast %142 : vector<256x256xf32> to vector<1x256x256xf32>
    tpu.vector_store %arg6[%c0_53, %c0_54, %c0_55], %145 {strides = array<i32>} : memref<2x256x256xf32, #tpu.memory_space<vmem>>, vector<1x256x256xf32>,
    %146 = vector.extract_strided_slice %141 {offsets = [0, 256], sizes = [256, 256], strides = [1, 1]} : vector<256x512xf32> to vector<256x256xf32>
    %c1_56 = arith.constant 1 : index
    %c0_57 = arith.constant 0 : index
    %c0_58 = arith.constant 0 : index
    %147 = vector.load %arg6[%c1_56, %c0_57, %c0_58] : memref<2x256x256xf32, #tpu.memory_space<vmem>>, vector<1x256x256xf32>
    %148 = vector.shape_cast %147 : vector<1x256x256xf32> to vector<256x256xf32>
    %149 = vector.shape_cast %146 : vector<256x256xf32> to vector<1x256x256xf32>
    tpu.vector_store %arg6[%c1_56, %c0_57, %c0_58], %149 {strides = array<i32>} : memref<2x256x256xf32, #tpu.memory_space<vmem>>, vector<1x256x256xf32>,
    return
  }
}

</mosaic_0001>

<bundles_post_ra>
// kernel: autoencoder0_forward.1
= control target key start
LH: loop header
LB: loop body
LE: loop exit
PB: predicated region body
PF: predicated region fallthrough
CT: control target
= control target key end

     0   :  { %s8049_s21 = smov 1   ;;  %s14286_s0 = inlined_call_operand.vmem [shape: f32[2,256,256], index: 0, kind: input, shape index: {}]   ;;  %s14287_s1 = inlined_call_operand.vmem [shape: bf16[256,256], index: 1, kind: input, shape index: {}]   ;;  %s14288_s5 = inlined_call_operand.vmem [shape: f32[256,8], index: 5, kind: input, shape index: {}]   ;;  %s14289_s2 = inlined_call_operand.vmem [shape: bf16[64,256], index: 2, kind: input, shape index: {}]   ;;  %s14290_s3 = inlined_call_operand.vmem [shape: bf16[64,64], index: 3, kind: input, shape index: {}]   ;;  %s14291_s4 = inlined_call_operand.vmem [shape: bf16[256,64], index: 4, kind: input, shape index: {}]   ;;  %s14292_s6 = inlined_call_operand.vmem [shape: f32[2,256,256], index: 6, kind: output, shape index: {}]  }
   0x1   :  { %v84_v0 = vld [vmem:[%s14286_s0 + $0xe0] sm:$0xff]  ;;  %v86_v1 = vld [vmem:[%s14286_s0 + $0xf0] sm:$0xff]  ;;  %v85_v5 = vld [vmem:[%s14286_s0 + $0xe8] sm:$0xff] }
   0x2   :  { %v116_v2 = vld [vmem:[%s14286_s0 + $0x1e0] sm:$0xff]  ;;  %v245_v3 = vpack.c.bf16 %v86_v1, %v84_v0  ;;  %v118_v4 = vld [vmem:[%s14286_s0 + $0x1f0] sm:$0xff]  ;;  %v87_v6 = vld [vmem:[%s14286_s0 + $0xf8] sm:$0xff] }
   0x3   :  { %v277_v7 = vpack.c.bf16 %v118_v4, %v116_v2  ;;  %v246_v8 = vpack.c.bf16 %v87_v6, %v85_v5  ;;  %v117_v9 = vld [vmem:[%s14286_s0 + $0x1e8] sm:$0xff]  ;;  %v119_v10 = vld [vmem:[%s14286_s0 + $0x1f8] sm:$0xff]  ;;  %v80_v11 = vld [vmem:[%s14286_s0 + $0xc0] sm:$0xff] }
   0x4   :  { %441 = vmatpush.bf16.msra.mxu0 %v245_v3  ;;  %v278_v12 = vpack.c.bf16 %v119_v10, %v117_v9  ;;  %v82_v13 = vld [vmem:[%s14286_s0 + $0xd0] sm:$0xff]  ;;  %v112_v14 = vld [vmem:[%s14286_s0 + $0x1c0] sm:$0xff]  ;;  %v81_v18 = vld [vmem:[%s14286_s0 + $0xc8] sm:$0xff] }
   0x5   :  { %v114_v15 = vld [vmem:[%s14286_s0 + $0x1d0] sm:$0xff]  ;;  %530 = vmatpush.bf16.msra.mxu1 %v277_v7  ;;  %619 = vmatpush.bf16.msra.mxu2 %v246_v8  ;;  %v241_v16 = vpack.c.bf16 %v82_v13, %v80_v11  ;;  %v83_v19 = vld [vmem:[%s14286_s0 + $0xd8] sm:$0xff]  ;;  %v113_v20 = vld [vmem:[%s14286_s0 + $0x1c8] sm:$0xff] }
   0x6   :  { %v273_v17 = vpack.c.bf16 %v114_v15, %v112_v14  ;;  %708 = vmatpush.bf16.msra.mxu3 %v278_v12  ;;  %v242_v21 = vpack.c.bf16 %v83_v19, %v81_v18  ;;  %v115_v22 = vld [vmem:[%s14286_s0 + $0x1d8] sm:$0xff]  ;;  %v76_v23 = vld [vmem:[%s14286_s0 + $0xa0] sm:$0xff]  ;;  %v78_v24 = vld [vmem:[%s14286_s0 + $0xb0] sm:$0xff] }
   0x7   :  { %v274_v25 = vpack.c.bf16 %v115_v22, %v113_v20  ;;  %v108_v26 = vld [vmem:[%s14286_s0 + $0x1a0] sm:$0xff]  ;;  %v110_v27 = vld [vmem:[%s14286_s0 + $0x1b0] sm:$0xff]  ;;  %v77_v28 = vld [vmem:[%s14286_s0 + $0xa8] sm:$0xff]  ;;  %v237_v29 = vpack.c.bf16 %v78_v24, %v76_v23 }
   0x8   :  { %442 = vmatpush.bf16.msra.mxu0 %v241_v16  ;;  %v79_v30 = vld [vmem:[%s14286_s0 + $0xb8] sm:$0xff]  ;;  %v109_v31 = vld [vmem:[%s14286_s0 + $0x1a8] sm:$0xff]  ;;  %v269_v33 = vpack.c.bf16 %v110_v27, %v108_v26  ;;  %v72_v35 = vld [vmem:[%s14286_s0 + $0x80] sm:$0xff] }
   0x9   :  { %v111_v32 = vld [vmem:[%s14286_s0 + $0x1b8] sm:$0xff]  ;;  %531 = vmatpush.bf16.msra.mxu1 %v273_v17  ;;  %620 = vmatpush.bf16.msra.mxu2 %v242_v21  ;;  %v238_v34 = vpack.c.bf16 %v79_v30, %v77_v28  ;;  %v74_v36 = vld [vmem:[%s14286_s0 + $0x90] sm:$0xff]  ;;  %v104_v37 = vld [vmem:[%s14286_s0 + $0x180] sm:$0xff] }
   0xa   :  { %709 = vmatpush.bf16.msra.mxu3 %v274_v25  ;;  %v270_v38 = vpack.c.bf16 %v111_v32, %v109_v31  ;;  %v106_v39 = vld [vmem:[%s14286_s0 + $0x190] sm:$0xff]  ;;  %v73_v40 = vld [vmem:[%s14286_s0 + $0x88] sm:$0xff]  ;;  %v75_v41 = vld [vmem:[%s14286_s0 + $0x98] sm:$0xff]  ;;  %v233_v44 = vpack.c.bf16 %v74_v36, %v72_v35 }
   0xb   :  { %v105_v42 = vld [vmem:[%s14286_s0 + $0x188] sm:$0xff]  ;;  %v107_v43 = vld [vmem:[%s14286_s0 + $0x198] sm:$0xff]  ;;  %v265_v45 = vpack.c.bf16 %v106_v39, %v104_v37  ;;  %v234_v46 = vpack.c.bf16 %v75_v41, %v73_v40  ;;  %v68_v47 = vld [vmem:[%s14286_s0 + $0x60] sm:$0xff] }
   0xc   :  { %443 = vmatpush.bf16.msra.mxu0 %v237_v29  ;;  %v70_v48 = vld [vmem:[%s14286_s0 + $0x70] sm:$0xff]  ;;  %v100_v49 = vld [vmem:[%s14286_s0 + $0x160] sm:$0xff]  ;;  %v266_v50 = vpack.c.bf16 %v107_v43, %v105_v42  ;;  %v69_v52 = vld [vmem:[%s14286_s0 + $0x68] sm:$0xff] }
   0xd   :  { %532 = vmatpush.bf16.msra.mxu1 %v269_v33  ;;  %621 = vmatpush.bf16.msra.mxu2 %v238_v34  ;;  %v102_v51 = vld [vmem:[%s14286_s0 + $0x170] sm:$0xff]  ;;  %v71_v53 = vld [vmem:[%s14286_s0 + $0x78] sm:$0xff]  ;;  %v101_v54 = vld [vmem:[%s14286_s0 + $0x168] sm:$0xff]  ;;  %v229_v56 = vpack.c.bf16 %v70_v48, %v68_v47 }
   0xe   :  { %710 = vmatpush.bf16.msra.mxu3 %v270_v38  ;;  %v103_v55 = vld [vmem:[%s14286_s0 + $0x178] sm:$0xff]  ;;  %v261_v57 = vpack.c.bf16 %v102_v51, %v100_v49  ;;  %v230_v58 = vpack.c.bf16 %v71_v53, %v69_v52  ;;  %v64_v59 = vld [vmem:[%s14286_s0 + $0x40] sm:$0xff]  ;;  %v66_v60 = vld [vmem:[%s14286_s0 + $0x50] sm:$0xff] }
   0xf   :  { %v96_v61 = vld [vmem:[%s14286_s0 + $0x140] sm:$0xff]  ;;  %v262_v62 = vpack.c.bf16 %v103_v55, %v101_v54  ;;  %v98_v63 = vld [vmem:[%s14286_s0 + $0x150] sm:$0xff]  ;;  %v65_v0 = vld [vmem:[%s14286_s0 + $0x48] sm:$0xff]  ;;  %v225_v4 = vpack.c.bf16 %v66_v60, %v64_v59 }
  0x10   :  { %444 = vmatpush.bf16.msra.mxu0 %v233_v44  ;;  %v67_v1 = vld [vmem:[%s14286_s0 + $0x58] sm:$0xff]  ;;  %v97_v2 = vld [vmem:[%s14286_s0 + $0x148] sm:$0xff]  ;;  %v257_v5 = vpack.c.bf16 %v98_v63, %v96_v61  ;;  %v60_v7 = vld [vmem:[%s14286_s0 + $0x20] sm:$0xff] }
  0x11   :  { %533 = vmatpush.bf16.msra.mxu1 %v265_v45  ;;  %622 = vmatpush.bf16.msra.mxu2 %v234_v46  ;;  %v99_v3 = vld [vmem:[%s14286_s0 + $0x158] sm:$0xff]  ;;  %v226_v6 = vpack.c.bf16 %v67_v1, %v65_v0  ;;  %v62_v8 = vld [vmem:[%s14286_s0 + $0x30] sm:$0xff]  ;;  %v92_v9 = vld [vmem:[%s14286_s0 + $0x120] sm:$0xff] }
  0x12   :  { %711 = vmatpush.bf16.msra.mxu3 %v266_v50  ;;  %v258_v10 = vpack.c.bf16 %v99_v3, %v97_v2  ;;  %v94_v11 = vld [vmem:[%s14286_s0 + $0x130] sm:$0xff]  ;;  %v61_v12 = vld [vmem:[%s14286_s0 + $0x28] sm:$0xff]  ;;  %v63_v13 = vld [vmem:[%s14286_s0 + $0x38] sm:$0xff]  ;;  %v221_v16 = vpack.c.bf16 %v62_v8, %v60_v7 }
  0x13   :  { %v93_v14 = vld [vmem:[%s14286_s0 + $0x128] sm:$0xff]  ;;  %v95_v15 = vld [vmem:[%s14286_s0 + $0x138] sm:$0xff]  ;;  %v253_v17 = vpack.c.bf16 %v94_v11, %v92_v9  ;;  %v222_v18 = vpack.c.bf16 %v63_v13, %v61_v12  ;;  %v56_v19 = vld [vmem:[%s14286_s0] sm:$0xff] }
  0x14   :  { %445 = vmatpush.bf16.msra.mxu0 %v229_v56  ;;  %v58_v20 = vld [vmem:[%s14286_s0 + $0x10] sm:$0xff]  ;;  %v88_v21 = vld [vmem:[%s14286_s0 + $0x100] sm:$0xff]  ;;  %v254_v22 = vpack.c.bf16 %v95_v15, %v93_v14  ;;  %v57_v24 = vld [vmem:[%s14286_s0 + $0x8] sm:$0xff] }
  0x15   :  { %534 = vmatpush.bf16.msra.mxu1 %v261_v57  ;;  %623 = vmatpush.bf16.msra.mxu2 %v230_v58  ;;  %v90_v23 = vld [vmem:[%s14286_s0 + $0x110] sm:$0xff]  ;;  %v59_v25 = vld [vmem:[%s14286_s0 + $0x18] sm:$0xff]  ;;  %v89_v26 = vld [vmem:[%s14286_s0 + $0x108] sm:$0xff]  ;;  %v217_v28 = vpack.c.bf16 %v58_v20, %v56_v19 }
  0x16   :  { %712 = vmatpush.bf16.msra.mxu3 %v262_v62  ;;  %v91_v27 = vld [vmem:[%s14286_s0 + $0x118] sm:$0xff]  ;;  %v7288_v29 = vld [vmem:[%s14287_s1] sm:$0xf]  ;;  %v7671_v30 = vld [vmem:[%s14287_s1 + $0x4] sm:$0xf0]  ;;  %v249_v31 = vpack.c.bf16 %v90_v23, %v88_v21  ;;  %v218_v32 = vpack.c.bf16 %v59_v25, %v57_v24 }
  0x17   :  { %v7670_v33 = vld [vmem:[%s14287_s1 + $0x4] sm:$0xf]  ;;  %v7290_v34 = vld [vmem:[%s14287_s1 + $0x8] sm:$0xf0]  ;;  %v250_v35 = vpack.c.bf16 %v91_v27, %v89_v26  ;;  %v8296_v36 = vor.u32 %v7671_v30, %v7288_v29  ;;  %v7296_v38 = vld [vmem:[%s14287_s1 + $0x10] sm:$0xf] }
  0x18   :  { %446 = vmatpush.bf16.msra.mxu0 %v225_v4  ;;  %v8298_v37 = vor.u32 %v7670_v33, %v7290_v34  ;;  %v7673_v39 = vld [vmem:[%s14287_s1 + $0x14] sm:$0xf0]  ;;  %v7672_v40 = vld [vmem:[%s14287_s1 + $0x14] sm:$0xf]  ;;  %v7298_v41 = vld [vmem:[%s14287_s1 + $0x18] sm:$0xf0] }
  0x19   :  { %535 = vmatpush.bf16.msra.mxu1 %v257_v5  ;;  %624 = vmatpush.bf16.msra.mxu2 %v226_v6  ;;  %v8316_v42 = vor.u32 %v7673_v39, %v7296_v38  ;;  %v8318_v43 = vor.u32 %v7672_v40, %v7298_v41  ;;  %v7304_v44 = vld [vmem:[%s14287_s1 + $0x20] sm:$0xf]  ;;  %v7675_v45 = vld [vmem:[%s14287_s1 + $0x24] sm:$0xf0]  ;;  %v7674_v46 = vld [vmem:[%s14287_s1 + $0x24] sm:$0xf] }
  0x1a   :  { %713 = vmatpush.bf16.msra.mxu3 %v258_v10  ;;  %v7306_v47 = vld [vmem:[%s14287_s1 + $0x28] sm:$0xf0]  ;;  %v8336_v48 = vor.u32 %v7675_v45, %v7304_v44  ;;  %v7312_v50 = vld [vmem:[%s14287_s1 + $0x30] sm:$0xf]  ;;  %v7677_v51 = vld [vmem:[%s14287_s1 + $0x34] sm:$0xf0] }
  0x1b   :  { %v8338_v49 = vor.u32 %v7674_v46, %v7306_v47  ;;  %v7676_v52 = vld [vmem:[%s14287_s1 + $0x34] sm:$0xf]  ;;  %v7314_v53 = vld [vmem:[%s14287_s1 + $0x38] sm:$0xf0]  ;;  %v8356_v54 = vor.u32 %v7677_v51, %v7312_v50  ;;  %v7320_v56 = vld [vmem:[%s14287_s1 + $0x40] sm:$0xf] }
  0x1c   :  { %447 = vmatpush.bf16.msra.mxu0 %v221_v16  ;;  %v8358_v55 = vor.u32 %v7676_v52, %v7314_v53  ;;  %v7679_v57 = vld [vmem:[%s14287_s1 + $0x44] sm:$0xf0]  ;;  %v7678_v58 = vld [vmem:[%s14287_s1 + $0x44] sm:$0xf]  ;;  %v7322_v59 = vld [vmem:[%s14287_s1 + $0x48] sm:$0xf0] }
  0x1d   :  { %536 = vmatpush.bf16.msra.mxu1 %v253_v17  ;;  %625 = vmatpush.bf16.msra.mxu2 %v222_v18  ;;  %v8376_v60 = vor.u32 %v7679_v57, %v7320_v56  ;;  %v8378_v61 = vor.u32 %v7678_v58, %v7322_v59  ;;  %v7328_v62 = vld [vmem:[%s14287_s1 + $0x50] sm:$0xf]  ;;  %v7681_v63 = vld [vmem:[%s14287_s1 + $0x54] sm:$0xf0]  ;;  %v7680_v0 = vld [vmem:[%s14287_s1 + $0x54] sm:$0xf] }
  0x1e   :  { %714 = vmatpush.bf16.msra.mxu3 %v254_v22  ;;  %v7330_v1 = vld [vmem:[%s14287_s1 + $0x58] sm:$0xf0]  ;;  %v8396_v2 = vor.u32 %v7681_v63, %v7328_v62  ;;  %v7336_v4 = vld [vmem:[%s14287_s1 + $0x60] sm:$0xf]  ;;  %v7683_v5 = vld [vmem:[%s14287_s1 + $0x64] sm:$0xf0] }
  0x1f   :  { %v8398_v3 = vor.u32 %v7680_v0, %v7330_v1  ;;  %v7682_v6 = vld [vmem:[%s14287_s1 + $0x64] sm:$0xf]  ;;  %v7338_v7 = vld [vmem:[%s14287_s1 + $0x68] sm:$0xf0]  ;;  %v8416_v8 = vor.u32 %v7683_v5, %v7336_v4  ;;  %v7344_v10 = vld [vmem:[%s14287_s1 + $0x70] sm:$0xf] }
  0x20   :  { %448 = vmatpush.bf16.msra.mxu0 %v217_v28  ;;  %v8418_v9 = vor.u32 %v7682_v6, %v7338_v7  ;;  %v7685_v11 = vld [vmem:[%s14287_s1 + $0x74] sm:$0xf0]  ;;  %v7684_v12 = vld [vmem:[%s14287_s1 + $0x74] sm:$0xf]  ;;  %v7346_v13 = vld [vmem:[%s14287_s1 + $0x78] sm:$0xf0] }
  0x21   :  { %537 = vmatpush.bf16.msra.mxu1 %v249_v31  ;;  %626 = vmatpush.bf16.msra.mxu2 %v218_v32  ;;  %v8436_v14 = vor.u32 %v7685_v11, %v7344_v10  ;;  %v8438_v15 = vor.u32 %v7684_v12, %v7346_v13  ;;  %v7352_v16 = vld [vmem:[%s14287_s1 + $0x80] sm:$0xf]  ;;  %v7687_v17 = vld [vmem:[%s14287_s1 + $0x84] sm:$0xf0]  ;;  %v7686_v18 = vld [vmem:[%s14287_s1 + $0x84] sm:$0xf] }
  0x22   :  { %715 = vmatpush.bf16.msra.mxu3 %v250_v35  ;;  %v7354_v19 = vld [vmem:[%s14287_s1 + $0x88] sm:$0xf0]  ;;  %v8456_v20 = vor.u32 %v7687_v17, %v7352_v16  ;;  %v7360_v31 = vld [vmem:[%s14287_s1 + $0x90] sm:$0xf]  ;;  %v7689_v32 = vld [vmem:[%s14287_s1 + $0x94] sm:$0xf0] }
  0x23   :  { %449 = vmatmul.bf16.vlgmr.msra.gmra.mxu0 %v8296_v36  ;;  %v8458_v22 = vor.u32 %v7686_v18, %v7354_v19  ;;  %v7688_v33 = vld [vmem:[%s14287_s1 + $0x94] sm:$0xf]  ;;  %v7362_v34 = vld [vmem:[%s14287_s1 + $0x98] sm:$0xf0]  ;;  %v8482_v38 = vor.u32 %v7689_v32, %v7360_v31  ;;  %v7368_v57 = vld [vmem:[%s14287_s1 + $0xa0] sm:$0xf] }
  0x24   :  { %538 = vmatmul.bf16.vlgmr.msra.gmra.mxu1 %v8298_v37  ;;  %627 = vmatmul.bf16.vlgmr.msra.gmra.mxu2 %v8296_v36  ;;  %v8484_v41 = vor.u32 %v7688_v33, %v7362_v34  ;;  %v7691_v58 = vld [vmem:[%s14287_s1 + $0xa4] sm:$0xf0]  ;;  %v7690_v59 = vld [vmem:[%s14287_s1 + $0xa4] sm:$0xf]  ;;  %v7370_v62 = vld [vmem:[%s14287_s1 + $0xa8] sm:$0xf0] }
  0x25   :  { %716 = vmatmul.bf16.vlgmr.msra.gmra.mxu3 %v8298_v37  ;;  %v8510_v0 = vor.u32 %v7691_v58, %v7368_v57  ;;  %v8512_v5 = vor.u32 %v7690_v59, %v7370_v62  ;;  %v7376_v19 = vld [vmem:[%s14287_s1 + $0xb0] sm:$0xf]  ;;  %v7695_v57 = vld [vmem:[%s14287_s1 + $0xc4] sm:$0xf0]  ;;  %v7694_v58 = vld [vmem:[%s14287_s1 + $0xc4] sm:$0xf] }
  0x26   :  { %v7386_v59 = vld [vmem:[%s14287_s1 + $0xc8] sm:$0xf0] }
  0x33   :  { %454 = vmatmul.bf16.gmra.mxu0 %v8316_v42 }
  0x34   :  { %543 = vmatmul.bf16.gmra.mxu1 %v8318_v43  ;;  %632 = vmatmul.bf16.gmra.mxu2 %v8316_v42 }
  0x35   :  { %721 = vmatmul.bf16.gmra.mxu3 %v8318_v43 }
  0x43   :  { %459 = vmatmul.bf16.gmra.mxu0 %v8336_v48 }
  0x44   :  { %548 = vmatmul.bf16.gmra.mxu1 %v8338_v49  ;;  %637 = vmatmul.bf16.gmra.mxu2 %v8336_v48 }
  0x45   :  { %726 = vmatmul.bf16.gmra.mxu3 %v8338_v49 }
  0x53   :  { %464 = vmatmul.bf16.gmra.mxu0 %v8356_v54 }
  0x54   :  { %553 = vmatmul.bf16.gmra.mxu1 %v8358_v55  ;;  %642 = vmatmul.bf16.gmra.mxu2 %v8356_v54 }
  0x55   :  { %731 = vmatmul.bf16.gmra.mxu3 %v8358_v55 }
  0x63   :  { %469 = vmatmul.bf16.gmra.mxu0 %v8376_v60 }
  0x64   :  { %558 = vmatmul.bf16.gmra.mxu1 %v8378_v61  ;;  %647 = vmatmul.bf16.gmra.mxu2 %v8376_v60 }
  0x65   :  { %736 = vmatmul.bf16.gmra.mxu3 %v8378_v61 }
  0x73   :  { %474 = vmatmul.bf16.gmra.mxu0 %v8396_v2 }
  0x74   :  { %563 = vmatmul.bf16.gmra.mxu1 %v8398_v3  ;;  %652 = vmatmul.bf16.gmra.mxu2 %v8396_v2 }
  0x75   :  { %741 = vmatmul.bf16.gmra.mxu3 %v8398_v3 }
  0x83   :  { %479 = vmatmul.bf16.gmra.mxu0 %v8416_v8 }
  0x84   :  { %568 = vmatmul.bf16.gmra.mxu1 %v8418_v9  ;;  %657 = vmatmul.bf16.gmra.mxu2 %v8416_v8 }
  0x85   :  { %746 = vmatmul.bf16.gmra.mxu3 %v8418_v9 }
  0x93   :  { %484 = vmatmul.bf16.gmra.mxu0 %v8436_v14 }
  0x94   :  { %573 = vmatmul.bf16.gmra.mxu1 %v8438_v15  ;;  %662 = vmatmul.bf16.gmra.mxu2 %v8436_v14 }
  0x95   :  { %751 = vmatmul.bf16.gmra.mxu3 %v8438_v15 }
  0xa0   :  { %v450_v21 = vpop.f32.mrf.mxu0 }
  0xa1   :  { %v539_v23 = vpop.f32.mrf.mxu1 }
  0xa2   :  { %v8460_v24 = vadd.f32 %v539_v23, %v450_v21  ;;  %v7693_v21 = vld [vmem:[%s14287_s1 + $0xb4] sm:$0xf0]  ;;  %v7692_v23 = vld [vmem:[%s14287_s1 + $0xb4] sm:$0xf] }
  0xa3   :  { %489 = vmatmul.bf16.gmra.mxu0 %v8456_v20 }
  0xa4   :  { %14639 = vst [vmem:[#allocation2_spill] sm:$0xff] %v8460_v24  ;;  %578 = vmatmul.bf16.gmra.mxu1 %v8458_v22  ;;  %667 = vmatmul.bf16.gmra.mxu2 %v8456_v20 }
  0xa5   :  { %756 = vmatmul.bf16.gmra.mxu3 %v8458_v22 }
  0xa7   :  { %v628_v25 = vpop.f32.mrf.mxu2 }
  0xa8   :  { %v717_v26 = vpop.f32.mrf.mxu3  ;;  %v452_v27 = vpop.f32.mrf.mxu0 }
  0xa9   :  { %v8466_v28 = vadd.f32 %v717_v26, %v628_v25  ;;  %v541_v29 = vpop.f32.mrf.mxu1  ;;  %v7378_v25 = vld [vmem:[%s14287_s1 + $0xb8] sm:$0xf0] }
  0xaa   :  { %v8468_v30 = vadd.f32 %v541_v29, %v452_v27  ;;  %v8538_v27 = vor.u32 %v7693_v21, %v7376_v19  ;;  %v8540_v32 = vor.u32 %v7692_v23, %v7378_v25  ;;  %v7253_v19 = vld [vmem:[%s14286_s0 + $0x2f8] sm:$0xff]  ;;  %v7283_v21 = vld [vmem:[%s14286_s0 + $0x3e8] sm:$0xff] }
  0xab   :  { %14640 = vst [vmem:[#allocation3_spill] sm:$0xff] %v8466_v28  ;;  %v7285_v25 = vld [vmem:[%s14286_s0 + $0x3f8] sm:$0xff] }
  0xac   :  { %14641 = vst [vmem:[#allocation4_spill] sm:$0xff] %v8468_v30 }
  0xaf   :  { %v630_v35 = vpop.f32.mrf.mxu2 }
  0xb0   :  { %v719_v39 = vpop.f32.mrf.mxu3  ;;  %v455_v40 = vpop.f32.mrf.mxu0 }
  0xb1   :  { %v8486_v44 = vadd.f32 %v719_v39, %v630_v35  ;;  %v544_v45 = vpop.f32.mrf.mxu1 }
  0xb2   :  { %v8488_v46 = vadd.f32 %v544_v45, %v455_v40 }
  0xb3   :  { %14642 = vst [vmem:[#allocation5_spill] sm:$0xff] %v8486_v44  ;;  %494 = vmatmul.bf16.gmra.mxu0 %v8482_v38 }
  0xb4   :  { %14643 = vst [vmem:[#allocation6_spill] sm:$0xff] %v8488_v46  ;;  %583 = vmatmul.bf16.gmra.mxu1 %v8484_v41  ;;  %672 = vmatmul.bf16.gmra.mxu2 %v8482_v38 }
  0xb5   :  { %761 = vmatmul.bf16.gmra.mxu3 %v8484_v41 }
  0xb7   :  { %v633_v47 = vpop.f32.mrf.mxu2 }
  0xb8   :  { %v722_v50 = vpop.f32.mrf.mxu3  ;;  %v457_v51 = vpop.f32.mrf.mxu0 }
  0xb9   :  { %v8494_v52 = vadd.f32 %v722_v50, %v633_v47  ;;  %v546_v53 = vpop.f32.mrf.mxu1 }
  0xba   :  { %v8496_v56 = vadd.f32 %v546_v53, %v457_v51  ;;  %v7384_v53 = vld [vmem:[%s14287_s1 + $0xc0] sm:$0xf] }
  0xbb   :  { %14644 = vst [vmem:[#allocation7_spill] sm:$0xff] %v8494_v52 }
  0xbc   :  { %14645 = vst [vmem:[#allocation8_spill] sm:$0xff] %v8496_v56 }
  0xbf   :  { %v635_v63 = vpop.f32.mrf.mxu2 }
  0xc0   :  { %v724_v1 = vpop.f32.mrf.mxu3  ;;  %v460_v4 = vpop.f32.mrf.mxu0 }
  0xc1   :  { %v8514_v6 = vadd.f32 %v724_v1, %v635_v63  ;;  %v549_v7 = vpop.f32.mrf.mxu1  ;;  %v8566_v63 = vor.u32 %v7695_v57, %v7384_v53  ;;  %v7246_v53 = vld [vmem:[%s14286_s0 + $0x2c0] sm:$0xff]  ;;  %v7248_v57 = vld [vmem:[%s14286_s0 + $0x2d0] sm:$0xff] }
  0xc2   :  { %v8516_v10 = vadd.f32 %v549_v7, %v460_v4  ;;  %v8568_v7 = vor.u32 %v7694_v58, %v7386_v59  ;;  %v7278_v58 = vld [vmem:[%s14286_s0 + $0x3c0] sm:$0xff] }
  0xc3   :  { %14646 = vst [vmem:[#allocation9_spill] sm:$0xff] %v8514_v6  ;;  %499 = vmatmul.bf16.gmra.mxu0 %v8510_v0 }
  0xc4   :  { %14647 = vst [vmem:[#allocation10_spill] sm:$0xff] %v8516_v10  ;;  %588 = vmatmul.bf16.gmra.mxu1 %v8512_v5  ;;  %677 = vmatmul.bf16.gmra.mxu2 %v8510_v0 }
  0xc5   :  { %766 = vmatmul.bf16.gmra.mxu3 %v8512_v5 }
  0xc7   :  { %v638_v11 = vpop.f32.mrf.mxu2 }
  0xc8   :  { %v727_v12 = vpop.f32.mrf.mxu3  ;;  %v462_v13 = vpop.f32.mrf.mxu0 }
  0xc9   :  { %v8522_v16 = vadd.f32 %v727_v12, %v638_v11  ;;  %v551_v17 = vpop.f32.mrf.mxu1 }
  0xca   :  { %v8524_v18 = vadd.f32 %v551_v17, %v462_v13  ;;  %v7251_v17 = vld [vmem:[%s14286_s0 + $0x2e8] sm:$0xff] }
  0xcb   :  { %14648 = vst [vmem:[#allocation11_spill] sm:$0xff] %v8522_v16  ;;  %v248_v23 = vpack.c.bf16 %v7253_v19, %v7251_v17  ;;  %v7249_v17 = vld [vmem:[%s14286_s0 + $0x2d8] sm:$0xff] }
  0xcc   :  { %14649 = vst [vmem:[#allocation12_spill] sm:$0xff] %v8524_v18 }
  0xcd   :  { %975 = vmatpush.bf16.msrb.mxu2 %v248_v23 }
  0xcf   :  { %v640_v26 = vpop.f32.mrf.mxu2 }
  0xd0   :  { %v729_v29 = vpop.f32.mrf.mxu3  ;;  %v465_v31 = vpop.f32.mrf.mxu0 }
  0xd1   :  { %v8542_v33 = vadd.f32 %v729_v29, %v640_v26  ;;  %v554_v34 = vpop.f32.mrf.mxu1  ;;  %v7250_v26 = vld [vmem:[%s14286_s0 + $0x2e0] sm:$0xff]  ;;  %v280_v29 = vpack.c.bf16 %v7285_v25, %v7283_v21 }
  0xd2   :  { %v8544_v35 = vadd.f32 %v554_v34, %v465_v31  ;;  %v7252_v31 = vld [vmem:[%s14286_s0 + $0x2f0] sm:$0xff]  ;;  %v7282_v34 = vld [vmem:[%s14286_s0 + $0x3e0] sm:$0xff] }
  0xd3   :  { %14650 = vst [vmem:[#allocation13_spill] sm:$0xff] %v8542_v33  ;;  %504 = vmatmul.bf16.gmra.mxu0 %v8538_v27  ;;  %1064 = vmatpush.bf16.msrb.mxu3 %v280_v29  ;;  %v7281_v29 = vld [vmem:[%s14286_s0 + $0x3d8] sm:$0xff] }
  0xd4   :  { %14651 = vst [vmem:[#allocation14_spill] sm:$0xff] %v8544_v35  ;;  %593 = vmatmul.bf16.gmra.mxu1 %v8540_v32  ;;  %682 = vmatmul.bf16.gmra.mxu2 %v8538_v27 }
  0xd5   :  { %771 = vmatmul.bf16.gmra.mxu3 %v8540_v32 }
  0xd7   :  { %v643_v39 = vpop.f32.mrf.mxu2 }
  0xd8   :  { %v732_v40 = vpop.f32.mrf.mxu3  ;;  %v467_v45 = vpop.f32.mrf.mxu0 }
  0xd9   :  { %v8550_v47 = vadd.f32 %v732_v40, %v643_v39  ;;  %v556_v50 = vpop.f32.mrf.mxu1  ;;  %v7284_v39 = vld [vmem:[%s14286_s0 + $0x3f0] sm:$0xff]  ;;  %v247_v40 = vpack.c.bf16 %v7252_v31, %v7250_v26  ;;  %v7279_v26 = vld [vmem:[%s14286_s0 + $0x3c8] sm:$0xff] }
  0xda   :  { %v8552_v51 = vadd.f32 %v556_v50, %v467_v45  ;;  %v279_v45 = vpack.c.bf16 %v7284_v39, %v7282_v34  ;;  %v7392_v34 = vld [vmem:[%s14287_s1 + $0xd0] sm:$0xf]  ;;  %v7697_v39 = vld [vmem:[%s14287_s1 + $0xd4] sm:$0xf0] }
  0xdb   :  { %14652 = vst [vmem:[#allocation15_spill] sm:$0xff] %v8550_v47  ;;  %797 = vmatpush.bf16.msrb.mxu0 %v247_v40  ;;  %v276_v40 = vpack.c.bf16 %v7281_v29, %v7279_v26  ;;  %v8666_v29 = vor.u32 %v7697_v39, %v7392_v34  ;;  %v7272_v34 = vld [vmem:[%s14286_s0 + $0x390] sm:$0xff]  ;;  %v7239_v39 = vld [vmem:[%s14286_s0 + $0x288] sm:$0xff] }
  0xdc   :  { %14653 = vst [vmem:[#allocation16_spill] sm:$0xff] %v8552_v51  ;;  %886 = vmatpush.bf16.msrb.mxu1 %v279_v45  ;;  %v7696_v45 = vld [vmem:[%s14287_s1 + $0xd4] sm:$0xf] }
  0xdd   :  { %1065 = vmatpush.bf16.msrb.mxu3 %v276_v40  ;;  %14658 = vst [vmem:[#allocation21_spill] sm:$0xff] %v8666_v29  ;;  %v7240_v40 = vld [vmem:[%s14286_s0 + $0x290] sm:$0xff] }
  0xdf   :  { %v645_v62 = vpop.f32.mrf.mxu2 }
  0xe0   :  { %v734_v1 = vpop.f32.mrf.mxu3  ;;  %v470_v4 = vpop.f32.mrf.mxu0 }
  0xe1   :  { %v8570_v11 = vadd.f32 %v734_v1, %v645_v62  ;;  %v559_v12 = vpop.f32.mrf.mxu1  ;;  %v243_v1 = vpack.c.bf16 %v7248_v57, %v7246_v53  ;;  %v7244_v53 = vld [vmem:[%s14286_s0 + $0x2b0] sm:$0xff]  ;;  %v7274_v57 = vld [vmem:[%s14286_s0 + $0x3a0] sm:$0xff] }
  0xe2   :  { %v8572_v13 = vadd.f32 %v559_v12, %v470_v4  ;;  %v7280_v4 = vld [vmem:[%s14286_s0 + $0x3d0] sm:$0xff]  ;;  %v7247_v12 = vld [vmem:[%s14286_s0 + $0x2c8] sm:$0xff] }
  0xe3   :  { %14654 = vst [vmem:[#allocation17_spill] sm:$0xff] %v8570_v11  ;;  %509 = vmatmul.bf16.gmra.mxu0 %v8566_v63  ;;  %v275_v23 = vpack.c.bf16 %v7280_v4, %v7278_v58  ;;  %v244_v25 = vpack.c.bf16 %v7249_v17, %v7247_v12  ;;  %v7245_v4 = vld [vmem:[%s14286_s0 + $0x2b8] sm:$0xff] }
  0xe4   :  { %14655 = vst [vmem:[#allocation18_spill] sm:$0xff] %v8572_v13  ;;  %598 = vmatmul.bf16.gmra.mxu1 %v8568_v7  ;;  %687 = vmatmul.bf16.gmra.mxu2 %v8566_v63  ;;  %v7394_v12 = vld [vmem:[%s14287_s1 + $0xd8] sm:$0xf0] }
  0xe5   :  { %776 = vmatmul.bf16.gmra.mxu3 %v8568_v7  ;;  %976 = vmatpush.bf16.msrb.mxu2 %v244_v25 }
  0xe6   :  { %798 = vmatpush.bf16.msrb.mxu0 %v243_v1  ;;  %887 = vmatpush.bf16.msrb.mxu1 %v275_v23  ;;  %v7277_v23 = vld [vmem:[%s14286_s0 + $0x3b8] sm:$0xff] }
  0xe7   :  { %v648_v50 = vpop.f32.mrf.mxu2 }
  0xe8   :  { %v737_v59 = vpop.f32.mrf.mxu3  ;;  %v472_v62 = vpop.f32.mrf.mxu0 }
  0xe9   :  { %v8620_v19 = vadd.f32 %v737_v59, %v648_v50  ;;  %v561_v21 = vpop.f32.mrf.mxu1  ;;  %v7242_v50 = vld [vmem:[%s14286_s0 + $0x2a0] sm:$0xff]  ;;  %v7276_v59 = vld [vmem:[%s14286_s0 + $0x3b0] sm:$0xff] }
  0xea   :  { %v8628_v31 = vadd.f32 %v561_v21, %v472_v62  ;;  %v239_v58 = vpack.c.bf16 %v7244_v53, %v7242_v50  ;;  %v7243_v62 = vld [vmem:[%s14286_s0 + $0x2a8] sm:$0xff]  ;;  %v271_v1 = vpack.c.bf16 %v7276_v59, %v7274_v57  ;;  %v7238_v50 = vld [vmem:[%s14286_s0 + $0x280] sm:$0xff] }
  0xeb   :  { %14656 = vst [vmem:[#allocation19_spill] sm:$0xff] %v8620_v19  ;;  %v240_v17 = vpack.c.bf16 %v7245_v4, %v7243_v62  ;;  %v7275_v21 = vld [vmem:[%s14286_s0 + $0x3a8] sm:$0xff]  ;;  %v7270_v53 = vld [vmem:[%s14286_s0 + $0x380] sm:$0xff]  ;;  %v8677_v62 = vor.u32 %v7696_v45, %v7394_v12  ;;  %v7241_v4 = vld [vmem:[%s14286_s0 + $0x298] sm:$0xff]  ;;  %v235_v45 = vpack.c.bf16 %v7240_v40, %v7238_v50 }
  0xec   :  { %14657 = vst [vmem:[#allocation20_spill] sm:$0xff] %v8628_v31  ;;  %v272_v25 = vpack.c.bf16 %v7277_v23, %v7275_v21  ;;  %799 = vmatpush.bf16.msrb.mxu0 %v239_v58  ;;  %888 = vmatpush.bf16.msrb.mxu1 %v271_v1  ;;  %v236_v12 = vpack.c.bf16 %v7241_v4, %v7239_v39  ;;  %v7271_v58 = vld [vmem:[%s14286_s0 + $0x388] sm:$0xff]  ;;  %v7273_v1 = vld [vmem:[%s14286_s0 + $0x398] sm:$0xff]  ;;  %v7266_v50 = vld [vmem:[%s14286_s0 + $0x360] sm:$0xff] }
  0xed   :  { %977 = vmatpush.bf16.msrb.mxu2 %v240_v17  ;;  %14659 = vst [vmem:[#allocation22_spill] sm:$0xff] %v8677_v62  ;;  %v267_v31 = vpack.c.bf16 %v7272_v34, %v7270_v53  ;;  %v268_v13 = vpack.c.bf16 %v7273_v1, %v7271_v58  ;;  %v7268_v40 = vld [vmem:[%s14286_s0 + $0x370] sm:$0xff]  ;;  %v7235_v53 = vld [vmem:[%s14286_s0 + $0x268] sm:$0xff]  ;;  %v7269_v39 = vld [vmem:[%s14286_s0 + $0x378] sm:$0xff] }
  0xee   :  { %1066 = vmatpush.bf16.msrb.mxu3 %v272_v25  ;;  %v7234_v25 = vld [vmem:[%s14286_s0 + $0x260] sm:$0xff]  ;;  %v7267_v34 = vld [vmem:[%s14286_s0 + $0x368] sm:$0xff]  ;;  %v263_v4 = vpack.c.bf16 %v7268_v40, %v7266_v50  ;;  %v7232_v1 = vld [vmem:[%s14286_s0 + $0x250] sm:$0xff] }
  0xef   :  { %v650_v26 = vpop.f32.mrf.mxu2  ;;  %v7233_v50 = vld [vmem:[%s14286_s0 + $0x258] sm:$0xff] }
  0xf0   :  { %v739_v57 = vpop.f32.mrf.mxu3  ;;  %v475_v59 = vpop.f32.mrf.mxu0  ;;  %800 = vmatpush.bf16.msrb.mxu0 %v235_v45  ;;  %889 = vmatpush.bf16.msrb.mxu1 %v267_v31  ;;  %v7230_v45 = vld [vmem:[%s14286_s0 + $0x240] sm:$0xff]  ;;  %v7231_v31 = vld [vmem:[%s14286_s0 + $0x248] sm:$0xff] }
  0xf1   :  { %v8688_v17 = vadd.f32 %v739_v57, %v650_v26  ;;  %v564_v21 = vpop.f32.mrf.mxu1  ;;  %978 = vmatpush.bf16.msrb.mxu2 %v236_v12  ;;  %v7236_v26 = vld [vmem:[%s14286_s0 + $0x270] sm:$0xff]  ;;  %v264_v12 = vpack.c.bf16 %v7269_v39, %v7267_v34  ;;  %v228_v34 = vpack.c.bf16 %v7233_v50, %v7231_v31  ;;  %v7263_v39 = vld [vmem:[%s14286_s0 + $0x348] sm:$0xff]  ;;  %v7258_v31 = vld [vmem:[%s14286_s0 + $0x320] sm:$0xff] }
  0xf2   :  { %v8696_v23 = vadd.f32 %v564_v21, %v475_v59  ;;  %v231_v57 = vpack.c.bf16 %v7236_v26, %v7234_v25  ;;  %v7237_v59 = vld [vmem:[%s14286_s0 + $0x278] sm:$0xff]  ;;  %1067 = vmatpush.bf16.msrb.mxu3 %v268_v13  ;;  %v7262_v25 = vld [vmem:[%s14286_s0 + $0x340] sm:$0xff]  ;;  %v7264_v13 = vld [vmem:[%s14286_s0 + $0x350] sm:$0xff] }
  0xf3   :  { %14660 = vst [vmem:[#allocation23_spill] sm:$0xff] %v8688_v17  ;;  %514 = vmatmul.bf16.gmra.mxu0 %v8666_v29  ;;  %v232_v21 = vpack.c.bf16 %v7237_v59, %v7235_v53  ;;  %v227_v59 = vpack.c.bf16 %v7232_v1, %v7230_v45  ;;  %v7698_v1 = vld [vmem:[%s14287_s1 + $0xe4] sm:$0xf] }
  0xf4   :  { %14661 = vst [vmem:[#allocation24_spill] sm:$0xff] %v8696_v23  ;;  %603 = vmatmul.bf16.gmra.mxu1 %v8677_v62  ;;  %692 = vmatmul.bf16.gmra.mxu2 %v8666_v29  ;;  %v7400_v29 = vld [vmem:[%s14287_s1 + $0xe0] sm:$0xf] }
  0xf5   :  { %781 = vmatmul.bf16.gmra.mxu3 %v8677_v62  ;;  %979 = vmatpush.bf16.msrb.mxu2 %v232_v21  ;;  %v7265_v21 = vld [vmem:[%s14286_s0 + $0x358] sm:$0xff] }
  0xf6   :  { %801 = vmatpush.bf16.msrb.mxu0 %v231_v57  ;;  %v7699_v57 = vld [vmem:[%s14287_s1 + $0xe4] sm:$0xf0]  ;;  %890 = vmatpush.bf16.msrb.mxu1 %v263_v4  ;;  %v260_v45 = vpack.c.bf16 %v7265_v21, %v7263_v39  ;;  %v7260_v4 = vld [vmem:[%s14286_s0 + $0x330] sm:$0xff]  ;;  %v7261_v39 = vld [vmem:[%s14286_s0 + $0x338] sm:$0xff] }
  0xf7   :  { %v653_v58 = vpop.f32.mrf.mxu2  ;;  %1068 = vmatpush.bf16.msrb.mxu3 %v264_v12  ;;  %v7227_v12 = vld [vmem:[%s14286_s0 + $0x228] sm:$0xff]  ;;  %v255_v21 = vpack.c.bf16 %v7260_v4, %v7258_v31  ;;  %v8790_v17 = vor.u32 %v7699_v57, %v7400_v29  ;;  %v7256_v29 = vld [vmem:[%s14286_s0 + $0x310] sm:$0xff]  ;;  %v7225_v31 = vld [vmem:[%s14286_s0 + $0x218] sm:$0xff] }
  0xf8   :  { %v742_v26 = vpop.f32.mrf.mxu3  ;;  %v477_v23 = vpop.f32.mrf.mxu0  ;;  %v7223_v57 = vld [vmem:[%s14286_s0 + $0x208] sm:$0xff] }
  0xf9   :  { %v8744_v40 = vadd.f32 %v742_v26, %v653_v58  ;;  %v566_v53 = vpop.f32.mrf.mxu1  ;;  %v259_v58 = vpack.c.bf16 %v7264_v13, %v7262_v25  ;;  %v7228_v26 = vld [vmem:[%s14286_s0 + $0x230] sm:$0xff]  ;;  %980 = vmatpush.bf16.msrb.mxu2 %v228_v34  ;;  %v7229_v25 = vld [vmem:[%s14286_s0 + $0x238] sm:$0xff]  ;;  %v7402_v13 = vld [vmem:[%s14287_s1 + $0xe8] sm:$0xf0]  ;;  %v220_v19 = vpack.c.bf16 %v7225_v31, %v7223_v57 }
  0xfa   :  { %v8752_v62 = vadd.f32 %v566_v53, %v477_v23  ;;  %v7226_v23 = vld [vmem:[%s14286_s0 + $0x220] sm:$0xff]  ;;  %802 = vmatpush.bf16.msrb.mxu0 %v227_v59  ;;  %v224_v53 = vpack.c.bf16 %v7229_v25, %v7227_v12  ;;  %v7259_v34 = vld [vmem:[%s14286_s0 + $0x328] sm:$0xff] }
  0xfb   :  { %14662 = vst [vmem:[#allocation25_spill] sm:$0xff] %v8744_v40  ;;  %v223_v50 = vpack.c.bf16 %v7228_v26, %v7226_v23  ;;  %891 = vmatpush.bf16.msrb.mxu1 %v259_v58  ;;  %1069 = vmatpush.bf16.msrb.mxu3 %v260_v45  ;;  %v7222_v59 = vld [vmem:[%s14286_s0 + $0x200] sm:$0xff]  ;;  %v7224_v23 = vld [vmem:[%s14286_s0 + $0x210] sm:$0xff]  ;;  %v8801_v45 = vor.u32 %v7698_v1, %v7402_v13  ;;  %v7255_v1 = vld [vmem:[%s14286_s0 + $0x308] sm:$0xff] }
  0xfc   :  { %14663 = vst [vmem:[#allocation26_spill] sm:$0xff] %v8752_v62  ;;  %v256_v62 = vpack.c.bf16 %v7261_v39, %v7259_v34  ;;  %v7254_v26 = vld [vmem:[%s14286_s0 + $0x300] sm:$0xff]  ;;  %v219_v34 = vpack.c.bf16 %v7224_v23, %v7222_v59  ;;  %v7257_v13 = vld [vmem:[%s14286_s0 + $0x318] sm:$0xff] }
  0xfd   :  { %981 = vmatpush.bf16.msrb.mxu2 %v224_v53  ;;  %v251_v39 = vpack.c.bf16 %v7256_v29, %v7254_v26  ;;  %v7410_v29 = vld [vmem:[%s14287_s1 + $0xf8] sm:$0xf0] }
  0xfe   :  { %803 = vmatpush.bf16.msrb.mxu0 %v223_v50 }
  0xff   :  { %v655_v40 = vpop.f32.mrf.mxu2  ;;  %892 = vmatpush.bf16.msrb.mxu1 %v255_v21  ;;  %1070 = vmatpush.bf16.msrb.mxu3 %v256_v62 }
 0x100   :  { %v744_v12 = vpop.f32.mrf.mxu3  ;;  %v480_v58 = vpop.f32.mrf.mxu0 }
 0x101   :  { %v8812_v4 = vadd.f32 %v744_v12, %v655_v40  ;;  %v569_v25 = vpop.f32.mrf.mxu1  ;;  %v252_v40 = vpack.c.bf16 %v7257_v13, %v7255_v1  ;;  %982 = vmatpush.bf16.msrb.mxu2 %v220_v19  ;;  %v7408_v12 = vld [vmem:[%s14287_s1 + $0xf0] sm:$0xf]  ;;  %v7700_v19 = vld [vmem:[%s14287_s1 + $0xf4] sm:$0xf] }
 0x102   :  { %v8820_v53 = vadd.f32 %v569_v25, %v480_v58  ;;  %804 = vmatpush.bf16.msrb.mxu0 %v219_v34  ;;  %v7701_v58 = vld [vmem:[%s14287_s1 + $0xf4] sm:$0xf0]  ;;  %v8844_v1 = vor.u32 %v7700_v19, %v7410_v29 }
 0x103   :  { %14664 = vst [vmem:[#allocation27_spill] sm:$0xff] %v8812_v4  ;;  %519 = vmatmul.bf16.gmra.mxu0 %v8790_v17  ;;  %893 = vmatpush.bf16.msrb.mxu1 %v251_v39  ;;  %v8842_v31 = vor.u32 %v7701_v58, %v7408_v12 }
 0x104   :  { %14665 = vst [vmem:[#allocation28_spill] sm:$0xff] %v8820_v53  ;;  %608 = vmatmul.bf16.gmra.mxu1 %v8801_v45  ;;  %697 = vmatmul.bf16.gmra.mxu2 %v8790_v17 }
 0x105   :  { %786 = vmatmul.bf16.gmra.mxu3 %v8801_v45 }
 0x106   :  { %1071 = vmatpush.bf16.msrb.mxu3 %v252_v40 }
 0x107   :  { %v658_v50 = vpop.f32.mrf.mxu2 }
 0x108   :  { %v747_v59 = vpop.f32.mrf.mxu3  ;;  %v482_v23 = vpop.f32.mrf.mxu0 }
 0x109   :  { %v8826_v21 = vadd.f32 %v747_v59, %v658_v50  ;;  %v571_v62 = vpop.f32.mrf.mxu1 }
 0x10a   :  { %v8828_v26 = vadd.f32 %v571_v62, %v482_v23 }
 0x10b   :  { %14666 = vst [vmem:[#allocation29_spill] sm:$0xff] %v8826_v21 }
 0x10c   :  { %14667 = vst [vmem:[#allocation30_spill] sm:$0xff] %v8828_v26 }
 0x10f   :  { %v660_v57 = vpop.f32.mrf.mxu2 }
 0x110   :  { %v749_v25 = vpop.f32.mrf.mxu3  ;;  %v485_v34 = vpop.f32.mrf.mxu0 }
 0x111   :  { %v8846_v13 = vadd.f32 %v749_v25, %v660_v57  ;;  %v574_v39 = vpop.f32.mrf.mxu1 }
 0x112   :  { %v8848_v40 = vadd.f32 %v574_v39, %v485_v34 }
 0x113   :  { %14668 = vst [vmem:[#allocation31_spill] sm:$0xff] %v8846_v13  ;;  %524 = vmatmul.bf16.gmra.mxu0 %v8842_v31 }
 0x114   :  { %14669 = vst [vmem:[#allocation32_spill] sm:$0xff] %v8848_v40  ;;  %613 = vmatmul.bf16.gmra.mxu1 %v8844_v1  ;;  %702 = vmatmul.bf16.gmra.mxu2 %v8842_v31 }
 0x115   :  { %791 = vmatmul.bf16.gmra.mxu3 %v8844_v1 }
 0x117   :  { %v663_v50 = vpop.f32.mrf.mxu2 }
 0x118   :  { %v752_v59 = vpop.f32.mrf.mxu3  ;;  %v487_v23 = vpop.f32.mrf.mxu0 }
 0x119   :  { %v8854_v62 = vadd.f32 %v752_v59, %v663_v50  ;;  %v576_v12 = vpop.f32.mrf.mxu1 }
 0x11a   :  { %v8856_v58 = vadd.f32 %v576_v12, %v487_v23 }
 0x11b   :  { %14670 = vst [vmem:[#allocation33_spill] sm:$0xff] %v8854_v62 }
 0x11c   :  { %14671 = vst [vmem:[#allocation34_spill] sm:$0xff] %v8856_v58 }
 0x11f   :  { %v665_v19 = vpop.f32.mrf.mxu2 }
 0x120   :  { %v754_v29 = vpop.f32.mrf.mxu3  ;;  %v490_v57 = vpop.f32.mrf.mxu0 }
 0x121   :  { %v8858_v25 = vadd.f32 %v754_v29, %v665_v19  ;;  %v579_v34 = vpop.f32.mrf.mxu1 }
 0x122   :  { %v8860_v39 = vadd.f32 %v579_v34, %v490_v57 }
 0x123   :  { %14672 = vst [vmem:[#allocation35_spill] sm:$0xff] %v8858_v25  ;;  %805 = vmatmul.bf16.vlgmr.msrb.gmra.mxu0 %v8296_v36 }
 0x124   :  { %14673 = vst [vmem:[#allocation36_spill] sm:$0xff] %v8860_v39  ;;  %894 = vmatmul.bf16.vlgmr.msrb.gmra.mxu1 %v8298_v37  ;;  %983 = vmatmul.bf16.vlgmr.msrb.gmra.mxu2 %v8296_v36 }
 0x125   :  { %1072 = vmatmul.bf16.vlgmr.msrb.gmra.mxu3 %v8298_v37 }
 0x127   :  { %v668_v50 = vpop.f32.mrf.mxu2 }
 0x128   :  { %v757_v59 = vpop.f32.mrf.mxu3  ;;  %v492_v23 = vpop.f32.mrf.mxu0 }
 0x129   :  { %v8866_v12 = vadd.f32 %v757_v59, %v668_v50  ;;  %v581_v58 = vpop.f32.mrf.mxu1 }
 0x12a   :  { %v8868_v40 = vadd.f32 %v581_v58, %v492_v23 }
 0x12b   :  { %14674 = vst [vmem:[#allocation37_spill] sm:$0xff] %v8866_v12 }
 0x12c   :  { %14675 = vst [vmem:[#allocation38_spill] sm:$0xff] %v8868_v40 }
 0x12f   :  { %v670_v19 = vpop.f32.mrf.mxu2 }
 0x130   :  { %v759_v29 = vpop.f32.mrf.mxu3  ;;  %v495_v57 = vpop.f32.mrf.mxu0 }
 0x131   :  { %v8870_v34 = vadd.f32 %v759_v29, %v670_v19  ;;  %v584_v39 = vpop.f32.mrf.mxu1 }
 0x132   :  { %v8872_v25 = vadd.f32 %v584_v39, %v495_v57 }
 0x133   :  { %14676 = vst [vmem:[#allocation39_spill] sm:$0xff] %v8870_v34  ;;  %810 = vmatmul.bf16.gmra.mxu0 %v8316_v42 }
 0x134   :  { %14677 = vst [vmem:[#allocation40_spill] sm:$0xff] %v8872_v25  ;;  %899 = vmatmul.bf16.gmra.mxu1 %v8318_v43  ;;  %988 = vmatmul.bf16.gmra.mxu2 %v8316_v42 }
 0x135   :  { %1077 = vmatmul.bf16.gmra.mxu3 %v8318_v43 }
 0x137   :  { %v673_v36 = vpop.f32.mrf.mxu2 }
 0x138   :  { %v762_v37 = vpop.f32.mrf.mxu3  ;;  %v497_v58 = vpop.f32.mrf.mxu0 }
 0x139   :  { %v8878_v50 = vadd.f32 %v762_v37, %v673_v36  ;;  %v586_v59 = vpop.f32.mrf.mxu1 }
 0x13a   :  { %v8880_v23 = vadd.f32 %v586_v59, %v497_v58 }
 0x13b   :  { %14678 = vst [vmem:[#allocation41_spill] sm:$0xff] %v8878_v50 }
 0x13c   :  { %14679 = vst [vmem:[#allocation42_spill] sm:$0xff] %v8880_v23 }
 0x13f   :  { %v675_v19 = vpop.f32.mrf.mxu2 }
 0x140   :  { %v764_v29 = vpop.f32.mrf.mxu3  ;;  %v500_v39 = vpop.f32.mrf.mxu0 }
 0x141   :  { %v8882_v57 = vadd.f32 %v764_v29, %v675_v19  ;;  %v589_v25 = vpop.f32.mrf.mxu1 }
 0x142   :  { %v8884_v40 = vadd.f32 %v589_v25, %v500_v39 }
 0x143   :  { %14680 = vst [vmem:[#allocation43_spill] sm:$0xff] %v8882_v57  ;;  %815 = vmatmul.bf16.gmra.mxu0 %v8336_v48 }
 0x144   :  { %14681 = vst [vmem:[#allocation44_spill] sm:$0xff] %v8884_v40  ;;  %904 = vmatmul.bf16.gmra.mxu1 %v8338_v49  ;;  %993 = vmatmul.bf16.gmra.mxu2 %v8336_v48 }
 0x145   :  { %1082 = vmatmul.bf16.gmra.mxu3 %v8338_v49 }
 0x147   :  { %v678_v42 = vpop.f32.mrf.mxu2 }
 0x148   :  { %v767_v43 = vpop.f32.mrf.mxu3  ;;  %v502_v36 = vpop.f32.mrf.mxu0 }
 0x149   :  { %v8890_v37 = vadd.f32 %v767_v43, %v678_v42  ;;  %v591_v58 = vpop.f32.mrf.mxu1 }
 0x14a   :  { %v8892_v59 = vadd.f32 %v591_v58, %v502_v36 }
 0x14b   :  { %14682 = vst [vmem:[#allocation45_spill] sm:$0xff] %v8890_v37 }
 0x14c   :  { %14683 = vst [vmem:[#allocation46_spill] sm:$0xff] %v8892_v59 }
 0x14f   :  { %v680_v19 = vpop.f32.mrf.mxu2 }
 0x150   :  { %v769_v29 = vpop.f32.mrf.mxu3  ;;  %v505_v25 = vpop.f32.mrf.mxu0 }
 0x151   :  { %v8894_v39 = vadd.f32 %v769_v29, %v680_v19  ;;  %v594_v40 = vpop.f32.mrf.mxu1 }
 0x152   :  { %v8896_v23 = vadd.f32 %v594_v40, %v505_v25 }
 0x153   :  { %14684 = vst [vmem:[#allocation47_spill] sm:$0xff] %v8894_v39  ;;  %820 = vmatmul.bf16.gmra.mxu0 %v8356_v54 }
 0x154   :  { %14685 = vst [vmem:[#allocation48_spill] sm:$0xff] %v8896_v23  ;;  %909 = vmatmul.bf16.gmra.mxu1 %v8358_v55  ;;  %998 = vmatmul.bf16.gmra.mxu2 %v8356_v54 }
 0x155   :  { %1087 = vmatmul.bf16.gmra.mxu3 %v8358_v55 }
 0x157   :  { %v683_v48 = vpop.f32.mrf.mxu2 }
 0x158   :  { %v772_v49 = vpop.f32.mrf.mxu3  ;;  %v507_v42 = vpop.f32.mrf.mxu0 }
 0x159   :  { %v8902_v43 = vadd.f32 %v772_v49, %v683_v48  ;;  %v596_v36 = vpop.f32.mrf.mxu1 }
 0x15a   :  { %v8904_v58 = vadd.f32 %v596_v36, %v507_v42 }
 0x15b   :  { %14686 = vst [vmem:[#allocation49_spill] sm:$0xff] %v8902_v43 }
 0x15c   :  { %14687 = vst [vmem:[#allocation50_spill] sm:$0xff] %v8904_v58 }
 0x15f   :  { %v685_v19 = vpop.f32.mrf.mxu2 }
 0x160   :  { %v774_v29 = vpop.f32.mrf.mxu3  ;;  %v510_v40 = vpop.f32.mrf.mxu0 }
 0x161   :  { %v8906_v25 = vadd.f32 %v774_v29, %v685_v19  ;;  %v599_v23 = vpop.f32.mrf.mxu1 }
 0x162   :  { %v8908_v59 = vadd.f32 %v599_v23, %v510_v40 }
 0x163   :  { %14688 = vst [vmem:[#allocation51_spill] sm:$0xff] %v8906_v25  ;;  %825 = vmatmul.bf16.gmra.mxu0 %v8376_v60 }
 0x164   :  { %14689 = vst [vmem:[#allocation52_spill] sm:$0xff] %v8908_v59  ;;  %914 = vmatmul.bf16.gmra.mxu1 %v8378_v61  ;;  %1003 = vmatmul.bf16.gmra.mxu2 %v8376_v60 }
 0x165   :  { %1092 = vmatmul.bf16.gmra.mxu3 %v8378_v61 }
 0x167   :  { %v688_v54 = vpop.f32.mrf.mxu2 }
 0x168   :  { %v777_v55 = vpop.f32.mrf.mxu3  ;;  %v512_v48 = vpop.f32.mrf.mxu0 }
 0x169   :  { %v8914_v49 = vadd.f32 %v777_v55, %v688_v54  ;;  %v601_v42 = vpop.f32.mrf.mxu1 }
 0x16a   :  { %v8916_v36 = vadd.f32 %v601_v42, %v512_v48 }
 0x16b   :  { %14690 = vst [vmem:[#allocation53_spill] sm:$0xff] %v8914_v49 }
 0x16c   :  { %14691 = vst [vmem:[#allocation54_spill] sm:$0xff] %v8916_v36 }
 0x16f   :  { %v690_v19 = vpop.f32.mrf.mxu2 }
 0x170   :  { %v779_v29 = vpop.f32.mrf.mxu3  ;;  %v515_v23 = vpop.f32.mrf.mxu0 }
 0x171   :  { %v8918_v40 = vadd.f32 %v779_v29, %v690_v19  ;;  %v604_v59 = vpop.f32.mrf.mxu1 }
 0x172   :  { %v8920_v25 = vadd.f32 %v604_v59, %v515_v23 }
 0x173   :  { %14692 = vst [vmem:[#allocation55_spill] sm:$0xff] %v8918_v40  ;;  %830 = vmatmul.bf16.gmra.mxu0 %v8396_v2 }
 0x174   :  { %14693 = vst [vmem:[#allocation56_spill] sm:$0xff] %v8920_v25  ;;  %919 = vmatmul.bf16.gmra.mxu1 %v8398_v3  ;;  %1008 = vmatmul.bf16.gmra.mxu2 %v8396_v2 }
 0x175   :  { %1097 = vmatmul.bf16.gmra.mxu3 %v8398_v3 }
 0x177   :  { %v693_v60 = vpop.f32.mrf.mxu2 }
 0x178   :  { %v782_v61 = vpop.f32.mrf.mxu3  ;;  %v517_v54 = vpop.f32.mrf.mxu0 }
 0x179   :  { %v8926_v55 = vadd.f32 %v782_v61, %v693_v60  ;;  %v606_v48 = vpop.f32.mrf.mxu1 }
 0x17a   :  { %v8928_v42 = vadd.f32 %v606_v48, %v517_v54 }
 0x17b   :  { %14694 = vst [vmem:[#allocation57_spill] sm:$0xff] %v8926_v55 }
 0x17c   :  { %14695 = vst [vmem:[#allocation58_spill] sm:$0xff] %v8928_v42 }
 0x17f   :  { %v695_v19 = vpop.f32.mrf.mxu2 }
 0x180   :  { %v784_v29 = vpop.f32.mrf.mxu3  ;;  %v520_v59 = vpop.f32.mrf.mxu0 }
 0x181   :  { %v8930_v23 = vadd.f32 %v784_v29, %v695_v19  ;;  %v609_v25 = vpop.f32.mrf.mxu1 }
 0x182   :  { %v8932_v40 = vadd.f32 %v609_v25, %v520_v59 }
 0x183   :  { %14696 = vst [vmem:[#allocation59_spill] sm:$0xff] %v8930_v23  ;;  %835 = vmatmul.bf16.gmra.mxu0 %v8416_v8 }
 0x184   :  { %14697 = vst [vmem:[#allocation60_spill] sm:$0xff] %v8932_v40  ;;  %924 = vmatmul.bf16.gmra.mxu1 %v8418_v9  ;;  %1013 = vmatmul.bf16.gmra.mxu2 %v8416_v8 }
 0x185   :  { %1102 = vmatmul.bf16.gmra.mxu3 %v8418_v9 }
 0x187   :  { %v698_v2 = vpop.f32.mrf.mxu2 }
 0x188   :  { %v787_v3 = vpop.f32.mrf.mxu3  ;;  %v522_v60 = vpop.f32.mrf.mxu0 }
 0x189   :  { %v8938_v61 = vadd.f32 %v787_v3, %v698_v2  ;;  %v611_v54 = vpop.f32.mrf.mxu1 }
 0x18a   :  { %v8940_v48 = vadd.f32 %v611_v54, %v522_v60 }
 0x18b   :  { %14698 = vst [vmem:[#allocation61_spill] sm:$0xff] %v8938_v61 }
 0x18c   :  { %14699 = vst [vmem:[#allocation62_spill] sm:$0xff] %v8940_v48 }
 0x18f   :  { %v700_v19 = vpop.f32.mrf.mxu2 }
 0x190   :  { %v789_v29 = vpop.f32.mrf.mxu3  ;;  %v525_v25 = vpop.f32.mrf.mxu0 }
 0x191   :  { %v8942_v59 = vadd.f32 %v789_v29, %v700_v19  ;;  %v614_v40 = vpop.f32.mrf.mxu1 }
 0x192   :  { %v8944_v42 = vadd.f32 %v614_v40, %v525_v25 }
 0x193   :  { %14700 = vst [vmem:[#allocation63_spill] sm:$0xff] %v8942_v59  ;;  %840 = vmatmul.bf16.gmra.mxu0 %v8436_v14 }
 0x194   :  { %14701 = vst [vmem:[#allocation64_spill] sm:$0xff] %v8944_v42  ;;  %929 = vmatmul.bf16.gmra.mxu1 %v8438_v15  ;;  %1018 = vmatmul.bf16.gmra.mxu2 %v8436_v14  ;;  %v1346_v14 = vmul.f32 %v8466_v28, %v8466_v28 }
 0x195   :  { %1107 = vmatmul.bf16.gmra.mxu3 %v8438_v15  ;;  %v1345_v15 = vmul.f32 %v8460_v24, %v8460_v24 }
 0x197   :  { %v703_v8 = vpop.f32.mrf.mxu2 }
 0x198   :  { %v792_v9 = vpop.f32.mrf.mxu3  ;;  %v527_v2 = vpop.f32.mrf.mxu0 }
 0x199   :  { %v8950_v3 = vadd.f32 %v792_v9, %v703_v8  ;;  %v616_v60 = vpop.f32.mrf.mxu1  ;;  %v1153_v9 = vadd.f32 %v8466_v28, %v8460_v24 }
 0x19a   :  { %v8952_v54 = vadd.f32 %v616_v60, %v527_v2 }
 0x19b   :  { %14702 = vst [vmem:[#allocation65_spill] sm:$0xff] %v8950_v3 }
 0x19c   :  { %14703 = vst [vmem:[#allocation66_spill] sm:$0xff] %v8952_v54 }
 0x19f   :  { %v705_v19 = vpop.f32.mrf.mxu2 }
 0x1a0   :  { %v794_v29 = vpop.f32.mrf.mxu3  ;;  %v806_v40 = vpop.f32.mrf.mxu0 }
 0x1a1   :  { %v8954_v25 = vadd.f32 %v794_v29, %v705_v19  ;;  %v895_v42 = vpop.f32.mrf.mxu1 }
 0x1a2   :  { %v8956_v61 = vadd.f32 %v895_v42, %v806_v40  ;;  %v1473_v40 = vadd.f32 %v1346_v14, %v1345_v15 }
 0x1a3   :  { %14704 = vst [vmem:[#allocation67_spill] sm:$0xff] %v8954_v25  ;;  %845 = vmatmul.bf16.gmra.mxu0 %v8456_v20 }
 0x1a4   :  { %14705 = vst [vmem:[#allocation68_spill] sm:$0xff] %v8956_v61  ;;  %934 = vmatmul.bf16.gmra.mxu1 %v8458_v22  ;;  %1023 = vmatmul.bf16.gmra.mxu2 %v8456_v20  ;;  %v1347_v42 = vmul.f32 %v8956_v61, %v8956_v61  ;;  %v1154_v29 = vadd.f32 %v1153_v9, %v8956_v61 }
 0x1a5   :  { %1112 = vmatmul.bf16.gmra.mxu3 %v8458_v22  ;;  %v1350_v9 = vmul.f32 %v8486_v44, %v8486_v44 }
 0x1a6   :  { %v1474_v25 = vadd.f32 %v1473_v40, %v1347_v42 }
 0x1a7   :  { %v984_v8 = vpop.f32.mrf.mxu2 }
 0x1a8   :  { %v1073_v2 = vpop.f32.mrf.mxu3  ;;  %v808_v60 = vpop.f32.mrf.mxu0 }
 0x1a9   :  { %v8970_v19 = vadd.f32 %v1073_v2, %v984_v8  ;;  %v897_v20 = vpop.f32.mrf.mxu1  ;;  %v1158_v8 = vadd.f32 %v8486_v44, %v8468_v30 }
 0x1aa   :  { %v8976_v3 = vadd.f32 %v897_v20, %v808_v60 }
 0x1ab   :  { %14706 = vst [vmem:[#allocation69_spill] sm:$0xff] %v8970_v19  ;;  %v1155_v22 = vadd.f32 %v1154_v29, %v8970_v19  ;;  %v1348_v54 = vmul.f32 %v8970_v19, %v8970_v19  ;;  %v1163_v29 = vadd.f32 %v8494_v52, %v8488_v46  ;;  %v14757_v19 = vld [vmem:[#allocation40_spill] sm:$0xff] }
 0x1ac   :  { %14707 = vst [vmem:[#allocation70_spill] sm:$0xff] %v8976_v3  ;;  %v1159_v15 = vadd.f32 %v1158_v8, %v8976_v3  ;;  %v1417_v61 = vmul.f32 %v14757_v19, %v14757_v19 }
 0x1ad   :  { %1156 = vadd.xlane.f32.xlu0 %v1155_v22  ;;  %v1475_v28 = vadd.f32 %v1474_v25, %v1348_v54 }
 0x1af   :  { %1476 = vadd.xlane.f32.xlu2 %v1475_v28  ;;  %v986_v24 = vpop.f32.mrf.mxu2  ;;  %v1349_v28 = vmul.f32 %v8468_v30, %v8468_v30  ;;  %v14793_v30 = vld [vmem:[#allocation60_spill] sm:$0xff] }
 0x1b0   :  { %v1075_v2 = vpop.f32.mrf.mxu3  ;;  %v811_v59 = vpop.f32.mrf.mxu0 }
 0x1b1   :  { %v8980_v48 = vadd.f32 %v1075_v2, %v986_v24  ;;  %v900_v14 = vpop.f32.mrf.mxu1  ;;  %v1351_v24 = vmul.f32 %v8976_v3, %v8976_v3  ;;  %v1478_v20 = vadd.f32 %v1350_v9, %v1349_v28  ;;  %v1354_v2 = vmul.f32 %v8494_v52, %v8494_v52 }
 0x1b2   :  { %v8991_v54 = vadd.f32 %v900_v14, %v811_v59  ;;  %v1353_v9 = vmul.f32 %v8488_v46, %v8488_v46  ;;  %v1358_v28 = vmul.f32 %v8514_v6, %v8514_v6 }
 0x1b3   :  { %14708 = vst [vmem:[#allocation71_spill] sm:$0xff] %v8980_v48  ;;  %850 = vmatmul.bf16.gmra.mxu0 %v8482_v38  ;;  %v1160_v42 = vadd.f32 %v1159_v15, %v8980_v48  ;;  %v1352_v60 = vmul.f32 %v8980_v48, %v8980_v48  ;;  %v1479_v8 = vadd.f32 %v1478_v20, %v1351_v24 }
 0x1b4   :  { %939 = vmatmul.bf16.gmra.mxu1 %v8484_v41  ;;  %1028 = vmatmul.bf16.gmra.mxu2 %v8482_v38  ;;  %14709 = vst [vmem:[#allocation72_spill] sm:$0xff] %v8991_v54  ;;  %v1357_v24 = vmul.f32 %v8496_v56, %v8496_v56 }
 0x1b5   :  { %1117 = vmatmul.bf16.gmra.mxu3 %v8484_v41  ;;  %1161 = vadd.xlane.f32.xlu0 %v1160_v42  ;;  %v1164_v41 = vadd.f32 %v1163_v29, %v8991_v54  ;;  %v1480_v15 = vadd.f32 %v1479_v8, %v1352_v60  ;;  %v1483_v29 = vadd.f32 %v1354_v2, %v1353_v9 }
 0x1b6   :  { %v1362_v2 = vmul.f32 %v8522_v16, %v8522_v16 }
 0x1b7   :  { %v989_v25 = vpop.f32.mrf.mxu2 }
 0x1b8   :  { %v1078_v38 = vpop.f32.mrf.mxu3  ;;  %v813_v40 = vpop.f32.mrf.mxu0 }
 0x1b9   :  { %v9000_v22 = vadd.f32 %v1078_v38, %v989_v25  ;;  %v902_v59 = vpop.f32.mrf.mxu1  ;;  %v1355_v25 = vmul.f32 %v8991_v54, %v8991_v54  ;;  %v1488_v54 = vadd.f32 %v1358_v28, %v1357_v24  ;;  %v1168_v28 = vadd.f32 %v8514_v6, %v8496_v56 }
 0x1ba   :  { %v9005_v14 = vadd.f32 %v902_v59, %v813_v40  ;;  %v14369_v6 = vmov 0  }
 0x1bb   :  { %14710 = vst [vmem:[#allocation73_spill] sm:$0xff] %v9000_v22  ;;  %v1165_v42 = vadd.f32 %v1164_v41, %v9000_v22  ;;  %v1356_v60 = vmul.f32 %v9000_v22, %v9000_v22  ;;  %v1484_v52 = vadd.f32 %v1483_v29, %v1355_v25  ;;  %7740 = vset.pattern.permute.xlu0 %v14369_v6 }
 0x1bc   :  { %14711 = vst [vmem:[#allocation74_spill] sm:$0xff] %v9005_v14  ;;  %v1359_v38 = vmul.f32 %v9005_v14, %v9005_v14  ;;  %7741 = vset.pattern.permute.xlu2 %v14369_v6  ;;  %7742 = vset.pattern.permute.xlu1 %v14369_v6 }
 0x1bd   :  { %1481 = vadd.xlane.f32.xlu0 %v1480_v15  ;;  %1166 = vadd.xlane.f32.xlu1 %v1165_v42  ;;  %v1485_v42 = vadd.f32 %v1484_v52, %v1356_v60  ;;  %v1361_v52 = vmul.f32 %v8516_v10, %v8516_v10 }
 0x1be   :  { %v1489_v22 = vadd.f32 %v1488_v54, %v1359_v38 }
 0x1bf   :  { %v991_v20 = vpop.f32.mrf.mxu2 }
 0x1c0   :  { %v1080_v40 = vpop.f32.mrf.mxu3  ;;  %v816_v59 = vpop.f32.mrf.mxu0 }
 0x1c1   :  { %v9020_v8 = vadd.f32 %v1080_v40, %v991_v20  ;;  %v905_v41 = vpop.f32.mrf.mxu1  ;;  %v1169_v20 = vadd.f32 %v1168_v28, %v9005_v14 }
 0x1c2   :  { %v9022_v15 = vadd.f32 %v905_v41, %v816_v59 }
 0x1c3   :  { %14712 = vst [vmem:[#allocation75_spill] sm:$0xff] %v9020_v8  ;;  %855 = vmatmul.bf16.gmra.mxu0 %v8510_v0  ;;  %v1360_v46 = vmul.f32 %v9020_v8, %v9020_v8  ;;  %v1170_v29 = vadd.f32 %v1169_v20, %v9020_v8  ;;  %v14736_v8 = vld [vmem:[#allocation26_spill] sm:$0xff] }
 0x1c4   :  { %14713 = vst [vmem:[#allocation76_spill] sm:$0xff] %v9022_v15  ;;  %944 = vmatmul.bf16.gmra.mxu1 %v8512_v5  ;;  %1033 = vmatmul.bf16.gmra.mxu2 %v8510_v0  ;;  %v1363_v54 = vmul.f32 %v9022_v15, %v9022_v15 }
 0x1c5   :  { %1122 = vmatmul.bf16.gmra.mxu3 %v8512_v5  ;;  %1486 = vadd.xlane.f32.xlu1 %v1485_v42  ;;  %v1490_v9 = vadd.f32 %v1489_v22, %v1360_v46  ;;  %v1173_v5 = vadd.f32 %v8522_v16, %v8516_v10  ;;  %v1493_v22 = vadd.f32 %v1362_v2, %v1361_v52 }
 0x1c6   :  { %v1366_v42 = vmul.f32 %v8542_v33, %v8542_v33  ;;  %v1365_v2 = vmul.f32 %v8524_v18, %v8524_v18 }
 0x1c7   :  { %1491 = vadd.xlane.f32.xlu2 %v1490_v9  ;;  %v994_v25 = vpop.f32.mrf.mxu2  ;;  %v1494_v59 = vadd.f32 %v1493_v22, %v1363_v54  ;;  %v1174_v41 = vadd.f32 %v1173_v5, %v9022_v15 }
 0x1c8   :  { %v1083_v24 = vpop.f32.mrf.mxu3  ;;  %v818_v0 = vpop.f32.mrf.mxu0  ;;  %v1498_v5 = vadd.f32 %v1366_v42, %v1365_v2  ;;  %v1183_v2 = vadd.f32 %v8550_v47, %v8544_v35 }
 0x1c9   :  { %v9041_v60 = vadd.f32 %v1083_v24, %v994_v25  ;;  %v907_v46 = vpop.f32.mrf.mxu1 }
 0x1ca   :  { %v9044_v38 = vadd.f32 %v907_v46, %v818_v0  ;;  %v1178_v46 = vadd.f32 %v8542_v33, %v8524_v18 }
 0x1cb   :  { %14714 = vst [vmem:[#allocation77_spill] sm:$0xff] %v9041_v60  ;;  %v1364_v40 = vmul.f32 %v9041_v60, %v9041_v60  ;;  %v1175_v28 = vadd.f32 %v1174_v41, %v9041_v60  ;;  %v1370_v41 = vmul.f32 %v8550_v47, %v8550_v47 }
 0x1cc   :  { %14715 = vst [vmem:[#allocation78_spill] sm:$0xff] %v9044_v38  ;;  %v1367_v25 = vmul.f32 %v9044_v38, %v9044_v38 }
 0x1cd   :  { %1171 = vadd.xlane.f32.xlu1 %v1170_v29  ;;  %v1495_v9 = vadd.f32 %v1494_v59, %v1364_v40  ;;  %v1179_v59 = vadd.f32 %v1178_v46, %v9044_v38 }
 0x1ce   :  { %v1499_v40 = vadd.f32 %v1498_v5, %v1367_v25 }
 0x1cf   :  { %1496 = vadd.xlane.f32.xlu0 %v1495_v9  ;;  %1176 = vadd.xlane.f32.xlu2 %v1175_v28  ;;  %v996_v52 = vpop.f32.mrf.mxu2  ;;  %v1369_v28 = vmul.f32 %v8544_v35, %v8544_v35 }
 0x1d0   :  { %v1085_v24 = vpop.f32.mrf.mxu3  ;;  %v821_v54 = vpop.f32.mrf.mxu0 }
 0x1d1   :  { %v9056_v0 = vadd.f32 %v1085_v24, %v996_v52  ;;  %v910_v20 = vpop.f32.mrf.mxu1  ;;  %v1503_v5 = vadd.f32 %v1370_v41, %v1369_v28  ;;  %v1188_v41 = vadd.f32 %v8570_v11, %v8552_v51 }
 0x1d2   :  { %v9060_v22 = vadd.f32 %v910_v20, %v821_v54 }
 0x1d3   :  { %14716 = vst [vmem:[#allocation79_spill] sm:$0xff] %v9056_v0  ;;  %860 = vmatmul.bf16.gmra.mxu0 %v8538_v27  ;;  %v1368_v29 = vmul.f32 %v9056_v0, %v9056_v0  ;;  %v1180_v9 = vadd.f32 %v1179_v59, %v9056_v0 }
 0x1d4   :  { %14717 = vst [vmem:[#allocation80_spill] sm:$0xff] %v9060_v22  ;;  %949 = vmatmul.bf16.gmra.mxu1 %v8540_v32  ;;  %1038 = vmatmul.bf16.gmra.mxu2 %v8538_v27  ;;  %v1371_v52 = vmul.f32 %v9060_v22, %v9060_v22  ;;  %v1184_v20 = vadd.f32 %v1183_v2, %v9060_v22  ;;  %v14731_v22 = vld [vmem:[#allocation22_spill] sm:$0xff] }
 0x1d5   :  { %1127 = vmatmul.bf16.gmra.mxu3 %v8540_v32  ;;  %v1500_v42 = vadd.f32 %v1499_v40, %v1368_v29 }
 0x1d6   :  { %v1504_v59 = vadd.f32 %v1503_v5, %v1371_v52 }
 0x1d7   :  { %1501 = vadd.xlane.f32.xlu1 %v1500_v42  ;;  %1181 = vadd.xlane.f32.xlu2 %v1180_v9  ;;  %v999_v27 = vpop.f32.mrf.mxu2  ;;  %v1374_v42 = vmul.f32 %v8570_v11, %v8570_v11 }
 0x1d8   :  { %v1088_v25 = vpop.f32.mrf.mxu3  ;;  %v823_v24 = vpop.f32.mrf.mxu0 }
 0x1d9   :  { %v9078_v54 = vadd.f32 %v1088_v25, %v999_v27  ;;  %v912_v32 = vpop.f32.mrf.mxu1  ;;  %v1373_v27 = vmul.f32 %v8552_v51, %v8552_v51 }
 0x1da   :  { %v9081_v46 = vadd.f32 %v912_v32, %v823_v24 }
 0x1db   :  { %14718 = vst [vmem:[#allocation81_spill] sm:$0xff] %v9078_v54  ;;  %v1185_v29 = vadd.f32 %v1184_v20, %v9078_v54  ;;  %v1372_v40 = vmul.f32 %v9078_v54, %v9078_v54  ;;  %v1508_v5 = vadd.f32 %v1374_v42, %v1373_v27  ;;  %v14723_v27 = vld [vmem:[#allocation18_spill] sm:$0xff]  ;;  %v14727_v54 = vld [vmem:[#allocation20_spill] sm:$0xff] }
 0x1dc   :  { %14719 = vst [vmem:[#allocation82_spill] sm:$0xff] %v9081_v46  ;;  %v1375_v28 = vmul.f32 %v9081_v46, %v9081_v46  ;;  %v1189_v20 = vadd.f32 %v1188_v41, %v9081_v46  ;;  %v1377_v41 = vmul.f32 %v14723_v27, %v14723_v27  ;;  %v14726_v46 = vld [vmem:[#allocation23_spill] sm:$0xff] }
 0x1dd   :  { %1186 = vadd.xlane.f32.xlu0 %v1185_v29  ;;  %v1505_v9 = vadd.f32 %v1504_v59, %v1372_v40 }
 0x1df   :  { %1506 = vadd.xlane.f32.xlu2 %v1505_v9  ;;  %v1001_v25 = vpop.f32.mrf.mxu2  ;;  %v1509_v9 = vadd.f32 %v1508_v5, %v1375_v28 }
 0x1e0   :  { %v1090_v2 = vpop.f32.mrf.mxu3  ;;  %v826_v24 = vpop.f32.mrf.mxu0 }
 0x1e1   :  { %v9094_v32 = vadd.f32 %v1090_v2, %v1001_v25  ;;  %v915_v52 = vpop.f32.mrf.mxu1  ;;  %v14722_v25 = vld [vmem:[#allocation19_spill] sm:$0xff] }
 0x1e2   :  { %v9097_v29 = vadd.f32 %v915_v52, %v826_v24  ;;  %v1378_v2 = vmul.f32 %v14722_v25, %v14722_v25  ;;  %v1193_v24 = vadd.f32 %v14722_v25, %v14723_v27 }
 0x1e3   :  { %14720 = vst [vmem:[#allocation83_spill] sm:$0xff] %v9094_v32  ;;  %865 = vmatmul.bf16.gmra.mxu0 %v8566_v63  ;;  %v1190_v40 = vadd.f32 %v1189_v20, %v9094_v32  ;;  %v1376_v59 = vmul.f32 %v9094_v32, %v9094_v32 }
 0x1e4   :  { %14721 = vst [vmem:[#allocation84_spill] sm:$0xff] %v9097_v29  ;;  %954 = vmatmul.bf16.gmra.mxu1 %v8568_v7  ;;  %1043 = vmatmul.bf16.gmra.mxu2 %v8566_v63  ;;  %v1379_v28 = vmul.f32 %v9097_v29, %v9097_v29 }
 0x1e5   :  { %1132 = vmatmul.bf16.gmra.mxu3 %v8568_v7  ;;  %1191 = vadd.xlane.f32.xlu1 %v1190_v40  ;;  %v1510_v42 = vadd.f32 %v1509_v9, %v1376_v59  ;;  %v1194_v7 = vadd.f32 %v1193_v24, %v9097_v29  ;;  %v1513_v40 = vadd.f32 %v1378_v2, %v1377_v41 }
 0x1e7   :  { %1511 = vadd.xlane.f32.xlu0 %v1510_v42  ;;  %v1004_v52 = vpop.f32.mrf.mxu2  ;;  %v1514_v32 = vadd.f32 %v1513_v40, %v1379_v28  ;;  %v1382_v42 = vmul.f32 %v14726_v46, %v14726_v46 }
 0x1e8   :  { %v1093_v20 = vpop.f32.mrf.mxu3  ;;  %v828_v63 = vpop.f32.mrf.mxu0 }
 0x1e9   :  { %v9114_v5 = vadd.f32 %v1093_v20, %v1004_v52  ;;  %v917_v0 = vpop.f32.mrf.mxu1  ;;  %v1381_v52 = vmul.f32 %v14727_v54, %v14727_v54 }
 0x1ea   :  { %v9117_v59 = vadd.f32 %v917_v0, %v828_v63  ;;  %v1198_v0 = vadd.f32 %v14726_v46, %v14727_v54 }
 0x1eb   :  { %14724 = vst [vmem:[#allocation85_spill] sm:$0xff] %v9114_v5  ;;  %v1195_v9 = vadd.f32 %v1194_v7, %v9114_v5  ;;  %v1380_v38 = vmul.f32 %v9114_v5, %v9114_v5  ;;  %v1518_v40 = vadd.f32 %v1382_v42, %v1381_v52  ;;  %v14733_v52 = vld [vmem:[#allocation24_spill] sm:$0xff] }
 0x1ec   :  { %14725 = vst [vmem:[#allocation86_spill] sm:$0xff] %v9117_v59  ;;  %v1383_v2 = vmul.f32 %v9117_v59, %v9117_v59  ;;  %v1199_v7 = vadd.f32 %v1198_v0, %v9117_v59  ;;  %v1385_v0 = vmul.f32 %v14733_v52, %v14733_v52 }
 0x1ed   :  { %1196 = vadd.xlane.f32.xlu2 %v1195_v9  ;;  %v1515_v60 = vadd.f32 %v1514_v32, %v1380_v38  ;;  %v14730_v32 = vld [vmem:[#allocation21_spill] sm:$0xff] }
 0x1ee   :  { %v1519_v5 = vadd.f32 %v1518_v40, %v1383_v2 }
 0x1ef   :  { %1516 = vadd.xlane.f32.xlu1 %v1515_v60  ;;  %v1006_v20 = vpop.f32.mrf.mxu2 }
 0x1f0   :  { %v1095_v41 = vpop.f32.mrf.mxu3  ;;  %v831_v24 = vpop.f32.mrf.mxu0 }
 0x1f1   :  { %v9130_v63 = vadd.f32 %v1095_v41, %v1006_v20  ;;  %v920_v28 = vpop.f32.mrf.mxu1  ;;  %v14732_v20 = vld [vmem:[#allocation25_spill] sm:$0xff] }
 0x1f2   :  { %v9133_v38 = vadd.f32 %v920_v28, %v831_v24  ;;  %v1386_v41 = vmul.f32 %v14732_v20, %v14732_v20  ;;  %v1203_v24 = vadd.f32 %v14732_v20, %v14733_v52 }
 0x1f3   :  { %14728 = vst [vmem:[#allocation87_spill] sm:$0xff] %v9130_v63  ;;  %870 = vmatmul.bf16.gmra.mxu0 %v14730_v32  ;;  %v1200_v60 = vadd.f32 %v1199_v7, %v9130_v63  ;;  %v1384_v9 = vmul.f32 %v9130_v63, %v9130_v63 }
 0x1f4   :  { %14729 = vst [vmem:[#allocation88_spill] sm:$0xff] %v9133_v38  ;;  %959 = vmatmul.bf16.gmra.mxu1 %v14731_v22  ;;  %1048 = vmatmul.bf16.gmra.mxu2 %v14730_v32  ;;  %v1387_v2 = vmul.f32 %v9133_v38, %v9133_v38 }
 0x1f5   :  { %1137 = vmatmul.bf16.gmra.mxu3 %v14731_v22  ;;  %1201 = vadd.xlane.f32.xlu0 %v1200_v60  ;;  %v1520_v42 = vadd.f32 %v1519_v5, %v1384_v9  ;;  %v1204_v22 = vadd.f32 %v1203_v24, %v9133_v38  ;;  %v1523_v60 = vadd.f32 %v1386_v41, %v1385_v0 }
 0x1f7   :  { %1521 = vadd.xlane.f32.xlu2 %v1520_v42  ;;  %v1009_v28 = vpop.f32.mrf.mxu2  ;;  %v1524_v29 = vadd.f32 %v1523_v60, %v1387_v2  ;;  %v1390_v42 = vmul.f32 %v8812_v4, %v8812_v4 }
 0x1f8   :  { %v1098_v7 = vpop.f32.mrf.mxu3  ;;  %v833_v40 = vpop.f32.mrf.mxu0 }
 0x1f9   :  { %v9150_v32 = vadd.f32 %v1098_v7, %v1009_v28  ;;  %v922_v63 = vpop.f32.mrf.mxu1  ;;  %v1389_v28 = vmul.f32 %v14736_v8, %v14736_v8 }
 0x1fa   :  { %v9153_v5 = vadd.f32 %v922_v63, %v833_v40  ;;  %v1208_v63 = vadd.f32 %v8812_v4, %v14736_v8 }
 0x1fb   :  { %14734 = vst [vmem:[#allocation21_spill] sm:$0xff] %v9150_v32  ;;  %v1205_v9 = vadd.f32 %v1204_v22, %v9150_v32  ;;  %v1388_v59 = vmul.f32 %v9150_v32, %v9150_v32  ;;  %v1528_v60 = vadd.f32 %v1390_v42, %v1389_v28  ;;  %v8047_v28 = vmov 512.0  }
 0x1fc   :  { %14735 = vst [vmem:[#allocation22_spill] sm:$0xff] %v9153_v5  ;;  %v1391_v41 = vmul.f32 %v9153_v5, %v9153_v5  ;;  %v1209_v22 = vadd.f32 %v1208_v63, %v9153_v5  ;;  %7812 = vrcp.f32 %v8047_v28  ;;  %v1393_v63 = vmul.f32 %v8820_v53, %v8820_v53 }
 0x1fd   :  { %1206 = vadd.xlane.f32.xlu1 %v1205_v9  ;;  %v1525_v15 = vadd.f32 %v1524_v29, %v1388_v59 }
 0x1fe   :  { %v1529_v9 = vadd.f32 %v1528_v60, %v1391_v41 }
 0x1ff   :  { %1526 = vadd.xlane.f32.xlu0 %v1525_v15  ;;  %v1011_v7 = vpop.f32.mrf.mxu2 }
 0x200   :  { %v1100_v0 = vpop.f32.mrf.mxu3  ;;  %v836_v24 = vpop.f32.mrf.mxu0 }
 0x201   :  { %v9166_v40 = vadd.f32 %v1100_v0, %v1011_v7  ;;  %v925_v2 = vpop.f32.mrf.mxu1  ;;  %v1394_v7 = vmul.f32 %v8826_v21, %v8826_v21  ;;  %v1213_v0 = vadd.f32 %v8826_v21, %v8820_v53 }
 0x202   :  { %v9169_v29 = vadd.f32 %v925_v2, %v836_v24 }
 0x203   :  { %14737 = vst [vmem:[#allocation89_spill] sm:$0xff] %v9166_v40  ;;  %875 = vmatmul.bf16.gmra.mxu0 %v8790_v17  ;;  %v1210_v15 = vadd.f32 %v1209_v22, %v9166_v40  ;;  %v1392_v59 = vmul.f32 %v9166_v40, %v9166_v40 }
 0x204   :  { %14738 = vst [vmem:[#allocation90_spill] sm:$0xff] %v9169_v29  ;;  %964 = vmatmul.bf16.gmra.mxu1 %v8801_v45  ;;  %1053 = vmatmul.bf16.gmra.mxu2 %v8790_v17  ;;  %v1395_v41 = vmul.f32 %v9169_v29, %v9169_v29  ;;  %v1214_v60 = vadd.f32 %v1213_v0, %v9169_v29 }
 0x205   :  { %1142 = vmatmul.bf16.gmra.mxu3 %v8801_v45  ;;  %1211 = vadd.xlane.f32.xlu2 %v1210_v15  ;;  %v1530_v42 = vadd.f32 %v1529_v9, %v1392_v59  ;;  %v1533_v15 = vadd.f32 %v1394_v7, %v1393_v63  ;;  %v7813_v59 = vpop.eup %7812  ;;  %v1218_v63 = vadd.f32 %v8846_v13, %v8828_v26 }
 0x206   :  { %vm1670_vm0 = vweird.f32 %v7813_v59 }
 0x207   :  { %1531 = vadd.xlane.f32.xlu1 %v1530_v42  ;;  %v1014_v17 = vpop.f32.mrf.mxu2  ;;  %v1534_v32 = vadd.f32 %v1533_v15, %v1395_v41  ;;  %v1398_v42 = vmul.f32 %v8846_v13, %v8846_v13 }
 0x208   :  { %v1103_v24 = vpop.f32.mrf.mxu3  ;;  %v838_v2 = vpop.f32.mrf.mxu0 }
 0x209   :  { %v9186_v22 = vadd.f32 %v1103_v24, %v1014_v17  ;;  %v927_v45 = vpop.f32.mrf.mxu1  ;;  %v1666_v17 = vmul.f32 512.0, %v7813_v59  ;;  %v1397_v24 = vmul.f32 %v8828_v26, %v8828_v26 }
 0x20a   :  { %v9189_v9 = vadd.f32 %v927_v45, %v838_v2 }
 0x20b   :  { %14739 = vst [vmem:[#allocation91_spill] sm:$0xff] %v9186_v22  ;;  %v1215_v28 = vadd.f32 %v1214_v60, %v9186_v22  ;;  %v1396_v40 = vmul.f32 %v9186_v22, %v9186_v22 }
 0x20c   :  { %14740 = vst [vmem:[#allocation92_spill] sm:$0xff] %v9189_v9  ;;  %v1399_v0 = vmul.f32 %v9189_v9, %v9189_v9  ;;  %v1219_v15 = vadd.f32 %v1218_v63, %v9189_v9 }
 0x20d   :  { %1216 = vadd.xlane.f32.xlu0 %v1215_v28  ;;  %v1535_v5 = vadd.f32 %v1534_v32, %v1396_v40  ;;  %v1538_v32 = vadd.f32 %v1398_v42, %v1397_v24  ;;  %v1667_v40 = vsub.f32 1.0, %v1666_v17  ;;  %v14743_v24 = vld [vmem:[#allocation32_spill] sm:$0xff] }
 0x20e   :  { %v1401_v63 = vmul.f32 %v14743_v24, %v14743_v24 }
 0x20f   :  { %1536 = vadd.xlane.f32.xlu2 %v1535_v5  ;;  %v1016_v7 = vpop.f32.mrf.mxu2  ;;  %v1539_v29 = vadd.f32 %v1538_v32, %v1399_v0  ;;  %v1668_v17 = vmul.f32 %v7813_v59, %v1667_v40 }
 0x210   :  { %v1105_v2 = vpop.f32.mrf.mxu3  ;;  %v841_v45 = vpop.f32.mrf.mxu0 }
 0x211   :  { %v9202_v41 = vadd.f32 %v1105_v2, %v1016_v7  ;;  %v930_v60 = vpop.f32.mrf.mxu1  ;;  %v1402_v7 = vmul.f32 %v8854_v62, %v8854_v62  ;;  %v1223_v2 = vadd.f32 %v8854_v62, %v14743_v24  ;;  %v1669_v40 = vadd.f32 %v7813_v59, %v1668_v17 }
 0x212   :  { %v9205_v28 = vadd.f32 %v930_v60, %v841_v45 }
 0x213   :  { %14741 = vst [vmem:[#allocation93_spill] sm:$0xff] %v9202_v41  ;;  %880 = vmatmul.bf16.gmra.mxu0 %v8842_v31  ;;  %v1220_v5 = vadd.f32 %v1219_v15, %v9202_v41  ;;  %v1400_v22 = vmul.f32 %v9202_v41, %v9202_v41 }
 0x214   :  { %14742 = vst [vmem:[#allocation94_spill] sm:$0xff] %v9205_v28  ;;  %969 = vmatmul.bf16.gmra.mxu1 %v8844_v1  ;;  %1058 = vmatmul.bf16.gmra.mxu2 %v8842_v31  ;;  %v1403_v0 = vmul.f32 %v9205_v28, %v9205_v28 }
 0x215   :  { %1147 = vmatmul.bf16.gmra.mxu3 %v8844_v1  ;;  %1221 = vadd.xlane.f32.xlu1 %v1220_v5  ;;  %v1540_v42 = vadd.f32 %v1539_v29, %v1400_v22  ;;  %v1224_v1 = vadd.f32 %v1223_v2, %v9205_v28  ;;  %v1543_v29 = vadd.f32 %v1402_v7, %v1401_v63 }
 0x216   :  { %v9234_v2 = vsel %vm1670_vm0, %v7813_v59, %v1669_v40 }
 0x217   :  { %1541 = vadd.xlane.f32.xlu0 %v1540_v42  ;;  %v1019_v45 = vpop.f32.mrf.mxu2  ;;  %v1544_v9 = vadd.f32 %v1543_v29, %v1403_v0  ;;  %v14746_v42 = vld [vmem:[#allocation35_spill] sm:$0xff]  ;;  %14748 = vst [vmem:[#allocation97_spill] sm:$0xff] %v9234_v2 }
 0x218   :  { %v1108_v31 = vpop.f32.mrf.mxu3  ;;  %v843_v60 = vpop.f32.mrf.mxu0  ;;  %v1406_v38 = vmul.f32 %v14746_v42, %v14746_v42 }
 0x219   :  { %v9222_v15 = vadd.f32 %v1108_v31, %v1019_v45  ;;  %v932_v32 = vpop.f32.mrf.mxu1  ;;  %v14747_v31 = vld [vmem:[#allocation34_spill] sm:$0xff] }
 0x21a   :  { %v9225_v22 = vadd.f32 %v932_v32, %v843_v60  ;;  %v1405_v14 = vmul.f32 %v14747_v31, %v14747_v31  ;;  %v1228_v63 = vadd.f32 %v14746_v42, %v14747_v31 }
 0x21b   :  { %14744 = vst [vmem:[#allocation95_spill] sm:$0xff] %v9222_v15  ;;  %v1225_v5 = vadd.f32 %v1224_v1, %v9222_v15  ;;  %v1404_v41 = vmul.f32 %v9222_v15, %v9222_v15 }
 0x21c   :  { %14745 = vst [vmem:[#allocation96_spill] sm:$0xff] %v9225_v22  ;;  %v1407_v7 = vmul.f32 %v9225_v22, %v9225_v22  ;;  %v1548_v32 = vadd.f32 %v1406_v38, %v1405_v14  ;;  %v1229_v59 = vadd.f32 %v1228_v63, %v9225_v22  ;;  %v1410_v63 = vmul.f32 %v8866_v12, %v8866_v12 }
 0x21d   :  { %1226 = vadd.xlane.f32.xlu2 %v1225_v5  ;;  %v1545_v45 = vadd.f32 %v1544_v9, %v1404_v41 }
 0x21e   :  { %v1549_v5 = vadd.f32 %v1548_v32, %v1407_v7 }
 0x21f   :  { %1546 = vadd.xlane.f32.xlu1 %v1545_v45  ;;  %v1021_v17 = vpop.f32.mrf.mxu2 }
 0x220   :  { %v1110_v0 = vpop.f32.mrf.mxu3  ;;  %v1157_v60 = vpop.xlane.xlu0 %1156 }
 0x221   :  { %v9240_v1 = vadd.f32 %v1110_v0, %v1021_v17  ;;  %v9243_v9 = vmul.f32 %v9234_v2, %v1157_v60  ;;  %v935_v41 = vpop.f32.mrf.mxu1  ;;  %v846_v29 = vpop.f32.mrf.mxu0  ;;  %v14751_v60 = vld [vmem:[#allocation36_spill] sm:$0xff] }
 0x222   :  { %v1477_v40 = vpop.xlane.xlu2 %1476  ;;  %v9252_v38 = vadd.f32 %v935_v41, %v846_v29  ;;  %v1233_v7 = vadd.f32 %v8866_v12, %v14751_v60 }
 0x223   :  { %14749 = vst [vmem:[#allocation98_spill] sm:$0xff] %v9240_v1  ;;  %v1736_v45 = vmul.f32 %v9243_v9, %v9243_v9  ;;  %v1704_v15 = vmul.f32 %v9234_v2, %v1477_v40  ;;  %v1230_v28 = vadd.f32 %v1229_v59, %v9240_v1  ;;  %v1408_v14 = vmul.f32 %v9240_v1, %v9240_v1 }
 0x224   :  { %14750 = vst [vmem:[#allocation99_spill] sm:$0xff] %v9252_v38  ;;  %v1409_v59 = vmul.f32 %v14751_v60, %v14751_v60  ;;  %v1411_v40 = vmul.f32 %v9252_v38, %v9252_v38  ;;  %v1414_v60 = vmul.f32 %v8870_v34, %v8870_v34 }
 0x225   :  { %v1768_v17 = vsub.f32 %v1704_v15, %v1736_v45  ;;  %1231 = vadd.xlane.f32.xlu0 %v1230_v28  ;;  %v1550_v0 = vadd.f32 %v1549_v5, %v1408_v14  ;;  %v1234_v14 = vadd.f32 %v1233_v7, %v9252_v38 }
 0x227   :  { %v1800_v32 = vmax.f32 %v1768_v17, 0.0  ;;  %1551 = vadd.xlane.f32.xlu2 %v1550_v0  ;;  %v1024_v22 = vpop.f32.mrf.mxu2  ;;  %v1553_v17 = vadd.f32 %v1410_v63, %v1409_v59 }
 0x228   :  { %v1113_v41 = vpop.f32.mrf.mxu3  ;;  %v1162_v29 = vpop.xlane.xlu0 %1161 }
 0x229   :  { %v9262_v15 = vadd.f32 1e-05, %v1800_v32  ;;  %v9264_v28 = vadd.f32 %v1113_v41, %v1024_v22  ;;  %v848_v5 = vpop.f32.mrf.mxu0  ;;  %v937_v45 = vpop.f32.mrf.mxu1  ;;  %v9274_v1 = vmul.f32 %v9234_v2, %v1162_v29  ;;  %v1554_v32 = vadd.f32 %v1553_v17, %v1411_v40  ;;  %v14754_v41 = vld [vmem:[#allocation38_spill] sm:$0xff] }
 0x22a   :  { %v9267_v12 = vadd.f32 %v937_v45, %v848_v5  ;;  %v1413_v7 = vmul.f32 %v14754_v41, %v14754_v41  ;;  %v1238_v45 = vadd.f32 %v8870_v34, %v14754_v41 }
 0x22b   :  { %14752 = vst [vmem:[#allocation100_spill] sm:$0xff] %v9264_v28  ;;  %7814 = vrsqrt.f32 %v9262_v15  ;;  %v1235_v0 = vadd.f32 %v1234_v14, %v9264_v28  ;;  %v1412_v22 = vmul.f32 %v9264_v28, %v9264_v28  ;;  %v1737_v29 = vmul.f32 %v9274_v1, %v9274_v1 }
 0x22c   :  { %14753 = vst [vmem:[#allocation101_spill] sm:$0xff] %v9267_v12  ;;  %v1415_v63 = vmul.f32 %v9267_v12, %v9267_v12  ;;  %v1558_v28 = vadd.f32 %v1414_v60, %v1413_v7  ;;  %vm1870_vm2 = vweird.f32 %v9262_v15 }
 0x22d   :  { %1236 = vadd.xlane.f32.xlu1 %v1235_v0  ;;  %v1555_v5 = vadd.f32 %v1554_v32, %v1412_v22  ;;  %v1239_v32 = vadd.f32 %v1238_v45, %v9267_v12  ;;  %v1418_v45 = vmul.f32 %v8878_v50, %v8878_v50 }
 0x22f   :  { %v1026_v59 = vpop.f32.mrf.mxu2  ;;  %1556 = vadd.xlane.f32.xlu0 %v1555_v5  ;;  %v1559_v5 = vadd.f32 %v1558_v28, %v1415_v63  ;;  %v1243_v28 = vadd.f32 %v8878_v50, %v14757_v19 }
 0x230   :  { %v1115_v14 = vpop.f32.mrf.mxu3  ;;  %v1482_v38 = vpop.xlane.xlu0 %1481 }
 0x231   :  { %v7815_v40 = vpop.eup %7814  ;;  %v9286_v17 = vadd.f32 %v1115_v14, %v1026_v59  ;;  %v1705_v0 = vmul.f32 %v9234_v2, %v1482_v38  ;;  %v851_v22 = vpop.f32.mrf.mxu0 }
 0x232   :  { %v1865_v34 = vmul.f32 %v7815_v40, %v9262_v15  ;;  %v940_v41 = vpop.f32.mrf.mxu1  ;;  %vm1871_vm1 = vweird.f32 %v7815_v40 }
 0x233   :  { %14755 = vst [vmem:[#allocation102_spill] sm:$0xff] %v9286_v17  ;;  %v1769_v60 = vsub.f32 %v1705_v0, %v1737_v29  ;;  %v9294_v7 = vadd.f32 %v940_v41, %v851_v22  ;;  %v1240_v59 = vadd.f32 %v1239_v32, %v9286_v17  ;;  %v1416_v38 = vmul.f32 %v9286_v17, %v9286_v17  ;;  %vm1872_vm3 = vmor %vm1870_vm2, %vm1871_vm1 }
 0x234   :  { %v1866_v63 = vmul.f32 %v7815_v40, %v1865_v34 }
 0x235   :  { %14756 = vst [vmem:[#allocation103_spill] sm:$0xff] %v9294_v7  ;;  %v1801_v14 = vmax.f32 %v1769_v60, 0.0  ;;  %1241 = vadd.xlane.f32.xlu2 %v1240_v59  ;;  %v1560_v12 = vadd.f32 %v1559_v5, %v1416_v38  ;;  %v1419_v29 = vmul.f32 %v9294_v7, %v9294_v7  ;;  %v1244_v60 = vadd.f32 %v1243_v28, %v9294_v7 }
 0x236   :  { %v1563_v5 = vadd.f32 %v1418_v45, %v1417_v61  ;;  %v1867_v59 = vmul.f32 0.5, %v1866_v63  ;;  %v24_v61 = vld [vmem:[%s14288_s5] sm:$0xff] }
 0x237   :  { %v1833_v41 = vadd.f32 1e-05, %v1801_v14  ;;  %1561 = vadd.xlane.f32.xlu1 %v1560_v12  ;;  %v1029_v0 = vpop.f32.mrf.mxu2 }
 0x238   :  { %v1118_v22 = vpop.f32.mrf.mxu3  ;;  %v1564_v34 = vadd.f32 %v1563_v5, %v1419_v29  ;;  %v1868_v50 = vsub.f32 1.5, %v1867_v59 }
 0x239   :  { %7816 = vrsqrt.f32 %v1833_v41  ;;  %v9307_v32 = vadd.f32 %v1118_v22, %v1029_v0  ;;  %v1167_v0 = vpop.xlane.xlu1 %1166  ;;  %vm1880_vm5 = vweird.f32 %v1833_v41 }
 0x23a   :  { %v1869_v56 = vmul.f32 %v7815_v40, %v1868_v50  ;;  %v25_v50 = vld [vmem:[%s14288_s5 + $0x8] sm:$0xff] }
 0x23b   :  { %14758 = vst [vmem:[#allocation104_spill] sm:$0xff] %v9307_v32  ;;  %v1245_v38 = vadd.f32 %v1244_v60, %v9307_v32  ;;  %v1420_v6 = vmul.f32 %v9307_v32, %v9307_v32  ;;  %v1426_v32 = vmul.f32 %v8890_v37, %v8890_v37 }
 0x23c   :  { %v1873_v45 = vsel %vm1872_vm3, %v7815_v40, %v1869_v56  ;;  %v9323_v40 = vmul.f32 %v9234_v2, %v1167_v0 }
 0x23d   :  { %1246 = vadd.xlane.f32.xlu0 %v1245_v38  ;;  %v1565_v14 = vadd.f32 %v1564_v34, %v1420_v6  ;;  %v2184_v63 = vmul.f32 %v1873_v45, %v24_v61  ;;  %v853_v34 = vpop.f32.mrf.mxu0 }
 0x23e   :  { %v1738_v60 = vmul.f32 %v9323_v40, %v9323_v40 }
 0x23f   :  { %v7817_v17 = vpop.eup %7816  ;;  %1566 = vadd.xlane.f32.xlu2 %v1565_v14  ;;  %v2216_v6 = vmul.f32 %v2184_v63, %v9243_v9  ;;  %v1031_v14 = vpop.f32.mrf.mxu2 }
 0x240   :  { %v1875_v12 = vmul.f32 %v7817_v17, %v1833_v41  ;;  %vm1881_vm4 = vweird.f32 %v7817_v17 }
 0x241   :  { %vm1882_vm6 = vmor %vm1880_vm5, %vm1881_vm4  ;;  %v1487_v56 = vpop.xlane.xlu1 %1486 }
 0x242   :  { %v1876_v19 = vmul.f32 %v7817_v17, %v1875_v12  ;;  %v1706_v9 = vmul.f32 %v9234_v2, %v1487_v56  ;;  %v1120_v12 = vpop.f32.mrf.mxu3  ;;  %v1492_v56 = vpop.xlane.xlu2 %1491 }
 0x243   :  { %v1707_v7 = vmul.f32 %v9234_v2, %v1492_v56 }
 0x244   :  { %v1877_v28 = vmul.f32 0.5, %v1876_v19  ;;  %v1770_v5 = vsub.f32 %v1706_v9, %v1738_v60 }
 0x246   :  { %v1878_v29 = vsub.f32 1.5, %v1877_v28  ;;  %v1802_v59 = vmax.f32 %v1770_v5, 0.0 }
 0x247   :  { %v1034_v60 = vpop.f32.mrf.mxu2 }
 0x248   :  { %v1879_v22 = vmul.f32 %v7817_v17, %v1878_v29  ;;  %v1834_v38 = vadd.f32 1e-05, %v1802_v59  ;;  %v9334_v29 = vadd.f32 %v1120_v12, %v1031_v14 }
 0x249   :  { %v1172_v45 = vpop.xlane.xlu1 %1171 }
 0x24a   :  { %v1883_v19 = vsel %vm1882_vm6, %v7817_v17, %v1879_v22  ;;  %7818 = vrsqrt.f32 %v1834_v38  ;;  %v942_v17 = vpop.f32.mrf.mxu1  ;;  %14760 = vst [vmem:[#allocation106_spill] sm:$0xff] %v9334_v29  ;;  %v1123_v5 = vpop.f32.mrf.mxu3  ;;  %vm1890_vm8 = vweird.f32 %v1834_v38 }
 0x24b   :  { %v2185_v15 = vmul.f32 %v1883_v19, %v25_v50  ;;  %v9330_v61 = vadd.f32 %v942_v17, %v853_v34  ;;  %v856_v19 = vpop.f32.mrf.mxu0 }
 0x24d   :  { %v2217_v41 = vmul.f32 %v2185_v15, %v9274_v1  ;;  %14759 = vst [vmem:[#allocation105_spill] sm:$0xff] %v9330_v61  ;;  %v9337_v1 = vmul.f32 %v9234_v2, %v1172_v45 }
 0x24f   :  { %v1739_v34 = vmul.f32 %v9337_v1, %v9337_v1 }
 0x250   :  { %2280 = vrot.lane.b32.xlu1 %v2216_v6, %s8049_s21  ;;  %v7819_v28 = vpop.eup %7818  ;;  %v14761_v6 = vld [vmem:[#allocation42_spill] sm:$0xff] }
 0x251   :  { %2410 = vperm.xlu0 %7740, %v2184_v63   ;;  %v1422_v63 = vmul.f32 %v8882_v57, %v8882_v57  ;;  %v1885_v0 = vmul.f32 %v7819_v28, %v1834_v38  ;;  %v1421_v22 = vmul.f32 %v14761_v6, %v14761_v6  ;;  %v1248_v9 = vadd.f32 %v8882_v57, %v14761_v6 }
 0x252   :  { %v945_v50 = vpop.f32.mrf.mxu1  ;;  %v9355_v57 = vadd.f32 %v1123_v5, %v1034_v60  ;;  %v1771_v3 = vsub.f32 %v1707_v7, %v1739_v34  ;;  %vm1891_vm7 = vweird.f32 %v7819_v28  ;;  %v1036_v34 = vpop.f32.mrf.mxu2 }
 0x253   :  { %v1568_v59 = vadd.f32 %v1422_v63, %v1421_v22  ;;  %v1886_v17 = vmul.f32 %v7819_v28, %v1885_v0  ;;  %v9349_v14 = vadd.f32 %v945_v50, %v856_v19  ;;  %v1249_v12 = vadd.f32 %v1248_v9, %v9330_v61  ;;  %v14764_v63 = vld [vmem:[#allocation44_spill] sm:$0xff]  ;;  %vm1892_vm9 = vmor %vm1890_vm8, %vm1891_vm7 }
 0x254   :  { %14763 = vst [vmem:[#allocation108_spill] sm:$0xff] %v9355_v57  ;;  %v1425_v0 = vmul.f32 %v14764_v63, %v14764_v63  ;;  %v1428_v19 = vmul.f32 %v9355_v57, %v9355_v57  ;;  %v1803_v9 = vmax.f32 %v1771_v3, 0.0  ;;  %v1430_v3 = vmul.f32 %v8894_v39, %v8894_v39 }
 0x255   :  { %14762 = vst [vmem:[#allocation107_spill] sm:$0xff] %v9349_v14  ;;  %v1250_v6 = vadd.f32 %v1249_v12, %v9334_v29  ;;  %v1887_v22 = vmul.f32 0.5, %v1886_v17  ;;  %v1427_v50 = vmul.f32 %v9349_v14, %v9349_v14  ;;  %v1253_v12 = vadd.f32 %v8890_v37, %v14764_v63 }
 0x256   :  { %v1835_v17 = vadd.f32 1e-05, %v1803_v9 }
 0x257   :  { %2415 = vperm.xlu2 %7741, %v2185_v15   ;;  %v1423_v15 = vmul.f32 %v9330_v61, %v9330_v61  ;;  %v1888_v56 = vsub.f32 1.5, %v1887_v22  ;;  %v26_v22 = vld [vmem:[%s14288_s5 + $0x10] sm:$0xff] }
 0x258   :  { %7820 = vrsqrt.f32 %v1835_v17  ;;  %vm1900_vm11 = vweird.f32 %v1835_v17 }
 0x259   :  { %v1569_v45 = vadd.f32 %v1568_v59, %v1423_v15  ;;  %v1573_v15 = vadd.f32 %v1426_v32, %v1425_v0  ;;  %v1889_v7 = vmul.f32 %v7819_v28, %v1888_v56  ;;  %v1254_v32 = vadd.f32 %v1253_v12, %v9349_v14  ;;  %v1177_v12 = vpop.xlane.xlu2 %1176 }
 0x25a   :  { %v947_v59 = vpop.f32.mrf.mxu1 }
 0x25b   :  { %v1574_v60 = vadd.f32 %v1573_v15, %v1427_v50  ;;  %v1255_v0 = vadd.f32 %v1254_v32, %v9355_v57  ;;  %v1893_v50 = vsel %vm1892_vm9, %v7819_v28, %v1889_v7 }
 0x25c   :  { %v2186_v56 = vmul.f32 %v1893_v50, %v26_v22  ;;  %v1502_v50 = vpop.xlane.xlu1 %1501 }
 0x25d   :  { %v1575_v5 = vadd.f32 %v1574_v60, %v1428_v19  ;;  %v14767_v19 = vld [vmem:[#allocation46_spill] sm:$0xff] }
 0x25e   :  { %v1429_v38 = vmul.f32 %v14767_v19, %v14767_v19 }
 0x25f   :  { %2282 = vrot.lane.b32.xlu2 %v2217_v41, %s8049_s21  ;;  %v1424_v41 = vmul.f32 %v9334_v29, %v9334_v29 }
 0x260   :  { %v1578_v60 = vadd.f32 %v1430_v3, %v1429_v38  ;;  %v1709_v38 = vmul.f32 %v9234_v2, %v1502_v50 }
 0x261   :  { %v1570_v48 = vadd.f32 %v1569_v45, %v1424_v41  ;;  %v858_v41 = vpop.f32.mrf.mxu0  ;;  %v1182_v32 = vpop.xlane.xlu2 %1181 }
 0x262   :  { %v9386_v22 = vmul.f32 %v9234_v2, %v1182_v32 }
 0x269   :  { %v1507_v61 = vpop.xlane.xlu2 %1506 }
 0x27a   :  { %1251 = vadd.xlane.f32.xlu1 %v1250_v6  ;;  %v1125_v6 = vpop.f32.mrf.mxu3 }
 0x27b   :  { %1571 = vadd.xlane.f32.xlu0 %v1570_v48  ;;  %v9366_v48 = vadd.f32 %v947_v59, %v858_v41  ;;  %v9371_v45 = vadd.f32 %v1125_v6, %v1036_v34  ;;  %v2218_v41 = vmul.f32 %v2186_v56, %v9323_v40  ;;  %v1741_v40 = vmul.f32 %v9386_v22, %v9386_v22 }
 0x27d   :  { %14765 = vst [vmem:[#allocation109_spill] sm:$0xff] %v9366_v48  ;;  %v1431_v15 = vmul.f32 %v9366_v48, %v9366_v48  ;;  %v1432_v9 = vmul.f32 %v9371_v45, %v9371_v45 }
 0x27e   :  { %14766 = vst [vmem:[#allocation110_spill] sm:$0xff] %v9371_v45 }
 0x27f   :  { %v1579_v59 = vadd.f32 %v1578_v60, %v1431_v15  ;;  %v27_v15 = vld [vmem:[%s14288_s5 + $0x18] sm:$0xff]  ;;  %v1773_v60 = vsub.f32 %v1709_v38, %v1741_v40 }
 0x281   :  { %v1580_v34 = vadd.f32 %v1579_v59, %v1432_v9 }
 0x282   :  { %1576 = vadd.xlane.f32.xlu1 %v1575_v5  ;;  %v7821_v5 = vpop.eup %7820  ;;  %v1128_v40 = vpop.f32.mrf.mxu3 }
 0x283   :  { %v1895_v6 = vmul.f32 %v7821_v5, %v1835_v17  ;;  %vm1901_vm10 = vweird.f32 %v7821_v5 }
 0x284   :  { %vm1902_vm12 = vmor %vm1900_vm11, %vm1901_vm10 }
 0x285   :  { %v1896_v28 = vmul.f32 %v7821_v5, %v1895_v6 }
 0x287   :  { %v1897_v7 = vmul.f32 0.5, %v1896_v28 }
 0x288   :  { %1256 = vadd.xlane.f32.xlu2 %v1255_v0 }
 0x289   :  { %v1898_v0 = vsub.f32 1.5, %v1897_v7 }
 0x28b   :  { %v1899_v3 = vmul.f32 %v7821_v5, %v1898_v0  ;;  %v861_v0 = vpop.f32.mrf.mxu0 }
 0x28d   :  { %v1903_v9 = vsel %vm1902_vm12, %v7821_v5, %v1899_v3  ;;  %v950_v5 = vpop.f32.mrf.mxu1  ;;  %v1039_v3 = vpop.f32.mrf.mxu2 }
 0x28e   :  { %v2187_v59 = vmul.f32 %v1903_v9, %v27_v15  ;;  %v9404_v15 = vadd.f32 %v950_v5, %v861_v0 }
 0x28f   :  { %2284 = vrot.lane.b32.xlu0 %v2218_v41, %s8049_s21  ;;  %v1805_v41 = vmax.f32 %v1773_v60, 0.0  ;;  %v9409_v60 = vadd.f32 %v1128_v40, %v1039_v3 }
 0x290   :  { %1581 = vadd.xlane.f32.xlu2 %v1580_v34  ;;  %v1497_v34 = vpop.xlane.xlu0 %1496  ;;  %v2219_v28 = vmul.f32 %v2187_v59, %v9337_v1  ;;  %14768 = vst [vmem:[#allocation111_spill] sm:$0xff] %v9404_v15  ;;  %v1434_v1 = vmul.f32 %v8902_v43, %v8902_v43 }
 0x291   :  { %v1837_v6 = vadd.f32 1e-05, %v1805_v41  ;;  %v1708_v7 = vmul.f32 %v9234_v2, %v1497_v34  ;;  %14769 = vst [vmem:[#allocation112_spill] sm:$0xff] %v9409_v60 }
 0x293   :  { %7822 = vrsqrt.f32 %v1837_v6  ;;  %vm1920_vm14 = vweird.f32 %v1837_v6 }
 0x299   :  { %v7823_v38 = vpop.eup %7822 }
 0x29a   :  { %v1915_v34 = vmul.f32 %v7823_v38, %v1837_v6  ;;  %vm1921_vm13 = vweird.f32 %v7823_v38 }
 0x29b   :  { %2420 = vperm.xlu1 %7742, %v2186_v56   ;;  %v9395_v56 = vmul.f32 %v9234_v2, %v1177_v12  ;;  %v1258_v12 = vadd.f32 %v8894_v39, %v14767_v19  ;;  %v1130_v39 = vpop.f32.mrf.mxu3  ;;  %vm1922_vm15 = vmor %vm1920_vm14, %vm1921_vm13 }
 0x29c   :  { %v1916_v0 = vmul.f32 %v7823_v38, %v1915_v34  ;;  %v1710_v34 = vmul.f32 %v9234_v2, %v1507_v61 }
 0x29d   :  { %v1740_v17 = vmul.f32 %v9395_v56, %v9395_v56  ;;  %v1259_v9 = vadd.f32 %v1258_v12, %v9366_v48  ;;  %v1187_v12 = vpop.xlane.xlu0 %1186  ;;  %v1192_v48 = vpop.xlane.xlu1 %1191 }
 0x29e   :  { %v9424_v40 = vmul.f32 %v9234_v2, %v1187_v12  ;;  %v1917_v29 = vmul.f32 0.5, %v1916_v0  ;;  %v952_v0 = vpop.f32.mrf.mxu1  ;;  %v9433_v61 = vmul.f32 %v9234_v2, %v1192_v48 }
 0x29f   :  { %v1772_v32 = vsub.f32 %v1708_v7, %v1740_v17  ;;  %v14770_v17 = vld [vmem:[#allocation48_spill] sm:$0xff]  ;;  %v1435_v7 = vmul.f32 %v9404_v15, %v9404_v15 }
 0x2a0   :  { %v1743_v6 = vmul.f32 %v9433_v61, %v9433_v61 }
 0x2a1   :  { %v1804_v50 = vmax.f32 %v1772_v32, 0.0  ;;  %v1436_v32 = vmul.f32 %v9409_v60, %v9409_v60 }
 0x2a3   :  { %v9412_v41 = vadd.f32 1e-05, %v1804_v50  ;;  %v1263_v50 = vadd.f32 %v8902_v43, %v14770_v17  ;;  %v14772_v43 = vld [vmem:[#allocation51_spill] sm:$0xff] }
 0x2a5   :  { %7824 = vrsqrt.f32 %v9412_v41  ;;  %vm1910_vm1 = vweird.f32 %v9412_v41 }
 0x2a6   :  { %v955_v48 = vpop.f32.mrf.mxu1 }
 0x2a8   :  { %2425 = vperm.xlu2 %7741, %v2187_v59   ;;  %v1260_v59 = vadd.f32 %v1259_v9, %v9371_v45 }
 0x2ab   :  { %v7825_v45 = vpop.eup %7824 }
 0x2ac   :  { %vm1911_vm0 = vweird.f32 %v7825_v45 }
 0x2ad   :  { %vm1912_vm2 = vmor %vm1910_vm1, %vm1911_vm0 }
 0x2b0   :  { %2286 = vrot.lane.b32.xlu2 %v2219_v28, %s8049_s21  ;;  %v1433_v28 = vmul.f32 %v14770_v17, %v14770_v17  ;;  %v1268_v17 = vadd.f32 %v14772_v43, %v8904_v58 }
 0x2b2   :  { %v1583_v5 = vadd.f32 %v1434_v1, %v1433_v28  ;;  %v1742_v1 = vmul.f32 %v9424_v40, %v9424_v40 }
 0x2b4   :  { %v1584_v3 = vadd.f32 %v1583_v5, %v1435_v7  ;;  %v1918_v7 = vsub.f32 1.5, %v1917_v29  ;;  %v1905_v5 = vmul.f32 %v7825_v45, %v9412_v41  ;;  %v1774_v12 = vsub.f32 %v1710_v34, %v1742_v1  ;;  %v29_v29 = vld [vmem:[%s14288_s5 + $0x28] sm:$0xff]  ;;  %v1512_v1 = vpop.xlane.xlu0 %1511 }
 0x2b6   :  { %v1585_v9 = vadd.f32 %v1584_v3, %v1436_v32  ;;  %v1919_v32 = vmul.f32 %v7823_v38, %v1918_v7  ;;  %v863_v3 = vpop.f32.mrf.mxu0  ;;  %v1806_v19 = vmax.f32 %v1774_v12, 0.0 }
 0x2b7   :  { %v9443_v12 = vadd.f32 %v952_v0, %v863_v3  ;;  %v1442_v3 = vmul.f32 %v8914_v49, %v8914_v49 }
 0x2b8   :  { %v1838_v7 = vadd.f32 1e-05, %v1806_v19 }
 0x2b9   :  { %1261 = vadd.xlane.f32.xlu0 %v1260_v59  ;;  %v1264_v59 = vadd.f32 %v1263_v50, %v9404_v15  ;;  %v1041_v50 = vpop.f32.mrf.mxu2  ;;  %14771 = vst [vmem:[#allocation113_spill] sm:$0xff] %v9443_v12  ;;  %v1269_v0 = vadd.f32 %v1268_v17, %v9443_v12 }
 0x2ba   :  { %7826 = vrsqrt.f32 %v1838_v7  ;;  %vm1930_vm4 = vweird.f32 %v1838_v7 }
 0x2bb   :  { %v1265_v28 = vadd.f32 %v1264_v59, %v9409_v60  ;;  %v1923_v59 = vsel %vm1922_vm15, %v7823_v38, %v1919_v32 }
 0x2be   :  { %v866_v15 = vpop.f32.mrf.mxu0 }
 0x2c1   :  { %1586 = vadd.xlane.f32.xlu0 %v1585_v9  ;;  %v1906_v9 = vmul.f32 %v7825_v45, %v1905_v5  ;;  %v1711_v5 = vmul.f32 %v9234_v2, %v1512_v1  ;;  %v1044_v19 = vpop.f32.mrf.mxu2  ;;  %v9451_v1 = vadd.f32 %v955_v48, %v866_v15 }
 0x2c3   :  { %v1907_v34 = vmul.f32 0.5, %v1906_v9  ;;  %v1775_v32 = vsub.f32 %v1711_v5, %v1743_v6  ;;  %v9449_v9 = vadd.f32 %v1130_v39, %v1041_v50  ;;  %14774 = vst [vmem:[#allocation115_spill] sm:$0xff] %v9451_v1  ;;  %v7827_v50 = vpop.eup %7826  ;;  %v28_v6 = vld [vmem:[%s14288_s5 + $0x20] sm:$0xff]  ;;  %v1443_v5 = vmul.f32 %v9451_v1, %v9451_v1 }
 0x2c4   :  { %vm1931_vm3 = vweird.f32 %v7827_v50 }
 0x2c5   :  { %1266 = vadd.xlane.f32.xlu1 %v1265_v28  ;;  %v9438_v28 = vmul.f32 %v1923_v59, %v29_v29  ;;  %v1908_v60 = vsub.f32 1.5, %v1907_v34  ;;  %14773 = vst [vmem:[#allocation114_spill] sm:$0xff] %v9449_v9  ;;  %v1133_v29 = vpop.f32.mrf.mxu3  ;;  %v1270_v39 = vadd.f32 %v1269_v0, %v9449_v9  ;;  %vm1932_vm5 = vmor %vm1930_vm4, %vm1931_vm3 }
 0x2c6   :  { %v9458_v34 = vadd.f32 %v1133_v29, %v1044_v19  ;;  %v1925_v19 = vmul.f32 %v7827_v50, %v1838_v7 }
 0x2c7   :  { %v2221_v38 = vmul.f32 %v9438_v28, %v9386_v22  ;;  %v1909_v59 = vmul.f32 %v7825_v45, %v1908_v60  ;;  %v1807_v22 = vmax.f32 %v1775_v32, 0.0  ;;  %v14776_v60 = vld [vmem:[#allocation52_spill] sm:$0xff] }
 0x2c8   :  { %14775 = vst [vmem:[#allocation116_spill] sm:$0xff] %v9458_v34  ;;  %v1441_v15 = vmul.f32 %v14776_v60, %v14776_v60  ;;  %v1444_v48 = vmul.f32 %v9458_v34, %v9458_v34  ;;  %v1926_v57 = vmul.f32 %v7827_v50, %v1925_v19 }
 0x2c9   :  { %v1913_v17 = vsel %vm1912_vm2, %v7825_v45, %v1909_v59  ;;  %v1839_v41 = vadd.f32 1e-05, %v1807_v22 }
 0x2ca   :  { %v2188_v32 = vmul.f32 %v1913_v17, %v28_v6  ;;  %v1927_v45 = vmul.f32 0.5, %v1926_v57 }
 0x2cb   :  { %7828 = vrsqrt.f32 %v1839_v41  ;;  %vm1940_vm7 = vweird.f32 %v1839_v41 }
 0x2cc   :  { %v2220_v14 = vmul.f32 %v2188_v32, %v9395_v56 }
 0x2d1   :  { %v7829_v59 = vpop.eup %7828 }
 0x2d2   :  { %v1935_v22 = vmul.f32 %v7829_v59, %v1839_v41  ;;  %vm1941_vm6 = vweird.f32 %v7829_v59  ;;  %v1439_v41 = vmul.f32 %v9443_v12, %v9443_v12 }
 0x2d3   :  { %vm1942_vm8 = vmor %vm1940_vm7, %vm1941_vm6 }
 0x2d4   :  { %v1936_v37 = vmul.f32 %v7829_v59, %v1935_v22  ;;  %v1046_v22 = vpop.f32.mrf.mxu2 }
 0x2d5   :  { %2290 = vrot.lane.b32.xlu0 %v2221_v38, %s8049_s21  ;;  %v1593_v38 = vadd.f32 %v1442_v3, %v1441_v15  ;;  %v9475_v15 = vld [vmem:[%s14288_s5 + $0x30] sm:$0xff] }
 0x2d6   :  { %v1937_v3 = vmul.f32 0.5, %v1936_v37 }
 0x2d7   :  { %v1594_v29 = vadd.f32 %v1593_v38, %v1443_v5  ;;  %v1273_v5 = vadd.f32 %v8914_v49, %v14776_v60  ;;  %v1437_v38 = vmul.f32 %v8904_v58, %v8904_v58 }
 0x2d8   :  { %v1938_v57 = vsub.f32 1.5, %v1937_v3  ;;  %v1135_v3 = vpop.f32.mrf.mxu3 }
 0x2d9   :  { %1271 = vadd.xlane.f32.xlu2 %v1270_v39  ;;  %v1595_v0 = vadd.f32 %v1594_v29, %v1444_v48  ;;  %v1928_v39 = vsub.f32 1.5, %v1927_v45  ;;  %v1274_v37 = vadd.f32 %v1273_v5, %v9451_v1  ;;  %v1438_v48 = vmul.f32 %v14772_v43, %v14772_v43  ;;  %v1197_v29 = vpop.xlane.xlu2 %1196  ;;  %v957_v45 = vpop.f32.mrf.mxu1  ;;  %v14781_v1 = vld [vmem:[#allocation56_spill] sm:$0xff] }
 0x2db   :  { %v1929_v63 = vmul.f32 %v7827_v50, %v1928_v39  ;;  %v1588_v19 = vadd.f32 %v1438_v48, %v1437_v38  ;;  %v9507_v48 = vmul.f32 %v9234_v2, %v1197_v29  ;;  %v1517_v38 = vpop.xlane.xlu1 %1516 }
 0x2dd   :  { %v1933_v6 = vsel %vm1932_vm5, %v7827_v50, %v1929_v63  ;;  %v31_v63 = vld [vmem:[%s14288_s5 + $0x38] sm:$0xff]  ;;  %v1275_v50 = vadd.f32 %v1274_v37, %v9458_v34 }
 0x2de   :  { %2430 = vperm.xlu1 %7742, %v2188_v32   ;;  %v2190_v56 = vmul.f32 %v1933_v6, %v9475_v15  ;;  %v1440_v32 = vmul.f32 %v9449_v9, %v9449_v9 }
 0x2e0   :  { %v2222_v17 = vmul.f32 %v2190_v56, %v9424_v40 }
 0x2e1   :  { %1596 = vadd.xlane.f32.xlu2 %v1595_v0  ;;  %v1589_v0 = vadd.f32 %v1588_v19, %v1439_v41  ;;  %v960_v19 = vpop.f32.mrf.mxu1 }
 0x2e3   :  { %v1590_v39 = vadd.f32 %v1589_v0, %v1440_v32  ;;  %v1744_v0 = vmul.f32 %v9507_v48, %v9507_v48 }
 0x2e6   :  { %2288 = vrot.lane.b32.xlu1 %v2220_v14, %s8049_s21  ;;  %v1939_v14 = vmul.f32 %v7829_v59, %v1938_v57  ;;  %v1202_v57 = vpop.xlane.xlu0 %1201 }
 0x2e7   :  { %v9502_v37 = vmul.f32 %v9234_v2, %v1202_v57 }
 0x2e8   :  { %v1943_v7 = vsel %vm1942_vm8, %v7829_v59, %v1939_v14  ;;  %v868_v59 = vpop.f32.mrf.mxu0  ;;  %v14779_v14 = vld [vmem:[#allocation55_spill] sm:$0xff] }
 0x2e9   :  { %v2191_v40 = vmul.f32 %v1943_v7, %v31_v63  ;;  %v9495_v6 = vadd.f32 %v957_v45, %v868_v59  ;;  %v1278_v5 = vadd.f32 %v14779_v14, %v8916_v36  ;;  %v1522_v7 = vpop.xlane.xlu2 %1521  ;;  %v1745_v41 = vmul.f32 %v9502_v37, %v9502_v37  ;;  %v1049_v59 = vpop.f32.mrf.mxu2 }
 0x2ea   :  { %v1713_v32 = vmul.f32 %v9234_v2, %v1522_v7  ;;  %v1712_v45 = vmul.f32 %v9234_v2, %v1517_v38  ;;  %v1283_v7 = vadd.f32 %v8926_v55, %v14781_v1 }
 0x2eb   :  { %14777 = vst [vmem:[#allocation117_spill] sm:$0xff] %v9495_v6  ;;  %v1279_v63 = vadd.f32 %v1278_v5, %v9495_v6 }
 0x2f1   :  { %v1051_v60 = vpop.f32.mrf.mxu2 }
 0x2f9   :  { %2292 = vrot.lane.b32.xlu2 %v2222_v17, %s8049_s21  ;;  %v9497_v17 = vadd.f32 %v1135_v3, %v1046_v22  ;;  %v1777_v22 = vsub.f32 %v1713_v32, %v1745_v41  ;;  %v1776_v3 = vsub.f32 %v1712_v45, %v1744_v0  ;;  %v1454_v32 = vmul.f32 %v8930_v23, %v8930_v23  ;;  %v14785_v0 = vld [vmem:[#allocation58_spill] sm:$0xff] }
 0x2fa   :  { %v1453_v45 = vmul.f32 %v14785_v0, %v14785_v0 }
 0x2fb   :  { %14778 = vst [vmem:[#allocation118_spill] sm:$0xff] %v9497_v17  ;;  %v1809_v29 = vmax.f32 %v1777_v22, 0.0  ;;  %v1808_v5 = vmax.f32 %v1776_v3, 0.0 }
 0x2fd   :  { %v1840_v41 = vadd.f32 1e-05, %v1808_v5 }
 0x2ff   :  { %1276 = vadd.xlane.f32.xlu0 %v1275_v50  ;;  %v1280_v50 = vadd.f32 %v1279_v63, %v9497_v17  ;;  %v962_v63 = vpop.f32.mrf.mxu1  ;;  %vm1950_vm13 = vweird.f32 %v1840_v41 }
 0x301   :  { %2445 = vperm.xlu2 %7741, %v2191_v40  }
 0x310   :  { %1591 = vadd.xlane.f32.xlu1 %v1590_v39  ;;  %v1138_v39 = vpop.f32.mrf.mxu3 }
 0x311   :  { %v9519_v49 = vadd.f32 %v1138_v39, %v1049_v59  ;;  %v1608_v39 = vadd.f32 %v1454_v32, %v1453_v45  ;;  %v1447_v32 = vmul.f32 %v9495_v6, %v9495_v6  ;;  %v33_v6 = vld [vmem:[%s14288_s5 + $0x48] sm:$0xff] }
 0x313   :  { %2440 = vperm.xlu0 %7740, %v2190_v56   ;;  %v871_v56 = vpop.f32.mrf.mxu0  ;;  %14782 = vst [vmem:[#allocation120_spill] sm:$0xff] %v9519_v49 }
 0x314   :  { %v9515_v57 = vadd.f32 %v960_v19, %v871_v56 }
 0x316   :  { %14780 = vst [vmem:[#allocation119_spill] sm:$0xff] %v9515_v57  ;;  %v1284_v38 = vadd.f32 %v1283_v7, %v9515_v57 }
 0x318   :  { %1281 = vadd.xlane.f32.xlu1 %v1280_v50  ;;  %v1841_v50 = vadd.f32 1e-05, %v1809_v29  ;;  %v1140_v9 = vpop.f32.mrf.mxu3  ;;  %v1285_v56 = vadd.f32 %v1284_v38, %v9519_v49  ;;  %v2223_v29 = vmul.f32 %v2191_v40, %v9433_v61  ;;  %v1445_v38 = vmul.f32 %v8916_v36, %v8916_v36 }
 0x319   :  { %v9526_v19 = vadd.f32 %v1140_v9, %v1051_v60  ;;  %v1448_v61 = vmul.f32 %v9497_v17, %v9497_v17 }
 0x31a   :  { %7830 = vrsqrt.f32 %v1841_v50  ;;  %vm1960_vm10 = vweird.f32 %v1841_v50 }
 0x31b   :  { %v873_v34 = vpop.f32.mrf.mxu0  ;;  %14784 = vst [vmem:[#allocation122_spill] sm:$0xff] %v9526_v19  ;;  %7832 = vrsqrt.f32 %v1840_v41 }
 0x31c   :  { %v9521_v12 = vadd.f32 %v962_v63, %v873_v34  ;;  %v1456_v34 = vmul.f32 %v9526_v19, %v9526_v19  ;;  %v1446_v63 = vmul.f32 %v14779_v14, %v14779_v14 }
 0x31e   :  { %14783 = vst [vmem:[#allocation121_spill] sm:$0xff] %v9521_v12  ;;  %v1455_v59 = vmul.f32 %v9521_v12, %v9521_v12  ;;  %v1598_v40 = vadd.f32 %v1446_v63, %v1445_v38 }
 0x320   :  { %v7831_v22 = vpop.eup %7830  ;;  %v1609_v3 = vadd.f32 %v1608_v39, %v1455_v59 }
 0x321   :  { %v7833_v60 = vpop.eup %7832  ;;  %v1955_v5 = vmul.f32 %v7831_v22, %v1841_v50  ;;  %vm1961_vm9 = vweird.f32 %v7831_v22 }
 0x322   :  { %v1610_v9 = vadd.f32 %v1609_v3, %v1456_v34  ;;  %v1945_v7 = vmul.f32 %v7833_v60, %v1840_v41  ;;  %v1599_v34 = vadd.f32 %v1598_v40, %v1447_v32  ;;  %vm1962_vm11 = vmor %vm1960_vm10, %vm1961_vm9  ;;  %vm1951_vm12 = vweird.f32 %v7833_v60 }
 0x323   :  { %vm1952_vm14 = vmor %vm1950_vm13, %vm1951_vm12  ;;  %v1452_v41 = vmul.f32 %v9519_v49, %v9519_v49 }
 0x324   :  { %v1946_v45 = vmul.f32 %v7833_v60, %v1945_v7  ;;  %v1600_v39 = vadd.f32 %v1599_v34, %v1448_v61  ;;  %v9551_v7 = vld [vmem:[%s14288_s5 + $0x40] sm:$0xff]  ;;  %v1450_v61 = vmul.f32 %v8926_v55, %v8926_v55 }
 0x326   :  { %v1947_v3 = vmul.f32 0.5, %v1946_v45 }
 0x32a   :  { %1286 = vadd.xlane.f32.xlu2 %v1285_v56  ;;  %v1956_v56 = vmul.f32 %v7831_v22, %v1955_v5 }
 0x32c   :  { %v1957_v59 = vmul.f32 0.5, %v1956_v56 }
 0x331   :  { %2294 = vrot.lane.b32.xlu1 %v2223_v29, %s8049_s21  ;;  %v1958_v29 = vsub.f32 1.5, %v1957_v59 }
 0x332   :  { %1611 = vadd.xlane.f32.xlu2 %v1610_v9  ;;  %v1948_v9 = vsub.f32 1.5, %v1947_v3 }
 0x333   :  { %v1959_v14 = vmul.f32 %v7831_v22, %v1958_v29  ;;  %v1527_v29 = vpop.xlane.xlu0 %1526 }
 0x334   :  { %v1949_v5 = vmul.f32 %v7833_v60, %v1948_v9 }
 0x335   :  { %v1963_v17 = vsel %vm1962_vm11, %v7831_v22, %v1959_v14  ;;  %v1212_v14 = vpop.xlane.xlu2 %1211  ;;  %v1207_v22 = vpop.xlane.xlu1 %1206 }
 0x336   :  { %v2193_v63 = vmul.f32 %v1963_v17, %v33_v6  ;;  %v1953_v38 = vsel %vm1952_vm14, %v7833_v60, %v1949_v5  ;;  %v1449_v6 = vmul.f32 %v14781_v1, %v14781_v1  ;;  %v1451_v17 = vmul.f32 %v9515_v57, %v9515_v57 }
 0x337   :  { %v2192_v50 = vmul.f32 %v1953_v38, %v9551_v7  ;;  %v9569_v45 = vmul.f32 %v9234_v2, %v1212_v14  ;;  %v9572_v34 = vmul.f32 %v9234_v2, %v1207_v22  ;;  %v1143_v14 = vpop.f32.mrf.mxu3 }
 0x338   :  { %v2225_v32 = vmul.f32 %v2193_v63, %v9502_v37 }
 0x339   :  { %v2224_v56 = vmul.f32 %v2192_v50, %v9507_v48  ;;  %v1603_v48 = vadd.f32 %v1450_v61, %v1449_v6  ;;  %v1746_v5 = vmul.f32 %v9572_v34, %v9572_v34  ;;  %v1054_v61 = vpop.f32.mrf.mxu2 }
 0x33b   :  { %v1604_v37 = vadd.f32 %v1603_v48, %v1451_v17 }
 0x33d   :  { %1601 = vadd.xlane.f32.xlu0 %v1600_v39  ;;  %v1605_v60 = vadd.f32 %v1604_v37, %v1452_v41  ;;  %v9566_v40 = vpop.xlane.xlu2 %1536  ;;  %v1532_v59 = vpop.xlane.xlu1 %1531  ;;  %v1747_v39 = vmul.f32 %v9569_v45, %v9569_v45 }
 0x33e   :  { %v1715_v3 = vmul.f32 %v9234_v2, %v1532_v59 }
 0x33f   :  { %v1145_v55 = vpop.f32.mrf.mxu3 }
 0x340   :  { %v1779_v38 = vsub.f32 %v1715_v3, %v1747_v39  ;;  %v1217_v3 = vpop.xlane.xlu0 %1216 }
 0x341   :  { %v1056_v57 = vpop.f32.mrf.mxu2 }
 0x342   :  { %v1811_v17 = vmax.f32 %v1779_v38, 0.0  ;;  %v14788_v38 = vld [vmem:[#allocation62_spill] sm:$0xff] }
 0x344   :  { %v1843_v22 = vadd.f32 1e-05, %v1811_v17 }
 0x345   :  { %v9577_v9 = vpop.xlane.xlu2 %1226  ;;  %v9584_v37 = vpop.xlane.xlu1 %1221 }
 0x346   :  { %7834 = vrsqrt.f32 %v1843_v22  ;;  %vm1980_vm0 = vweird.f32 %v1843_v22 }
 0x34a   :  { %2455 = vperm.xlu2 %7741, %v2193_v63   ;;  %v1714_v63 = vmul.f32 %v9234_v2, %v1527_v29 }
 0x34c   :  { %v1778_v6 = vsub.f32 %v1714_v63, %v1746_v5  ;;  %v9590_v5 = vadd.f32 %v1145_v55, %v1056_v57  ;;  %v1288_v63 = vadd.f32 %v8930_v23, %v14785_v0  ;;  %v9604_v55 = vadd.f32 %v1143_v14, %v1054_v61 }
 0x34d   :  { %v9582_v41 = vpop.xlane.xlu2 %1551  ;;  %v9596_v1 = vpop.xlane.xlu1 %1546 }
 0x34e   :  { %v1810_v48 = vmax.f32 %v1778_v6, 0.0  ;;  %14787 = vst [vmem:[#allocation124_spill] sm:$0xff] %v9590_v5  ;;  %v14789_v6 = vld [vmem:[#allocation63_spill] sm:$0xff]  ;;  %v1289_v43 = vadd.f32 %v1288_v63, %v9521_v12  ;;  %v1542_v63 = vpop.xlane.xlu0 %1541  ;;  %v1460_v61 = vmul.f32 %v9604_v55, %v9604_v55 }
 0x34f   :  { %v1298_v17 = vadd.f32 %v14789_v6, %v14788_v38  ;;  %14792 = vst [vmem:[#allocation126_spill] sm:$0xff] %v9604_v55 }
 0x350   :  { %v1842_v49 = vadd.f32 1e-05, %v1810_v48  ;;  %v7835_v48 = vpop.eup %7834  ;;  %v1290_v57 = vadd.f32 %v1289_v43, %v9526_v19 }
 0x351   :  { %2296 = vrot.lane.b32.xlu0 %v2224_v56, %s8049_s21  ;;  %v965_v56 = vpop.f32.mrf.mxu1  ;;  %v1975_v0 = vmul.f32 %v7835_v48, %v1843_v22  ;;  %vm1981_vm15 = vweird.f32 %v7835_v48 }
 0x352   :  { %2298 = vrot.lane.b32.xlu2 %v2225_v32, %s8049_s21  ;;  %v876_v32 = vpop.f32.mrf.mxu0  ;;  %7836 = vrsqrt.f32 %v1842_v49  ;;  %vm1982_vm1 = vmor %vm1980_vm0, %vm1981_vm15  ;;  %vm1970_vm3 = vweird.f32 %v1842_v49 }
 0x353   :  { %v9598_v36 = vadd.f32 %v965_v56, %v876_v32  ;;  %v1457_v56 = vmul.f32 %v14793_v30, %v14793_v30 }
 0x355   :  { %v9586_v29 = vpop.xlane.xlu2 %1241  ;;  %14790 = vst [vmem:[#allocation125_spill] sm:$0xff] %v9598_v36  ;;  %v1459_v32 = vmul.f32 %v9598_v36, %v9598_v36 }
 0x356   :  { %v1232_v16 = vpop.xlane.xlu0 %1231 }
 0x358   :  { %v7837_v44 = vpop.eup %7836 }
 0x359   :  { %v1965_v43 = vmul.f32 %v7837_v44, %v1842_v49  ;;  %vm1971_vm2 = vweird.f32 %v7837_v44 }
 0x35a   :  { %v878_v59 = vpop.f32.mrf.mxu0  ;;  %vm1972_vm4 = vmor %vm1970_vm3, %vm1971_vm2 }
 0x35b   :  { %1606 = vadd.xlane.f32.xlu1 %v1605_v60  ;;  %v967_v60 = vpop.f32.mrf.mxu1  ;;  %v1966_v33 = vmul.f32 %v7837_v44, %v1965_v43 }
 0x35c   :  { %v9588_v39 = vadd.f32 %v967_v60, %v878_v59  ;;  %v14791_v59 = vld [vmem:[#allocation61_spill] sm:$0xff] }
 0x35d   :  { %v9608_v58 = vpop.xlane.xlu2 %1566  ;;  %v1967_v47 = vmul.f32 0.5, %v1966_v33 }
 0x35e   :  { %14786 = vst [vmem:[#allocation123_spill] sm:$0xff] %v9588_v39  ;;  %v1299_v60 = vadd.f32 %v1298_v17, %v9588_v39  ;;  %v1976_v17 = vmul.f32 %v7835_v48, %v1975_v0 }
 0x35f   :  { %v1968_v11 = vsub.f32 1.5, %v1967_v47  ;;  %v9634_v47 = vld [vmem:[%s14288_s5 + $0x50] sm:$0xff] }
 0x360   :  { %v1300_v23 = vadd.f32 %v1299_v60, %v9590_v5  ;;  %v9616_v60 = vpop.xlane.xlu1 %1236  ;;  %v1977_v18 = vmul.f32 0.5, %v1976_v17 }
 0x361   :  { %v1969_v33 = vmul.f32 %v7837_v44, %v1968_v11  ;;  %v9646_v11 = vmul.f32 %v9234_v2, %v1217_v3 }
 0x363   :  { %v1973_v22 = vsel %vm1972_vm4, %v7837_v44, %v1969_v33  ;;  %v1748_v17 = vmul.f32 %v9646_v11, %v9646_v11 }
 0x365   :  { %v9618_v10 = vpop.permute.xlu2 %2415 }
 0x366   :  { %14794 = vst [vmem:[#allocation127_spill] sm:$0xff] %v9618_v10 }
 0x374   :  { %2450 = vperm.xlu1 %7742, %v2192_v50   ;;  %v1458_v50 = vmul.f32 %v14791_v59, %v14791_v59 }
 0x376   :  { %v1613_v14 = vadd.f32 %v1458_v50, %v1457_v56  ;;  %v9622_v50 = vpop.xlane.xlu0 %1556 }
 0x378   :  { %v1614_v19 = vadd.f32 %v1613_v14, %v1459_v32 }
 0x37a   :  { %v1615_v12 = vadd.f32 %v1614_v19, %v1460_v61  ;;  %v9626_v19 = vpop.permute.xlu2 %2282  ;;  %v2194_v61 = vmul.f32 %v1973_v22, %v9634_v47 }
 0x37b   :  { %1291 = vadd.xlane.f32.xlu0 %v1290_v57  ;;  %1301 = vadd.xlane.f32.xlu2 %v1300_v23  ;;  %v9620_v57 = vpop.xlane.xlu1 %1561  ;;  %v1978_v23 = vsub.f32 1.5, %v1977_v18  ;;  %14796 = vst [vmem:[#allocation129_spill] sm:$0xff] %v9626_v19 }
 0x37d   :  { %v1979_v35 = vmul.f32 %v7835_v48, %v1978_v23  ;;  %v1716_v23 = vmul.f32 %v9234_v2, %v9566_v40 }
 0x37e   :  { %v9636_v32 = vpop.xlane.xlu0 %1246 }
 0x37f   :  { %v1983_v56 = vsel %vm1982_vm1, %v7835_v48, %v1979_v35  ;;  %v1293_v35 = vadd.f32 %v14791_v59, %v14793_v30  ;;  %v1780_v33 = vsub.f32 %v1716_v23, %v1748_v17  ;;  %v970_v23 = vpop.f32.mrf.mxu1  ;;  %v1148_v59 = vpop.f32.mrf.mxu3 }
 0x381   :  { %v1294_v49 = vadd.f32 %v1293_v35, %v9598_v36  ;;  %v1812_v35 = vmax.f32 %v1780_v33, 0.0  ;;  %v881_v33 = vpop.f32.mrf.mxu0  ;;  %v1059_v36 = vpop.f32.mrf.mxu2 }
 0x382   :  { %v9641_v43 = vpop.xlane.xlu2 %1256  ;;  %v9687_v30 = vadd.f32 %v970_v23, %v881_v33  ;;  %v1718_v33 = vmul.f32 %v9234_v2, %v9596_v1 }
 0x383   :  { %1616 = vadd.xlane.f32.xlu0 %v1615_v12  ;;  %v9624_v0 = vpop.permute.xlu1 %2280  ;;  %v35_v12 = vld [vmem:[%s14288_s5 + $0x58] sm:$0xff]  ;;  %v1295_v44 = vadd.f32 %v1294_v49, %v9604_v55  ;;  %v9666_v49 = vmul.f32 %v9234_v2, %v9584_v37  ;;  %v9670_v40 = vadd.f32 1e-05, %v1812_v35  ;;  %v9681_v37 = vmul.f32 %v9234_v2, %v1232_v16 }
 0x384   :  { %14795 = vst [vmem:[#allocation128_spill] sm:$0xff] %v9624_v0  ;;  %v2195_v18 = vmul.f32 %v1983_v56, %v35_v12  ;;  %v9685_v35 = vmul.f32 %v9234_v2, %v9577_v9 }
 0x385   :  { %7838 = vrsqrt.f32 %v9670_v40  ;;  %14801 = vst [vmem:[#allocation134_spill] sm:$0xff] %v9687_v30  ;;  %v1751_v16 = vmul.f32 %v9681_v37, %v9681_v37  ;;  %vm1990_vm6 = vweird.f32 %v9670_v40 }
 0x386   :  { %v9649_v48 = vpop.permute.xlu0 %2410  ;;  %v2227_v12 = vmul.f32 %v2195_v18, %v9569_v45  ;;  %v1749_v45 = vmul.f32 %v9666_v49, %v9666_v49  ;;  %v1750_v23 = vmul.f32 %v9685_v35, %v9685_v35 }
 0x387   :  { %14797 = vst [vmem:[#allocation130_spill] sm:$0xff] %v9649_v48 }
 0x388   :  { %v1782_v27 = vsub.f32 %v1718_v33, %v1750_v23  ;;  %v1721_v23 = vmul.f32 %v9234_v2, %v9620_v57  ;;  %v9753_v57 = vmul.f32 %v9234_v2, %v9641_v43 }
 0x38a   :  { %v9660_v3 = vpop.xlane.xlu2 %1581 }
 0x38b   :  { %v9639_v14 = vpop.xlane.xlu1 %1251  ;;  %v9699_v9 = vpop.eup %7838  ;;  %v1725_v42 = vmul.f32 %v9234_v2, %v9660_v3 }
 0x38c   :  { %v1985_v19 = vmul.f32 %v9699_v9, %v9670_v40  ;;  %vm1991_vm5 = vweird.f32 %v9699_v9 }
 0x38d   :  { %vm1992_vm7 = vmor %vm1990_vm6, %vm1991_vm5 }
 0x38e   :  { %v9662_v22 = vpop.xlane.xlu0 %1571 }
 0x393   :  { %2465 = vperm.xlu2 %7741, %v2195_v18   ;;  %v9658_v56 = vpop.xlane.xlu1 %1576  ;;  %v1717_v18 = vmul.f32 %v9234_v2, %v1542_v63 }
 0x395   :  { %v1781_v17 = vsub.f32 %v1717_v18, %v1749_v45  ;;  %v9693_v45 = vadd.f32 %v1148_v59, %v1059_v36  ;;  %v1719_v18 = vmul.f32 %v9234_v2, %v9582_v41  ;;  %v1467_v36 = vmul.f32 %v9687_v30, %v9687_v30 }
 0x396   :  { %v2226_v41 = vmul.f32 %v2194_v61, %v9572_v34  ;;  %v1986_v34 = vmul.f32 %v9699_v9, %v1985_v19  ;;  %v1722_v19 = vmul.f32 %v9234_v2, %v9608_v58 }
 0x397   :  { %2460 = vperm.xlu0 %7740, %v2194_v61   ;;  %14803 = vst [vmem:[#allocation135_spill] sm:$0xff] %v9693_v45  ;;  %v1783_v51 = vsub.f32 %v1719_v18, %v1751_v16  ;;  %v1468_v1 = vmul.f32 %v9693_v45, %v9693_v45  ;;  %v9731_v16 = vmul.f32 %v9234_v2, %v9636_v32 }
 0x399   :  { %v1815_v61 = vmax.f32 %v1783_v51, 0.0  ;;  %v1754_v51 = vmul.f32 %v9731_v16, %v9731_v16 }
 0x39b   :  { %v9668_v55 = vpop.permute.xlu1 %2420  ;;  %v9739_v33 = vadd.f32 1e-05, %v1815_v61  ;;  %v1786_v61 = vsub.f32 %v1722_v19, %v1754_v51  ;;  %v14808_v19 = vld [vmem:[#allocation67_spill] sm:$0xff] }
 0x39c   :  { %14798 = vst [vmem:[#allocation131_spill] sm:$0xff] %v9668_v55  ;;  %v1813_v55 = vmax.f32 %v1781_v17, 0.0  ;;  %v14804_v17 = vld [vmem:[#allocation64_spill] sm:$0xff]  ;;  %v1470_v20 = vmul.f32 %v14808_v19, %v14808_v19 }
 0x39d   :  { %v1465_v10 = vmul.f32 %v14804_v17, %v14804_v17  ;;  %vm2020_vm13 = vweird.f32 %v9739_v33 }
 0x39e   :  { %1296 = vadd.xlane.f32.xlu1 %v1295_v44  ;;  %v9675_v44 = vpop.permute.xlu2 %2425 }
 0x39f   :  { %2302 = vrot.lane.b32.xlu0 %v2227_v12, %s8049_s21  ;;  %14799 = vst [vmem:[#allocation132_spill] sm:$0xff] %v9675_v44  ;;  %v9677_v12 = vpop.permute.xlu0 %2284  ;;  %v14802_v44 = vld [vmem:[#allocation65_spill] sm:$0xff] }
 0x3a0   :  { %14800 = vst [vmem:[#allocation133_spill] sm:$0xff] %v9677_v12  ;;  %v1466_v48 = vmul.f32 %v14802_v44, %v14802_v44  ;;  %v9713_v12 = vadd.f32 1e-05, %v1813_v55  ;;  %v9726_v55 = vmul.f32 %v9234_v2, %v9586_v29  ;;  %v1987_v29 = vmul.f32 0.5, %v1986_v34  ;;  %v972_v34 = vpop.f32.mrf.mxu1 }
 0x3a1   :  { %v1303_v58 = vadd.f32 %v14802_v44, %v14804_v17 }
 0x3a2   :  { %v1623_v25 = vadd.f32 %v1466_v48, %v1465_v10  ;;  %7840 = vrsqrt.f32 %v9713_v12  ;;  %v1814_v48 = vmax.f32 %v1782_v27, 0.0  ;;  %vm2000_vm9 = vweird.f32 %v9713_v12 }
 0x3a3   :  { %v9689_v63 = vpop.xlane.xlu1 %1266  ;;  %7842 = vrsqrt.f32 %v9739_v33  ;;  %v1304_v51 = vadd.f32 %v1303_v58, %v9687_v30 }
 0x3a4   :  { %v1624_v54 = vadd.f32 %v1623_v25, %v1467_v36  ;;  %v1753_v25 = vmul.f32 %v9726_v55, %v9726_v55  ;;  %v9749_v32 = vadd.f32 1e-05, %v1814_v48  ;;  %v883_v36 = vpop.f32.mrf.mxu0 }
 0x3a5   :  { %v1305_v58 = vadd.f32 %v1304_v51, %v9693_v45 }
 0x3a6   :  { %v9709_v59 = vpop.permute.xlu2 %2286  ;;  %v1625_v10 = vadd.f32 %v1624_v54, %v1468_v1  ;;  %v1988_v1 = vsub.f32 1.5, %v1987_v29  ;;  %7844 = vrsqrt.f32 %v9749_v32  ;;  %v1756_v29 = vmul.f32 %v9753_v57, %v9753_v57 }
 0x3a7   :  { %14805 = vst [vmem:[#allocation136_spill] sm:$0xff] %v9709_v59  ;;  %v9711_v0 = vpop.xlane.xlu0 %1261  ;;  %v1818_v59 = vmax.f32 %v1786_v61, 0.0  ;;  %v14810_v61 = vld [vmem:[#allocation66_spill] sm:$0xff]  ;;  %vm2010_vm14 = vweird.f32 %v9749_v32 }
 0x3a8   :  { %v9747_v27 = vpop.eup %7840  ;;  %v1989_v4 = vmul.f32 %v9699_v9, %v1988_v1  ;;  %v1469_v52 = vmul.f32 %v14810_v61, %v14810_v61 }
 0x3a9   :  { %v1995_v48 = vmul.f32 %v9747_v27, %v9713_v12  ;;  %v9782_v30 = vpop.eup %7842  ;;  %vm2001_vm8 = vweird.f32 %v9747_v27 }
 0x3aa   :  { %v1628_v51 = vadd.f32 %v1470_v20, %v1469_v52  ;;  %v2015_v40 = vmul.f32 %v9782_v30, %v9739_v33  ;;  %vm2002_vm10 = vmor %vm2000_vm9, %vm2001_vm8  ;;  %vm2021_vm11 = vweird.f32 %v9782_v30 }
 0x3ab   :  { %v9721_v46 = vpop.permute.xlu1 %2430  ;;  %vm9894_vm15 = vmor %vm2020_vm13, %vm2021_vm11 }
 0x3ac   :  { %14806 = vst [vmem:[#allocation137_spill] sm:$0xff] %v9721_v46  ;;  %v9763_v46 = vadd.f32 %v972_v34, %v883_v36  ;;  %v1996_v36 = vmul.f32 %v9747_v27, %v1995_v48  ;;  %v1724_v34 = vmul.f32 %v9234_v2, %v9658_v56  ;;  %v9786_v8 = vpop.eup %7844  ;;  %v9797_v56 = vmul.f32 %v9234_v2, %v9711_v0 }
 0x3ad   :  { %v1993_v0 = vsel %vm1992_vm7, %v9699_v9, %v1989_v4  ;;  %v2005_v20 = vmul.f32 %v9786_v8, %v9749_v32  ;;  %v2016_v13 = vmul.f32 %v9782_v30, %v2015_v40  ;;  %vm2011_vm12 = vweird.f32 %v9786_v8 }
 0x3ae   :  { %v9733_v18 = vpop.xlane.xlu2 %1271  ;;  %14807 = vst [vmem:[#allocation138_spill] sm:$0xff] %v9763_v46  ;;  %v1788_v21 = vsub.f32 %v1724_v34, %v1756_v29  ;;  %v1471_v48 = vmul.f32 %v9763_v46, %v9763_v46  ;;  %v1997_v45 = vmul.f32 0.5, %v1996_v36  ;;  %v1757_v36 = vmul.f32 %v9797_v56, %v9797_v56  ;;  %vm2012_vm0 = vmor %vm2010_vm14, %vm2011_vm12 }
 0x3af   :  { %v9745_v54 = vpop.xlane.xlu0 %1586  ;;  %v2006_v9 = vmul.f32 %v9786_v8, %v2005_v20 }
 0x3b0   :  { %v1820_v52 = vmax.f32 %v1788_v21, 0.0  ;;  %v1629_v29 = vadd.f32 %v1628_v51, %v1471_v48  ;;  %v1998_v4 = vsub.f32 1.5, %v1997_v45  ;;  %v9830_v51 = vmul.f32 %v9234_v2, %v9733_v18 }
 0x3b1   :  { %v2017_v45 = vmul.f32 0.5, %v2016_v13 }
 0x3b2   :  { %v9826_v48 = vadd.f32 1e-05, %v1820_v52  ;;  %v1999_v3 = vmul.f32 %v9747_v27, %v1998_v4  ;;  %v1759_v13 = vmul.f32 %v9830_v51, %v9830_v51 }
 0x3b4   :  { %v2003_v12 = vsel %vm2002_vm10, %v9747_v27, %v1999_v3  ;;  %vm2070_vm8 = vweird.f32 %v9826_v48 }
 0x3b6   :  { %v9772_v17 = vpop.xlane.xlu2 %1596 }
 0x3b7   :  { %2300 = vrot.lane.b32.xlu1 %v2226_v41, %s8049_s21  ;;  %v1785_v41 = vsub.f32 %v1721_v23, %v1753_v25  ;;  %v1061_v25 = vpop.f32.mrf.mxu2  ;;  %v1150_v23 = vpop.f32.mrf.mxu3 }
 0x3b8   :  { %v9770_v44 = vpop.permute.xlu0 %2290 }
 0x3b9   :  { %v1817_v43 = vmax.f32 %v1785_v41, 0.0  ;;  %v9777_v41 = vadd.f32 %v1150_v23, %v1061_v25  ;;  %v9793_v25 = vadd.f32 1e-05, %v1818_v59  ;;  %v9808_v59 = vld [vmem:[%s14288_s5 + $0x60] sm:$0xff] }
 0x3bb   :  { %14809 = vst [vmem:[#allocation139_spill] sm:$0xff] %v9777_v41  ;;  %v9789_v1 = vadd.f32 1e-05, %v1817_v43  ;;  %v1472_v43 = vmul.f32 %v9777_v41, %v9777_v41  ;;  %vm2050_vm4 = vweird.f32 %v9793_v25 }
 0x3bc   :  { %1626 = vadd.xlane.f32.xlu2 %v1625_v10  ;;  %v9756_v10 = vpop.permute.xlu1 %2288 }
 0x3bd   :  { %7846 = vrsqrt.f32 %v9789_v1  ;;  %v1630_v53 = vadd.f32 %v1629_v29, %v1472_v43  ;;  %v2007_v29 = vmul.f32 0.5, %v2006_v9  ;;  %v9859_v9 = vld [vmem:[%s14288_s5 + $0x68] sm:$0xff]  ;;  %vm2040_vm3 = vweird.f32 %v9789_v1 }
 0x3be   :  { %7848 = vrsqrt.f32 %v9793_v25  ;;  %v9824_v21 = vpop.permute.xlu2 %2292  ;;  %v9875_v27 = vmul.f32 %v2003_v12, %v9859_v9 }
 0x3bf   :  { %7850 = vrsqrt.f32 %v9826_v48 }
 0x3c0   :  { %v1277_v34 = vpop.xlane.xlu0 %1276 }
 0x3c3   :  { %v9834_v43 = vpop.eup %7846 }
 0x3c4   :  { %v1592_v23 = vpop.xlane.xlu1 %1591  ;;  %v9839_v52 = vpop.eup %7848  ;;  %vm2041_vm1 = vweird.f32 %v9834_v43 }
 0x3c5   :  { %v1727_v20 = vmul.f32 %v9234_v2, %v1592_v23  ;;  %vm2051_vm2 = vweird.f32 %v9839_v52  ;;  %vm2042_vm5 = vmor %vm2040_vm3, %vm2041_vm1 }
 0x3c6   :  { %vm9956_vm6 = vmor %vm2050_vm4, %vm2051_vm2 }
 0x3c7   :  { %v1791_v4 = vsub.f32 %v1727_v20, %v1759_v13  ;;  %v9869_v20 = vpop.permute.xlu2 %2445  ;;  %v9872_v13 = vmul.f32 %v9234_v2, %v1277_v34 }
 0x3c8   :  { %v9852_v23 = vpop.permute.xlu0 %2440  ;;  %14812 = vst [vmem:[#allocation141_spill] sm:$0xff] %v9869_v20 }
 0x3c9   :  { %1306 = vadd.xlane.f32.xlu0 %v1305_v58  ;;  %v9818_v58 = vmul.f32 %v1993_v0, %v9808_v59  ;;  %v1789_v0 = vsub.f32 %v1725_v42, %v1757_v36  ;;  %v1461_v42 = vmul.f32 %v14788_v38, %v14788_v38  ;;  %14811 = vst [vmem:[#allocation140_spill] sm:$0xff] %v9852_v23 }
 0x3ca   :  { %v2045_v36 = vmul.f32 %v9839_v52, %v9793_v25  ;;  %v1463_v38 = vmul.f32 %v9588_v39, %v9588_v39 }
 0x3cb   :  { %v2228_v40 = vmul.f32 %v9818_v58, %v9646_v11  ;;  %v2035_v11 = vmul.f32 %v9834_v43, %v9789_v1  ;;  %v1821_v18 = vmax.f32 %v1789_v0, 0.0  ;;  %v1464_v0 = vmul.f32 %v9590_v5, %v9590_v5  ;;  %v41_v1 = vld [vmem:[%s14288_s5 + $0x88] sm:$0xff] }
 0x3cc   :  { %v1282_v31 = vpop.xlane.xlu1 %1281  ;;  %v2046_v3 = vmul.f32 %v9839_v52, %v2045_v36  ;;  %v1760_v36 = vmul.f32 %v9872_v13, %v9872_v13 }
 0x3cd   :  { %v2036_v26 = vmul.f32 %v9834_v43, %v2035_v11  ;;  %v9867_v62 = vadd.f32 1e-05, %v1821_v18 }
 0x3cf   :  { %v2037_v11 = vmul.f32 0.5, %v2036_v26  ;;  %7852 = vrsqrt.f32 %v9867_v62  ;;  %v9903_v26 = vld [vmem:[%s14288_s5 + $0x78] sm:$0xff]  ;;  %vm2080_vm11 = vweird.f32 %v9867_v62 }
 0x3d1   :  { %1631 = vadd.xlane.f32.xlu0 %v1630_v53  ;;  %v1462_v53 = vmul.f32 %v14789_v6, %v14789_v6  ;;  %v2008_v6 = vsub.f32 1.5, %v2007_v29  ;;  %v1823_v29 = vmax.f32 %v1791_v4, 0.0  ;;  %v1602_v4 = vpop.xlane.xlu0 %1601 }
 0x3d3   :  { %v1618_v23 = vadd.f32 %v1462_v53, %v1461_v42  ;;  %v2009_v42 = vmul.f32 %v9786_v8, %v2008_v6  ;;  %v2047_v6 = vmul.f32 0.5, %v2046_v3  ;;  %v9919_v3 = vmul.f32 %v9234_v2, %v1282_v31 }
 0x3d4   :  { %2304 = vrot.lane.b32.xlu2 %v2228_v40, %s8049_s21  ;;  %v2018_v40 = vsub.f32 1.5, %v2017_v45  ;;  %v9877_v45 = vpop.eup %7850  ;;  %v9882_v53 = vpop.permute.xlu1 %2294 }
 0x3d5   :  { %v1619_v34 = vadd.f32 %v1618_v23, %v1463_v38  ;;  %v2065_v18 = vmul.f32 %v9877_v45, %v9826_v48  ;;  %v9898_v38 = vadd.f32 1e-05, %v1823_v29  ;;  %v1728_v23 = vmul.f32 %v9234_v2, %v9772_v17  ;;  %v9926_v24 = vpop.eup %7852 }
 0x3d6   :  { %v2019_v5 = vmul.f32 %v9782_v30, %v2018_v40  ;;  %v9915_v40 = vld [vmem:[%s14288_s5 + $0x70] sm:$0xff]  ;;  %v2038_v29 = vsub.f32 1.5, %v2037_v11  ;;  %v2048_v39 = vsub.f32 1.5, %v2047_v6  ;;  %v1729_v17 = vmul.f32 %v9234_v2, %v1602_v4 }
 0x3d7   :  { %v1620_v33 = vadd.f32 %v1619_v34, %v1464_v0  ;;  %v2013_v0 = vsel %vm2012_vm0, %v9786_v8, %v2009_v42  ;;  %v1287_v34 = vpop.xlane.xlu2 %1286  ;;  %7854 = vrsqrt.f32 %v9898_v38  ;;  %v1761_v31 = vmul.f32 %v9919_v3, %v9919_v3 }
 0x3d8   :  { %v2023_v32 = vsel %vm9894_vm15, %v9782_v30, %v2019_v5  ;;  %v2066_v30 = vmul.f32 %v9877_v45, %v2065_v18  ;;  %v1792_v5 = vsub.f32 %v1728_v23, %v1760_v36  ;;  %v2198_v20 = vmul.f32 %v2013_v0, %v9915_v40 }
 0x3d9   :  { %v2199_v12 = vmul.f32 %v2023_v32, %v9903_v26  ;;  %v9931_v42 = vmul.f32 %v9234_v2, %v1287_v34  ;;  %v9934_v36 = vpop.permute.xlu0 %2296  ;;  %v2039_v4 = vmul.f32 %v9834_v43, %v2038_v29  ;;  %v2075_v6 = vmul.f32 %v9926_v24, %v9867_v62 }
 0x3da   :  { %v2067_v11 = vmul.f32 0.5, %v2066_v30  ;;  %v1824_v18 = vmax.f32 %v1792_v5, 0.0  ;;  %v2049_v23 = vmul.f32 %v9839_v52, %v2048_v39  ;;  %v2230_v29 = vmul.f32 %v2198_v20, %v9685_v35 }
 0x3db   :  { %v1762_v30 = vmul.f32 %v9931_v42, %v9931_v42  ;;  %v2231_v5 = vmul.f32 %v2199_v12, %v9681_v37  ;;  %v2043_v37 = vsel %vm2042_vm5, %v9834_v43, %v2039_v4  ;;  %v2076_v35 = vmul.f32 %v9926_v24, %v2075_v6 }
 0x3dc   :  { %2475 = vperm.xlu2 %7741, %v9875_v27   ;;  %v1607_v8 = vpop.xlane.xlu1 %1606  ;;  %v2068_v34 = vsub.f32 1.5, %v2067_v11  ;;  %v9977_v43 = vmul.f32 %v2043_v37, %v41_v1  ;;  %v14460_v11 = vmov 1   ;;  %vm2071_vm7 = vweird.f32 %v9877_v45  ;;  %v10001_v1 = vld [vmem:[%s14288_s5 + $0xa0] sm:$0xff] }
 0x3dd   :  { %v1730_v32 = vmul.f32 %v9234_v2, %v1607_v8  ;;  %v9943_v0 = vpop.eup %7854  ;;  %v2053_v8 = vsel %vm9956_vm6, %v9839_v52, %v2049_v23  ;;  %v2077_v6 = vmul.f32 0.5, %v2076_v35  ;;  %vm2072_vm9 = vmor %vm2070_vm8, %vm2071_vm7  ;;  %vm2081_vm10 = vweird.f32 %v9926_v24 }
 0x3de   :  { %v2233_v39 = vmul.f32 %v9977_v43, %v9726_v55  ;;  %vm2082_vm12 = vmor %vm2080_vm11, %vm2081_vm10  ;;  %vm2101_vm13 = vweird.f32 %v9943_v0  ;;  %vm2100_vm14 = vweird.f32 %v9898_v38 }
 0x3df   :  { %v2078_v37 = vsub.f32 1.5, %v2077_v6  ;;  %v2382_v6 = vsub.f32 %v9475_v15, %v9824_v21  ;;  %vm2102_vm15 = vmor %vm2100_vm14, %vm2101_vm13 }
 0x3e1   :  { %1621 = vadd.xlane.f32.xlu1 %v1620_v33  ;;  %v1793_v33 = vsub.f32 %v1729_v17, %v1761_v31  ;;  %v9952_v17 = vadd.f32 1e-05, %v1824_v18  ;;  %v2095_v31 = vmul.f32 %v9943_v0, %v9898_v38  ;;  %v2069_v18 = vmul.f32 %v9877_v45, %v2068_v34 }
 0x3e3   :  { %v1825_v25 = vmax.f32 %v1793_v33, 0.0  ;;  %7856 = vrsqrt.f32 %v9952_v17  ;;  %vm2110_vm1 = vweird.f32 %v9952_v17 }
 0x3e4   :  { %2485 = vperm.xlu2 %7741, %v2199_v12   ;;  %v9968_v12 = vld [vmem:[%s14288_s5 + $0x90] sm:$0xff] }
 0x3e5   :  { %2480 = vperm.xlu0 %7740, %v2198_v20   ;;  %v1794_v20 = vsub.f32 %v1730_v32, %v1762_v30  ;;  %v9984_v52 = vmul.f32 %v2053_v8, %v9968_v12  ;;  %v9986_v33 = vadd.f32 1e-05, %v1825_v25  ;;  %v2096_v30 = vmul.f32 %v9943_v0, %v2095_v31 }
 0x3e7   :  { %v1826_v32 = vmax.f32 %v1794_v20, 0.0  ;;  %v2234_v34 = vmul.f32 %v9984_v52, %v9731_v16  ;;  %7858 = vrsqrt.f32 %v9986_v33  ;;  %v2097_v25 = vmul.f32 0.5, %v2096_v30  ;;  %v10032_v30 = vld [vmem:[%s14288_s5 + $0xa8] sm:$0xff] }
 0x3e8   :  { %v2079_v20 = vmul.f32 %v9926_v24, %v2078_v37  ;;  %vm2120_vm4 = vweird.f32 %v9986_v33 }
 0x3e9   :  { %v10004_v48 = vadd.f32 1e-05, %v1826_v32  ;;  %v10008_v35 = vpop.eup %7856 }
 0x3ea   :  { %v2105_v8 = vmul.f32 %v10008_v35, %v9952_v17  ;;  %vm2111_vm0 = vweird.f32 %v10008_v35 }
 0x3eb   :  { %7860 = vrsqrt.f32 %v10004_v48  ;;  %vm2112_vm2 = vmor %vm2110_vm1, %vm2111_vm0  ;;  %vm2130_vm7 = vweird.f32 %v10004_v48 }
 0x3ec   :  { %2310 = vrot.lane.b32.xlu2 %v2231_v5, %s8049_s21  ;;  %v2073_v5 = vsel %vm2072_vm9, %v9877_v45, %v2069_v18  ;;  %v2098_v18 = vsub.f32 1.5, %v2097_v25 }
 0x3ed   :  { %2308 = vrot.lane.b32.xlu0 %v2230_v29, %s8049_s21  ;;  %7743 = vset.pattern.permute.xlu2 %v14460_v11  ;;  %v1612_v29 = vpop.xlane.xlu2 %1611  ;;  %v10014_v16 = vmul.f32 %v2073_v5, %v10001_v1  ;;  %v2083_v5 = vsel %vm2082_vm12, %v9926_v24, %v2079_v20 }
 0x3ee   :  { %v1292_v4 = vpop.xlane.xlu0 %1291  ;;  %v1731_v55 = vmul.f32 %v9234_v2, %v1612_v29  ;;  %v2106_v29 = vmul.f32 %v10008_v35, %v2105_v8  ;;  %v2099_v15 = vmul.f32 %v9943_v0, %v2098_v18 }
 0x3ef   :  { %v9989_v23 = vmul.f32 %v9234_v2, %v1292_v4  ;;  %v10021_v4 = vpop.eup %7858  ;;  %v2236_v32 = vmul.f32 %v10014_v16, %v9753_v57  ;;  %v10044_v57 = vmul.f32 %v2083_v5, %v10032_v30  ;;  %v2384_v5 = vsub.f32 %v9551_v7, %v9934_v36 }
 0x3f0   :  { %v2115_v62 = vmul.f32 %v10021_v4, %v9986_v33  ;;  %v2107_v24 = vmul.f32 0.5, %v2106_v29  ;;  %v2103_v25 = vsel %vm2102_vm15, %v9943_v0, %v2099_v15  ;;  %v10076_v29 = vmul.f32 %v9234_v2, %v9616_v60 }
 0x3f1   :  { %v1763_v45 = vmul.f32 %v9989_v23, %v9989_v23  ;;  %vm2121_vm3 = vweird.f32 %v10021_v4 }
 0x3f2   :  { %v2108_v38 = vsub.f32 1.5, %v2107_v24  ;;  %v1752_v36 = vmul.f32 %v10076_v29, %v10076_v29  ;;  %vm2122_vm5 = vmor %vm2120_vm4, %vm2121_vm3 }
 0x3f3   :  { %v1795_v31 = vsub.f32 %v1731_v55, %v1763_v45  ;;  %v10055_v45 = vld [vmem:[%s14288_s5 + $0xb8] sm:$0xff]  ;;  %v2237_v55 = vmul.f32 %v10044_v57, %v9797_v56 }
 0x3f4   :  { %2316 = vrot.lane.b32.xlu2 %v2234_v34, %s8049_s21  ;;  %v2207_v20 = vmul.f32 %v2103_v25, %v10055_v45  ;;  %v2109_v18 = vmul.f32 %v10008_v35, %v2108_v38 }
 0x3f5   :  { %2314 = vrot.lane.b32.xlu0 %v2233_v39, %s8049_s21  ;;  %v1827_v34 = vmax.f32 %v1795_v31, 0.0  ;;  %v2116_v39 = vmul.f32 %v10021_v4, %v2115_v62  ;;  %v10084_v15 = vpop.permute.xlu2 %2455 }
 0x3f6   :  { %v2113_v62 = vsel %vm2112_vm2, %v10008_v35, %v2109_v18  ;;  %v2239_v17 = vmul.f32 %v2207_v20, %v9830_v51  ;;  %v1720_v51 = vmul.f32 %v9234_v2, %v9622_v50 }
 0x3f7   :  { %v10047_v21 = vadd.f32 1e-05, %v1827_v34  ;;  %v2117_v8 = vmul.f32 0.5, %v2116_v39  ;;  %v10081_v34 = vld [vmem:[%s14288_s5 + $0xc0] sm:$0xff] }
 0x3f8   :  { %v10093_v60 = vmul.f32 %v2113_v62, %v10081_v34 }
 0x3f9   :  { %7862 = vrsqrt.f32 %v10047_v21  ;;  %vm2140_vm10 = vweird.f32 %v10047_v21 }
 0x3fa   :  { %2470 = vperm.xlu1 %7742, %v9818_v58   ;;  %v10040_v58 = vpop.eup %7860  ;;  %v2240_v38 = vmul.f32 %v10093_v60, %v9872_v13  ;;  %v10128_v13 = vld [vmem:[%s14288_s5 + $0xd0] sm:$0xff] }
 0x3fb   :  { %v2125_v37 = vmul.f32 %v10040_v58, %v10004_v48  ;;  %vm2131_vm6 = vweird.f32 %v10040_v58 }
 0x3fc   :  { %2728 = vperm.xlu2 %7743, %v2382_v6   ;;  %v2118_v6 = vsub.f32 1.5, %v2117_v8  ;;  %v10117_v8 = vmul.f32 %v9234_v2, %v9639_v14  ;;  %vm2132_vm8 = vmor %vm2130_vm7, %vm2131_vm6 }
 0x3fd   :  { %2320 = vrot.lane.b32.xlu0 %v2236_v32, %s8049_s21  ;;  %v2126_v31 = vmul.f32 %v10040_v58, %v2125_v37  ;;  %v10070_v32 = vpop.permute.xlu1 %2450  ;;  %v10104_v37 = vld [vmem:[%s14288_s5 + $0xc8] sm:$0xff]  ;;  %v10131_v14 = vpop.permute.xlu2 %2298 }
 0x3fe   :  { %v2119_v7 = vmul.f32 %v10021_v4, %v2118_v6  ;;  %v1755_v62 = vmul.f32 %v10117_v8, %v10117_v8 }
 0x3ff   :  { %v2127_v0 = vmul.f32 0.5, %v2126_v31  ;;  %v10067_v56 = vpop.eup %7862  ;;  %v1617_v31 = vpop.xlane.xlu0 %1616 }
 0x400   :  { %v2135_v39 = vmul.f32 %v10067_v56, %v10047_v21  ;;  %v2123_v25 = vsel %vm2122_vm5, %v10021_v4, %v2119_v7  ;;  %v1732_v6 = vmul.f32 %v9234_v2, %v1617_v31  ;;  %vm2141_vm9 = vweird.f32 %v10067_v56 }
 0x401   :  { %v2128_v24 = vsub.f32 1.5, %v2127_v0  ;;  %v10120_v4 = vmul.f32 %v2123_v25, %v10104_v37  ;;  %vm2142_vm11 = vmor %vm2140_vm10, %vm2141_vm9 }
 0x402   :  { %7744 = vset.pattern.permute.xlu1 %v14460_v11  ;;  %v2136_v35 = vmul.f32 %v10067_v56, %v2135_v39 }
 0x404   :  { %2322 = vrot.lane.b32.xlu2 %v2237_v55, %s8049_s21  ;;  %v2129_v55 = vmul.f32 %v10040_v58, %v2128_v24  ;;  %v2137_v18 = vmul.f32 0.5, %v2136_v35 }
 0x405   :  { %2525 = vperm.xlu0 %7740, %v2207_v20   ;;  %v1784_v20 = vsub.f32 %v1720_v51, %v1752_v36 }
 0x406   :  { %v2133_v48 = vsel %vm2132_vm8, %v10040_v58, %v2129_v55  ;;  %v2138_v39 = vsub.f32 1.5, %v2137_v18  ;;  %v10146_v55 = vpop.xlane.xlu2 %1301 }
 0x407   :  { %v10140_v24 = vmul.f32 %v2133_v48, %v10128_v13 }
 0x408   :  { %v2139_v35 = vmul.f32 %v10067_v56, %v2138_v39 }
 0x409   :  { %v2242_v51 = vmul.f32 %v10140_v24, %v9931_v42  ;;  %v10155_v42 = vld [vmem:[%s14288_s5 + $0xd8] sm:$0xff] }
 0x40c   :  { %2738 = vperm.xlu2 %7743, %v2384_v5   ;;  %v1816_v5 = vmax.f32 %v1784_v20, 0.0 }
 0x40d   :  { %2326 = vrot.lane.b32.xlu0 %v2239_v17, %s8049_s21  ;;  %v1723_v17 = vmul.f32 %v9234_v2, %v9662_v22  ;;  %v1308_v22 = vadd.f32 %v14808_v19, %v14810_v61 }
 0x40e   :  { %v1848_v36 = vadd.f32 1e-05, %v1816_v5 }
 0x40f   :  { %v1787_v58 = vsub.f32 %v1723_v17, %v1755_v62  ;;  %v1309_v31 = vadd.f32 %v1308_v22, %v9763_v46  ;;  %v10165_v62 = vmul.f32 %v9234_v2, %v9689_v63 }
 0x410   :  { %7864 = vrsqrt.f32 %v1848_v36  ;;  %vm2030_vm13 = vweird.f32 %v1848_v36 }
 0x411   :  { %v1297_v33 = vpop.xlane.xlu1 %1296  ;;  %v1310_v18 = vadd.f32 %v1309_v31, %v9777_v41 }
 0x412   :  { %v10113_v50 = vmul.f32 %v9234_v2, %v1297_v33  ;;  %v1819_v33 = vmax.f32 %v1787_v58, 0.0  ;;  %v1758_v58 = vmul.f32 %v10165_v62, %v10165_v62 }
 0x414   :  { %v1764_v0 = vmul.f32 %v10113_v50, %v10113_v50  ;;  %2328 = vrot.lane.b32.xlu2 %v2240_v38, %s8049_s21  ;;  %v2143_v38 = vsel %vm2142_vm11, %v10067_v56, %v2139_v35 }
 0x415   :  { %2535 = vperm.xlu0 %7740, %v10120_v4   ;;  %v2211_v21 = vmul.f32 %v2143_v38, %v10155_v42 }
 0x416   :  { %v1796_v7 = vsub.f32 %v1732_v6, %v1764_v0  ;;  %v1851_v0 = vadd.f32 1e-05, %v1819_v33  ;;  %v7865_v48 = vpop.eup %7864  ;;  %v10161_v6 = vpop.permute.xlu2 %2465 }
 0x417   :  { %v2025_v5 = vmul.f32 %v7865_v48, %v1848_v36  ;;  %vm2031_vm12 = vweird.f32 %v7865_v48 }
 0x418   :  { %v1828_v25 = vmax.f32 %v1796_v7, 0.0  ;;  %vm2032_vm14 = vmor %vm2030_vm13, %vm2031_vm12  ;;  %vm2060_vm3 = vweird.f32 %v1851_v0 }
 0x419   :  { %v2026_v7 = vmul.f32 %v7865_v48, %v2025_v5 }
 0x41a   :  { %v1860_v20 = vadd.f32 1e-05, %v1828_v25  ;;  %v1726_v25 = vmul.f32 %v9234_v2, %v9745_v54 }
 0x41b   :  { %v2027_v33 = vmul.f32 0.5, %v2026_v7  ;;  %v2229_v7 = vmul.f32 %v9875_v27, %v9666_v49 }
 0x41c   :  { %7866 = vrsqrt.f32 %v1860_v20  ;;  %v1790_v63 = vsub.f32 %v1726_v25, %v1758_v58  ;;  %vm2150_vm0 = vweird.f32 %v1860_v20 }
 0x41d   :  { %2332 = vrot.lane.b32.xlu0 %v2242_v51, %s8049_s21  ;;  %7868 = vrsqrt.f32 %v1851_v0  ;;  %v2028_v11 = vsub.f32 1.5, %v2027_v33 }
 0x41e   :  { %v1822_v5 = vmax.f32 %v1790_v63, 0.0 }
 0x41f   :  { %v2029_v61 = vmul.f32 %v7865_v48, %v2028_v11 }
 0x420   :  { %v1854_v46 = vadd.f32 1e-05, %v1822_v5 }
 0x421   :  { %v2033_v25 = vsel %vm2032_vm14, %v7865_v48, %v2029_v61  ;;  %v10196_v61 = vld [vmem:[%s14288_s5 + $0xe0] sm:$0xff] }
 0x422   :  { %v7867_v17 = vpop.eup %7866  ;;  %7870 = vrsqrt.f32 %v1854_v46  ;;  %vm2090_vm6 = vweird.f32 %v1854_v46 }
 0x423   :  { %v7869_v51 = vpop.eup %7868  ;;  %v2145_v35 = vmul.f32 %v7867_v17, %v1860_v20  ;;  %vm2151_vm15 = vweird.f32 %v7867_v17 }
 0x424   :  { %1311 = vadd.xlane.f32.xlu1 %v1310_v18  ;;  %v2055_v38 = vmul.f32 %v7869_v51, %v1851_v0  ;;  %v10174_v18 = vpop.permute.xlu0 %2460  ;;  %vm2152_vm1 = vmor %vm2150_vm0, %vm2151_vm15  ;;  %vm2061_vm2 = vweird.f32 %v7869_v51 }
 0x425   :  { %2545 = vperm.xlu0 %7740, %v2211_v21   ;;  %v2146_v31 = vmul.f32 %v7867_v17, %v2145_v35  ;;  %v10182_v35 = vld [vmem:[%s14288_s5 + $0x80] sm:$0xff]  ;;  %vm2062_vm4 = vmor %vm2060_vm3, %vm2061_vm2 }
 0x426   :  { %v10190_v49 = vmul.f32 %v2033_v25, %v10182_v35 }
 0x428   :  { %v7871_v11 = vpop.eup %7870  ;;  %v2232_v36 = vmul.f32 %v10190_v49, %v10076_v29 }
 0x429   :  { %v2301_v56 = vpop.permute.xlu1 %2300  ;;  %v2085_v48 = vmul.f32 %v7871_v11, %v1854_v46  ;;  %vm2091_vm5 = vweird.f32 %v7871_v11 }
 0x42a   :  { %v2386_v39 = vsub.f32 %v9634_v47, %v2301_v56  ;;  %v2056_v47 = vmul.f32 %v7869_v51, %v2055_v38  ;;  %v2147_v56 = vmul.f32 0.5, %v2146_v31  ;;  %vm2092_vm7 = vmor %vm2090_vm6, %vm2091_vm5 }
 0x42b   :  { %v2086_v31 = vmul.f32 %v7871_v11, %v2085_v48 }
 0x42c   :  { %2748 = vperm.xlu2 %7743, %v2386_v39   ;;  %v2057_v39 = vmul.f32 0.5, %v2056_v47  ;;  %v2148_v54 = vsub.f32 1.5, %v2147_v56  ;;  %v10184_v33 = vpop.permute.xlu0 %2302 }
 0x42e   :  { %v2058_v58 = vsub.f32 1.5, %v2057_v39  ;;  %v2149_v38 = vmul.f32 %v7867_v17, %v2148_v54  ;;  %v10227_v39 = vmul.f32 %v9234_v2, %v10146_v55 }
 0x42f   :  { %v10172_v22 = vpop.xlane.xlu2 %1626 }
 0x430   :  { %v2153_v27 = vsel %vm2152_vm1, %v7867_v17, %v2149_v38  ;;  %v1765_v25 = vmul.f32 %v10227_v39, %v10227_v39 }
 0x431   :  { %v10202_v20 = vmul.f32 %v2153_v27, %v10196_v61 }
 0x433   :  { %v2244_v29 = vmul.f32 %v10202_v20, %v10113_v50  ;;  %v7974_v50 = vld [vmem:[%s14288_s5 + $0x38] sm:$0xff] }
 0x437   :  { %v2305_v41 = vpop.permute.xlu2 %2304 }
 0x438   :  { %v2388_v19 = vsub.f32 %v9808_v59, %v2305_v41  ;;  %v2243_v41 = vmul.f32 %v2211_v21, %v9989_v23  ;;  %v2059_v59 = vmul.f32 %v7869_v51, %v2058_v58  ;;  %v10207_v23 = vld [vmem:[%s14288_s5 + $0x98] sm:$0xff] }
 0x43a   :  { %2758 = vperm.xlu2 %7743, %v2388_v19   ;;  %v2063_v21 = vsel %vm2062_vm4, %v7869_v51, %v2059_v59  ;;  %v2087_v51 = vmul.f32 0.5, %v2086_v31  ;;  %v10243_v59 = vld [vmem:[%s14288_s5 + $0xb0] sm:$0xff] }
 0x43b   :  { %v10213_v0 = vmul.f32 %v2063_v21, %v10207_v23 }
 0x43c   :  { %v10209_v63 = vpop.xlane.xlu0 %1306  ;;  %v2088_v56 = vsub.f32 1.5, %v2087_v51 }
 0x43d   :  { %2306 = vrot.lane.b32.xlu1 %v2229_v7, %s8049_s21  ;;  %v2235_v47 = vmul.f32 %v10213_v0, %v10117_v8  ;;  %v2383_v7 = vsub.f32 %v7974_v50, %v9882_v53 }
 0x43e   :  { %v2089_v8 = vmul.f32 %v7871_v11, %v2088_v56 }
 0x43f   :  { %v10187_v19 = vpop.permute.xlu2 %2475 }
 0x440   :  { %v2093_v53 = vsel %vm2092_vm7, %v7871_v11, %v2089_v8 }
 0x441   :  { %v2206_v21 = vmul.f32 %v2093_v53, %v10243_v59 }
 0x442   :  { %2334 = vrot.lane.b32.xlu2 %v2243_v41, %s8049_s21 }
 0x443   :  { %v2238_v51 = vmul.f32 %v2206_v21, %v10165_v62 }
 0x444   :  { %v10223_v5 = vpop.xlane.xlu0 %1631 }
 0x445   :  { %2312 = vrot.lane.b32.xlu1 %v2232_v36, %s8049_s21 }
 0x447   :  { %v10217_v17 = vpop.permute.xlu2 %2485 }
 0x44a   :  { %2336 = vrot.lane.b32.xlu2 %v2244_v29, %s8049_s21  ;;  %v14817_v29 = vmov 0  }
 0x44d   :  { %2318 = vrot.lane.b32.xlu1 %v2235_v47, %s8049_s21 }
 0x44f   :  { %v10229_v54 = vpop.permute.xlu2 %2310 }
 0x454   :  { %v1622_v58 = vpop.xlane.xlu1 %1621 }
 0x455   :  { %v1733_v38 = vmul.f32 %v9234_v2, %v1622_v58  ;;  %2733 = vperm.xlu1 %7744, %v2383_v7   ;;  %v14818_v58 = vmov 1  }
 0x457   :  { %v1797_v55 = vsub.f32 %v1733_v38, %v1765_v25  ;;  %v10238_v41 = vpop.permute.xlu0 %2480  ;;  %v10246_v48 = vpop.permute.xlu2 %2316  ;;  %v10266_v38 = vld [vmem:[%s14288_s5 + $0xe8] sm:$0xff] }
 0x459   :  { %v1829_v27 = vmax.f32 %v1797_v55, 0.0 }
 0x45b   :  { %v1861_v36 = vadd.f32 1e-05, %v1829_v27 }
 0x45d   :  { %7872 = vrsqrt.f32 %v1861_v36  ;;  %7745 = vset.pattern.permute.xlu1 %v14817_v29  ;;  %vm2160_vm9 = vweird.f32 %v1861_v36 }
 0x45e   :  { %2520 = vperm.xlu1 %7745, %v2206_v21  }
 0x45f   :  { %v2309_v46 = vpop.permute.xlu0 %2308  ;;  %v10251_v11 = vpop.permute.xlu2 %2728 }
 0x460   :  { %v2390_v31 = vsub.f32 %v9915_v40, %v2309_v46  ;;  %v7975_v40 = vld [vmem:[%s14288_s5 + $0x48] sm:$0xff] }
 0x461   :  { %v2385_v62 = vsub.f32 %v7975_v40, %v10131_v14  ;;  %v7976_v14 = vld [vmem:[%s14288_s5 + $0x28] sm:$0xff] }
 0x462   :  { %2768 = vperm.xlu2 %7743, %v2390_v31   ;;  %v2381_v46 = vsub.f32 %v7976_v14, %v9770_v44  ;;  %v10312_v14 = vmul.f32 %v9234_v2, %v10209_v63 }
 0x463   :  { %v7873_v47 = vpop.eup %7872 }
 0x464   :  { %v2155_v56 = vmul.f32 %v7873_v47, %v1861_v36  ;;  %vm2161_vm8 = vweird.f32 %v7873_v47 }
 0x465   :  { %vm2162_vm10 = vmor %vm2160_vm9, %vm2161_vm8 }
 0x466   :  { %v2156_v50 = vmul.f32 %v7873_v47, %v2155_v56  ;;  %2324 = vrot.lane.b32.xlu1 %v2238_v51, %s8049_s21 }
 0x467   :  { %v10254_v7 = vpop.permute.xlu0 %2314  ;;  %7746 = vset.pattern.permute.xlu1 %v14818_v58  ;;  %v10273_v21 = vpop.permute.xlu2 %2322 }
 0x468   :  { %v2157_v8 = vmul.f32 0.5, %v2156_v50  ;;  %v7977_v50 = vld [vmem:[%s14288_s5 + $0x58] sm:$0xff] }
 0x46a   :  { %7754 = vset.pattern.permute.xlu2 %v14817_v29  ;;  %v2158_v25 = vsub.f32 1.5, %v2157_v8 }
 0x46b   :  { %2510 = vperm.xlu2 %7754, %v10014_v16  }
 0x46c   :  { %v2159_v55 = vmul.f32 %v7873_v47, %v2158_v25 }
 0x46e   :  { %2743 = vperm.xlu1 %7746, %v2385_v62   ;;  %v2163_v53 = vsel %vm2162_vm10, %v7873_v47, %v2159_v55  ;;  %v2241_v47 = vmul.f32 %v10120_v4, %v9919_v3  ;;  %v10299_v4 = vpop.permute.xlu1 %2470 }
 0x46f   :  { %v10268_v27 = vpop.permute.xlu0 %2320  ;;  %v10271_v16 = vmul.f32 %v2163_v53, %v10266_v38  ;;  %v10285_v31 = vpop.permute.xlu2 %2738 }
 0x471   :  { %2555 = vperm.xlu0 %7740, %v10271_v16  }
 0x473   :  { %7756 = vset.pattern.permute.xlu2 %v14818_v58 }
 0x474   :  { %2723 = vperm.xlu2 %7756, %v2381_v46  }
 0x476   :  { %7747 = vset.pattern.permute.xlu1 %v14817_v29 }
 0x477   :  { %v10282_v36 = vpop.permute.xlu0 %2525  ;;  %2530 = vperm.xlu1 %7747, %v10093_v60   ;;  %v2329_v44 = vpop.permute.xlu2 %2328  ;;  %v2387_v60 = vsub.f32 %v7977_v50, %v10184_v33  ;;  %v1735_v33 = vmul.f32 %v9234_v2, %v10223_v5 }
 0x478   :  { %v2400_v8 = vsub.f32 %v10081_v34, %v2329_v44 }
 0x47f   :  { %v2327_v51 = vpop.permute.xlu0 %2326  ;;  %2330 = vrot.lane.b32.xlu1 %v2241_v47, %s8049_s21  ;;  %v1766_v47 = vmul.f32 %v10312_v14, %v10312_v14 }
 0x480   :  { %v2399_v56 = vsub.f32 %v10055_v45, %v2327_v51  ;;  %7748 = vset.pattern.permute.xlu1 %v14818_v58  ;;  %v1734_v51 = vmul.f32 %v9234_v2, %v10172_v22  ;;  %v10323_v22 = vld [vmem:[%s14288_s5 + $0xf8] sm:$0xff] }
 0x482   :  { %2813 = vperm.xlu2 %7756, %v2399_v56   ;;  %v1798_v44 = vsub.f32 %v1734_v51, %v1766_v47 }
 0x486   :  { %v10297_v3 = vpop.permute.xlu2 %2748 }
 0x487   :  { %2753 = vperm.xlu1 %7748, %v2387_v60   ;;  %v1830_v60 = vmax.f32 %v1798_v44, 0.0 }
 0x48a   :  { %2818 = vperm.xlu2 %7756, %v2400_v8  }
 0x48f   :  { %7749 = vset.pattern.permute.xlu1 %v14817_v29 }
 0x490   :  { %2540 = vperm.xlu1 %7749, %v10140_v24  }
 0x494   :  { %v10303_v45 = vpop.permute.xlu2 %2758 }
 0x497   :  { %v1312_v25 = vpop.xlane.xlu1 %1311 }
 0x498   :  { %v1703_v40 = vmul.f32 %v9234_v2, %v1312_v25  ;;  %7750 = vset.pattern.permute.xlu1 %v14818_v58  ;;  %v1862_v25 = vadd.f32 1e-05, %v1830_v60  ;;  %v2391_v60 = vsub.f32 %v9903_v26, %v10229_v54  ;;  %v10357_v26 = vpop.permute.xlu0 %2535 }
 0x49a   :  { %v1767_v34 = vmul.f32 %v1703_v40, %v1703_v40  ;;  %vm2170_vm15 = vweird.f32 %v1862_v25 }
 0x49c   :  { %v1799_v62 = vsub.f32 %v1735_v33, %v1767_v34  ;;  %v2335_v55 = vpop.permute.xlu2 %2334 }
 0x49d   :  { %v2403_v53 = vsub.f32 %v10155_v42, %v2335_v55 }
 0x49e   :  { %v1831_v24 = vmax.f32 %v1799_v62, 0.0 }
 0x49f   :  { %2833 = vperm.xlu2 %7756, %v2403_v53  }
 0x4a0   :  { %v1863_v46 = vadd.f32 1e-05, %v1831_v24 }
 0x4a2   :  { %7874 = vrsqrt.f32 %v1863_v46  ;;  %vm2180_vm12 = vweird.f32 %v1863_v46 }
 0x4a3   :  { %7876 = vrsqrt.f32 %v1862_v25 }
 0x4a4   :  { %v2337_v5 = vpop.permute.xlu2 %2336 }
 0x4a5   :  { %v2404_v56 = vsub.f32 %v10196_v61, %v2337_v5 }
 0x4a7   :  { %2838 = vperm.xlu2 %7756, %v2404_v56   ;;  %v2245_v56 = vmul.f32 %v10271_v16, %v10227_v39  ;;  %v2397_v39 = vsub.f32 %v10032_v30, %v10273_v21 }
 0x4a8   :  { %v7875_v42 = vpop.eup %7874 }
 0x4a9   :  { %v2175_v50 = vmul.f32 %v7875_v42, %v1863_v46  ;;  %vm2181_vm11 = vweird.f32 %v7875_v42  ;;  %v7877_v47 = vpop.eup %7876 }
 0x4aa   :  { %vm2182_vm13 = vmor %vm2180_vm12, %vm2181_vm11  ;;  %vm2171_vm14 = vweird.f32 %v7877_v47 }
 0x4ab   :  { %v2176_v63 = vmul.f32 %v7875_v42, %v2175_v50  ;;  %vm2172_vm0 = vmor %vm2170_vm15, %vm2171_vm14 }
 0x4ad   :  { %v2177_v8 = vmul.f32 0.5, %v2176_v63 }
 0x4af   :  { %v2178_v33 = vsub.f32 1.5, %v2177_v8  ;;  %v2307_v34 = vpop.permute.xlu1 %2306 }
 0x4b0   :  { %v2389_v62 = vsub.f32 %v9859_v9, %v2307_v34  ;;  %v2165_v9 = vmul.f32 %v7877_v47, %v1862_v25  ;;  %v2333_v25 = vpop.permute.xlu0 %2332 }
 0x4b1   :  { %v2179_v55 = vmul.f32 %v7875_v42, %v2178_v33  ;;  %v2402_v34 = vsub.f32 %v10128_v13, %v2333_v25 }
 0x4b2   :  { %2763 = vperm.xlu1 %7750, %v2389_v62   ;;  %v2166_v5 = vmul.f32 %v7877_v47, %v2165_v9 }
 0x4b3   :  { %v2183_v61 = vsel %vm2182_vm13, %v7875_v42, %v2179_v55  ;;  %v7978_v42 = vld [vmem:[%s14288_s5 + $0x20] sm:$0xff] }
 0x4b4   :  { %v2215_v53 = vmul.f32 %v2183_v61, %v10323_v22  ;;  %v2167_v44 = vmul.f32 0.5, %v2166_v5 }
 0x4b6   :  { %2565 = vperm.xlu0 %7740, %v2215_v53   ;;  %v2247_v51 = vmul.f32 %v2215_v53, %v1703_v40  ;;  %v2168_v40 = vsub.f32 1.5, %v2167_v44  ;;  %v14819_v44 = vld [vmem:[#allocation32_spill] sm:$0xff] }
 0x4b7   :  { %v10326_v24 = vpop.permute.xlu1 %2312 }
 0x4b8   :  { %v2169_v63 = vmul.f32 %v7877_v47, %v2168_v40  ;;  %v10375_v53 = vpop.permute.xlu0 %2545 }
 0x4ba   :  { %7751 = vset.pattern.permute.xlu1 %v14817_v29  ;;  %v2173_v16 = vsel %vm2172_vm0, %v7877_v47, %v2169_v63 }
 0x4bb   :  { %2550 = vperm.xlu1 %7751, %v10202_v20   ;;  %v2380_v20 = vsub.f32 %v7978_v42, %v9756_v10  ;;  %v10351_v10 = vld [vmem:[%s14288_s5 + $0xf0] sm:$0xff]  ;;  %v2624_v42 = vmul.f32 %v10238_v41, %v14819_v44  ;;  %v14827_v44 = vld [vmem:[#allocation26_spill] sm:$0xff] }
 0x4bc   :  { %v2214_v33 = vmul.f32 %v2173_v16, %v10351_v10  ;;  %v14823_v16 = vld [vmem:[#allocation35_spill] sm:$0xff] }
 0x4be   :  { %2342 = vrot.lane.b32.xlu0 %v2247_v51, %s8049_s21  ;;  %v2246_v21 = vmul.f32 %v2214_v33, %v10312_v14 }
 0x4bf   :  { %v10331_v46 = vpop.permute.xlu1 %2318  ;;  %7755 = vset.pattern.permute.xlu0 %v14818_v58 }
 0x4c3   :  { %2338 = vrot.lane.b32.xlu1 %v2245_v56, %s8049_s21  ;;  %v10389_v56 = vpop.permute.xlu2 %2768 }
 0x4c4   :  { %7752 = vset.pattern.permute.xlu1 %v14818_v58 }
 0x4c6   :  { %2718 = vperm.xlu0 %7755, %v2380_v20   ;;  %v14820_v20 = vld [vmem:[#allocation33_spill] sm:$0xff] }
 0x4c7   :  { %v10342_v50 = vpop.permute.xlu1 %2733  ;;  %v2625_v40 = vmul.f32 %v10238_v41, %v14820_v20 }
 0x4cb   :  { %2773 = vperm.xlu1 %7752, %v2391_v60   ;;  %v14821_v60 = vld [vmem:[#allocation30_spill] sm:$0xff] }
 0x4cc   :  { %v2620_v63 = vmul.f32 %v10187_v19, %v14821_v60 }
 0x4ce   :  { %2803 = vperm.xlu0 %7755, %v2397_v39   ;;  %v14822_v39 = vld [vmem:[#allocation34_spill] sm:$0xff] }
 0x4d0   :  { %v10353_v8 = vpop.permute.xlu1 %2520 }
 0x4d3   :  { %7753 = vset.pattern.permute.xlu1 %v14817_v29 }
 0x4d4   :  { %2560 = vperm.xlu1 %7753, %v2214_v33   ;;  %v2912_v33 = vadd.f32 %v10389_v56, %v2624_v42  ;;  %v2612_v42 = vmul.f32 %v10161_v6, %v14827_v44 }
 0x4d6   :  { %v3040_v20 = vmax.f32 %v2912_v33, 0.0 }
 0x4d8   :  { %v2325_v54 = vpop.permute.xlu1 %2324 }
 0x4d9   :  { %v2398_v30 = vsub.f32 %v10243_v59, %v2325_v54  ;;  %v2396_v59 = vsub.f32 %v10001_v1, %v10268_v27  ;;  %v2913_v54 = vadd.f32 %v10389_v56, %v2625_v40 }
 0x4db   :  { %2808 = vperm.xlu0 %7755, %v2398_v30   ;;  %v3041_v40 = vmax.f32 %v2913_v54, 0.0  ;;  %v7979_v54 = vld [vmem:[%s14288_s5 + $0x18] sm:$0xff] }
 0x4dc   :  { %2340 = vrot.lane.b32.xlu1 %v2246_v21, %s8049_s21  ;;  %v14824_v21 = vld [vmem:[#allocation28_spill] sm:$0xff] }
 0x4dd   :  { %v2616_v25 = vmul.f32 %v10299_v4, %v14824_v21 }
 0x4e0   :  { %v10363_v62 = vpop.permute.xlu1 %2743 }
 0x4e3   :  { %2828 = vperm.xlu0 %7755, %v2402_v34   ;;  %v14825_v34 = vld [vmem:[#allocation31_spill] sm:$0xff] }
 0x4e4   :  { %2435 = vperm.xlu1 %7753, %v9438_v28   ;;  %v10379_v28 = vpop.permute.xlu0 %2555 }
 0x4e9   :  { %v10367_v55 = vpop.permute.xlu1 %2530 }
 0x4ec   :  { %2515 = vperm.xlu1 %7753, %v10044_v57  }
 0x4f1   :  { %v2331_v14 = vpop.permute.xlu1 %2330 }
 0x4f2   :  { %v2401_v61 = vsub.f32 %v10104_v37, %v2331_v14 }
 0x4f4   :  { %7757 = vset.pattern.permute.xlu1 %v14818_v58 }
 0x4f5   :  { %2798 = vperm.xlu1 %7757, %v2396_v59   ;;  %v2621_v59 = vmul.f32 %v10187_v19, %v14825_v34 }
 0x4f9   :  { %v10373_v13 = vpop.permute.xlu1 %2753 }
 0x4fa   :  { %v2900_v33 = vadd.f32 %v10373_v13, %v2612_v42 }
 0x4fd   :  { %2823 = vperm.xlu1 %7757, %v2401_v61  }
 0x502   :  { %v10377_v47 = vpop.permute.xlu1 %2540 }
 0x524   :  { %v10381_v57 = vpop.permute.xlu1 %2763 }
 0x528   :  { %v10383_v9 = vpop.permute.xlu0 %2565 }
 0x52d   :  { %v10385_v1 = vpop.permute.xlu1 %2550 }
 0x530   :  { %v2343_v27 = vpop.permute.xlu0 %2342 }
 0x531   :  { %v2407_v51 = vsub.f32 %v10323_v22, %v2343_v27  ;;  %v2628_v22 = vmul.f32 %v10217_v17, %v14822_v39  ;;  %v2908_v27 = vadd.f32 %v10381_v57, %v2620_v63 }
 0x533   :  { %2853 = vperm.xlu2 %7756, %v2407_v51   ;;  %v2904_v51 = vadd.f32 %v10303_v45, %v2616_v25 }
 0x535   :  { %v2339_v37 = vpop.permute.xlu1 %2338 }
 0x536   :  { %v2405_v5 = vsub.f32 %v10266_v38, %v2339_v37  ;;  %v2629_v38 = vmul.f32 %v10217_v17, %v14823_v16  ;;  %v14826_v37 = vld [vmem:[#allocation29_spill] sm:$0xff] }
 0x538   :  { %2843 = vperm.xlu1 %7757, %v2405_v5   ;;  %v2617_v5 = vmul.f32 %v10299_v4, %v14826_v37  ;;  %v14831_v37 = vld [vmem:[#allocation25_spill] sm:$0xff] }
 0x53a   :  { %v2905_v63 = vadd.f32 %v10303_v45, %v2617_v5  ;;  %v2609_v5 = vmul.f32 %v10174_v18, %v14831_v37 }
 0x53b   :  { %7758 = vset.pattern.permute.xlu2 %v14817_v29 }
 0x53c   :  { %2500 = vperm.xlu2 %7758, %v9984_v52   ;;  %v2909_v52 = vadd.f32 %v10381_v57, %v2621_v59  ;;  %v3036_v59 = vmax.f32 %v2908_v27, 0.0 }
 0x53d   :  { %v10405_v30 = vpop.permute.xlu1 %2773 }
 0x53e   :  { %v2916_v14 = vadd.f32 %v10405_v30, %v2628_v22  ;;  %v2917_v61 = vadd.f32 %v10405_v30, %v2629_v38  ;;  %v14828_v22 = vld [vmem:[#allocation24_spill] sm:$0xff]  ;;  %v14829_v38 = vld [vmem:[#allocation27_spill] sm:$0xff] }
 0x53f   :  { %v2608_v16 = vmul.f32 %v10174_v18, %v14828_v22  ;;  %v2613_v21 = vmul.f32 %v10161_v6, %v14829_v38 }
 0x540   :  { %v3044_v60 = vmax.f32 %v2916_v14, 0.0  ;;  %v3045_v39 = vmax.f32 %v2917_v61, 0.0  ;;  %7759 = vset.pattern.permute.xlu1 %v14817_v29  ;;  %v14830_v14 = vld [vmem:[#allocation136_spill] sm:$0xff] }
 0x541   :  { %2505 = vperm.xlu1 %7759, %v10213_v0   ;;  %v2379_v61 = vsub.f32 %v7979_v54, %v14830_v14  ;;  %v3037_v0 = vmax.f32 %v2909_v52, 0.0  ;;  %v2901_v44 = vadd.f32 %v10373_v13, %v2613_v21  ;;  %v2896_v27 = vadd.f32 %v10297_v3, %v2608_v16  ;;  %v14833_v52 = vld [vmem:[#allocation23_spill] sm:$0xff]  ;;  %v14834_v14 = vld [vmem:[#allocation18_spill] sm:$0xff] }
 0x542   :  { %v3148_v25 = vpack.c.bf16 %v3044_v60, %v3040_v20  ;;  %v3149_v34 = vpack.c.bf16 %v3045_v39, %v3041_v40  ;;  %v3032_v20 = vmax.f32 %v2904_v51, 0.0  ;;  %v14832_v40 = vld [vmem:[#allocation20_spill] sm:$0xff]  ;;  %v3033_v60 = vmax.f32 %v2905_v63, 0.0 }
 0x543   :  { %v2604_v42 = vmul.f32 %v10084_v15, %v14832_v40  ;;  %v2897_v39 = vadd.f32 %v10297_v3, %v2609_v5  ;;  %v2605_v22 = vmul.f32 %v10084_v15, %v14833_v52  ;;  %v3028_v54 = vmax.f32 %v2900_v33, 0.0  ;;  %v14835_v40 = vld [vmem:[#allocation19_spill] sm:$0xff]  ;;  %v14836_v33 = vld [vmem:[#allocation16_spill] sm:$0xff] }
 0x544   :  { %7760 = vset.pattern.permute.xlu2 %v14818_v58  ;;  %3224 = vmatpush.bf16.msra.mxu0 %v3148_v25  ;;  %v3144_v21 = vpack.c.bf16 %v3036_v59, %v3032_v20  ;;  %v2600_v51 = vmul.f32 %v10070_v32, %v14834_v14  ;;  %v3145_v25 = vpack.c.bf16 %v3037_v0, %v3033_v60  ;;  %v3029_v37 = vmax.f32 %v2901_v44, 0.0  ;;  %v14837_v20 = vld [vmem:[#allocation141_spill] sm:$0xff] }
 0x545   :  { %3282 = vmatpush.bf16.msra.mxu2 %v3149_v34  ;;  %2713 = vperm.xlu2 %7760, %v2379_v61   ;;  %v2892_v16 = vadd.f32 %v10363_v62, %v2604_v42  ;;  %v2601_v34 = vmul.f32 %v10070_v32, %v14835_v40  ;;  %v2893_v63 = vadd.f32 %v10363_v62, %v2605_v22  ;;  %v3024_v5 = vmax.f32 %v2896_v27, 0.0  ;;  %v14838_v42 = vld [vmem:[#allocation17_spill] sm:$0xff] }
 0x546   :  { %v10442_v38 = vpop.permute.xlu1 %2560  ;;  %v2394_v61 = vsub.f32 %v9968_v12, %v10246_v48  ;;  %v2888_v59 = vadd.f32 %v10285_v31, %v2600_v51  ;;  %v2596_v52 = vmul.f32 %v14837_v20, %v14836_v33  ;;  %v3025_v0 = vmax.f32 %v2897_v39, 0.0  ;;  %v14839_v12 = vld [vmem:[#allocation14_spill] sm:$0xff]  ;;  %v14840_v48 = vld [vmem:[#allocation140_spill] sm:$0xff]  ;;  %v14841_v33 = vld [vmem:[#allocation15_spill] sm:$0xff] }
 0x547   :  { %v2889_v44 = vadd.f32 %v10285_v31, %v2601_v34  ;;  %v2597_v60 = vmul.f32 %v14837_v20, %v14838_v42  ;;  %v3140_v22 = vpack.c.bf16 %v3028_v54, %v3024_v5  ;;  %v3020_v14 = vmax.f32 %v2892_v16, 0.0 }
 0x548   :  { %3225 = vmatpush.bf16.msra.mxu0 %v3144_v21  ;;  %v2592_v27 = vmul.f32 %v14840_v48, %v14839_v12  ;;  %v2884_v21 = vadd.f32 %v10342_v50, %v2596_v52  ;;  %v3141_v51 = vpack.c.bf16 %v3029_v37, %v3025_v0  ;;  %v3021_v40 = vmax.f32 %v2893_v63, 0.0  ;;  %v10474_v12 = vpop.permute.xlu0 %2718 }
 0x549   :  { %3283 = vmatpush.bf16.msra.mxu2 %v3145_v25  ;;  %7761 = vset.pattern.permute.xlu1 %v14818_v58  ;;  %v2593_v25 = vmul.f32 %v14840_v48, %v14841_v33  ;;  %v2885_v39 = vadd.f32 %v10342_v50, %v2597_v60  ;;  %v3016_v34 = vmax.f32 %v2888_v59, 0.0  ;;  %v3017_v54 = vmax.f32 %v2889_v44, 0.0  ;;  %14842 = vst [vmem:[#allocation32_spill] sm:$0xff] %v10474_v12 }
 0x54a   :  { %2788 = vperm.xlu1 %7761, %v2394_v61   ;;  %v2880_v2 = vadd.f32 %v10251_v11, %v2592_v27  ;;  %v10468_v61 = vpop.permute.xlu2 %2510  ;;  %v3012_v5 = vmax.f32 %v2884_v21, 0.0  ;;  %v14845_v27 = vld [vmem:[#allocation137_spill] sm:$0xff] }
 0x54b   :  { %v2881_v16 = vadd.f32 %v10251_v11, %v2593_v25  ;;  %v3136_v63 = vpack.c.bf16 %v3020_v14, %v3016_v34  ;;  %v3137_v0 = vpack.c.bf16 %v3021_v40, %v3017_v54  ;;  %v3013_v42 = vmax.f32 %v2885_v39, 0.0  ;;  %v14847_v40 = vld [vmem:[#allocation133_spill] sm:$0xff]  ;;  %v14849_v39 = vld [vmem:[#allocation12_spill] sm:$0xff] }
 0x54c   :  { %3226 = vmatpush.bf16.msra.mxu0 %v3140_v22  ;;  %v3008_v59 = vmax.f32 %v2880_v2, 0.0  ;;  %v14844_v2 = vld [vmem:[#allocation10_spill] sm:$0xff] }
 0x54d   :  { %3284 = vmatpush.bf16.msra.mxu2 %v3141_v51  ;;  %7762 = vset.pattern.permute.xlu2 %v14817_v29  ;;  %v3009_v60 = vmax.f32 %v2881_v16, 0.0  ;;  %v2584_v21 = vmul.f32 %v14845_v27, %v14844_v2  ;;  %v14846_v51 = vld [vmem:[#allocation11_spill] sm:$0xff]  ;;  %v14850_v16 = vld [vmem:[#allocation13_spill] sm:$0xff]  ;;  %v7982_v2 = vld [vmem:[%s14288_s5] sm:$0xff] }
 0x54e   :  { %2490 = vperm.xlu2 %7762, %v10190_v49   ;;  %v2341_v37 = vpop.permute.xlu1 %2340  ;;  %v3132_v44 = vpack.c.bf16 %v3012_v5, %v3008_v59  ;;  %v7980_v49 = vld [vmem:[%s14288_s5 + $0x8] sm:$0xff] }
 0x54f   :  { %v2406_v52 = vsub.f32 %v10351_v10, %v2341_v37  ;;  %v3133_v22 = vpack.c.bf16 %v3013_v42, %v3009_v60  ;;  %v14843_v10 = vld [vmem:[#allocation129_spill] sm:$0xff]  ;;  %v2872_v54 = vadd.f32 %v10474_v12, %v2584_v21  ;;  %v2392_v42 = vsub.f32 %v10182_v35, %v10326_v24  ;;  %v14852_v35 = vld [vmem:[#allocation128_spill] sm:$0xff] }
 0x550   :  { %3227 = vmatpush.bf16.msra.mxu0 %v3136_v63  ;;  %v2377_v14 = vsub.f32 %v7980_v49, %v14843_v10  ;;  %v2376_v24 = vsub.f32 %v7982_v2, %v14852_v35  ;;  %v14872_v35 = vld [vmem:[#allocation69_spill] sm:$0xff] }
 0x551   :  { %3285 = vmatpush.bf16.msra.mxu2 %v3137_v0  ;;  %2848 = vperm.xlu0 %7755, %v2406_v52   ;;  %v3000_v59 = vmax.f32 %v2872_v54, 0.0  ;;  %v14858_v54 = vld [vmem:[#allocation130_spill] sm:$0xff] }
 0x552   :  { %7763 = vset.pattern.permute.xlu1 %v14817_v29  ;;  %v2585_v29 = vmul.f32 %v14845_v27, %v14846_v51  ;;  %v10497_v5 = vpop.permute.xlu2 %2723 }
 0x553   :  { %2495 = vperm.xlu1 %7763, %v9977_v43   ;;  %v7981_v43 = vld [vmem:[%s14288_s5 + $0x10] sm:$0xff]  ;;  %14851 = vst [vmem:[#allocation30_spill] sm:$0xff] %v10497_v5 }
 0x554   :  { %3228 = vmatpush.bf16.msra.mxu0 %v3132_v44  ;;  %v2378_v33 = vsub.f32 %v7981_v43, %v14847_v40  ;;  %v2873_v63 = vadd.f32 %v10474_v12, %v2585_v29  ;;  %v14853_v43 = vld [vmem:[#allocation4_spill] sm:$0xff]  ;;  %v14854_v40 = vld [vmem:[#allocation127_spill] sm:$0xff] }
 0x555   :  { %3286 = vmatpush.bf16.msra.mxu2 %v3133_v22 }
 0x556   :  { %7764 = vset.pattern.permute.xlu2 %v14818_v58  ;;  %v10489_v25 = vpop.permute.xlu1 %2435  ;;  %v3001_v44 = vmax.f32 %v2873_v63, 0.0  ;;  %v14862_v63 = vld [vmem:[#allocation70_spill] sm:$0xff] }
 0x557   :  { %14848 = vst [vmem:[#allocation33_spill] sm:$0xff] %v10489_v25  ;;  %2703 = vperm.xlu2 %7764, %v2377_v14   ;;  %v2588_v34 = vmul.f32 %v10489_v25, %v14849_v39  ;;  %v2589_v37 = vmul.f32 %v10489_v25, %v14850_v16  ;;  %v2395_v14 = vsub.f32 %v10207_v23, %v10331_v46 }
 0x559   :  { %2708 = vperm.xlu0 %7755, %v2378_v33   ;;  %v2876_v52 = vadd.f32 %v10497_v5, %v2588_v34  ;;  %v2877_v0 = vadd.f32 %v10497_v5, %v2589_v37  ;;  %v10524_v33 = vmul.f32 %v14854_v40, %v14853_v43  ;;  %v14857_v34 = vld [vmem:[#allocation2_spill] sm:$0xff] }
 0x55a   :  { %v10514_v51 = vpop.permute.xlu2 %2813  ;;  %v10530_v16 = vmul.f32 %v14858_v54, %v14857_v34 }
 0x55b   :  { %7765 = vset.pattern.permute.xlu1 %v14818_v58  ;;  %v3004_v60 = vmax.f32 %v2876_v52, 0.0  ;;  %v3005_v22 = vmax.f32 %v2877_v0, 0.0  ;;  %v7983_v58 = vld [vmem:[%s14288_s5 + $0x88] sm:$0xff]  ;;  %14855 = vst [vmem:[#allocation34_spill] sm:$0xff] %v10524_v33  ;;  %v10538_v52 = vmul.f32 %v14854_v40, %v14862_v63  ;;  %v14924_v33 = vld [vmem:[#allocation118_spill] sm:$0xff] }
 0x55c   :  { %2778 = vperm.xlu1 %7765, %v2392_v42   ;;  %v2393_v21 = vsub.f32 %v7983_v58, %v10254_v7  ;;  %14859 = vst [vmem:[#allocation28_spill] sm:$0xff] %v10530_v16  ;;  %v14860_v7 = vld [vmem:[#allocation5_spill] sm:$0xff]  ;;  %v14864_v0 = vld [vmem:[#allocation71_spill] sm:$0xff]  ;;  %v14874_v58 = vld [vmem:[#allocation6_spill] sm:$0xff] }
 0x55d   :  { %v3128_v49 = vpack.c.bf16 %v3004_v60, %v3000_v59  ;;  %v3129_v10 = vpack.c.bf16 %v3005_v22, %v3001_v44  ;;  %v10534_v37 = vmul.f32 %v14854_v40, %v14860_v7  ;;  %14863 = vst [vmem:[#allocation29_spill] sm:$0xff] %v10538_v52  ;;  %v10542_v42 = vmul.f32 %v14854_v40, %v14864_v0  ;;  %v14866_v60 = vld [vmem:[#allocation8_spill] sm:$0xff]  ;;  %v14876_v40 = vld [vmem:[#allocation9_spill] sm:$0xff]  ;;  %v14877_v7 = vld [vmem:[#allocation74_spill] sm:$0xff]  ;;  %v10594_v52 = vpop.permute.xlu0 %2803 }
 0x55e   :  { %v10518_v46 = vpop.permute.xlu1 %2515  ;;  %v14867_v44 = vld [vmem:[#allocation132_spill] sm:$0xff]  ;;  %v14879_v0 = vld [vmem:[#allocation75_spill] sm:$0xff]  ;;  %14888 = vst [vmem:[#allocation16_spill] sm:$0xff] %v10594_v52 }
 0x55f   :  { %3229 = vmatpush.bf16.msra.mxu0 %v3128_v49  ;;  %3287 = vmatpush.bf16.msra.mxu2 %v3129_v10  ;;  %14861 = vst [vmem:[#allocation31_spill] sm:$0xff] %v10534_v37  ;;  %v10548_v22 = vmul.f32 %v14867_v44, %v14866_v60  ;;  %v14868_v49 = vld [vmem:[#allocation3_spill] sm:$0xff]  ;;  %v10568_v34 = vmul.f32 %v14867_v44, %v14876_v40 }
 0x560   :  { %14865 = vst [vmem:[#allocation26_spill] sm:$0xff] %v10542_v42  ;;  %v10552_v10 = vmul.f32 %v14858_v54, %v14868_v49  ;;  %v10572_v63 = vmul.f32 %v14867_v44, %v14877_v7  ;;  %v10576_v60 = vmul.f32 %v14867_v44, %v14879_v0  ;;  %v14881_v49 = vld [vmem:[#allocation7_spill] sm:$0xff]  ;;  %v14886_v42 = vld [vmem:[#allocation73_spill] sm:$0xff]  ;;  %v14889_v44 = vld [vmem:[#allocation84_spill] sm:$0xff] }
 0x561   :  { %2793 = vperm.xlu0 %7755, %v2395_v14   ;;  %v14870_v14 = vld [vmem:[#allocation68_spill] sm:$0xff]  ;;  %v2602_v0 = vmul.f32 %v10070_v32, %v14889_v44  ;;  %v14897_v44 = vld [vmem:[#allocation83_spill] sm:$0xff] }
 0x562   :  { %v10516_v23 = vpop.permute.xlu2 %2818  ;;  %14869 = vst [vmem:[#allocation24_spill] sm:$0xff] %v10552_v10  ;;  %v10556_v2 = vmul.f32 %v14858_v54, %v14870_v14  ;;  %v14882_v14 = vld [vmem:[#allocation76_spill] sm:$0xff]  ;;  %v2599_v25 = vmul.f32 %v14837_v20, %v14897_v44  ;;  %v14903_v44 = vld [vmem:[#allocation89_spill] sm:$0xff]  ;;  %v14910_v10 = vld [vmem:[#allocation90_spill] sm:$0xff] }
 0x563   :  { %14878 = vst [vmem:[#allocation25_spill] sm:$0xff] %v10572_v63  ;;  %v14911_v16 = vld [vmem:[#allocation91_spill] sm:$0xff] }
 0x564   :  { %14871 = vst [vmem:[#allocation27_spill] sm:$0xff] %v10556_v2  ;;  %v14891_v2 = vld [vmem:[#allocation81_spill] sm:$0xff]  ;;  %v2619_v12 = vmul.f32 %v10299_v4, %v14911_v16  ;;  %v14914_v16 = vld [vmem:[#allocation50_spill] sm:$0xff]  ;;  %v14927_v52 = vld [vmem:[#allocation59_spill] sm:$0xff] }
 0x565   :  { %14880 = vst [vmem:[#allocation20_spill] sm:$0xff] %v10576_v60  ;;  %v14892_v60 = vld [vmem:[#allocation77_spill] sm:$0xff] }
 0x566   :  { %v10604_v63 = vmul.f32 %v14845_v27, %v14892_v60 }
 0x567   :  { %v10526_v39 = vpop.permute.xlu1 %2798 }
 0x568   :  { %14856 = vst [vmem:[#allocation35_spill] sm:$0xff] %v10526_v39  ;;  %v2677_v39 = vmul.f32 %v10375_v53, %v14927_v52 }
 0x569   :  { %2698 = vperm.xlu0 %7755, %v2376_v24   ;;  %v10560_v24 = vmul.f32 %v14858_v54, %v14872_v35  ;;  %v10584_v35 = vmul.f32 %v14845_v27, %v14882_v14  ;;  %v2595_v14 = vmul.f32 %v14840_v48, %v14891_v2  ;;  %14893 = vst [vmem:[#allocation141_spill] sm:$0xff] %v10604_v63 }
 0x56a   :  { %v10520_v29 = vpop.permute.xlu2 %2833  ;;  %v10635_v63 = vmul.f32 %v10161_v6, %v14903_v44 }
 0x56b   :  { %14873 = vst [vmem:[#allocation136_spill] sm:$0xff] %v10560_v24  ;;  %v14890_v24 = vld [vmem:[#allocation80_spill] sm:$0xff]  ;;  %v10623_v60 = vadd.f32 %v10251_v11, %v2595_v14 }
 0x56c   :  { %14883 = vst [vmem:[#allocation23_spill] sm:$0xff] %v10584_v35  ;;  %v10675_v35 = vadd.f32 %v10303_v45, %v2619_v12 }
 0x56d   :  { %14899 = vst [vmem:[#allocation17_spill] sm:$0xff] %v10623_v60 }
 0x56e   :  { %14913 = vst [vmem:[#allocation140_spill] sm:$0xff] %v10675_v35 }
 0x571   :  { %2783 = vperm.xlu0 %7755, %v2393_v21   ;;  %v14875_v21 = vld [vmem:[#allocation131_spill] sm:$0xff] }
 0x572   :  { %v10544_v59 = vpop.permute.xlu2 %2838  ;;  %v10564_v43 = vmul.f32 %v14875_v21, %v14874_v58  ;;  %v10580_v54 = vmul.f32 %v14875_v21, %v14881_v49  ;;  %v14884_v58 = vld [vmem:[#allocation72_spill] sm:$0xff]  ;;  %v10592_v7 = vmul.f32 %v14875_v21, %v14886_v42  ;;  %v2594_v49 = vmul.f32 %v14840_v48, %v14890_v24  ;;  %v14895_v42 = vld [vmem:[#allocation87_spill] sm:$0xff]  ;;  %v14898_v48 = vld [vmem:[#allocation85_spill] sm:$0xff] }
 0x573   :  { %v10588_v40 = vmul.f32 %v14875_v21, %v14884_v58  ;;  %v14894_v58 = vld [vmem:[#allocation86_spill] sm:$0xff]  ;;  %v2607_v21 = vmul.f32 %v10084_v15, %v14895_v42  ;;  %v10615_v24 = vadd.f32 %v10285_v31, %v2602_v0  ;;  %v2603_v2 = vmul.f32 %v10070_v32, %v14898_v48  ;;  %v14904_v32 = vld [vmem:[#allocation96_spill] sm:$0xff]  ;;  %v14906_v48 = vld [vmem:[#allocation93_spill] sm:$0xff] }
 0x574   :  { %14887 = vst [vmem:[#allocation19_spill] sm:$0xff] %v10592_v7  ;;  %v14896_v7 = vld [vmem:[#allocation82_spill] sm:$0xff]  ;;  %v10620_v27 = vadd.f32 %v10251_v11, %v2594_v49  ;;  %v10639_v49 = vmul.f32 %v10217_v17, %v14904_v32  ;;  %v14905_v11 = vld [vmem:[#allocation92_spill] sm:$0xff] }
 0x575   :  { %14885 = vst [vmem:[#allocation18_spill] sm:$0xff] %v10588_v40  ;;  %v2606_v40 = vmul.f32 %v10084_v15, %v14894_v58  ;;  %v2598_v5 = vmul.f32 %v14837_v20, %v14896_v7  ;;  %v14900_v58 = vld [vmem:[#allocation88_spill] sm:$0xff]  ;;  %v14901_v42 = vld [vmem:[#allocation22_spill] sm:$0xff]  ;;  %v14902_v20 = vld [vmem:[#allocation21_spill] sm:$0xff]  ;;  %v10643_v14 = vmul.f32 %v10187_v19, %v14905_v11  ;;  %v2618_v11 = vmul.f32 %v10299_v4, %v14910_v10 }
 0x576   :  { %v2610_v15 = vmul.f32 %v10174_v18, %v14900_v58  ;;  %v10629_v7 = vmul.f32 %v10161_v6, %v14901_v42  ;;  %v2611_v0 = vmul.f32 %v10174_v18, %v14902_v20  ;;  %v10647_v58 = vmul.f32 %v10187_v19, %v14906_v48  ;;  %v14907_v18 = vld [vmem:[#allocation98_spill] sm:$0xff]  ;;  %v14912_v19 = vld [vmem:[#allocation95_spill] sm:$0xff] }
 0x577   :  { %v10650_v42 = vadd.f32 %v10285_v31, %v2603_v2  ;;  %v10654_v20 = vmul.f32 %v10217_v17, %v14907_v18  ;;  %v14908_v6 = vld [vmem:[#allocation94_spill] sm:$0xff]  ;;  %v2627_v48 = vmul.f32 %v10238_v41, %v14912_v19  ;;  %v10666_v31 = vpop.permute.xlu1 %2823  ;;  %v3010_v17 = vmax.f32 %v10620_v27, 0.0  ;;  %v14915_v27 = vld [vmem:[#allocation51_spill] sm:$0xff]  ;;  %v14916_v2 = vld [vmem:[#allocation113_spill] sm:$0xff] }
 0x578   :  { %v2626_v44 = vmul.f32 %v10238_v41, %v14908_v6  ;;  %v10672_v6 = vadd.f32 %v10303_v45, %v2618_v11  ;;  %v10678_v10 = vadd.f32 %v10297_v3, %v2610_v15  ;;  %v10681_v4 = vadd.f32 %v10297_v3, %v2611_v0  ;;  %v10683_v41 = vpop.permute.xlu0 %2808  ;;  %v14919_v0 = vld [vmem:[#allocation114_spill] sm:$0xff] }
 0x579   :  { %v2660_v19 = vmul.f32 %v10282_v36, %v14914_v16  ;;  %v2661_v18 = vmul.f32 %v10282_v36, %v14915_v27  ;;  %v3019_v11 = vmax.f32 %v10650_v42, 0.0  ;;  %v2662_v45 = vmul.f32 %v10282_v36, %v14916_v2  ;;  %v14920_v16 = vld [vmem:[#allocation54_spill] sm:$0xff]  ;;  %v14921_v27 = vld [vmem:[#allocation55_spill] sm:$0xff]  ;;  %v14922_v2 = vld [vmem:[#allocation117_spill] sm:$0xff] }
 0x57a   :  { %v10693_v12 = vadd.f32 %v10389_v56, %v2626_v44  ;;  %v10696_v15 = vadd.f32 %v10389_v56, %v2627_v48  ;;  %v2886_v3 = vadd.f32 %v10342_v50, %v2598_v5  ;;  %v2663_v60 = vmul.f32 %v10282_v36, %v14919_v0  ;;  %v14937_v5 = vld [vmem:[#allocation107_spill] sm:$0xff] }
 0x57b   :  { %v10703_v37 = vmul.f32 %v10357_v26, %v14920_v16  ;;  %v10707_v42 = vmul.f32 %v10357_v26, %v14921_v27  ;;  %v10711_v44 = vmul.f32 %v10357_v26, %v14922_v2  ;;  %v10715_v56 = vmul.f32 %v10357_v26, %v14924_v33  ;;  %v14926_v16 = vld [vmem:[#allocation58_spill] sm:$0xff]  ;;  %v14928_v2 = vld [vmem:[#allocation121_spill] sm:$0xff] }
 0x57c   :  { %14917 = vst [vmem:[#allocation15_spill] sm:$0xff] %v10693_v12  ;;  %v2676_v27 = vmul.f32 %v10375_v53, %v14926_v16  ;;  %v14929_v26 = vld [vmem:[#allocation122_spill] sm:$0xff]  ;;  %v3014_v48 = vmax.f32 %v2886_v3, 0.0  ;;  %v10736_v0 = vadd.f32 %v10342_v50, %v2599_v25  ;;  %v14936_v3 = vld [vmem:[#allocation52_spill] sm:$0xff]  ;;  %v10755_v25 = vadd.f32 %v10514_v51, %v2660_v19  ;;  %v14941_v12 = vld [vmem:[#allocation53_spill] sm:$0xff] }
 0x57d   :  { %14918 = vst [vmem:[#allocation129_spill] sm:$0xff] %v10696_v15  ;;  %v10731_v33 = vmul.f32 %v10375_v53, %v14929_v26  ;;  %v2895_v26 = vadd.f32 %v10363_v62, %v2607_v21  ;;  %v2664_v50 = vmul.f32 %v10367_v55, %v14936_v3  ;;  %v14939_v15 = vld [vmem:[#allocation108_spill] sm:$0xff]  ;;  %v10771_v21 = vadd.f32 %v10514_v51, %v2662_v45 }
 0x57e   :  { %14923 = vst [vmem:[#allocation10_spill] sm:$0xff] %v10711_v44  ;;  %v10727_v44 = vmul.f32 %v10375_v53, %v14928_v2  ;;  %v14933_v2 = vld [vmem:[#allocation45_spill] sm:$0xff]  ;;  %v2894_v53 = vadd.f32 %v10363_v62, %v2606_v40  ;;  %v2665_v40 = vmul.f32 %v10367_v55, %v14941_v12  ;;  %v10768_v62 = vadd.f32 %v10514_v51, %v2661_v18  ;;  %v14944_v3 = vld [vmem:[#allocation48_spill] sm:$0xff] }
 0x57f   :  { %14925 = vst [vmem:[#allocation137_spill] sm:$0xff] %v10715_v56  ;;  %v14932_v56 = vld [vmem:[#allocation44_spill] sm:$0xff]  ;;  %v10746_v35 = vmul.f32 %v10468_v61, %v14933_v2  ;;  %v10763_v2 = vmul.f32 %v10468_v61, %v14939_v15  ;;  %v10774_v19 = vadd.f32 %v10514_v51, %v2663_v60  ;;  %v10784_v15 = vpack.c.bf16 %v3014_v48, %v3010_v17  ;;  %v14948_v60 = vld [vmem:[#allocation111_spill] sm:$0xff] }
 0x580   :  { %14930 = vst [vmem:[#allocation11_spill] sm:$0xff] %v10736_v0  ;;  %v10742_v52 = vmul.f32 %v10468_v61, %v14932_v56  ;;  %v10759_v56 = vmul.f32 %v10468_v61, %v14937_v5  ;;  %v10778_v5 = vmul.f32 %v10353_v8, %v14944_v3  ;;  %v10787_v18 = vpop.permute.xlu0 %2828  ;;  %v3023_v45 = vmax.f32 %v2895_v26, 0.0  ;;  %v14950_v17 = vld [vmem:[#allocation116_spill] sm:$0xff] }
 0x581   :  { %14934 = vst [vmem:[#allocation12_spill] sm:$0xff] %v10746_v35  ;;  %v10793_v35 = vmul.f32 %v10353_v8, %v14948_v60  ;;  %v10796_v3 = vadd.f32 %v10516_v23, %v2664_v50  ;;  %v2667_v48 = vmul.f32 %v10367_v55, %v14950_v17  ;;  %v14951_v12 = vld [vmem:[#allocation112_spill] sm:$0xff]  ;;  %v14953_v50 = vld [vmem:[#allocation62_spill] sm:$0xff]  ;;  %v14959_v26 = vmax.f32 %v10615_v24, 0.0 }
 0x582   :  { %14938 = vst [vmem:[#allocation128_spill] sm:$0xff] %v10759_v56  ;;  %v14945_v56 = vld [vmem:[#allocation49_spill] sm:$0xff]  ;;  %v2684_v0 = vmul.f32 %v10379_v28, %v14953_v50  ;;  %v14965_v24 = vld [vmem:[#allocation60_spill] sm:$0xff] }
 0x583   :  { %14940 = vst [vmem:[#allocation4_spill] sm:$0xff] %v10763_v2  ;;  %v10782_v61 = vmul.f32 %v10353_v8, %v14945_v56  ;;  %v3022_v2 = vmax.f32 %v2894_v53, 0.0  ;;  %v10806_v53 = vadd.f32 %v10516_v23, %v2665_v40  ;;  %v14954_v56 = vld [vmem:[#allocation63_spill] sm:$0xff] }
 0x584   :  { %14942 = vst [vmem:[#allocation127_spill] sm:$0xff] %v10771_v21 }
 0x585   :  { %14943 = vst [vmem:[#allocation2_spill] sm:$0xff] %v10774_v19  ;;  %v10827_v60 = vpack.c.bf16 %v3022_v2, %v14959_v26  ;;  %v14963_v19 = vld [vmem:[#allocation67_spill] sm:$0xff]  ;;  %v14966_v2 = vld [vmem:[#allocation61_spill] sm:$0xff]  ;;  %v2903_v26 = vadd.f32 %v10373_v13, %v10635_v63  ;;  %v10867_v63 = vadd.f32 %v10520_v29, %v10727_v44 }
 0x586   :  { %14946 = vst [vmem:[#allocation130_spill] sm:$0xff] %v10784_v15  ;;  %v10803_v15 = vmul.f32 %v10353_v8, %v14951_v12  ;;  %v14957_v8 = vld [vmem:[#allocation124_spill] sm:$0xff]  ;;  %v2902_v12 = vadd.f32 %v10373_v13, %v10629_v7  ;;  %v2693_v21 = vmul.f32 %v10383_v9, %v14963_v19 }
 0x587   :  { %14949 = vst [vmem:[#allocation5_spill] sm:$0xff] %v10793_v35  ;;  %v2685_v35 = vmul.f32 %v10379_v28, %v14954_v56  ;;  %v10821_v40 = vmul.f32 %v10379_v28, %v14957_v8  ;;  %v14962_v56 = vld [vmem:[#allocation66_spill] sm:$0xff]  ;;  %v10840_v8 = vadd.f32 %v10516_v23, %v2667_v48 }
 0x588   :  { %14952 = vst [vmem:[#allocation70_spill] sm:$0xff] %v10803_v15  ;;  %v3030_v13 = vmax.f32 %v2902_v12, 0.0  ;;  %v3031_v12 = vmax.f32 %v2903_v26, 0.0  ;;  %v14973_v26 = vmax.f32 %v10678_v10, 0.0 }
 0x589   :  { %14958 = vst [vmem:[#allocation8_spill] sm:$0xff] %v10821_v40  ;;  %v14971_v40 = vld [vmem:[#allocation56_spill] sm:$0xff] }
 0x58a   :  { %14960 = vst [vmem:[#allocation132_spill] sm:$0xff] %v10827_v60 }
 0x58b   :  { %14964 = vst [vmem:[#allocation68_spill] sm:$0xff] %v10840_v8 }
 0x58c   :  { %14970 = vst [vmem:[#allocation6_spill] sm:$0xff] %v10867_v63 }
 0x58d   :  { %v10658_v32 = vpop.permute.xlu2 %2853 }
 0x58e   :  { %14909 = vst [vmem:[#allocation14_spill] sm:$0xff] %v10658_v32 }
 0x596   :  { %v10750_v36 = vpop.permute.xlu2 %2500 }
 0x597   :  { %14935 = vst [vmem:[#allocation13_spill] sm:$0xff] %v10750_v36  ;;  %v14947_v36 = vld [vmem:[#allocation115_spill] sm:$0xff] }
 0x598   :  { %v2666_v51 = vmul.f32 %v10367_v55, %v14947_v36  ;;  %v14955_v55 = vld [vmem:[#allocation123_spill] sm:$0xff]  ;;  %v10829_v36 = vpack.c.bf16 %v3023_v45, %v3019_v11  ;;  %v2680_v11 = vmul.f32 %v10385_v1, %v14965_v24  ;;  %v2681_v45 = vmul.f32 %v10385_v1, %v14966_v2 }
 0x599   :  { %v10817_v17 = vmul.f32 %v10379_v28, %v14955_v55  ;;  %v2692_v55 = vmul.f32 %v10383_v9, %v14962_v56  ;;  %v14967_v56 = vld [vmem:[#allocation64_spill] sm:$0xff]  ;;  %v14968_v28 = vld [vmem:[#allocation65_spill] sm:$0xff]  ;;  %v2964_v2 = vadd.f32 %v10520_v29, %v2676_v27 }
 0x59a   :  { %14961 = vst [vmem:[#allocation3_spill] sm:$0xff] %v10829_v36  ;;  %v10832_v50 = vadd.f32 %v10516_v23, %v2666_v51  ;;  %v2688_v19 = vmul.f32 %v10442_v38, %v14967_v56  ;;  %v2689_v23 = vmul.f32 %v10442_v38, %v14968_v28  ;;  %v2981_v36 = vadd.f32 %v10658_v32, %v2693_v21 }
 0x59b   :  { %14956 = vst [vmem:[#allocation71_spill] sm:$0xff] %v10817_v17  ;;  %v2980_v48 = vadd.f32 %v10658_v32, %v2692_v55  ;;  %v10863_v51 = vadd.f32 %v10520_v29, %v2677_v39  ;;  %v2968_v15 = vadd.f32 %v10544_v59, %v2680_v11  ;;  %v2969_v27 = vadd.f32 %v10544_v59, %v2681_v45 }
 0x59c   :  { %v2672_v39 = vmul.f32 %v10377_v47, %v14971_v40  ;;  %v3109_v32 = vmax.f32 %v2981_v36, 0.0  ;;  %v3092_v8 = vmax.f32 %v2964_v2, 0.0  ;;  %v14974_v2 = vmax.f32 %v10681_v4, 0.0 }
 0x59d   :  { %v3108_v17 = vmax.f32 %v2980_v48, 0.0  ;;  %v3093_v36 = vmax.f32 %v10863_v51, 0.0  ;;  %v10888_v48 = vpack.c.bf16 %v3030_v13, %v14973_v26  ;;  %v2956_v4 = vadd.f32 %v10666_v31, %v10703_v37 }
 0x59e   :  { %v2910_v13 = vadd.f32 %v10381_v57, %v10643_v14  ;;  %v2957_v37 = vadd.f32 %v10666_v31, %v10707_v42  ;;  %v2945_v42 = vadd.f32 %v10683_v41, %v10782_v61  ;;  %v14979_v61 = vld [vmem:[#allocation46_spill] sm:$0xff] }
 0x59f   :  { %v10857_v60 = vpop.permute.xlu2 %2713 }
 0x5aa   :  { %v10738_v16 = vpop.permute.xlu1 %2843 }
 0x5ab   :  { %14931 = vst [vmem:[#allocation133_spill] sm:$0xff] %v10738_v16  ;;  %v2972_v21 = vadd.f32 %v10738_v16, %v2684_v0  ;;  %v2973_v56 = vadd.f32 %v10738_v16, %v2685_v35  ;;  %v10882_v35 = vadd.f32 %v10520_v29, %v10731_v33  ;;  %v3096_v29 = vmax.f32 %v2968_v15, 0.0 }
 0x5ac   :  { %v3097_v33 = vmax.f32 %v2969_v27, 0.0  ;;  %v2911_v15 = vadd.f32 %v10381_v57, %v10647_v58 }
 0x5ad   :  { %v3100_v16 = vmax.f32 %v2972_v21, 0.0 }
 0x5b3   :  { %v10842_v7 = vpop.permute.xlu1 %2505 }
 0x5c3   :  { %v10859_v24 = vpop.permute.xlu0 %2848 }
 0x5c4   :  { %14969 = vst [vmem:[#allocation69_spill] sm:$0xff] %v10859_v24  ;;  %v2976_v28 = vadd.f32 %v10859_v24, %v2688_v19  ;;  %v2977_v55 = vadd.f32 %v10859_v24, %v2689_v23  ;;  %v2960_v19 = vadd.f32 %v10787_v18, %v2672_v39  ;;  %v14972_v23 = vld [vmem:[#allocation57_spill] sm:$0xff]  ;;  %v3101_v24 = vmax.f32 %v2973_v56, 0.0  ;;  %v14975_v39 = vld [vmem:[#allocation119_spill] sm:$0xff] }
 0x5c5   :  { %v2673_v0 = vmul.f32 %v10377_v47, %v14972_v23  ;;  %v10918_v14 = vmul.f32 %v10377_v47, %v14975_v39 }
 0x5c6   :  { %v3104_v44 = vmax.f32 %v2976_v28, 0.0  ;;  %v3105_v63 = vmax.f32 %v2977_v55, 0.0  ;;  %v10892_v28 = vpack.c.bf16 %v3031_v12, %v14974_v2  ;;  %v3088_v10 = vmax.f32 %v2960_v19, 0.0  ;;  %v10908_v55 = vpop.permute.xlu2 %2490  ;;  %v14976_v12 = vld [vmem:[#allocation120_spill] sm:$0xff] }
 0x5c7   :  { %v2961_v40 = vadd.f32 %v10787_v18, %v2673_v0  ;;  %v3177_v21 = vpack.c.bf16 %v3101_v24, %v3097_v33  ;;  %v10922_v57 = vmul.f32 %v10377_v47, %v14976_v12  ;;  %v3039_v19 = vmax.f32 %v2911_v15, 0.0  ;;  %v14977_v47 = vld [vmem:[#allocation138_spill] sm:$0xff] }
 0x5c8   :  { %v3180_v11 = vpack.c.bf16 %v3108_v17, %v3104_v44  ;;  %v3181_v45 = vpack.c.bf16 %v3109_v32, %v3105_v63  ;;  %v2868_v32 = vadd.f32 %v10857_v60, %v10548_v22  ;;  %v2869_v17 = vadd.f32 %v10857_v60, %v10568_v34  ;;  %v10898_v63 = vpop.permute.xlu1 %2788 }
 0x5c9   :  { %v3176_v22 = vpack.c.bf16 %v3100_v16, %v3096_v29  ;;  %v3089_v27 = vmax.f32 %v2961_v40, 0.0  ;;  %v3038_v44 = vmax.f32 %v2910_v13, 0.0  ;;  %v3172_v0 = vpack.c.bf16 %v3092_v8, %v3088_v10  ;;  %v14978_v29 = vld [vmem:[#allocation125_spill] sm:$0xff]  ;;  %v14980_v8 = vld [vmem:[#allocation126_spill] sm:$0xff] }
 0x5ca   :  { %3253 = vmatpush.bf16.msra.mxu1 %v3180_v11  ;;  %3311 = vmatpush.bf16.msra.mxu3 %v3181_v45  ;;  %v2996_v16 = vmax.f32 %v2868_v32, 0.0  ;;  %v2997_v24 = vmax.f32 %v2869_v17, 0.0  ;;  %v3084_v45 = vmax.f32 %v2956_v4, 0.0  ;;  %v10930_v40 = vmul.f32 %v10383_v9, %v14977_v47  ;;  %v14981_v4 = vld [vmem:[#allocation139_spill] sm:$0xff] }
 0x5cb   :  { %v10900_v51 = vpop.permute.xlu0 %2708  ;;  %v3173_v26 = vpack.c.bf16 %v3093_v36, %v3089_v27  ;;  %v3085_v2 = vmax.f32 %v2957_v37, 0.0  ;;  %v2682_v33 = vmul.f32 %v10385_v1, %v14978_v29  ;;  %v2652_v32 = vmul.f32 %v10518_v46, %v14979_v61  ;;  %v14984_v27 = vld [vmem:[#allocation35_spill] sm:$0xff]  ;;  %v14995_v61 = vld [vmem:[#allocation40_spill] sm:$0xff] }
 0x5cc   :  { %v2864_v34 = vadd.f32 %v10900_v51, %v10564_v43  ;;  %v2865_v56 = vadd.f32 %v10900_v51, %v10580_v54  ;;  %v2944_v54 = vadd.f32 %v10683_v41, %v10778_v5  ;;  %v2918_v5 = vadd.f32 %v10405_v30, %v10639_v49 }
 0x5cd   :  { %v2683_v17 = vmul.f32 %v10385_v1, %v14980_v8  ;;  %v3082_v10 = vmax.f32 %v10832_v50, 0.0  ;;  %v10943_v36 = vmul.f32 %v10383_v9, %v14981_v4  ;;  %v2919_v13 = vadd.f32 %v10405_v30, %v10654_v20  ;;  %v14997_v4 = vld [vmem:[#allocation34_spill] sm:$0xff]  ;;  %v7426_v50 = vld [vmem:[%s14289_s2 + $0x18] sm:$0xf0] }
 0x5ce   :  { %3254 = vmatpush.bf16.msra.mxu1 %v3176_v22  ;;  %3312 = vmatpush.bf16.msra.mxu3 %v3177_v21  ;;  %v2992_v58 = vmax.f32 %v2864_v34, 0.0  ;;  %v2993_v43 = vmax.f32 %v2865_v56, 0.0  ;;  %v3072_v15 = vmax.f32 %v2944_v54, 0.0  ;;  %v14982_v22 = vld [vmem:[#allocation47_spill] sm:$0xff]  ;;  %v14983_v34 = vmax.f32 %v10796_v3, 0.0 }
 0x5cf   :  { %v2653_v21 = vmul.f32 %v10518_v46, %v14982_v22  ;;  %v3073_v56 = vmax.f32 %v2945_v42, 0.0  ;;  %v2936_v37 = vadd.f32 %v14984_v27, %v10742_v52  ;;  %v14985_v9 = vmax.f32 %v10672_v6, 0.0  ;;  %v10972_v42 = vpop.permute.xlu2 %2703  ;;  %v14990_v6 = vld [vmem:[#allocation16_spill] sm:$0xff] }
 0x5d0   :  { %v3124_v23 = vpack.c.bf16 %v2996_v16, %v2992_v58  ;;  %v3125_v11 = vpack.c.bf16 %v2997_v24, %v2993_v43  ;;  %v3168_v1 = vpack.c.bf16 %v3084_v45, %v14983_v34  ;;  %v10959_v30 = vpop.permute.xlu1 %2495  ;;  %v14986_v20 = vmax.f32 %v10806_v53, 0.0  ;;  %v14987_v58 = vld [vmem:[#allocation12_spill] sm:$0xff]  ;;  %v14999_v34 = vld [vmem:[#allocation31_spill] sm:$0xff] }
 0x5d1   :  { %v10957_v39 = vpack.c.bf16 %v3038_v44, %v14985_v9  ;;  %v2937_v16 = vadd.f32 %v14984_v27, %v14987_v58  ;;  %v14988_v43 = vld [vmem:[#allocation140_spill] sm:$0xff]  ;;  %v10970_v54 = vadd.f32 %v10544_v59, %v2682_v33  ;;  %v3046_v52 = vmax.f32 %v2918_v5, 0.0 }
 0x5d2   :  { %3230 = vmatpush.bf16.msra.mxu0 %v3124_v23  ;;  %3255 = vmatpush.bf16.msra.mxu1 %v3172_v0  ;;  %v3169_v12 = vpack.c.bf16 %v3085_v2, %v14986_v20  ;;  %v14989_v24 = vmax.f32 %v14988_v43, 0.0  ;;  %v2940_v44 = vadd.f32 %v14990_v6, %v2652_v32  ;;  %v14991_v23 = vld [vmem:[#allocation42_spill] sm:$0xff]  ;;  %v10978_v0 = vadd.f32 %v10544_v59, %v2683_v17  ;;  %v14996_v32 = vld [vmem:[#allocation13_spill] sm:$0xff] }
 0x5d3   :  { %3288 = vmatpush.bf16.msra.mxu2 %v3125_v11  ;;  %3313 = vmatpush.bf16.msra.mxu3 %v3173_v26  ;;  %v10947_v49 = vpop.permute.xlu0 %2793  ;;  %v2644_v53 = vmul.f32 %v10842_v7, %v14991_v23  ;;  %v3047_v11 = vmax.f32 %v2919_v13, 0.0  ;;  %v2941_v47 = vadd.f32 %v14990_v6, %v2653_v21  ;;  %v14993_v26 = vld [vmem:[#allocation43_spill] sm:$0xff]  ;;  %v14994_v29 = vmax.f32 %v10768_v62, 0.0  ;;  %v15004_v23 = vld [vmem:[#allocation129_spill] sm:$0xff] }
 0x5d4   :  { %v10967_v3 = vpack.c.bf16 %v3039_v19, %v14989_v24  ;;  %v14992_v19 = vmax.f32 %v10755_v25, 0.0  ;;  %v2645_v2 = vmul.f32 %v10842_v7, %v14993_v26  ;;  %v3064_v5 = vmax.f32 %v2936_v37, 0.0  ;;  %v14998_v25 = vld [vmem:[#allocation41_spill] sm:$0xff]  ;;  %v15001_v37 = vld [vmem:[#allocation32_spill] sm:$0xff] }
 0x5d5   :  { %v3165_v33 = vpack.c.bf16 %v14994_v29, %v3073_v56  ;;  %v2640_v8 = vmul.f32 %v14996_v32, %v14995_v61  ;;  %v2932_v59 = vadd.f32 %v10947_v49, %v2644_v53  ;;  %v3065_v17 = vmax.f32 %v2937_v16, 0.0  ;;  %v15000_v56 = vld [vmem:[#allocation23_spill] sm:$0xff]  ;;  %v15007_v29 = vld [vmem:[#allocation24_spill] sm:$0xff] }
 0x5d6   :  { %3256 = vmatpush.bf16.msra.mxu1 %v3168_v1  ;;  %v3164_v45 = vpack.c.bf16 %v14992_v19, %v3072_v15  ;;  %v2860_v13 = vadd.f32 %v10972_v42, %v14997_v4  ;;  %v2641_v15 = vmul.f32 %v14996_v32, %v14998_v25  ;;  %v2933_v22 = vadd.f32 %v10947_v49, %v2645_v2  ;;  %v15002_v16 = vld [vmem:[#allocation15_spill] sm:$0xff] }
 0x5d7   :  { %3314 = vmatpush.bf16.msra.mxu3 %v3169_v12  ;;  %v3068_v21 = vmax.f32 %v2940_v44, 0.0  ;;  %v2928_v62 = vadd.f32 %v10898_v63, %v2640_v8  ;;  %v2861_v1 = vadd.f32 %v10972_v42, %v14999_v34  ;;  %v11000_v9 = vadd.f32 %v15001_v37, %v15000_v56 }
 0x5d8   :  { %v3069_v12 = vmax.f32 %v2941_v47, 0.0  ;;  %v2929_v58 = vadd.f32 %v10898_v63, %v2641_v15  ;;  %v15003_v43 = vmax.f32 %v15002_v16, 0.0  ;;  %v15005_v44 = vmax.f32 %v15004_v23, 0.0  ;;  %v15010_v16 = vld [vmem:[#allocation36_spill] sm:$0xff]  ;;  %v15011_v23 = vld [vmem:[#allocation37_spill] sm:$0xff] }
 0x5d9   :  { %v3160_v19 = vpack.c.bf16 %v3068_v21, %v3064_v5  ;;  %v3060_v2 = vmax.f32 %v2932_v59, 0.0  ;;  %v2988_v4 = vmax.f32 %v2860_v13, 0.0  ;;  %v3061_v25 = vmax.f32 %v2933_v22, 0.0  ;;  %v11017_v21 = vpop.permute.xlu1 %2778  ;;  %v7416_v13 = vld [vmem:[%s14289_s2] sm:$0xf] }
 0x5da   :  { %3257 = vmatpush.bf16.msra.mxu1 %v3164_v45  ;;  %v3150_v24 = vpack.c.bf16 %v3046_v52, %v15003_v43  ;;  %v3151_v53 = vpack.c.bf16 %v3047_v11, %v15005_v44  ;;  %v15006_v45 = vld [vmem:[#allocation28_spill] sm:$0xff]  ;;  %v3161_v47 = vpack.c.bf16 %v3069_v12, %v3065_v17  ;;  %v3056_v52 = vmax.f32 %v2928_v62, 0.0  ;;  %v15009_v11 = vld [vmem:[#allocation135_spill] sm:$0xff]  ;;  %v15012_v62 = vld [vmem:[#allocation69_spill] sm:$0xff] }
 0x5db   :  { %3315 = vmatpush.bf16.msra.mxu3 %v3165_v33  ;;  %v11002_v20 = vpop.permute.xlu0 %2698  ;;  %v15008_v33 = vld [vmem:[#allocation134_spill] sm:$0xff]  ;;  %v2989_v56 = vmax.f32 %v2861_v1, 0.0  ;;  %v2691_v5 = vmul.f32 %v10442_v38, %v15009_v11  ;;  %v3057_v59 = vmax.f32 %v2929_v58, 0.0  ;;  %v2632_v43 = vmul.f32 %v10908_v55, %v15010_v16  ;;  %v7703_v22 = vld [vmem:[%s14289_s2 + $0x4] sm:$0xf0] }
 0x5dc   :  { %v2856_v26 = vadd.f32 %v11002_v20, %v15006_v45  ;;  %v2857_v61 = vadd.f32 %v11002_v20, %v15007_v29  ;;  %v2690_v8 = vmul.f32 %v10442_v38, %v15008_v33  ;;  %v2633_v17 = vmul.f32 %v10908_v55, %v15011_v23  ;;  %v15013_v45 = vld [vmem:[#allocation38_spill] sm:$0xff]  ;;  %v15014_v29 = vld [vmem:[#allocation39_spill] sm:$0xff]  ;;  %v15020_v23 = vld [vmem:[#allocation133_spill] sm:$0xff] }
 0x5dd   :  { %v3156_v12 = vpack.c.bf16 %v3060_v2, %v3056_v52  ;;  %v2979_v58 = vadd.f32 %v15012_v62, %v2691_v5  ;;  %v2920_v33 = vadd.f32 %v11017_v21, %v2632_v43  ;;  %v11037_v11 = vor.u32 %v7703_v22, %v7416_v13  ;;  %v15018_v5 = vld [vmem:[#allocation5_spill] sm:$0xff] }
 0x5de   :  { %3258 = vmatpush.bf16.msra.mxu1 %v3160_v19  ;;  %v2984_v15 = vmax.f32 %v2856_v26, 0.0  ;;  %v2985_v34 = vmax.f32 %v2857_v61, 0.0  ;;  %v2978_v38 = vadd.f32 %v15012_v62, %v2690_v8  ;;  %v3157_v19 = vpack.c.bf16 %v3061_v25, %v3057_v59  ;;  %v15015_v8 = vld [vmem:[#allocation68_spill] sm:$0xff]  ;;  %v7702_v62 = vld [vmem:[%s14289_s2 + $0x4] sm:$0xf] }
 0x5df   :  { %3316 = vmatpush.bf16.msra.mxu3 %v3161_v47  ;;  %v2636_v26 = vmul.f32 %v10959_v30, %v15013_v45  ;;  %v2637_v61 = vmul.f32 %v10959_v30, %v15014_v29  ;;  %v2921_v47 = vadd.f32 %v11017_v21, %v2633_v17  ;;  %v3083_v2 = vmax.f32 %v15015_v8, 0.0  ;;  %v15023_v29 = vld [vmem:[#allocation33_spill] sm:$0xff] }
 0x5e0   :  { %v3120_v1 = vpack.c.bf16 %v2988_v4, %v2984_v15  ;;  %v3121_v44 = vpack.c.bf16 %v2989_v56, %v2985_v34  ;;  %v15016_v4 = vld [vmem:[#allocation14_spill] sm:$0xff]  ;;  %v11049_v59 = vadd.f32 %v10683_v41, %v15018_v5  ;;  %v3106_v13 = vmax.f32 %v2978_v38, 0.0 }
 0x5e1   :  { %v2982_v15 = vadd.f32 %v15016_v4, %v10930_v40  ;;  %v2983_v25 = vadd.f32 %v15016_v4, %v10943_v36  ;;  %v15017_v34 = vld [vmem:[#allocation6_spill] sm:$0xff]  ;;  %v15019_v40 = vld [vmem:[#allocation71_spill] sm:$0xff]  ;;  %v3098_v36 = vmax.f32 %v10970_v54, 0.0  ;;  %v3107_v22 = vmax.f32 %v2979_v58, 0.0 }
 0x5e2   :  { %3231 = vmatpush.bf16.msra.mxu0 %v3120_v1  ;;  %3259 = vmatpush.bf16.msra.mxu1 %v3156_v12  ;;  %v3094_v56 = vmax.f32 %v15017_v34, 0.0  ;;  %v2974_v17 = vadd.f32 %v15020_v23, %v15019_v40  ;;  %v15021_v1 = vld [vmem:[#allocation8_spill] sm:$0xff]  ;;  %v7418_v54 = vld [vmem:[%s14289_s2 + $0x8] sm:$0xf0] }
 0x5e3   :  { %3289 = vmatpush.bf16.msra.mxu2 %v3121_v44  ;;  %3317 = vmatpush.bf16.msra.mxu3 %v3157_v19  ;;  %v11044_v52 = vpop.permute.xlu0 %2783  ;;  %v2975_v12 = vadd.f32 %v15020_v23, %v15021_v1  ;;  %v3049_v19 = vmax.f32 %v2921_v47, 0.0  ;;  %v3110_v38 = vmax.f32 %v2982_v15, 0.0  ;;  %v3111_v58 = vmax.f32 %v2983_v25, 0.0  ;;  %v15024_v4 = vld [vmem:[#allocation79_spill] sm:$0xff]  ;;  %v15025_v1 = vld [vmem:[#allocation141_spill] sm:$0xff] }
 0x5e4   :  { %v2924_v16 = vadd.f32 %v11044_v52, %v2636_v26  ;;  %v2925_v43 = vadd.f32 %v11044_v52, %v2637_v61  ;;  %v15022_v26 = vld [vmem:[#allocation78_spill] sm:$0xff]  ;;  %v2591_v5 = vmul.f32 %v15023_v29, %v15024_v4  ;;  %v3102_v47 = vmax.f32 %v2974_v17, 0.0 }
 0x5e5   :  { %3232 = vmatmul.bf16.vlgmr.msra.gmra.mxu0 %v11037_v11  ;;  %v2590_v61 = vmul.f32 %v15023_v29, %v15022_v26  ;;  %v3183_v40 = vpack.c.bf16 %v3111_v58, %v3107_v22  ;;  %v11076_v15 = vor.u32 %v7702_v62, %v7418_v54  ;;  %v3103_v25 = vmax.f32 %v2975_v12, 0.0  ;;  %v15026_v26 = vld [vmem:[#allocation70_spill] sm:$0xff] }
 0x5e6   :  { %3340 = vmatpush.bf16.msrb.mxu0 %v3150_v24  ;;  %v2962_v24 = vadd.f32 %v10787_v18, %v10918_v14  ;;  %v3052_v44 = vmax.f32 %v2924_v16, 0.0  ;;  %v3053_v45 = vmax.f32 %v2925_v43, 0.0  ;;  %3290 = vmatmul.bf16.vlgmr.msra.gmra.mxu2 %v11037_v11  ;;  %v2963_v16 = vadd.f32 %v10787_v18, %v10922_v57  ;;  %v15028_v18 = vld [vmem:[#allocation30_spill] sm:$0xff] }
 0x5e7   :  { %3398 = vmatpush.bf16.msrb.mxu2 %v3151_v53  ;;  %v3048_v53 = vmax.f32 %v2920_v33, 0.0  ;;  %v3182_v43 = vpack.c.bf16 %v3110_v38, %v3106_v13  ;;  %v3099_v23 = vmax.f32 %v10978_v0, 0.0  ;;  %v2878_v57 = vadd.f32 %v15028_v18, %v2590_v61  ;;  %v15029_v62 = vld [vmem:[#allocation110_spill] sm:$0xff] }
 0x5e8   :  { %v3153_v33 = vpack.c.bf16 %v3053_v45, %v3049_v19  ;;  %v2879_v13 = vadd.f32 %v15028_v18, %v2591_v5  ;;  %v3074_v22 = vmax.f32 %v11049_v59, 0.0  ;;  %v2655_v0 = vmul.f32 %v10518_v46, %v15029_v62  ;;  %v15032_v45 = vld [vmem:[#allocation4_spill] sm:$0xff]  ;;  %v15036_v5 = vld [vmem:[#allocation11_spill] sm:$0xff] }
 0x5e9   :  { %v3152_v14 = vpack.c.bf16 %v3052_v44, %v3048_v53  ;;  %v15027_v53 = vld [vmem:[#allocation109_spill] sm:$0xff]  ;;  %v15031_v44 = vld [vmem:[#allocation128_spill] sm:$0xff]  ;;  %v2939_v54 = vadd.f32 %v14984_v27, %v15032_v45  ;;  %v3178_v59 = vpack.c.bf16 %v3102_v47, %v3098_v36  ;;  %v3179_v38 = vpack.c.bf16 %v3103_v25, %v3099_v23  ;;  %v15040_v23 = vld [vmem:[#allocation127_spill] sm:$0xff] }
 0x5ea   :  { %3341 = vmatpush.bf16.msrb.mxu0 %v10957_v39  ;;  %3318 = vmatpush.bf16.msra.mxu3 %v3153_v33  ;;  %v2875_v39 = vadd.f32 %v15001_v37, %v15025_v1  ;;  %v2654_v17 = vmul.f32 %v10518_v46, %v15027_v53  ;;  %v3090_v37 = vmax.f32 %v2962_v24, 0.0  ;;  %v2938_v19 = vadd.f32 %v14984_v27, %v15031_v44  ;;  %v15034_v27 = vld [vmem:[#allocation17_spill] sm:$0xff] }
 0x5eb   :  { %3399 = vmatpush.bf16.msrb.mxu2 %v10967_v3  ;;  %3260 = vmatpush.bf16.msra.mxu1 %v3152_v14  ;;  %v2947_v3 = vadd.f32 %v10683_v41, %v15026_v26  ;;  %v15030_v41 = vld [vmem:[#allocation10_spill] sm:$0xff]  ;;  %v3091_v46 = vmax.f32 %v2963_v16, 0.0  ;;  %v3095_v24 = vmax.f32 %v10882_v35, 0.0  ;;  %v3002_v58 = vmax.f32 %v11000_v9, 0.0  ;;  %v7705_v35 = vld [vmem:[%s14289_s2 + $0x14] sm:$0xf0] }
 0x5ec   :  { %v2958_v12 = vadd.f32 %v10666_v31, %v15030_v41  ;;  %v2942_v61 = vadd.f32 %v14990_v6, %v2654_v17  ;;  %v15035_v4 = vmax.f32 %v15034_v27, 0.0  ;;  %v15037_v36 = vmax.f32 %v15036_v5, 0.0  ;;  %v15038_v16 = vld [vmem:[#allocation132_spill] sm:$0xff]  ;;  %v15047_v45 = vld [vmem:[#allocation25_spill] sm:$0xff] }
 0x5ed   :  { %3319 = vmatmul.bf16.vlgmr.msra.gmra.mxu3 %v11076_v15  ;;  %v3075_v29 = vmax.f32 %v2947_v3, 0.0  ;;  %v3006_v33 = vmax.f32 %v2878_v57, 0.0  ;;  %v3007_v47 = vmax.f32 %v2879_v13, 0.0  ;;  %v2943_v9 = vadd.f32 %v14990_v6, %v2655_v0  ;;  %v15042_v13 = vld [vmem:[#allocation18_spill] sm:$0xff]  ;;  %v15043_v6 = vld [vmem:[#allocation19_spill] sm:$0xff] }
 0x5ee   :  { %3427 = vmatpush.bf16.msrb.mxu3 %v3183_v40  ;;  %3342 = vmatpush.bf16.msrb.mxu0 %v10888_v48  ;;  %v15033_v48 = vld [vmem:[#allocation137_spill] sm:$0xff]  ;;  %v3135_v14 = vpack.c.bf16 %v15037_v36, %v15035_v4  ;;  %v3174_v40 = vpack.c.bf16 %v3094_v56, %v3090_v37  ;;  %v3003_v25 = vmax.f32 %v2875_v39, 0.0  ;;  %v15041_v1 = vmax.f32 %v15040_v23, 0.0  ;;  %v15044_v39 = vld [vmem:[#allocation2_spill] sm:$0xff]  ;;  %v15053_v36 = vld [vmem:[#allocation104_spill] sm:$0xff] }
 0x5ef   :  { %3369 = vmatpush.bf16.msrb.mxu1 %v3182_v43  ;;  %3400 = vmatpush.bf16.msrb.mxu2 %v10892_v28  ;;  %v2959_v28 = vadd.f32 %v10666_v31, %v15033_v48  ;;  %v7424_v31 = vld [vmem:[%s14289_s2 + $0x10] sm:$0xf]  ;;  %v15039_v43 = vld [vmem:[#allocation3_spill] sm:$0xff]  ;;  %v3066_v3 = vmax.f32 %v2938_v19, 0.0  ;;  %v3175_v53 = vpack.c.bf16 %v3095_v24, %v3091_v46  ;;  %v3086_v17 = vmax.f32 %v2958_v12, 0.0  ;;  %v15046_v12 = vld [vmem:[#allocation130_spill] sm:$0xff] }
 0x5f0   :  { %3261 = vmatmul.bf16.vlgmr.msra.gmra.mxu1 %v11076_v15  ;;  %v3166_v26 = vpack.c.bf16 %v15041_v1, %v3074_v22  ;;  %v3067_v57 = vmax.f32 %v2939_v54, 0.0  ;;  %v2866_v62 = vadd.f32 %v10900_v51, %v15042_v13  ;;  %v2867_v0 = vadd.f32 %v10900_v51, %v15043_v6  ;;  %v15049_v24 = vld [vmem:[#allocation103_spill] sm:$0xff]  ;;  %v15052_v4 = vld [vmem:[#allocation105_spill] sm:$0xff] }
 0x5f1   :  { %v3087_v18 = vmax.f32 %v2959_v28, 0.0  ;;  %v11126_v41 = vor.u32 %v7705_v35, %v7424_v31  ;;  %v3070_v44 = vmax.f32 %v2942_v61, 0.0  ;;  %v3130_v34 = vpack.c.bf16 %v3006_v33, %v3002_v58  ;;  %v15054_v33 = vld [vmem:[#allocation106_spill] sm:$0xff] }
 0x5f2   :  { %3428 = vmatpush.bf16.msrb.mxu3 %v3179_v38  ;;  %3343 = vmatpush.bf16.msrb.mxu0 %v15038_v16  ;;  %v3131_v56 = vpack.c.bf16 %v3007_v47, %v3003_v25  ;;  %v15045_v22 = vmax.f32 %v15044_v39, 0.0  ;;  %v3071_v19 = vmax.f32 %v2943_v9, 0.0  ;;  %v2870_v54 = vadd.f32 %v10857_v60, %v15047_v45  ;;  %v15055_v9 = vld [vmem:[#allocation29_spill] sm:$0xff]  ;;  %v7432_v45 = vld [vmem:[%s14289_s2 + $0x20] sm:$0xf] }
 0x5f3   :  { %3370 = vmatpush.bf16.msrb.mxu1 %v3178_v59  ;;  %3401 = vmatpush.bf16.msrb.mxu2 %v15039_v43  ;;  %v15048_v59 = vld [vmem:[#allocation20_spill] sm:$0xff]  ;;  %v3162_v38 = vpack.c.bf16 %v3070_v44, %v3066_v3  ;;  %v3170_v46 = vpack.c.bf16 %v3086_v17, %v3082_v10  ;;  %v3171_v48 = vpack.c.bf16 %v3087_v18, %v3083_v2  ;;  %v2995_v61 = vmax.f32 %v2867_v0, 0.0  ;;  %v15050_v10 = vld [vmem:[#allocation27_spill] sm:$0xff]  ;;  %v15056_v43 = vld [vmem:[#allocation26_spill] sm:$0xff] }
 0x5f4   :  { %v3167_v37 = vpack.c.bf16 %v15045_v22, %v3075_v29  ;;  %v2871_v51 = vadd.f32 %v10857_v60, %v15048_v59  ;;  %v3163_v28 = vpack.c.bf16 %v3071_v19, %v3067_v57  ;;  %v2642_v58 = vmul.f32 %v14996_v32, %v15049_v24  ;;  %v7704_v60 = vld [vmem:[%s14289_s2 + $0x14] sm:$0xf]  ;;  %v15057_v18 = vld [vmem:[#allocation101_spill] sm:$0xff]  ;;  %v15059_v0 = vld [vmem:[#allocation99_spill] sm:$0xff] }
 0x5f5   :  { %3237 = vmatmul.bf16.gmra.mxu0 %v11126_v41  ;;  %v2994_v29 = vmax.f32 %v2866_v62, 0.0  ;;  %v2858_v8 = vadd.f32 %v11002_v20, %v15050_v10  ;;  %v15051_v2 = vld [vmem:[#allocation136_spill] sm:$0xff]  ;;  %v2646_v5 = vmul.f32 %v10842_v7, %v15052_v4  ;;  %v2647_v47 = vmul.f32 %v10842_v7, %v15054_v33 }
 0x5f6   :  { %3429 = vmatpush.bf16.msrb.mxu3 %v3175_v53  ;;  %3344 = vmatpush.bf16.msrb.mxu0 %v15046_v12  ;;  %v2859_v27 = vadd.f32 %v11002_v20, %v15051_v2  ;;  %v2998_v31 = vmax.f32 %v2870_v54, 0.0  ;;  %v2999_v35 = vmax.f32 %v2871_v51, 0.0  ;;  %v2862_v16 = vadd.f32 %v10972_v42, %v15055_v9  ;;  %v15060_v44 = vld [vmem:[#allocation100_spill] sm:$0xff]  ;;  %v7707_v54 = vld [vmem:[%s14289_s2 + $0x24] sm:$0xf0] }
 0x5f7   :  { %3371 = vmatpush.bf16.msrb.mxu1 %v3174_v40  ;;  %3402 = vmatpush.bf16.msrb.mxu2 %v3135_v14  ;;  %v2643_v14 = vmul.f32 %v14996_v32, %v15053_v36  ;;  %v2863_v20 = vadd.f32 %v10972_v42, %v15056_v43  ;;  %v11163_v40 = vor.u32 %v7704_v60, %v7426_v50  ;;  %v2986_v3 = vmax.f32 %v2858_v8, 0.0  ;;  %v15058_v42 = vld [vmem:[#allocation102_spill] sm:$0xff]  ;;  %v7440_v60 = vld [vmem:[%s14289_s2 + $0x30] sm:$0xf]  ;;  %v7709_v50 = vld [vmem:[%s14289_s2 + $0x34] sm:$0xf0] }
 0x5f8   :  { %3295 = vmatmul.bf16.gmra.mxu2 %v11126_v41  ;;  %v2930_v25 = vadd.f32 %v10898_v63, %v2642_v58  ;;  %v2934_v23 = vadd.f32 %v10947_v49, %v2646_v5  ;;  %v2935_v32 = vadd.f32 %v10947_v49, %v2647_v47  ;;  %v3126_v1 = vpack.c.bf16 %v2998_v31, %v2994_v29  ;;  %v7706_v58 = vld [vmem:[%s14289_s2 + $0x24] sm:$0xf]  ;;  %v7434_v29 = vld [vmem:[%s14289_s2 + $0x28] sm:$0xf0]  ;;  %v7708_v8 = vld [vmem:[%s14289_s2 + $0x34] sm:$0xf] }
 0x5f9   :  { %v3127_v7 = vpack.c.bf16 %v2999_v35, %v2995_v61  ;;  %v2987_v53 = vmax.f32 %v2859_v27, 0.0  ;;  %v2931_v17 = vadd.f32 %v10898_v63, %v2643_v14  ;;  %v2638_v57 = vmul.f32 %v10959_v30, %v15057_v18  ;;  %v7442_v2 = vld [vmem:[%s14289_s2 + $0x38] sm:$0xf0] }
 0x5fa   :  { %3430 = vmatpush.bf16.msrb.mxu3 %v3171_v48  ;;  %3345 = vmatpush.bf16.msrb.mxu0 %v3130_v34  ;;  %v2639_v13 = vmul.f32 %v10959_v30, %v15058_v42  ;;  %v2990_v62 = vmax.f32 %v2862_v16, 0.0  ;;  %v2991_v6 = vmax.f32 %v2863_v20, 0.0  ;;  %v2634_v49 = vmul.f32 %v10908_v55, %v15059_v0 }
 0x5fb   :  { %3372 = vmatpush.bf16.msrb.mxu1 %v3170_v46  ;;  %3403 = vmatpush.bf16.msrb.mxu2 %v3131_v56  ;;  %v2635_v34 = vmul.f32 %v10908_v55, %v15060_v44  ;;  %v3062_v63 = vmax.f32 %v2934_v23, 0.0  ;;  %v2926_v56 = vadd.f32 %v11044_v52, %v2638_v57  ;;  %v3059_v19 = vmax.f32 %v2931_v17, 0.0 }
 0x5fc   :  { %v2927_v30 = vadd.f32 %v11044_v52, %v2639_v13  ;;  %v3122_v39 = vpack.c.bf16 %v2990_v62, %v2986_v3  ;;  %v3123_v22 = vpack.c.bf16 %v2991_v6, %v2987_v53  ;;  %v2922_v12 = vadd.f32 %v11017_v21, %v2634_v49 }
 0x5fd   :  { %3324 = vmatmul.bf16.gmra.mxu3 %v11163_v40  ;;  %v2923_v55 = vadd.f32 %v11017_v21, %v2635_v34  ;;  %v3054_v51 = vmax.f32 %v2926_v56, 0.0  ;;  %v7433_v46 = vor.u32 %v7707_v54, %v7432_v45  ;;  %v7437_v61 = vor.u32 %v7706_v58, %v7434_v29 }
 0x5fe   :  { %3431 = vmatpush.bf16.msrb.mxu3 %v3167_v37  ;;  %3346 = vmatpush.bf16.msrb.mxu0 %v3126_v1  ;;  %v3058_v37 = vmax.f32 %v2930_v25, 0.0  ;;  %v3050_v48 = vmax.f32 %v2922_v12, 0.0  ;;  %v7441_v10 = vor.u32 %v7709_v50, %v7440_v60  ;;  %v7445_v27 = vor.u32 %v7708_v8, %v7442_v2 }
 0x5ff   :  { %3373 = vmatpush.bf16.msrb.mxu1 %v3166_v26  ;;  %3404 = vmatpush.bf16.msrb.mxu2 %v3127_v7  ;;  %v3063_v26 = vmax.f32 %v2935_v32, 0.0 }
 0x600   :  { %3266 = vmatmul.bf16.gmra.mxu1 %v11163_v40  ;;  %v3158_v52 = vpack.c.bf16 %v3062_v63, %v3058_v37  ;;  %v3154_v21 = vpack.c.bf16 %v3054_v51, %v3050_v48 }
 0x601   :  { %v3159_v59 = vpack.c.bf16 %v3063_v26, %v3059_v19 }
 0x602   :  { %3432 = vmatpush.bf16.msrb.mxu3 %v3163_v28  ;;  %3347 = vmatpush.bf16.msrb.mxu0 %v3122_v39  ;;  %v3051_v28 = vmax.f32 %v2923_v55, 0.0 }
 0x603   :  { %3374 = vmatpush.bf16.msrb.mxu1 %v3162_v38  ;;  %3405 = vmatpush.bf16.msrb.mxu2 %v3123_v22  ;;  %v3055_v38 = vmax.f32 %v2927_v30, 0.0 }
 0x605   :  { %v3155_v24 = vpack.c.bf16 %v3055_v38, %v3051_v28  ;;  %3242 = vmatmul.bf16.gmra.mxu0 %v7433_v46 }
 0x606   :  { %3433 = vmatpush.bf16.msrb.mxu3 %v3159_v59 }
 0x607   :  { %3375 = vmatpush.bf16.msrb.mxu1 %v3158_v52 }
 0x608   :  { %3300 = vmatmul.bf16.gmra.mxu2 %v7433_v46 }
 0x60a   :  { %3434 = vmatpush.bf16.msrb.mxu3 %v3155_v24 }
 0x60b   :  { %3376 = vmatpush.bf16.msrb.mxu1 %v3154_v21 }
 0x60d   :  { %3329 = vmatmul.bf16.gmra.mxu3 %v7437_v61 }
 0x610   :  { %3271 = vmatmul.bf16.gmra.mxu1 %v7437_v61 }
 0x615   :  { %3247 = vmatmul.bf16.gmra.mxu0 %v7441_v10 }
 0x618   :  { %3305 = vmatmul.bf16.gmra.mxu2 %v7441_v10 }
 0x61d   :  { %3334 = vmatmul.bf16.gmra.mxu3 %v7445_v27 }
 0x620   :  { %3276 = vmatmul.bf16.gmra.mxu1 %v7445_v27 }
 0x625   :  { %3348 = vmatmul.bf16.vlgmr.msrb.gmra.mxu0 %v11037_v11 }
 0x628   :  { %3406 = vmatmul.bf16.vlgmr.msrb.gmra.mxu2 %v11037_v11 }
 0x62d   :  { %3435 = vmatmul.bf16.vlgmr.msrb.gmra.mxu3 %v11076_v15 }
 0x630   :  { %3377 = vmatmul.bf16.vlgmr.msrb.gmra.mxu1 %v11076_v15 }
 0x635   :  { %3353 = vmatmul.bf16.gmra.mxu0 %v11126_v41 }
 0x638   :  { %3411 = vmatmul.bf16.gmra.mxu2 %v11126_v41 }
 0x63d   :  { %3440 = vmatmul.bf16.gmra.mxu3 %v11163_v40 }
 0x640   :  { %3382 = vmatmul.bf16.gmra.mxu1 %v11163_v40 }
 0x645   :  { %3358 = vmatmul.bf16.gmra.mxu0 %v7433_v46 }
 0x648   :  { %3416 = vmatmul.bf16.gmra.mxu2 %v7433_v46 }
 0x64d   :  { %3445 = vmatmul.bf16.gmra.mxu3 %v7437_v61 }
 0x650   :  { %3387 = vmatmul.bf16.gmra.mxu1 %v7437_v61 }
 0x655   :  { %3363 = vmatmul.bf16.gmra.mxu0 %v7441_v10 }
 0x658   :  { %3421 = vmatmul.bf16.gmra.mxu2 %v7441_v10 }
 0x65d   :  { %3450 = vmatmul.bf16.gmra.mxu3 %v7445_v27 }
 0x660   :  { %3392 = vmatmul.bf16.gmra.mxu1 %v7445_v27 }
 0x662   :  { %v3233_v11 = vpop.f32.mrf.mxu0 }
 0x669   :  { %v3291_v4 = vpop.f32.mrf.mxu2 }
 0x66a   :  { %v11215_v15 = vpop.f32.mrf.mxu0 }
 0x66d   :  { %v3262_v5 = vpop.f32.mrf.mxu1 }
 0x66e   :  { %v11217_v36 = vadd.f32 %v3262_v5, %v3233_v11 }
 0x670   :  { %v3320_v41 = vpop.f32.mrf.mxu3 }
 0x671   :  { %v11219_v14 = vadd.f32 %v3320_v41, %v3291_v4  ;;  %v11221_v33 = vpop.f32.mrf.mxu2 }
 0x672   :  { %v3238_v31 = vpop.f32.mrf.mxu0 }
 0x675   :  { %v11223_v47 = vpop.f32.mrf.mxu1 }
 0x678   :  { %v11225_v35 = vpop.f32.mrf.mxu3 }
 0x67a   :  { %v3240_v43 = vpop.f32.mrf.mxu0 }
 0x67b   :  { %v3296_v9 = vpop.f32.mrf.mxu2 }
 0x67d   :  { %v3267_v16 = vpop.f32.mrf.mxu1 }
 0x67e   :  { %v11261_v59 = vadd.f32 %v3267_v16, %v3238_v31 }
 0x680   :  { %v3325_v20 = vpop.f32.mrf.mxu3 }
 0x681   :  { %v11259_v54 = vadd.f32 %v3325_v20, %v3296_v9 }
 0x682   :  { %v3243_v23 = vpop.f32.mrf.mxu0 }
 0x683   :  { %v3298_v40 = vpop.f32.mrf.mxu2  ;;  %v3466_v38 = vadd.f32 %v11259_v54, %v11261_v59 }
 0x685   :  { %v3269_v25 = vpop.f32.mrf.mxu1 }
 0x686   :  { %v11273_v61 = vadd.f32 %v3269_v25, %v3240_v43 }
 0x688   :  { %v3327_v32 = vpop.f32.mrf.mxu3 }
 0x689   :  { %v11270_v58 = vadd.f32 %v3327_v32, %v3298_v40 }
 0x68a   :  { %v3245_v3 = vpop.f32.mrf.mxu0 }
 0x68b   :  { %v3301_v1 = vpop.f32.mrf.mxu2  ;;  %v3471_v10 = vadd.f32 %v11270_v58, %v11273_v61 }
 0x68d   :  { %v3272_v7 = vpop.f32.mrf.mxu1 }
 0x68e   :  { %v11284_v41 = vadd.f32 %v3272_v7, %v3243_v23 }
 0x690   :  { %v3330_v53 = vpop.f32.mrf.mxu3  ;;  %v3520_v43 = vmul.f32 %v11284_v41, %v11284_v41 }
 0x691   :  { %v11279_v2 = vadd.f32 %v3330_v53, %v3301_v1 }
 0x692   :  { %v11227_v57 = vpop.f32.mrf.mxu0 }
 0x693   :  { %v3303_v17 = vpop.f32.mrf.mxu2  ;;  %v3521_v16 = vmul.f32 %v11279_v2, %v11279_v2  ;;  %v3476_v20 = vadd.f32 %v11279_v2, %v11284_v41 }
 0x695   :  { %v3274_v18 = vpop.f32.mrf.mxu1  ;;  %v3556_v32 = vadd.f32 %v3521_v16, %v3520_v43 }
 0x698   :  { %v3332_v42 = vpop.f32.mrf.mxu3 }
 0x699   :  { %v11297_v1 = vadd.f32 %v3332_v42, %v3303_v17 }
 0x69a   :  { %v11233_v6 = vpop.f32.mrf.mxu0 }
 0x69b   :  { %v11229_v13 = vpop.f32.mrf.mxu2  ;;  %v3525_v17 = vmul.f32 %v11297_v1, %v11297_v1 }
 0x69d   :  { %v11231_v62 = vpop.f32.mrf.mxu1 }
 0x6a0   :  { %v11235_v0 = vpop.f32.mrf.mxu3 }
 0x6a2   :  { %v11241_v34 = vpop.f32.mrf.mxu0 }
 0x6a3   :  { %v11237_v49 = vpop.f32.mrf.mxu2 }
 0x6a5   :  { %v11239_v44 = vpop.f32.mrf.mxu1 }
 0x6a8   :  { %v11243_v63 = vpop.f32.mrf.mxu3 }
 0x6aa   :  { %v11249_v30 = vpop.f32.mrf.mxu0 }
 0x6ab   :  { %v11245_v26 = vpop.f32.mrf.mxu2 }
 0x6ad   :  { %v11247_v56 = vpop.f32.mrf.mxu1 }
 0x6b0   :  { %v11251_v39 = vpop.f32.mrf.mxu3 }
 0x6b2   :  { %v3354_v19 = vpop.f32.mrf.mxu0 }
 0x6b3   :  { %v11253_v22 = vpop.f32.mrf.mxu2 }
 0x6b5   :  { %v11255_v37 = vpop.f32.mrf.mxu1 }
 0x6b8   :  { %v11257_v12 = vpop.f32.mrf.mxu3 }
 0x6ba   :  { %v3356_v52 = vpop.f32.mrf.mxu0 }
 0x6bb   :  { %v3412_v55 = vpop.f32.mrf.mxu2 }
 0x6bd   :  { %v3383_v45 = vpop.f32.mrf.mxu1 }
 0x6be   :  { %v11263_v51 = vadd.f32 %v3383_v45, %v3354_v19  ;;  %v11302_v19 = vadd.f32 %v3274_v18, %v3245_v3 }
 0x6c0   :  { %v3441_v46 = vpop.f32.mrf.mxu3  ;;  %v3467_v48 = vadd.f32 %v3466_v38, %v11263_v51  ;;  %v3481_v3 = vadd.f32 %v11297_v1, %v11302_v19 }
 0x6c1   :  { %v11268_v28 = vadd.f32 %v3441_v46, %v3412_v55 }
 0x6c2   :  { %v3359_v50 = vpop.f32.mrf.mxu0 }
 0x6c3   :  { %v3414_v21 = vpop.f32.mrf.mxu2  ;;  %v3468_v29 = vadd.f32 %v3467_v48, %v11268_v28 }
 0x6c5   :  { %v3385_v24 = vpop.f32.mrf.mxu1  ;;  %3469 = vadd.xlane.f32.xlu0 %v3468_v29  ;;  %v11319_v29 = vadd.f32 %v11235_v0, %v11229_v13 }
 0x6c6   :  { %v11275_v60 = vadd.f32 %v3385_v24, %v3356_v52 }
 0x6c7   :  { %v3529_v0 = vmul.f32 %v11319_v29, %v11319_v29 }
 0x6c8   :  { %v3443_v8 = vpop.f32.mrf.mxu3  ;;  %v3472_v11 = vadd.f32 %v3471_v10, %v11275_v60 }
 0x6c9   :  { %v11281_v27 = vadd.f32 %v3443_v8, %v3414_v21  ;;  %v3524_v21 = vmul.f32 %v11302_v19, %v11302_v19 }
 0x6ca   :  { %v3361_v23 = vpop.f32.mrf.mxu0 }
 0x6cb   :  { %v3417_v5 = vpop.f32.mrf.mxu2  ;;  %v3473_v9 = vadd.f32 %v3472_v11, %v11281_v27  ;;  %v3561_v8 = vadd.f32 %v3525_v17, %v3524_v21  ;;  %v11326_v11 = vadd.f32 %v11231_v62, %v11227_v57  ;;  %v11355_v21 = vadd.f32 %v11247_v56, %v11241_v34 }
 0x6cc   :  { %v3516_v34 = vmul.f32 %v11273_v61, %v11273_v61 }
 0x6cd   :  { %v3388_v4 = vpop.f32.mrf.mxu1  ;;  %3474 = vadd.xlane.f32.xlu2 %v3473_v9  ;;  %v3528_v57 = vmul.f32 %v11326_v11, %v11326_v11  ;;  %v3486_v62 = vadd.f32 %v11319_v29, %v11326_v11  ;;  %15061 = vst [vmem:[#allocation131_spill] sm:$0xff] %v11355_v21 }
 0x6ce   :  { %v11286_v31 = vadd.f32 %v3388_v4, %v3359_v50 }
 0x6d0   :  { %v3522_v40 = vmul.f32 %v11286_v31, %v11286_v31  ;;  %v3446_v25 = vpop.f32.mrf.mxu3  ;;  %v3477_v7 = vadd.f32 %v3476_v20, %v11286_v31 }
 0x6d1   :  { %v11300_v53 = vadd.f32 %v3446_v25, %v3417_v5 }
 0x6d2   :  { %v3557_v46 = vadd.f32 %v3556_v32, %v3522_v40  ;;  %v3364_v4 = vpop.f32.mrf.mxu0  ;;  %v3566_v32 = vadd.f32 %v3529_v0, %v3528_v57  ;;  %v3512_v57 = vmul.f32 %v11261_v59, %v11261_v59 }
 0x6d3   :  { %v3523_v45 = vmul.f32 %v11300_v53, %v11300_v53  ;;  %v3478_v38 = vadd.f32 %v3477_v7, %v11300_v53  ;;  %v3419_v48 = vpop.f32.mrf.mxu2 }
 0x6d5   :  { %v3390_v55 = vpop.f32.mrf.mxu1  ;;  %3479 = vadd.xlane.f32.xlu1 %v3478_v38  ;;  %v3558_v42 = vadd.f32 %v3557_v46, %v3523_v45  ;;  %v11346_v38 = vadd.f32 %v11243_v63, %v11237_v49 }
 0x6d6   :  { %v11306_v52 = vadd.f32 %v3390_v55, %v3361_v23 }
 0x6d7   :  { %3559 = vadd.xlane.f32.xlu2 %v3558_v42  ;;  %v3517_v42 = vmul.f32 %v11270_v58, %v11270_v58 }
 0x6d8   :  { %v3526_v18 = vmul.f32 %v11306_v52, %v11306_v52  ;;  %v3448_v24 = vpop.f32.mrf.mxu3  ;;  %v3482_v10 = vadd.f32 %v3481_v3, %v11306_v52 }
 0x6d9   :  { %v11321_v50 = vadd.f32 %v3448_v24, %v3419_v48  ;;  %v3456_v24 = vadd.f32 %v11219_v14, %v11217_v36 }
 0x6da   :  { %v3562_v13 = vadd.f32 %v3561_v8, %v3526_v18  ;;  %v3366_v3 = vpop.f32.mrf.mxu0  ;;  %v11359_v18 = vadd.f32 %v11239_v44, %v11233_v6  ;;  %v11375_v6 = vadd.f32 %v11251_v39, %v11245_v26  ;;  %v3518_v44 = vmul.f32 %v11275_v60, %v11275_v60 }
 0x6db   :  { %v3483_v9 = vadd.f32 %v3482_v10, %v11321_v50  ;;  %v3527_v43 = vmul.f32 %v11321_v50, %v11321_v50  ;;  %v3422_v40 = vpop.f32.mrf.mxu2  ;;  %v11367_v10 = vadd.f32 %v11225_v35, %v11221_v33  ;;  %v11381_v8 = vadd.f32 %v11223_v47, %v11215_v15 }
 0x6dc   :  { %v3491_v56 = vadd.f32 %v11346_v38, %v11359_v18  ;;  %15063 = vst [vmem:[#allocation74_spill] sm:$0xff] %v11375_v6  ;;  %v3457_v33 = vadd.f32 %v3456_v24, %v11355_v21  ;;  %v3519_v39 = vmul.f32 %v11281_v27, %v11281_v27  ;;  %v3513_v47 = vmul.f32 %v11259_v54, %v11259_v54 }
 0x6dd   :  { %v3393_v5 = vpop.f32.mrf.mxu1  ;;  %3484 = vadd.xlane.f32.xlu0 %v3483_v9  ;;  %v3563_v20 = vadd.f32 %v3562_v13, %v3527_v43  ;;  %15062 = vst [vmem:[#allocation9_spill] sm:$0xff] %v11367_v10  ;;  %v11386_v9 = vadd.f32 %v11255_v37, %v11249_v30  ;;  %v3509_v15 = vmul.f32 %v11367_v10, %v11367_v10 }
 0x6de   :  { %v11329_v16 = vadd.f32 %v3393_v5, %v3364_v4  ;;  %15064 = vst [vmem:[#allocation75_spill] sm:$0xff] %v11381_v8  ;;  %v3551_v5 = vadd.f32 %v3517_v42, %v3516_v34  ;;  %v11399_v13 = vadd.f32 %v11257_v12, %v11253_v22  ;;  %v3458_v37 = vadd.f32 %v3457_v33, %v11375_v6 }
 0x6df   :  { %3564 = vadd.xlane.f32.xlu1 %v3563_v20  ;;  %15065 = vst [vmem:[#allocation7_spill] sm:$0xff] %v11386_v9  ;;  %v3505_v20 = vmul.f32 %v11219_v14, %v11219_v14  ;;  %v3514_v22 = vmul.f32 %v11263_v51, %v11263_v51 }
 0x6e0   :  { %v3530_v25 = vmul.f32 %v11329_v16, %v11329_v16  ;;  %v3451_v23 = vpop.f32.mrf.mxu3  ;;  %v3487_v7 = vadd.f32 %v3486_v62, %v11329_v16  ;;  %15066 = vst [vmem:[#allocation76_spill] sm:$0xff] %v11399_v13  ;;  %v3552_v0 = vadd.f32 %v3551_v5, %v3518_v44  ;;  %v3510_v62 = vmul.f32 %v11386_v9, %v11386_v9 }
 0x6e1   :  { %v11342_v55 = vadd.f32 %v3451_v23, %v3422_v40  ;;  %v3508_v40 = vmul.f32 %v11381_v8, %v11381_v8  ;;  %v3532_v44 = vmul.f32 %v11359_v18, %v11359_v18 }
 0x6e2   :  { %v3567_v17 = vadd.f32 %v3566_v32, %v3530_v25  ;;  %v3553_v12 = vadd.f32 %v3552_v0, %v3519_v39  ;;  %v3504_v25 = vmul.f32 %v11217_v36, %v11217_v36  ;;  %v3546_v32 = vadd.f32 %v3513_v47, %v3512_v57 }
 0x6e3   :  { %v3531_v46 = vmul.f32 %v11342_v55, %v11342_v55  ;;  %v3488_v48 = vadd.f32 %v3487_v7, %v11342_v55  ;;  %v3424_v35 = vpop.f32.mrf.mxu2  ;;  %v3541_v23 = vadd.f32 %v3509_v15, %v3508_v40  ;;  %v3506_v7 = vmul.f32 %v11355_v21, %v11355_v21  ;;  %v15067_v40 = vld [vmem:[#allocation97_spill] sm:$0xff] }
 0x6e4   :  { %v3547_v42 = vadd.f32 %v3546_v32, %v3514_v22 }
 0x6e5   :  { %v3395_v45 = vpop.f32.mrf.mxu1  ;;  %3489 = vadd.xlane.f32.xlu2 %v3488_v48  ;;  %v3568_v63 = vadd.f32 %v3567_v17, %v3531_v46  ;;  %v3511_v46 = vmul.f32 %v11399_v13, %v11399_v13  ;;  %v3536_v48 = vadd.f32 %v3505_v20, %v3504_v25  ;;  %v3507_v17 = vmul.f32 %v11375_v6, %v11375_v6 }
 0x6e6   :  { %v11361_v49 = vadd.f32 %v3395_v45, %v3366_v3  ;;  %v3515_v45 = vmul.f32 %v11268_v28, %v11268_v28  ;;  %v3542_v3 = vadd.f32 %v3541_v23, %v3510_v62 }
 0x6e7   :  { %3569 = vadd.xlane.f32.xlu0 %v3568_v63  ;;  %v3533_v63 = vmul.f32 %v11346_v38, %v11346_v38 }
 0x6e8   :  { %v3453_v4 = vpop.f32.mrf.mxu3  ;;  %v3492_v26 = vadd.f32 %v3491_v56, %v11361_v49  ;;  %v3548_v24 = vadd.f32 %v3547_v42, %v3515_v45  ;;  %v3543_v34 = vadd.f32 %v3542_v3, %v3511_v46  ;;  %v3537_v56 = vadd.f32 %v3536_v48, %v3506_v7 }
 0x6e9   :  { %v11388_v43 = vadd.f32 %v3453_v4, %v3424_v35  ;;  %v3534_v33 = vmul.f32 %v11361_v49, %v11361_v49  ;;  %v3461_v4 = vadd.f32 %v11367_v10, %v11381_v8 }
 0x6ea   :  { %v3538_v35 = vadd.f32 %v3537_v56, %v3507_v17 }
 0x6eb   :  { %v3493_v30 = vadd.f32 %v3492_v26, %v11388_v43  ;;  %v3535_v5 = vmul.f32 %v11388_v43, %v11388_v43  ;;  %v3571_v26 = vadd.f32 %v3533_v63, %v3532_v44  ;;  %v3462_v15 = vadd.f32 %v3461_v4, %v11386_v9 }
 0x6ed   :  { %3494 = vadd.xlane.f32.xlu1 %v3493_v30  ;;  %3459 = vadd.xlane.f32.xlu2 %v3458_v37  ;;  %v3572_v39 = vadd.f32 %v3571_v26, %v3534_v33  ;;  %v3463_v30 = vadd.f32 %v3462_v15, %v11399_v13 }
 0x6ef   :  { %3554 = vadd.xlane.f32.xlu0 %v3553_v12  ;;  %v3573_v47 = vadd.f32 %v3572_v39, %v3535_v5 }
 0x6f5   :  { %3549 = vadd.xlane.f32.xlu1 %v3548_v24  ;;  %3544 = vadd.xlane.f32.xlu2 %v3543_v34 }
 0x6f7   :  { %3539 = vadd.xlane.f32.xlu0 %v3538_v35 }
 0x6fd   :  { %3574 = vadd.xlane.f32.xlu2 %v3573_v47  ;;  %3464 = vadd.xlane.f32.xlu1 %v3463_v30 }
 0x738   :  { %v3470_v0 = vpop.xlane.xlu0 %3469 }
 0x740   :  { %v3475_v37 = vpop.xlane.xlu2 %3474 }
 0x741   :  { %v11452_v5 = vmul.f32 %v3475_v37, %v15067_v40 }
 0x748   :  { %v3480_v20 = vpop.xlane.xlu1 %3479 }
 0x749   :  { %v11436_v57 = vmul.f32 %v3480_v20, %v15067_v40 }
 0x74a   :  { %v3560_v62 = vpop.xlane.xlu2 %3559 }
 0x74b   :  { %v3604_v23 = vmul.f32 %v11436_v57, %v11436_v57  ;;  %v3596_v32 = vmul.f32 %v3560_v62, %v15067_v40  ;;  %v3603_v62 = vmul.f32 %v11452_v5, %v11452_v5 }
 0x74d   :  { %v3612_v48 = vsub.f32 %v3596_v32, %v3604_v23  ;;  %v11461_v23 = vmul.f32 %v3470_v0, %v15067_v40 }
 0x74f   :  { %v3620_v34 = vmax.f32 %v3612_v48, 0.0 }
 0x750   :  { %v3485_v22 = vpop.xlane.xlu0 %3484 }
 0x751   :  { %v3589_v12 = vmul.f32 %v3485_v22, %v15067_v40  ;;  %v11449_v35 = vadd.f32 1e-05, %v3620_v34 }
 0x752   :  { %v3565_v25 = vpop.xlane.xlu1 %3564 }
 0x753   :  { %v3605_v7 = vmul.f32 %v3589_v12, %v3589_v12  ;;  %v3597_v45 = vmul.f32 %v3565_v25, %v15067_v40  ;;  %vm3678_vm9 = vweird.f32 %v11449_v35 }
 0x755   :  { %v3613_v46 = vsub.f32 %v3597_v45, %v3605_v7 }
 0x757   :  { %v3621_v17 = vmax.f32 %v3613_v46, 0.0 }
 0x758   :  { %v3490_v42 = vpop.xlane.xlu2 %3489 }
 0x759   :  { %v3629_v3 = vadd.f32 1e-05, %v3621_v17  ;;  %v11444_v63 = vmul.f32 %v3490_v42, %v15067_v40 }
 0x75a   :  { %v3570_v24 = vpop.xlane.xlu0 %3569 }
 0x75b   :  { %7878 = vrsqrt.f32 %v3629_v3  ;;  %v3606_v56 = vmul.f32 %v11444_v63, %v11444_v63  ;;  %v3598_v44 = vmul.f32 %v3570_v24, %v15067_v40  ;;  %v3602_v24 = vmul.f32 %v11461_v23, %v11461_v23 }
 0x75c   :  { %7880 = vrsqrt.f32 %v11449_v35  ;;  %vm3688_vm2 = vweird.f32 %v3629_v3 }
 0x75d   :  { %v3614_v33 = vsub.f32 %v3598_v44, %v3606_v56 }
 0x75f   :  { %v3622_v4 = vmax.f32 %v3614_v33, 0.0 }
 0x760   :  { %v3495_v26 = vpop.xlane.xlu1 %3494  ;;  %v3460_v39 = vpop.xlane.xlu2 %3459 }
 0x761   :  { %v7879_v15 = vpop.eup %7878  ;;  %v11455_v20 = vadd.f32 1e-05, %v3622_v4  ;;  %v11465_v7 = vmul.f32 %v3460_v39, %v15067_v40 }
 0x762   :  { %v3683_v47 = vmul.f32 %v7879_v15, %v3629_v3  ;;  %v3555_v30 = vpop.xlane.xlu0 %3554  ;;  %vm3689_vm1 = vweird.f32 %v7879_v15  ;;  %v11467_v42 = vpop.eup %7880 }
 0x763   :  { %v3595_v25 = vmul.f32 %v3555_v30, %v15067_v40  ;;  %7882 = vrsqrt.f32 %v11455_v20  ;;  %vm3690_vm3 = vmor %vm3688_vm2, %vm3689_vm1  ;;  %v3600_v33 = vmul.f32 %v11465_v7, %v11465_v7  ;;  %vm3679_vm7 = vweird.f32 %v11467_v42 }
 0x764   :  { %v3684_v22 = vmul.f32 %v7879_v15, %v3683_v47  ;;  %v3673_v47 = vmul.f32 %v11467_v42, %v11449_v35  ;;  %vm11534_vm10 = vmor %vm3678_vm9, %vm3679_vm7  ;;  %vm3698_vm14 = vweird.f32 %v11455_v20  ;;  %vm3988_vm9 = vcmask 523264  }
 0x765   :  { %v3611_v32 = vsub.f32 %v3595_v25, %v3603_v62  ;;  %v11485_v25 = vld [vmem:[%s14288_s5 + $0x28] sm:$0xff] }
 0x766   :  { %v3685_v37 = vmul.f32 0.5, %v3684_v22  ;;  %v11480_v22 = vmul.f32 %v3495_v26, %v15067_v40 }
 0x767   :  { %v3619_v46 = vmax.f32 %v3611_v32, 0.0 }
 0x768   :  { %v3686_v45 = vsub.f32 1.5, %v3685_v37  ;;  %v3550_v48 = vpop.xlane.xlu1 %3549  ;;  %v3545_v17 = vpop.xlane.xlu2 %3544 }
 0x769   :  { %v3594_v0 = vmul.f32 %v3550_v48, %v15067_v40  ;;  %v3627_v56 = vadd.f32 1e-05, %v3619_v46  ;;  %v11477_v62 = vpop.eup %7882  ;;  %v3674_v48 = vmul.f32 %v11467_v42, %v3673_v47 }
 0x76a   :  { %v3687_v34 = vmul.f32 %v7879_v15, %v3686_v45  ;;  %v3540_v44 = vpop.xlane.xlu0 %3539  ;;  %v3693_v26 = vmul.f32 %v11477_v62, %v11455_v20  ;;  %vm3699_vm12 = vweird.f32 %v11477_v62 }
 0x76b   :  { %v3610_v4 = vsub.f32 %v3594_v0, %v3602_v24  ;;  %v3592_v39 = vmul.f32 %v3540_v44, %v15067_v40  ;;  %7884 = vrsqrt.f32 %v3627_v56  ;;  %v3607_v44 = vmul.f32 %v11480_v22, %v11480_v22  ;;  %vm11555_vm15 = vmor %vm3698_vm14, %vm3699_vm12 }
 0x76c   :  { %v3691_v30 = vsel %vm3690_vm3, %v7879_v15, %v3687_v34  ;;  %v14497_v34 = vmov 2   ;;  %v3675_v13 = vmul.f32 0.5, %v3674_v48  ;;  %vm3668_vm5 = vweird.f32 %v3627_v56 }
 0x76d   :  { %v3618_v3 = vmax.f32 %v3610_v4, 0.0  ;;  %v11488_v37 = vmul.f32 %v11485_v25, %v3691_v30  ;;  %v3608_v32 = vsub.f32 %v3592_v39, %v3600_v33  ;;  %7766 = vset.pattern.permute.xlu2 %v14497_v34  ;;  %7768 = vset.pattern.permute.xlu1 %v14497_v34  ;;  %v3593_v30 = vmul.f32 %v3545_v17, %v15067_v40 }
 0x76e   :  { %7767 = vset.pattern.permute.xlu0 %v14497_v34  ;;  %v3676_v34 = vsub.f32 1.5, %v3675_v13 }
 0x76f   :  { %v11490_v45 = vadd.f32 1e-05, %v3618_v3  ;;  %v3725_v46 = vmul.f32 %v11488_v37, %v3589_v12  ;;  %v3616_v15 = vmax.f32 %v3608_v32, 0.0 }
 0x770   :  { %v3575_v24 = vpop.xlane.xlu2 %3574  ;;  %v3465_v0 = vpop.xlane.xlu1 %3464  ;;  %v3677_v13 = vmul.f32 %v11467_v42, %v3676_v34 }
 0x771   :  { %7886 = vrsqrt.f32 %v11490_v45  ;;  %v3599_v12 = vmul.f32 %v3575_v24, %v15067_v40  ;;  %3746 = vrot.lane.b32.xlu0 %v3725_v46, %s8049_s21  ;;  %v11504_v33 = vmul.f32 %v3465_v0, %v15067_v40  ;;  %v7885_v4 = vpop.eup %7884  ;;  %v11506_v39 = vadd.f32 1e-05, %v3616_v15 }
 0x772   :  { %v3663_v47 = vmul.f32 %v7885_v4, %v3627_v56  ;;  %v3694_v24 = vmul.f32 %v11477_v62, %v3693_v26  ;;  %vm3669_vm4 = vweird.f32 %v7885_v4  ;;  %v11528_v56 = vld [vmem:[%s14288_s5 + $0x18] sm:$0xff]  ;;  %vm3658_vm11 = vweird.f32 %v11490_v45 }
 0x773   :  { %v3615_v3 = vsub.f32 %v3599_v12, %v3607_v44  ;;  %v3601_v32 = vmul.f32 %v11504_v33, %v11504_v33  ;;  %7888 = vrsqrt.f32 %v11506_v39  ;;  %vm3670_vm6 = vmor %vm3668_vm5, %vm3669_vm4  ;;  %v3681_v35 = vsel %vm11534_vm10, %v11467_v42, %v3677_v13 }
 0x774   :  { %v3664_v46 = vmul.f32 %v7885_v4, %v3663_v47  ;;  %v3695_v21 = vmul.f32 0.5, %v3694_v24  ;;  %vm3638_vm5 = vweird.f32 %v11506_v39 }
 0x775   :  { %v3623_v0 = vmax.f32 %v3615_v3, 0.0  ;;  %v3609_v9 = vsub.f32 %v3593_v30, %v3601_v32 }
 0x776   :  { %v3665_v15 = vmul.f32 0.5, %v3664_v46  ;;  %v3696_v30 = vsub.f32 1.5, %v3695_v21 }
 0x777   :  { %v7887_v10 = vpop.eup %7886  ;;  %v3631_v8 = vadd.f32 1e-05, %v3623_v0  ;;  %v3617_v6 = vmax.f32 %v3609_v9, 0.0 }
 0x778   :  { %v3653_v17 = vmul.f32 %v7887_v10, %v11490_v45  ;;  %v3666_v44 = vsub.f32 1.5, %v3665_v15  ;;  %vm3659_vm8 = vweird.f32 %v7887_v10  ;;  %v3697_v15 = vmul.f32 %v11477_v62, %v3696_v30  ;;  %v7987_v30 = vld [vmem:[%s14288_s5 + $0x20] sm:$0xff] }
 0x779   :  { %7890 = vrsqrt.f32 %v3631_v8  ;;  %v11515_v12 = vadd.f32 1e-05, %v3617_v6  ;;  %v11517_v48 = vpop.eup %7888  ;;  %vm3660_vm13 = vmor %vm3658_vm11, %vm3659_vm8  ;;  %vm3708_vm1 = vweird.f32 %v3631_v8 }
 0x77a   :  { %v3654_v26 = vmul.f32 %v7887_v10, %v3653_v17  ;;  %v3667_v40 = vmul.f32 %v7885_v4, %v3666_v44  ;;  %v3633_v47 = vmul.f32 %v11517_v48, %v11506_v39  ;;  %vm3639_vm3 = vweird.f32 %v11517_v48  ;;  %v11587_v39 = vld [vmem:[%s14288_s5 + $0x8] sm:$0xff] }
 0x77b   :  { %7892 = vrsqrt.f32 %v11515_v12  ;;  %vm3640_vm7 = vmor %vm3638_vm5, %vm3639_vm3 }
 0x77c   :  { %v3655_v9 = vmul.f32 0.5, %v3654_v26  ;;  %v3671_v3 = vsel %vm3670_vm6, %v7885_v4, %v3667_v40  ;;  %v3634_v32 = vmul.f32 %v11517_v48, %v3633_v47  ;;  %vm3648_vm6 = vweird.f32 %v11515_v12 }
 0x77d   :  { %v11531_v24 = vmul.f32 %v11528_v56, %v3671_v3  ;;  %v3701_v3 = vsel %vm11555_vm15, %v11477_v62, %v3697_v15 }
 0x77e   :  { %v3656_v6 = vsub.f32 1.5, %v3655_v9  ;;  %v3635_v26 = vmul.f32 0.5, %v3634_v32 }
 0x77f   :  { %v7891_v46 = vpop.eup %7890  ;;  %v3723_v4 = vmul.f32 %v11531_v24, %v11452_v5  ;;  %v11552_v5 = vld [vmem:[%s14288_s5 + $0x10] sm:$0xff] }
 0x780   :  { %v3657_v21 = vmul.f32 %v7887_v10, %v3656_v6  ;;  %v3703_v40 = vmul.f32 %v7891_v46, %v3631_v8  ;;  %vm3709_vm0 = vweird.f32 %v7891_v46  ;;  %v3636_v34 = vsub.f32 1.5, %v3635_v26  ;;  %v7989_v8 = vld [vmem:[%s14288_s5 + $0x38] sm:$0xff] }
 0x781   :  { %v7893_v0 = vpop.eup %7892  ;;  %3742 = vrot.lane.b32.xlu2 %v3723_v4, %s8049_s21  ;;  %vm3710_vm2 = vmor %vm3708_vm1, %vm3709_vm0 }
 0x782   :  { %v3704_v17 = vmul.f32 %v7891_v46, %v3703_v40  ;;  %v3643_v44 = vmul.f32 %v7893_v0, %v11515_v12  ;;  %v3661_v45 = vsel %vm3660_vm13, %v7887_v10, %v3657_v21  ;;  %v3716_v10 = vmul.f32 %v7987_v30, %v3681_v35 }
 0x783   :  { %v3714_v47 = vmul.f32 %v11552_v5, %v3661_v45  ;;  %vm3649_vm4 = vweird.f32 %v7893_v0  ;;  %v3637_v15 = vmul.f32 %v11517_v48, %v3636_v34 }
 0x784   :  { %v3705_v42 = vmul.f32 0.5, %v3704_v17  ;;  %v3644_v13 = vmul.f32 %v7893_v0, %v3643_v44  ;;  %v3724_v4 = vmul.f32 %v3716_v10, %v11436_v57  ;;  %vm3650_vm8 = vmor %vm3648_vm6, %vm3649_vm4 }
 0x785   :  { %v3722_v20 = vmul.f32 %v3714_v47, %v11461_v23  ;;  %v7988_v23 = vld [vmem:[%s14288_s5 + $0x30] sm:$0xff]  ;;  %v3641_v9 = vsel %vm3640_vm7, %v11517_v48, %v3637_v15 }
 0x786   :  { %v3706_v6 = vsub.f32 1.5, %v3705_v42  ;;  %v3645_v32 = vmul.f32 0.5, %v3644_v13  ;;  %v3718_v35 = vmul.f32 %v7988_v23, %v3701_v3 }
 0x787   :  { %3740 = vrot.lane.b32.xlu1 %v3722_v20, %s8049_s21 }
 0x788   :  { %v3707_v21 = vmul.f32 %v7891_v46, %v3706_v6  ;;  %v3646_v40 = vsub.f32 1.5, %v3645_v32  ;;  %v3726_v44 = vmul.f32 %v3718_v35, %v11444_v63  ;;  %v11593_v63 = vld [vmem:[%s14288_s5] sm:$0xff]  ;;  %v15072_v32 = vmov 2  }
 0x789   :  { %3744 = vrot.lane.b32.xlu2 %v3724_v4, %s8049_s21 }
 0x78a   :  { %v3647_v62 = vmul.f32 %v7893_v0, %v3646_v40  ;;  %v3711_v17 = vsel %vm3710_vm2, %v7891_v46, %v3707_v21 }
 0x78b   :  { %v3719_v57 = vmul.f32 %v7989_v8, %v3711_v17 }
 0x78c   :  { %v3651_v45 = vsel %vm3650_vm8, %v7893_v0, %v3647_v62  ;;  %v8052_v0 = vmov 3  }
 0x78d   :  { %v3727_v26 = vmul.f32 %v3719_v57, %v11480_v22  ;;  %v3713_v12 = vmul.f32 %v11587_v39, %v3651_v45  ;;  %v3712_v22 = vmul.f32 %v11593_v63, %v3641_v9 }
 0x78f   :  { %3748 = vrot.lane.b32.xlu1 %v3726_v44, %s8049_s21  ;;  %3750 = vrot.lane.b32.xlu0 %v3727_v26, %s8049_s21  ;;  %v3721_v48 = vmul.f32 %v3713_v12, %v11504_v33  ;;  %v3720_v46 = vmul.f32 %v3712_v22, %v11465_v7 }
 0x791   :  { %3800 = vperm.xlu2 %7766, %v3718_v35  }
 0x797   :  { %3738 = vrot.lane.b32.xlu1 %v3721_v48, %s8049_s21  ;;  %3736 = vrot.lane.b32.xlu0 %v3720_v46, %s8049_s21 }
 0x799   :  { %3795 = vperm.xlu2 %7766, %v11488_v37  }
 0x79f   :  { %3790 = vperm.xlu1 %7768, %v3716_v10   ;;  %3805 = vperm.xlu0 %7767, %v3719_v57  }
 0x7a1   :  { %3780 = vperm.xlu2 %7766, %v3714_v47  }
 0x7a7   :  { %3785 = vperm.xlu1 %7768, %v11531_v24   ;;  %7770 = vset.pattern.permute.xlu0 %v8052_v0 }
 0x7a9   :  { %7769 = vset.pattern.permute.xlu2 %v8052_v0 }
 0x7af   :  { %7771 = vset.pattern.permute.xlu1 %v8052_v0 }
 0x7db   :  { %v3743_v42 = vpop.permute.xlu2 %3742 }
 0x7dc   :  { %v3763_v33 = vsub.f32 %v11528_v56, %v3743_v42 }
 0x7de   :  { %3857 = vperm.xlu0 %7770, %v3763_v33  }
 0x7e3   :  { %v3747_v7 = vpop.permute.xlu0 %3746  ;;  %v3745_v20 = vpop.permute.xlu2 %3744 }
 0x7e4   :  { %v3765_v13 = vsub.f32 %v11485_v25, %v3747_v7  ;;  %v3764_v3 = vsub.f32 %v7987_v30, %v3745_v20 }
 0x7e6   :  { %3867 = vperm.xlu1 %7771, %v3765_v13   ;;  %3862 = vperm.xlu0 %7770, %v3764_v3  }
 0x7eb   :  { %v3801_v40 = vpop.permute.xlu2 %3800 }
 0x7ec   :  { %v3832_v44 = vmul.f32 %v3801_v40, %v11326_v11  ;;  %v3833_v26 = vmul.f32 %v3801_v40, %v11319_v29  ;;  %v3834_v45 = vmul.f32 %v3801_v40, %v11329_v16  ;;  %v3835_v9 = vmul.f32 %v3801_v40, %v11342_v55 }
 0x7f3   :  { %v3796_v4 = vpop.permute.xlu2 %3795 }
 0x7f4   :  { %v3829_v48 = vmul.f32 %v3796_v4, %v11297_v1  ;;  %v3830_v46 = vmul.f32 %v3796_v4, %v11306_v52 }
 0x7f9   :  { %v3741_v37 = vpop.permute.xlu1 %3740 }
 0x7fa   :  { %v3762_v47 = vsub.f32 %v11552_v5, %v3741_v37 }
 0x7fc   :  { %3852 = vperm.xlu2 %7769, %v3762_v47  }
 0x801   :  { %v3749_v24 = vpop.permute.xlu1 %3748  ;;  %v3751_v10 = vpop.permute.xlu0 %3750 }
 0x802   :  { %v3766_v6 = vsub.f32 %v7988_v23, %v3749_v24  ;;  %v3767_v21 = vsub.f32 %v7989_v8, %v3751_v10  ;;  %v3781_v23 = vpop.permute.xlu2 %3780 }
 0x803   :  { %v3816_v42 = vmul.f32 %v3781_v23, %v11261_v59  ;;  %v3817_v33 = vmul.f32 %v3781_v23, %v11259_v54  ;;  %v3818_v11 = vmul.f32 %v3781_v23, %v11263_v51  ;;  %v3819_v29 = vmul.f32 %v3781_v23, %v11268_v28 }
 0x804   :  { %7773 = vset.pattern.permute.xlu2 %v15072_v32  ;;  %3872 = vperm.xlu1 %7771, %v3766_v6  }
 0x805   :  { %3775 = vperm.xlu2 %7773, %v3713_v12  }
 0x809   :  { %v3737_v56 = vpop.permute.xlu0 %3736  ;;  %v3739_v25 = vpop.permute.xlu1 %3738 }
 0x80a   :  { %v3760_v34 = vsub.f32 %v11593_v63, %v3737_v56  ;;  %v3761_v30 = vsub.f32 %v11587_v39, %v3739_v25 }
 0x80c   :  { %7772 = vset.pattern.permute.xlu1 %v15072_v32  ;;  %3842 = vperm.xlu0 %7770, %v3760_v34  }
 0x80d   :  { %7775 = vset.pattern.permute.xlu2 %v8052_v0  ;;  %3770 = vperm.xlu1 %7772, %v3712_v22   ;;  %v3828_v22 = vmul.f32 %v3796_v4, %v11302_v19 }
 0x80e   :  { %3877 = vperm.xlu2 %7775, %v3767_v21  }
 0x811   :  { %v3791_v35 = vpop.permute.xlu1 %3790  ;;  %v3806_v15 = vpop.permute.xlu0 %3805 }
 0x812   :  { %v3836_v16 = vmul.f32 %v3806_v15, %v11359_v18  ;;  %v3837_v55 = vmul.f32 %v3806_v15, %v11346_v38  ;;  %v3838_v19 = vmul.f32 %v3806_v15, %v11361_v49  ;;  %v3839_v1 = vmul.f32 %v3806_v15, %v11388_v43 }
 0x813   :  { %v3824_v52 = vmul.f32 %v3791_v35, %v11284_v41  ;;  %v3826_v59 = vmul.f32 %v3791_v35, %v11286_v31  ;;  %v3827_v54 = vmul.f32 %v3791_v35, %v11300_v53 }
 0x815   :  { %7774 = vset.pattern.permute.xlu1 %v8052_v0  ;;  %v3831_v0 = vmul.f32 %v3796_v4, %v11321_v50  ;;  %v3825_v50 = vmul.f32 %v3791_v35, %v11279_v2 }
 0x816   :  { %3847 = vperm.xlu1 %7774, %v3761_v30  }
 0x819   :  { %v3786_v17 = vpop.permute.xlu1 %3785 }
 0x81a   :  { %v3820_v51 = vmul.f32 %v3786_v17, %v11273_v61  ;;  %v3821_v28 = vmul.f32 %v3786_v17, %v11270_v58  ;;  %v3822_v18 = vmul.f32 %v3786_v17, %v11275_v60  ;;  %v3823_v38 = vmul.f32 %v3786_v17, %v11281_v27 }
 0x850   :  { %v11611_v8 = vpop.permute.xlu0 %3857 }
 0x856   :  { %v3853_v62 = vpop.permute.xlu2 %3852 }
 0x857   :  { %v11637_v13 = vadd.f32 %v3853_v62, %v3816_v42  ;;  %v11639_v43 = vadd.f32 %v3853_v62, %v3817_v33  ;;  %v11641_v41 = vadd.f32 %v3853_v62, %v3818_v11  ;;  %v11643_v2 = vadd.f32 %v3853_v62, %v3819_v29 }
 0x858   :  { %v3868_v12 = vpop.permute.xlu1 %3867  ;;  %v3863_v49 = vpop.permute.xlu0 %3862  ;;  %v3892_v11 = vadd.f32 %v11611_v8, %v3820_v51  ;;  %v3893_v29 = vadd.f32 %v11611_v8, %v3821_v28 }
 0x859   :  { %v3900_v61 = vadd.f32 %v3868_v12, %v3828_v22  ;;  %v3901_v37 = vadd.f32 %v3868_v12, %v3829_v48  ;;  %v3902_v58 = vadd.f32 %v3868_v12, %v3830_v46  ;;  %v3903_v47 = vadd.f32 %v3868_v12, %v3831_v0 }
 0x85a   :  { %v3896_v24 = vadd.f32 %v3863_v49, %v3824_v52  ;;  %v3897_v27 = vadd.f32 %v3863_v49, %v3825_v50  ;;  %v3898_v10 = vadd.f32 %v3863_v49, %v3826_v59  ;;  %v3899_v6 = vadd.f32 %v3863_v49, %v3827_v54 }
 0x85b   :  { %v3932_v22 = vmax.f32 %v3900_v61, 0.0  ;;  %v3933_v48 = vmax.f32 %v3901_v37, 0.0  ;;  %v3920_v52 = vmax.f32 %v11637_v13, 0.0  ;;  %v3921_v50 = vmax.f32 %v11639_v43, 0.0 }
 0x85c   :  { %v3928_v17 = vmax.f32 %v3896_v24, 0.0  ;;  %v3929_v12 = vmax.f32 %v3897_v27, 0.0  ;;  %v3922_v49 = vmax.f32 %v11641_v41, 0.0  ;;  %v3923_v51 = vmax.f32 %v11643_v2, 0.0  ;;  %v15075_v27 = vld [vmem:[#allocation75_spill] sm:$0xff] }
 0x85d   :  { %v3924_v28 = vmax.f32 %v3892_v11, 0.0 }
 0x85f   :  { %v11609_v57 = vpop.permute.xlu2 %3775  ;;  %v3956_v61 = vpack.c.bf16 %v3924_v28, %v3920_v52 }
 0x868   :  { %v3878_v7 = vpop.permute.xlu2 %3877 }
 0x869   :  { %v3908_v31 = vadd.f32 %v3878_v7, %v3836_v16  ;;  %v3909_v20 = vadd.f32 %v3878_v7, %v3837_v55  ;;  %v3910_v53 = vadd.f32 %v3878_v7, %v3838_v19  ;;  %v3911_v3 = vadd.f32 %v3878_v7, %v3839_v1 }
 0x86a   :  { %v3894_v16 = vadd.f32 %v11611_v8, %v3822_v18  ;;  %v3895_v55 = vadd.f32 %v11611_v8, %v3823_v38  ;;  %v3960_v1 = vpack.c.bf16 %v3932_v22, %v3928_v17  ;;  %v3961_v7 = vpack.c.bf16 %v3933_v48, %v3929_v12 }
 0x86b   :  { %v3940_v25 = vmax.f32 %v3908_v31, 0.0  ;;  %v3941_v30 = vmax.f32 %v3909_v20, 0.0  ;;  %v3942_v40 = vmax.f32 %v3910_v53, 0.0  ;;  %v3943_v4 = vmax.f32 %v3911_v3, 0.0  ;;  %v15073_v20 = vld [vmem:[#allocation131_spill] sm:$0xff]  ;;  %v15074_v53 = vld [vmem:[#allocation74_spill] sm:$0xff] }
 0x86c   :  { %v3925_v18 = vmax.f32 %v3893_v29, 0.0  ;;  %v3926_v31 = vmax.f32 %v3894_v16, 0.0  ;;  %v3927_v38 = vmax.f32 %v3895_v55, 0.0 }
 0x86e   :  { %v3957_v41 = vpack.c.bf16 %v3925_v18, %v3921_v50  ;;  %v3958_v2 = vpack.c.bf16 %v3926_v31, %v3922_v49 }
 0x876   :  { %v3873_v60 = vpop.permute.xlu1 %3872 }
 0x877   :  { %v3904_v32 = vadd.f32 %v3873_v60, %v3832_v44  ;;  %v3905_v56 = vadd.f32 %v3873_v60, %v3833_v26  ;;  %v3906_v34 = vadd.f32 %v3873_v60, %v3834_v45  ;;  %v3907_v21 = vadd.f32 %v3873_v60, %v3835_v9 }
 0x878   :  { %v3930_v44 = vmax.f32 %v3898_v10, 0.0  ;;  %v3934_v26 = vmax.f32 %v3902_v58, 0.0  ;;  %v3931_v45 = vmax.f32 %v3899_v6, 0.0  ;;  %v3935_v9 = vmax.f32 %v3903_v47, 0.0  ;;  %v15076_v10 = vld [vmem:[#allocation9_spill] sm:$0xff] }
 0x879   :  { %v3936_v23 = vmax.f32 %v3904_v32, 0.0  ;;  %v3937_v35 = vmax.f32 %v3905_v56, 0.0  ;;  %v3938_v62 = vmax.f32 %v3906_v34, 0.0  ;;  %v3939_v15 = vmax.f32 %v3907_v21, 0.0  ;;  %v15077_v32 = vld [vmem:[#allocation7_spill] sm:$0xff]  ;;  %v15078_v34 = vld [vmem:[#allocation76_spill] sm:$0xff] }
 0x87a   :  { %v3962_v59 = vpack.c.bf16 %v3934_v26, %v3930_v44  ;;  %v3963_v54 = vpack.c.bf16 %v3935_v9, %v3931_v45  ;;  %v3959_v58 = vpack.c.bf16 %v3927_v38, %v3923_v51  ;;  %v3813_v6 = vmul.f32 %v11609_v57, %v15076_v10  ;;  %v7711_v26 = vld [vmem:[%s14290_s3 + $0x8] sm:$0xff]  ;;  %v7712_v45 = vld [vmem:[%s14290_s3 + $0x10] sm:$0xff]  ;;  %v7713_v9 = vld [vmem:[%s14290_s3 + $0x18] sm:$0xff] }
 0x87b   :  { %v3964_v46 = vpack.c.bf16 %v3940_v25, %v3936_v23  ;;  %v3965_v0 = vpack.c.bf16 %v3941_v30, %v3937_v35  ;;  %v3966_v42 = vpack.c.bf16 %v3942_v40, %v3938_v62  ;;  %v3967_v33 = vpack.c.bf16 %v3943_v4, %v3939_v15 }
 0x87c   :  { %v3814_v56 = vmul.f32 %v11609_v57, %v15077_v32  ;;  %v3815_v21 = vmul.f32 %v11609_v57, %v15078_v34 }
 0x87d   :  { %4005 = vmatpush.bf16.msra.mxu0 %v3964_v46  ;;  %4034 = vmatpush.bf16.msra.mxu1 %v3965_v0 }
 0x87e   :  { %4063 = vmatpush.bf16.msra.mxu2 %v3966_v42  ;;  %4092 = vmatpush.bf16.msra.mxu3 %v3967_v33  ;;  %v3843_v37 = vpop.permute.xlu0 %3842 }
 0x87f   :  { %v3771_v19 = vpop.permute.xlu1 %3770 }
 0x880   :  { %v3808_v8 = vmul.f32 %v3771_v19, %v11217_v36  ;;  %v3809_v13 = vmul.f32 %v3771_v19, %v11219_v14  ;;  %v3810_v43 = vmul.f32 %v3771_v19, %v15073_v20  ;;  %v3811_v3 = vmul.f32 %v3771_v19, %v15074_v53 }
 0x881   :  { %4006 = vmatpush.bf16.msra.mxu0 %v3960_v1  ;;  %4035 = vmatpush.bf16.msra.mxu1 %v3961_v7  ;;  %v3812_v14 = vmul.f32 %v11609_v57, %v15075_v27  ;;  %v7710_v57 = vld [vmem:[%s14290_s3] sm:$0xff] }
 0x882   :  { %4064 = vmatpush.bf16.msra.mxu2 %v3962_v59  ;;  %4093 = vmatpush.bf16.msra.mxu3 %v3963_v54  ;;  %v3880_v47 = vadd.f32 %v3843_v37, %v3808_v8  ;;  %v3881_v36 = vadd.f32 %v3843_v37, %v3809_v13  ;;  %v3882_v60 = vadd.f32 %v3843_v37, %v3810_v43 }
 0x883   :  { %v3883_v24 = vadd.f32 %v3843_v37, %v3811_v3 }
 0x884   :  { %v3912_v35 = vmax.f32 %v3880_v47, 0.0  ;;  %v3913_v62 = vmax.f32 %v3881_v36, 0.0  ;;  %v3914_v15 = vmax.f32 %v3882_v60, 0.0 }
 0x885   :  { %4007 = vmatpush.bf16.msra.mxu0 %v3956_v61  ;;  %4036 = vmatpush.bf16.msra.mxu1 %v3957_v41  ;;  %v3915_v17 = vmax.f32 %v3883_v24, 0.0 }
 0x886   :  { %4065 = vmatpush.bf16.msra.mxu2 %v3958_v2  ;;  %4094 = vmatpush.bf16.msra.mxu3 %v3959_v58 }
 0x888   :  { %v3848_v25 = vpop.permute.xlu1 %3847 }
 0x889   :  { %v3884_v30 = vadd.f32 %v3848_v25, %v3812_v14  ;;  %v3885_v40 = vadd.f32 %v3848_v25, %v3813_v6  ;;  %v3886_v4 = vadd.f32 %v3848_v25, %v3814_v56  ;;  %v3887_v23 = vadd.f32 %v3848_v25, %v3815_v21 }
 0x88b   :  { %v3916_v22 = vmax.f32 %v3884_v30, 0.0  ;;  %v3917_v12 = vmax.f32 %v3885_v40, 0.0  ;;  %v3918_v48 = vmax.f32 %v3886_v4, 0.0  ;;  %v3919_v46 = vmax.f32 %v3887_v23, 0.0 }
 0x88d   :  { %v3952_v0 = vpack.c.bf16 %v3916_v22, %v3912_v35  ;;  %v3953_v42 = vpack.c.bf16 %v3917_v12, %v3913_v62  ;;  %v3954_v33 = vpack.c.bf16 %v3918_v48, %v3914_v15  ;;  %v3955_v44 = vpack.c.bf16 %v3919_v46, %v3915_v17 }
 0x88f   :  { %4008 = vmatpush.bf16.msra.mxu0 %v3952_v0  ;;  %4037 = vmatpush.bf16.msra.mxu1 %v3953_v42 }
 0x890   :  { %4066 = vmatpush.bf16.msra.mxu2 %v3954_v33  ;;  %4095 = vmatpush.bf16.msra.mxu3 %v3955_v44 }
 0x892   :  { %7462 = vmatmul.msk.bf16.vlgmr.msra.gmra.mxu0 %vm3988_vm9, %v7710_v57  ;;  %7466 = vmatmul.msk.bf16.vlgmr.msra.gmra.mxu1 %vm3988_vm9, %v7710_v57 }
 0x893   :  { %7470 = vmatmul.msk.bf16.vlgmr.msra.gmra.mxu2 %vm3988_vm9, %v7710_v57  ;;  %7474 = vmatmul.msk.bf16.vlgmr.msra.gmra.mxu3 %vm3988_vm9, %v7710_v57 }
 0x8a2   :  { %7463 = vmatmul.msk.bf16.gmra.mxu0 %vm3988_vm9, %v7711_v26  ;;  %7467 = vmatmul.msk.bf16.gmra.mxu1 %vm3988_vm9, %v7711_v26 }
 0x8a3   :  { %7471 = vmatmul.msk.bf16.gmra.mxu2 %vm3988_vm9, %v7711_v26  ;;  %7475 = vmatmul.msk.bf16.gmra.mxu3 %vm3988_vm9, %v7711_v26 }
 0x8b2   :  { %7464 = vmatmul.msk.bf16.gmra.mxu0 %vm3988_vm9, %v7712_v45  ;;  %7468 = vmatmul.msk.bf16.gmra.mxu1 %vm3988_vm9, %v7712_v45 }
 0x8b3   :  { %7472 = vmatmul.msk.bf16.gmra.mxu2 %vm3988_vm9, %v7712_v45  ;;  %7476 = vmatmul.msk.bf16.gmra.mxu3 %vm3988_vm9, %v7712_v45 }
 0x8c2   :  { %7465 = vmatmul.msk.bf16.gmra.mxu0 %vm3988_vm9, %v7713_v9  ;;  %7469 = vmatmul.msk.bf16.gmra.mxu1 %vm3988_vm9, %v7713_v9 }
 0x8c3   :  { %7473 = vmatmul.msk.bf16.gmra.mxu2 %vm3988_vm9, %v7713_v9  ;;  %7477 = vmatmul.msk.bf16.gmra.mxu3 %vm3988_vm9, %v7713_v9 }
 0x90f   :  { %v11693_v11 = vpop.f32.mrf.mxu0  ;;  %v11695_v29 = vpop.f32.mrf.mxu1 }
 0x910   :  { %v4165_v16 = vmul.f32 %v11693_v11, %v11693_v11  ;;  %v4166_v55 = vmul.f32 %v11695_v29, %v11695_v29  ;;  %v4117_v19 = vadd.f32 %v11695_v29, %v11693_v11 }
 0x912   :  { %v4197_v1 = vadd.f32 %v4166_v55, %v4165_v16 }
 0x916   :  { %v11703_v7 = vpop.f32.mrf.mxu2  ;;  %v11705_v52 = vpop.f32.mrf.mxu3 }
 0x917   :  { %v4118_v50 = vadd.f32 %v4117_v19, %v11703_v7  ;;  %v4167_v59 = vmul.f32 %v11703_v7, %v11703_v7  ;;  %v4168_v54 = vmul.f32 %v11705_v52, %v11705_v52  ;;  %v11712_v49 = vpop.f32.mrf.mxu0  ;;  %v11714_v51 = vpop.f32.mrf.mxu1 }
 0x918   :  { %v4169_v31 = vmul.f32 %v11712_v49, %v11712_v49  ;;  %v4170_v8 = vmul.f32 %v11714_v51, %v11714_v51  ;;  %v4122_v13 = vadd.f32 %v11714_v51, %v11712_v49 }
 0x919   :  { %v4198_v28 = vadd.f32 %v4197_v1, %v4167_v59  ;;  %v4119_v18 = vadd.f32 %v4118_v50, %v11705_v52 }
 0x91a   :  { %v4202_v53 = vadd.f32 %v4170_v8, %v4169_v31 }
 0x91b   :  { %4120 = vadd.xlane.f32.xlu2 %v4119_v18  ;;  %v4199_v38 = vadd.f32 %v4198_v28, %v4168_v54 }
 0x91d   :  { %4200 = vadd.xlane.f32.xlu1 %v4199_v38 }
 0x91e   :  { %v11723_v20 = vpop.f32.mrf.mxu2  ;;  %v11725_v43 = vpop.f32.mrf.mxu3 }
 0x91f   :  { %v4123_v3 = vadd.f32 %v4122_v13, %v11723_v20  ;;  %v4171_v61 = vmul.f32 %v11723_v20, %v11723_v20  ;;  %v11730_v41 = vpop.f32.mrf.mxu0  ;;  %v11732_v37 = vpop.f32.mrf.mxu1  ;;  %v4172_v2 = vmul.f32 %v11725_v43, %v11725_v43 }
 0x920   :  { %v4173_v47 = vmul.f32 %v11730_v41, %v11730_v41  ;;  %v4174_v36 = vmul.f32 %v11732_v37, %v11732_v37  ;;  %v4127_v24 = vadd.f32 %v11732_v37, %v11730_v41 }
 0x921   :  { %v4124_v58 = vadd.f32 %v4123_v3, %v11725_v43  ;;  %v4203_v60 = vadd.f32 %v4202_v53, %v4171_v61 }
 0x922   :  { %v4207_v14 = vadd.f32 %v4174_v36, %v4173_v47 }
 0x923   :  { %4125 = vadd.xlane.f32.xlu0 %v4124_v58  ;;  %v4204_v27 = vadd.f32 %v4203_v60, %v4172_v2 }
 0x925   :  { %4205 = vadd.xlane.f32.xlu2 %v4204_v27 }
 0x926   :  { %v11743_v10 = vpop.f32.mrf.mxu2  ;;  %v11745_v6 = vpop.f32.mrf.mxu3 }
 0x927   :  { %v4128_v32 = vadd.f32 %v4127_v24, %v11743_v10  ;;  %v4175_v56 = vmul.f32 %v11743_v10, %v11743_v10  ;;  %v4176_v34 = vmul.f32 %v11745_v6, %v11745_v6  ;;  %v11752_v21 = vpop.f32.mrf.mxu0  ;;  %v11754_v25 = vpop.f32.mrf.mxu1 }
 0x928   :  { %v4177_v4 = vmul.f32 %v11752_v21, %v11752_v21  ;;  %v4178_v23 = vmul.f32 %v11754_v25, %v11754_v25  ;;  %v4132_v62 = vadd.f32 %v11754_v25, %v11752_v21 }
 0x929   :  { %v4208_v30 = vadd.f32 %v4207_v14, %v4175_v56  ;;  %v4129_v40 = vadd.f32 %v4128_v32, %v11745_v6 }
 0x92a   :  { %v4212_v22 = vadd.f32 %v4178_v23, %v4177_v4 }
 0x92b   :  { %4130 = vadd.xlane.f32.xlu1 %v4129_v40  ;;  %v4209_v35 = vadd.f32 %v4208_v30, %v4176_v34 }
 0x92d   :  { %4210 = vadd.xlane.f32.xlu0 %v4209_v35 }
 0x92e   :  { %v11763_v15 = vpop.f32.mrf.mxu2  ;;  %v11765_v17 = vpop.f32.mrf.mxu3 }
 0x92f   :  { %v4133_v12 = vadd.f32 %v4132_v62, %v11763_v15  ;;  %v4179_v48 = vmul.f32 %v11763_v15, %v11763_v15  ;;  %v11770_v46 = vpop.f32.mrf.mxu0  ;;  %v11772_v0 = vpop.f32.mrf.mxu1  ;;  %v4180_v42 = vmul.f32 %v11765_v17, %v11765_v17 }
 0x930   :  { %v4181_v44 = vmul.f32 %v11770_v46, %v11770_v46  ;;  %v4182_v57 = vmul.f32 %v11772_v0, %v11772_v0  ;;  %v4137_v45 = vadd.f32 %v11772_v0, %v11770_v46 }
 0x931   :  { %v4134_v33 = vadd.f32 %v4133_v12, %v11765_v17  ;;  %v4213_v26 = vadd.f32 %v4212_v22, %v4179_v48 }
 0x932   :  { %v4217_v16 = vadd.f32 %v4182_v57, %v4181_v44 }
 0x933   :  { %4135 = vadd.xlane.f32.xlu2 %v4134_v33  ;;  %v4214_v9 = vadd.f32 %v4213_v26, %v4180_v42 }
 0x935   :  { %4215 = vadd.xlane.f32.xlu1 %v4214_v9 }
 0x936   :  { %v11783_v55 = vpop.f32.mrf.mxu2  ;;  %v11785_v19 = vpop.f32.mrf.mxu3 }
 0x937   :  { %v4138_v1 = vadd.f32 %v4137_v45, %v11783_v55  ;;  %v4183_v50 = vmul.f32 %v11783_v55, %v11783_v55  ;;  %v4184_v59 = vmul.f32 %v11785_v19, %v11785_v19  ;;  %v11792_v54 = vpop.f32.mrf.mxu0  ;;  %v11794_v28 = vpop.f32.mrf.mxu1 }
 0x938   :  { %v4185_v8 = vmul.f32 %v11792_v54, %v11792_v54  ;;  %v4186_v38 = vmul.f32 %v11794_v28, %v11794_v28  ;;  %v4142_v53 = vadd.f32 %v11794_v28, %v11792_v54 }
 0x939   :  { %v4218_v18 = vadd.f32 %v4217_v16, %v4183_v50  ;;  %v4139_v31 = vadd.f32 %v4138_v1, %v11785_v19 }
 0x93a   :  { %v4222_v2 = vadd.f32 %v4186_v38, %v4185_v8 }
 0x93b   :  { %4140 = vadd.xlane.f32.xlu0 %v4139_v31  ;;  %v4219_v13 = vadd.f32 %v4218_v18, %v4184_v59 }
 0x93d   :  { %4220 = vadd.xlane.f32.xlu2 %v4219_v13 }
 0x93e   :  { %v11803_v3 = vpop.f32.mrf.mxu2  ;;  %v11805_v61 = vpop.f32.mrf.mxu3 }
 0x93f   :  { %v4143_v58 = vadd.f32 %v4142_v53, %v11803_v3  ;;  %v4187_v47 = vmul.f32 %v11803_v3, %v11803_v3  ;;  %v11810_v36 = vpop.f32.mrf.mxu0  ;;  %v11812_v60 = vpop.f32.mrf.mxu1  ;;  %v4188_v24 = vmul.f32 %v11805_v61, %v11805_v61  ;;  %v15079_v53 = vld [vmem:[#allocation97_spill] sm:$0xff] }
 0x940   :  { %v4189_v14 = vmul.f32 %v11810_v36, %v11810_v36  ;;  %v4190_v32 = vmul.f32 %v11812_v60, %v11812_v60  ;;  %v4147_v34 = vadd.f32 %v11812_v60, %v11810_v36 }
 0x941   :  { %v4144_v27 = vadd.f32 %v4143_v58, %v11805_v61  ;;  %v4223_v56 = vadd.f32 %v4222_v2, %v4187_v47  ;;  %v8053_v58 = vmov 4  }
 0x942   :  { %v4227_v40 = vadd.f32 %v4190_v32, %v4189_v14  ;;  %7776 = vset.pattern.permute.xlu0 %v8053_v58  ;;  %7777 = vset.pattern.permute.xlu2 %v8053_v58 }
 0x943   :  { %4145 = vadd.xlane.f32.xlu1 %v4144_v27  ;;  %v4224_v30 = vadd.f32 %v4223_v56, %v4188_v24 }
 0x944   :  { %7778 = vset.pattern.permute.xlu1 %v8053_v58 }
 0x945   :  { %4225 = vadd.xlane.f32.xlu0 %v4224_v30 }
 0x946   :  { %v11823_v4 = vpop.f32.mrf.mxu2  ;;  %v11825_v23 = vpop.f32.mrf.mxu3 }
 0x947   :  { %v4148_v35 = vadd.f32 %v4147_v34, %v11823_v4  ;;  %v4191_v62 = vmul.f32 %v11823_v4, %v11823_v4  ;;  %v4192_v22 = vmul.f32 %v11825_v23, %v11825_v23  ;;  %v11832_v12 = vpop.f32.mrf.mxu0  ;;  %v11834_v48 = vpop.f32.mrf.mxu1 }
 0x948   :  { %v4193_v44 = vmul.f32 %v11832_v12, %v11832_v12  ;;  %v4194_v57 = vmul.f32 %v11834_v48, %v11834_v48  ;;  %v4152_v45 = vadd.f32 %v11834_v48, %v11832_v12 }
 0x949   :  { %v4228_v42 = vadd.f32 %v4227_v40, %v4191_v62  ;;  %v4149_v33 = vadd.f32 %v4148_v35, %v11825_v23 }
 0x94a   :  { %v4232_v1 = vadd.f32 %v4194_v57, %v4193_v44 }
 0x94b   :  { %4150 = vadd.xlane.f32.xlu2 %v4149_v33  ;;  %v4229_v26 = vadd.f32 %v4228_v42, %v4192_v22 }
 0x94d   :  { %4230 = vadd.xlane.f32.xlu1 %v4229_v26 }
 0x94e   :  { %v11843_v9 = vpop.f32.mrf.mxu2  ;;  %v11845_v16 = vpop.f32.mrf.mxu3 }
 0x94f   :  { %v4153_v50 = vadd.f32 %v4152_v45, %v11843_v9  ;;  %v4195_v59 = vmul.f32 %v11843_v9, %v11843_v9  ;;  %v4196_v18 = vmul.f32 %v11845_v16, %v11845_v16 }
 0x951   :  { %v4154_v31 = vadd.f32 %v4153_v50, %v11845_v16  ;;  %v4233_v8 = vadd.f32 %v4232_v1, %v4195_v59 }
 0x953   :  { %4155 = vadd.xlane.f32.xlu0 %v4154_v31  ;;  %v4234_v38 = vadd.f32 %v4233_v8, %v4196_v18 }
 0x955   :  { %4235 = vadd.xlane.f32.xlu2 %v4234_v38 }
 0x98e   :  { %v4121_v13 = vpop.xlane.xlu2 %4120 }
 0x98f   :  { %v11854_v2 = vmul.f32 %v4121_v13, %v15079_v53 }
 0x990   :  { %v4201_v47 = vpop.xlane.xlu1 %4200 }
 0x991   :  { %v4261_v24 = vmul.f32 %v11854_v2, %v11854_v2  ;;  %v4253_v27 = vmul.f32 %v4201_v47, %v15079_v53 }
 0x993   :  { %v4269_v14 = vsub.f32 %v4253_v27, %v4261_v24 }
 0x995   :  { %v4277_v32 = vmax.f32 %v4269_v14, 0.0 }
 0x996   :  { %v4126_v56 = vpop.xlane.xlu0 %4125 }
 0x997   :  { %v4285_v34 = vadd.f32 1e-05, %v4277_v32  ;;  %v11860_v30 = vmul.f32 %v4126_v56, %v15079_v53 }
 0x998   :  { %v4206_v40 = vpop.xlane.xlu2 %4205 }
 0x999   :  { %7894 = vrsqrt.f32 %v4285_v34  ;;  %v4262_v35 = vmul.f32 %v11860_v30, %v11860_v30  ;;  %v4254_v62 = vmul.f32 %v4206_v40, %v15079_v53  ;;  %vm4299_vm11 = vweird.f32 %v4285_v34 }
 0x99b   :  { %v4270_v22 = vsub.f32 %v4254_v62, %v4262_v35 }
 0x99d   :  { %v4278_v42 = vmax.f32 %v4270_v22, 0.0 }
 0x99e   :  { %v4131_v33 = vpop.xlane.xlu1 %4130 }
 0x99f   :  { %v7895_v44 = vpop.eup %7894  ;;  %v4286_v57 = vadd.f32 1e-05, %v4278_v42  ;;  %v11866_v26 = vmul.f32 %v4131_v33, %v15079_v53 }
 0x9a0   :  { %v4294_v45 = vmul.f32 %v7895_v44, %v4285_v34  ;;  %v4211_v1 = vpop.xlane.xlu0 %4210  ;;  %vm4300_vm10 = vweird.f32 %v7895_v44 }
 0x9a1   :  { %7896 = vrsqrt.f32 %v4286_v57  ;;  %v4263_v50 = vmul.f32 %v11866_v26, %v11866_v26  ;;  %v4255_v59 = vmul.f32 %v4211_v1, %v15079_v53  ;;  %vm4301_vm12 = vmor %vm4299_vm11, %vm4300_vm10  ;;  %vm4309_vm14 = vweird.f32 %v4286_v57 }
 0x9a2   :  { %v4295_v18 = vmul.f32 %v7895_v44, %v4294_v45 }
 0x9a3   :  { %v4271_v31 = vsub.f32 %v4255_v59, %v4263_v50 }
 0x9a4   :  { %v4296_v8 = vmul.f32 0.5, %v4295_v18 }
 0x9a5   :  { %v4279_v38 = vmax.f32 %v4271_v31, 0.0 }
 0x9a6   :  { %v4297_v13 = vsub.f32 1.5, %v4296_v8  ;;  %v4136_v58 = vpop.xlane.xlu2 %4135 }
 0x9a7   :  { %v7897_v47 = vpop.eup %7896  ;;  %v4287_v24 = vadd.f32 1e-05, %v4279_v38  ;;  %v11872_v27 = vmul.f32 %v4136_v58, %v15079_v53 }
 0x9a8   :  { %v4304_v14 = vmul.f32 %v7897_v47, %v4286_v57  ;;  %v4216_v32 = vpop.xlane.xlu1 %4215  ;;  %v4298_v56 = vmul.f32 %v7895_v44, %v4297_v13  ;;  %vm4310_vm13 = vweird.f32 %v7897_v47 }
 0x9a9   :  { %7898 = vrsqrt.f32 %v4287_v24  ;;  %v4264_v40 = vmul.f32 %v11872_v27, %v11872_v27  ;;  %v4256_v35 = vmul.f32 %v4216_v32, %v15079_v53  ;;  %vm4311_vm15 = vmor %vm4309_vm14, %vm4310_vm13  ;;  %vm4319_vm1 = vweird.f32 %v4287_v24 }
 0x9aa   :  { %v4305_v62 = vmul.f32 %v7897_v47, %v4304_v14  ;;  %v4302_v22 = vsel %vm4301_vm12, %v7895_v44, %v4298_v56 }
 0x9ab   :  { %v4272_v42 = vsub.f32 %v4256_v35, %v4264_v40  ;;  %v4373_v33 = vmul.f32 %v11593_v63, %v4302_v22 }
 0x9ac   :  { %v4306_v45 = vmul.f32 0.5, %v4305_v62 }
 0x9ad   :  { %v4280_v1 = vmax.f32 %v4272_v42, 0.0  ;;  %4431 = vperm.xlu0 %7776, %v4373_v33   ;;  %v4381_v40 = vmul.f32 %v4373_v33, %v11854_v2 }
 0x9ae   :  { %v4307_v50 = vsub.f32 1.5, %v4306_v45  ;;  %v4141_v34 = vpop.xlane.xlu0 %4140 }
 0x9af   :  { %v7899_v59 = vpop.eup %7898  ;;  %v4288_v18 = vadd.f32 1e-05, %v4280_v1  ;;  %v11879_v31 = vmul.f32 %v4141_v34, %v15079_v53 }
 0x9b0   :  { %v4314_v8 = vmul.f32 %v7899_v59, %v4287_v24  ;;  %v4221_v38 = vpop.xlane.xlu2 %4220  ;;  %v4308_v13 = vmul.f32 %v7897_v47, %v4307_v50  ;;  %vm4320_vm0 = vweird.f32 %v7899_v59 }
 0x9b1   :  { %7900 = vrsqrt.f32 %v4288_v18  ;;  %v4265_v63 = vmul.f32 %v11879_v31, %v11879_v31  ;;  %v4257_v44 = vmul.f32 %v4221_v38, %v15079_v53  ;;  %vm4321_vm2 = vmor %vm4319_vm1, %vm4320_vm0  ;;  %vm4329_vm4 = vweird.f32 %v4288_v18 }
 0x9b2   :  { %v4315_v58 = vmul.f32 %v7899_v59, %v4314_v8  ;;  %v4312_v14 = vsel %vm4311_vm15, %v7897_v47, %v4308_v13 }
 0x9b3   :  { %v4273_v32 = vsub.f32 %v4257_v44, %v4265_v63  ;;  %v4374_v56 = vmul.f32 %v11587_v39, %v4312_v14 }
 0x9b4   :  { %v4316_v35 = vmul.f32 0.5, %v4315_v58 }
 0x9b5   :  { %v4281_v62 = vmax.f32 %v4273_v32, 0.0  ;;  %4436 = vperm.xlu2 %7777, %v4374_v56   ;;  %4397 = vrot.lane.b32.xlu0 %v4381_v40, %s8049_s21  ;;  %v4382_v57 = vmul.f32 %v4374_v56, %v11860_v30 }
 0x9b6   :  { %v4317_v22 = vsub.f32 1.5, %v4316_v35  ;;  %v4146_v42 = vpop.xlane.xlu1 %4145 }
 0x9b7   :  { %v7901_v45 = vpop.eup %7900  ;;  %v4289_v1 = vadd.f32 1e-05, %v4281_v62  ;;  %v11889_v50 = vmul.f32 %v4146_v42, %v15079_v53  ;;  %4399 = vrot.lane.b32.xlu1 %v4382_v57, %s8049_s21 }
 0x9b8   :  { %v4324_v39 = vmul.f32 %v7901_v45, %v4288_v18  ;;  %v4226_v2 = vpop.xlane.xlu0 %4225  ;;  %v4318_v47 = vmul.f32 %v7899_v59, %v4317_v22  ;;  %vm4330_vm3 = vweird.f32 %v7901_v45 }
 0x9b9   :  { %7902 = vrsqrt.f32 %v4289_v1  ;;  %v4266_v33 = vmul.f32 %v11889_v50, %v11889_v50  ;;  %v4258_v30 = vmul.f32 %v4226_v2, %v15079_v53  ;;  %vm4331_vm5 = vmor %vm4329_vm4, %vm4330_vm3  ;;  %vm4339_vm7 = vweird.f32 %v4289_v1 }
 0x9ba   :  { %v4325_v34 = vmul.f32 %v7901_v45, %v4324_v39  ;;  %v4322_v8 = vsel %vm4321_vm2, %v7899_v59, %v4318_v47  ;;  %v11907_v39 = vld [vmem:[%s14288_s5 + $0x18] sm:$0xff] }
 0x9bb   :  { %v4274_v38 = vsub.f32 %v4258_v30, %v4266_v33  ;;  %v4375_v13 = vmul.f32 %v11552_v5, %v4322_v8 }
 0x9bc   :  { %v4326_v63 = vmul.f32 0.5, %v4325_v34 }
 0x9bd   :  { %v4282_v44 = vmax.f32 %v4274_v38, 0.0  ;;  %v4383_v58 = vmul.f32 %v4375_v13, %v11866_v26 }
 0x9be   :  { %v4327_v24 = vsub.f32 1.5, %v4326_v63  ;;  %v4151_v14 = vpop.xlane.xlu2 %4150 }
 0x9bf   :  { %v7903_v32 = vpop.eup %7902  ;;  %v4290_v56 = vadd.f32 1e-05, %v4282_v44  ;;  %v11898_v40 = vmul.f32 %v4151_v14, %v15079_v53  ;;  %4441 = vperm.xlu1 %7778, %v4375_v13   ;;  %4401 = vrot.lane.b32.xlu2 %v4383_v58, %s8049_s21 }
 0x9c0   :  { %v4334_v59 = vmul.f32 %v7903_v32, %v4289_v1  ;;  %v4231_v35 = vpop.xlane.xlu1 %4230  ;;  %v4328_v62 = vmul.f32 %v7901_v45, %v4327_v24  ;;  %vm4340_vm6 = vweird.f32 %v7903_v32 }
 0x9c1   :  { %7904 = vrsqrt.f32 %v4290_v56  ;;  %v4267_v5 = vmul.f32 %v11898_v40, %v11898_v40  ;;  %v4259_v26 = vmul.f32 %v4231_v35, %v15079_v53  ;;  %vm4341_vm8 = vmor %vm4339_vm7, %vm4340_vm6  ;;  %v11917_v35 = vld [vmem:[%s14288_s5 + $0x20] sm:$0xff]  ;;  %vm4349_vm11 = vweird.f32 %v4290_v56 }
 0x9c2   :  { %v4335_v57 = vmul.f32 %v7903_v32, %v4334_v59  ;;  %v4332_v22 = vsel %vm4331_vm5, %v7901_v45, %v4328_v62 }
 0x9c3   :  { %v4275_v42 = vsub.f32 %v4259_v26, %v4267_v5  ;;  %v4376_v18 = vmul.f32 %v11907_v39, %v4332_v22 }
 0x9c4   :  { %v4336_v2 = vmul.f32 0.5, %v4335_v57 }
 0x9c5   :  { %v4283_v47 = vmax.f32 %v4275_v42, 0.0  ;;  %v4384_v33 = vmul.f32 %v4376_v18, %v11872_v27 }
 0x9c6   :  { %v4337_v30 = vsub.f32 1.5, %v4336_v2  ;;  %v4156_v34 = vpop.xlane.xlu0 %4155 }
 0x9c7   :  { %v7905_v8 = vpop.eup %7904  ;;  %v4291_v38 = vadd.f32 1e-05, %v4283_v47  ;;  %v4252_v13 = vmul.f32 %v4156_v34, %v15079_v53  ;;  %4446 = vperm.xlu2 %7777, %v4376_v18   ;;  %4403 = vrot.lane.b32.xlu0 %v4384_v33, %s8049_s21  ;;  %v11924_v33 = vld [vmem:[%s14288_s5 + $0x28] sm:$0xff] }
 0x9c8   :  { %v4344_v45 = vmul.f32 %v7905_v8, %v4290_v56  ;;  %v4236_v63 = vpop.xlane.xlu2 %4235  ;;  %v4338_v44 = vmul.f32 %v7903_v32, %v4337_v30  ;;  %vm4350_vm10 = vweird.f32 %v7905_v8 }
 0x9c9   :  { %7906 = vrsqrt.f32 %v4291_v38  ;;  %v4268_v58 = vmul.f32 %v4252_v13, %v4252_v13  ;;  %v4260_v24 = vmul.f32 %v4236_v63, %v15079_v53  ;;  %vm4351_vm12 = vmor %vm4349_vm11, %vm4350_vm10  ;;  %vm4359_vm14 = vweird.f32 %v4291_v38 }
 0x9ca   :  { %v4345_v27 = vmul.f32 %v7905_v8, %v4344_v45  ;;  %v4342_v14 = vsel %vm4341_vm8, %v7903_v32, %v4338_v44 }
 0x9cb   :  { %v4276_v59 = vsub.f32 %v4260_v24, %v4268_v58  ;;  %v4377_v62 = vmul.f32 %v11917_v35, %v4342_v14  ;;  %v7995_v58 = vld [vmem:[%s14288_s5 + $0x30] sm:$0xff] }
 0x9cc   :  { %v4346_v5 = vmul.f32 0.5, %v4345_v27 }
 0x9cd   :  { %v4284_v1 = vmax.f32 %v4276_v59, 0.0  ;;  %4451 = vperm.xlu1 %7778, %v4377_v62   ;;  %v4385_v47 = vmul.f32 %v4377_v62, %v11879_v31 }
 0x9ce   :  { %v4347_v26 = vsub.f32 1.5, %v4346_v5  ;;  %v7996_v5 = vld [vmem:[%s14288_s5 + $0x38] sm:$0xff] }
 0x9cf   :  { %v7907_v57 = vpop.eup %7906  ;;  %v4292_v22 = vadd.f32 1e-05, %v4284_v1 }
 0x9d0   :  { %v4354_v42 = vmul.f32 %v7907_v57, %v4291_v38  ;;  %v4348_v18 = vmul.f32 %v7905_v8, %v4347_v26  ;;  %vm4360_vm13 = vweird.f32 %v7907_v57 }
 0x9d1   :  { %7908 = vrsqrt.f32 %v4292_v22  ;;  %vm4361_vm15 = vmor %vm4359_vm14, %vm4360_vm13  ;;  %vm4369_vm1 = vweird.f32 %v4292_v22 }
 0x9d2   :  { %v4355_v32 = vmul.f32 %v7907_v57, %v4354_v42  ;;  %v4352_v2 = vsel %vm4351_vm12, %v7905_v8, %v4348_v18  ;;  %v7997_v18 = vld [vmem:[%s14288_s5 + $0x10] sm:$0xff] }
 0x9d3   :  { %v4378_v30 = vmul.f32 %v11924_v33, %v4352_v2 }
 0x9d4   :  { %v4356_v34 = vmul.f32 0.5, %v4355_v32 }
 0x9d5   :  { %4405 = vrot.lane.b32.xlu1 %v4385_v47, %s8049_s21  ;;  %4456 = vperm.xlu0 %7776, %v4378_v30   ;;  %v4386_v27 = vmul.f32 %v4378_v30, %v11889_v50 }
 0x9d6   :  { %v4357_v56 = vsub.f32 1.5, %v4356_v34  ;;  %v7999_v34 = vld [vmem:[%s14288_s5 + $0x8] sm:$0xff] }
 0x9d7   :  { %v7909_v45 = vpop.eup %7908 }
 0x9d8   :  { %v4364_v63 = vmul.f32 %v7909_v45, %v4292_v22  ;;  %v4358_v44 = vmul.f32 %v7907_v57, %v4357_v56  ;;  %vm4370_vm0 = vweird.f32 %v7909_v45 }
 0x9d9   :  { %vm4371_vm2 = vmor %vm4369_vm1, %vm4370_vm0 }
 0x9da   :  { %v4365_v8 = vmul.f32 %v7909_v45, %v4364_v63  ;;  %v4362_v31 = vsel %vm4361_vm15, %v7907_v57, %v4358_v44  ;;  %v8054_v57 = vmov 5  }
 0x9db   :  { %v4379_v24 = vmul.f32 %v7995_v58, %v4362_v31 }
 0x9dc   :  { %v4366_v14 = vmul.f32 0.5, %v4365_v8 }
 0x9dd   :  { %4461 = vperm.xlu2 %7777, %v4379_v24   ;;  %4407 = vrot.lane.b32.xlu0 %v4386_v27, %s8049_s21  ;;  %v4387_v26 = vmul.f32 %v4379_v24, %v11898_v40 }
 0x9de   :  { %v4367_v59 = vsub.f32 1.5, %v4366_v14  ;;  %7779 = vset.pattern.permute.xlu0 %v8054_v57 }
 0x9e0   :  { %v4368_v38 = vmul.f32 %v7909_v45, %v4367_v59 }
 0x9e2   :  { %v4372_v62 = vsel %vm4371_vm2, %v7909_v45, %v4368_v38 }
 0x9e3   :  { %v4380_v1 = vmul.f32 %v7996_v5, %v4372_v62 }
 0x9e5   :  { %4466 = vperm.xlu1 %7778, %v4380_v1   ;;  %4409 = vrot.lane.b32.xlu2 %v4387_v26, %s8049_s21  ;;  %v4388_v50 = vmul.f32 %v4380_v1, %v4252_v13  ;;  %v7998_v13 = vld [vmem:[%s14288_s5] sm:$0xff] }
 0x9e6   :  { %7780 = vset.pattern.permute.xlu2 %v8054_v57 }
 0x9ed   :  { %4411 = vrot.lane.b32.xlu1 %v4388_v50, %s8049_s21 }
 0x9ee   :  { %7781 = vset.pattern.permute.xlu1 %v8054_v57 }
 0xa0f   :  { %v4437_v22 = vpop.permute.xlu2 %4436 }
 0xa19   :  { %v4402_v42 = vpop.permute.xlu2 %4401 }
 0xa1a   :  { %v4423_v32 = vsub.f32 %v7997_v18, %v4402_v42 }
 0xa1c   :  { %4513 = vperm.xlu1 %7781, %v4423_v32  }
 0xa1f   :  { %v4432_v2 = vpop.permute.xlu0 %4431 }
 0xa21   :  { %v4447_v45 = vpop.permute.xlu2 %4446 }
 0xa27   :  { %v4398_v40 = vpop.permute.xlu0 %4397 }
 0xa28   :  { %v4421_v47 = vsub.f32 %v7998_v13, %v4398_v40  ;;  %v11958_v40 = vmul.f32 %v4437_v22, %v11712_v49  ;;  %v11967_v13 = vmul.f32 %v4437_v22, %v11725_v43  ;;  %v11979_v49 = vmul.f32 %v4432_v2, %v11705_v52 }
 0xa29   :  { %v4400_v30 = vpop.permute.xlu1 %4399  ;;  %v4484_v43 = vmul.f32 %v4447_v45, %v11765_v17 }
 0xa2a   :  { %v4422_v56 = vsub.f32 %v7999_v34, %v4400_v30  ;;  %4503 = vperm.xlu0 %7779, %v4421_v47   ;;  %v11973_v47 = vmul.f32 %v4432_v2, %v11695_v29  ;;  %v11976_v30 = vmul.f32 %v4432_v2, %v11703_v7  ;;  %v4483_v34 = vmul.f32 %v4447_v45, %v11763_v15 }
 0xa2c   :  { %4508 = vperm.xlu2 %7780, %v4422_v56  }
 0xa31   :  { %v4442_v63 = vpop.permute.xlu1 %4441 }
 0xa32   :  { %v4477_v56 = vmul.f32 %v4442_v63, %v11730_v41  ;;  %v4478_v29 = vmul.f32 %v4442_v63, %v11732_v37  ;;  %v4479_v7 = vmul.f32 %v4442_v63, %v11743_v10 }
 0xa37   :  { %v4462_v44 = vpop.permute.xlu2 %4461 }
 0xa38   :  { %v4493_v52 = vmul.f32 %v4462_v44, %v11810_v36  ;;  %v4496_v15 = vmul.f32 %v4462_v44, %v11825_v23 }
 0xa39   :  { %v4404_v8 = vpop.permute.xlu0 %4403 }
 0xa3a   :  { %v4424_v31 = vsub.f32 %v11907_v39, %v4404_v8  ;;  %v4480_v8 = vmul.f32 %v4442_v63, %v11745_v6 }
 0xa3c   :  { %4518 = vperm.xlu2 %7780, %v4424_v31  }
 0xa3f   :  { %v4452_v24 = vpop.permute.xlu1 %4451  ;;  %v4410_v27 = vpop.permute.xlu2 %4409 }
 0xa40   :  { %v4427_v14 = vsub.f32 %v7995_v58, %v4410_v27  ;;  %v4485_v17 = vmul.f32 %v4452_v24, %v11770_v46  ;;  %v4487_v41 = vmul.f32 %v4452_v24, %v11783_v55  ;;  %v4488_v37 = vmul.f32 %v4452_v24, %v11785_v19 }
 0xa44   :  { %4533 = vperm.xlu2 %7780, %v4427_v14  }
 0xa47   :  { %v4406_v59 = vpop.permute.xlu1 %4405  ;;  %v4457_v38 = vpop.permute.xlu0 %4456 }
 0xa48   :  { %v4425_v62 = vsub.f32 %v11917_v35, %v4406_v59  ;;  %v11961_v35 = vmul.f32 %v4437_v22, %v11714_v51  ;;  %v4481_v51 = vmul.f32 %v4447_v45, %v11752_v21  ;;  %v4494_v21 = vmul.f32 %v4462_v44, %v11812_v60 }
 0xa49   :  { %v4489_v6 = vmul.f32 %v4457_v38, %v11792_v54  ;;  %v4490_v36 = vmul.f32 %v4457_v38, %v11794_v28  ;;  %v4492_v23 = vmul.f32 %v4457_v38, %v11805_v61 }
 0xa4a   :  { %4523 = vperm.xlu1 %7781, %v4425_v62  }
 0xa4f   :  { %v4408_v1 = vpop.permute.xlu0 %4407 }
 0xa50   :  { %v4426_v26 = vsub.f32 %v11924_v33, %v4408_v1  ;;  %v11964_v33 = vmul.f32 %v4437_v22, %v11723_v20  ;;  %v4482_v20 = vmul.f32 %v4447_v45, %v11754_v25  ;;  %v4495_v25 = vmul.f32 %v4462_v44, %v11823_v4 }
 0xa51   :  { %v4491_v4 = vmul.f32 %v4457_v38, %v11803_v3 }
 0xa52   :  { %4528 = vperm.xlu0 %7779, %v4426_v26  }
 0xa57   :  { %v4467_v50 = vpop.permute.xlu1 %4466 }
 0xa58   :  { %v4497_v46 = vmul.f32 %v4467_v50, %v11832_v12  ;;  %v4499_v55 = vmul.f32 %v4467_v50, %v11843_v9  ;;  %v4500_v19 = vmul.f32 %v4467_v50, %v11845_v16 }
 0xa5f   :  { %v4412_v57 = vpop.permute.xlu1 %4411 }
 0xa60   :  { %v4428_v42 = vsub.f32 %v7996_v5, %v4412_v57  ;;  %v11970_v5 = vmul.f32 %v4432_v2, %v11693_v11  ;;  %v4486_v2 = vmul.f32 %v4452_v24, %v11772_v0  ;;  %v4498_v0 = vmul.f32 %v4467_v50, %v11834_v48 }
 0xa62   :  { %4538 = vperm.xlu1 %7781, %v4428_v42  }
 0xa86   :  { %v11951_v18 = vpop.permute.xlu2 %4508 }
 0xa8e   :  { %v11953_v32 = vpop.permute.xlu1 %4513 }
 0xa8f   :  { %v12006_v31 = vadd.f32 %v11953_v32, %v4477_v56  ;;  %v12011_v28 = vadd.f32 %v11953_v32, %v4478_v29 }
 0xa96   :  { %v4519_v39 = vpop.permute.xlu2 %4518 }
 0xa97   :  { %v12008_v54 = vadd.f32 %v4519_v39, %v4481_v51  ;;  %v12013_v3 = vadd.f32 %v4519_v39, %v4482_v20  ;;  %v12015_v12 = vadd.f32 %v4519_v39, %v4483_v34  ;;  %v12017_v48 = vadd.f32 %v4519_v39, %v4484_v43 }
 0xa9c   :  { %v11955_v58 = vpop.permute.xlu0 %4503 }
 0xa9e   :  { %v4534_v22 = vpop.permute.xlu2 %4533 }
 0xa9f   :  { %v4565_v45 = vadd.f32 %v4534_v22, %v4493_v52  ;;  %v4566_v10 = vadd.f32 %v4534_v22, %v4494_v21  ;;  %v4567_v63 = vadd.f32 %v4534_v22, %v4495_v25  ;;  %v4568_v60 = vadd.f32 %v4534_v22, %v4496_v15 }
 0xaa1   :  { %v4597_v61 = vmax.f32 %v4565_v45, 0.0  ;;  %v4598_v24 = vmax.f32 %v4566_v10, 0.0  ;;  %v4599_v9 = vmax.f32 %v4567_v63, 0.0  ;;  %v4600_v27 = vmax.f32 %v4568_v60, 0.0 }
 0xaa2   :  { %v4585_v60 = vmax.f32 %v12008_v54, 0.0  ;;  %v4581_v54 = vmax.f32 %v12006_v31, 0.0 }
 0xabc   :  { %v4524_v11 = vpop.permute.xlu1 %4523 }
 0xabd   :  { %v4557_v50 = vadd.f32 %v4524_v11, %v4485_v17  ;;  %v4558_v57 = vadd.f32 %v4524_v11, %v4486_v2  ;;  %v4559_v43 = vadd.f32 %v4524_v11, %v4487_v41  ;;  %v4560_v52 = vadd.f32 %v4524_v11, %v4488_v37 }
 0xabe   :  { %v4552_v17 = vadd.f32 %v11953_v32, %v4480_v8  ;;  %v4587_v37 = vmax.f32 %v12015_v12, 0.0  ;;  %v4542_v8 = vadd.f32 %v11955_v58, %v11973_v47  ;;  %v4546_v47 = vadd.f32 %v11951_v18, %v11961_v35 }
 0xabf   :  { %v4589_v2 = vmax.f32 %v4557_v50, 0.0  ;;  %v4590_v63 = vmax.f32 %v4558_v57, 0.0  ;;  %v4591_v11 = vmax.f32 %v4559_v43, 0.0  ;;  %v4592_v41 = vmax.f32 %v4560_v52, 0.0  ;;  %v7717_v50 = vld [vmem:[%s14291_s4 + $0x18] sm:$0xff]  ;;  %v7718_v57 = vld [vmem:[%s14291_s4 + $0x20] sm:$0xff] }
 0xac4   :  { %v4529_v44 = vpop.permute.xlu0 %4528 }
 0xac5   :  { %v4561_v14 = vadd.f32 %v4529_v44, %v4489_v6  ;;  %v4562_v59 = vadd.f32 %v4529_v44, %v4490_v36  ;;  %v4563_v42 = vadd.f32 %v4529_v44, %v4491_v4  ;;  %v4564_v51 = vadd.f32 %v4529_v44, %v4492_v23 }
 0xac6   :  { %v4551_v36 = vadd.f32 %v11953_v32, %v4479_v7  ;;  %v4586_v4 = vmax.f32 %v12013_v3, 0.0  ;;  %v4588_v23 = vmax.f32 %v12017_v48, 0.0  ;;  %v4541_v32 = vadd.f32 %v11955_v58, %v11970_v5 }
 0xac7   :  { %v4593_v29 = vmax.f32 %v4561_v14, 0.0  ;;  %v4594_v39 = vmax.f32 %v4562_v59, 0.0  ;;  %v4595_v10 = vmax.f32 %v4563_v42, 0.0  ;;  %v4596_v6 = vmax.f32 %v4564_v51, 0.0  ;;  %v7719_v42 = vld [vmem:[%s14291_s4 + $0x28] sm:$0xff]  ;;  %v7720_v51 = vld [vmem:[%s14291_s4 + $0x30] sm:$0xff] }
 0xac8   :  { %v4544_v44 = vadd.f32 %v11955_v58, %v11979_v49  ;;  %v4582_v3 = vmax.f32 %v12011_v28, 0.0  ;;  %v4545_v5 = vadd.f32 %v11951_v18, %v11958_v40  ;;  %v4641_v49 = vpack.c.bf16 %v4585_v60, %v4581_v54 }
 0xac9   :  { %v4646_v7 = vpack.c.bf16 %v4594_v39, %v4590_v63  ;;  %v4573_v12 = vmax.f32 %v4541_v32, 0.0  ;;  %v4574_v28 = vmax.f32 %v4542_v8, 0.0  ;;  %v7723_v32 = vld [vmem:[%s14291_s4 + $0x48] sm:$0xff] }
 0xaca   :  { %v4642_v31 = vpack.c.bf16 %v4586_v4, %v4582_v3  ;;  %v4577_v35 = vmax.f32 %v4545_v5, 0.0 }
 0xad4   :  { %v4539_v16 = vpop.permute.xlu1 %4538 }
 0xad5   :  { %v4569_v38 = vadd.f32 %v4539_v16, %v4497_v46  ;;  %v4570_v62 = vadd.f32 %v4539_v16, %v4498_v0  ;;  %v4571_v1 = vadd.f32 %v4539_v16, %v4499_v55  ;;  %v4572_v26 = vadd.f32 %v4539_v16, %v4500_v19 }
 0xad6   :  { %v4645_v46 = vpack.c.bf16 %v4593_v29, %v4589_v2  ;;  %v4647_v0 = vpack.c.bf16 %v4595_v10, %v4591_v11  ;;  %v4648_v55 = vpack.c.bf16 %v4596_v6, %v4592_v41  ;;  %v4543_v19 = vadd.f32 %v11955_v58, %v11976_v30 }
 0xad7   :  { %v4601_v20 = vmax.f32 %v4569_v38, 0.0  ;;  %v4602_v22 = vmax.f32 %v4570_v62, 0.0  ;;  %v4603_v56 = vmax.f32 %v4571_v1, 0.0  ;;  %v4604_v34 = vmax.f32 %v4572_v26, 0.0  ;;  %v7715_v1 = vld [vmem:[%s14291_s4 + $0x8] sm:$0xff]  ;;  %v7716_v26 = vld [vmem:[%s14291_s4 + $0x10] sm:$0xff] }
 0xad8   :  { %v4547_v30 = vadd.f32 %v11951_v18, %v11964_v33  ;;  %v4548_v58 = vadd.f32 %v11951_v18, %v11967_v13  ;;  %v4575_v40 = vmax.f32 %v4543_v19, 0.0  ;;  %v4578_v16 = vmax.f32 %v4546_v47, 0.0  ;;  %v7714_v13 = vld [vmem:[%s14291_s4] sm:$0xff] }
 0xad9   :  { %v4649_v21 = vpack.c.bf16 %v4601_v20, %v4597_v61  ;;  %v4650_v25 = vpack.c.bf16 %v4602_v22, %v4598_v24  ;;  %v4651_v15 = vpack.c.bf16 %v4603_v56, %v4599_v9  ;;  %v4652_v45 = vpack.c.bf16 %v4604_v34, %v4600_v27  ;;  %v7721_v20 = vld [vmem:[%s14291_s4 + $0x38] sm:$0xff]  ;;  %v7722_v22 = vld [vmem:[%s14291_s4 + $0x40] sm:$0xff] }
 0xada   :  { %v4583_v61 = vmax.f32 %v4551_v36, 0.0  ;;  %v4584_v24 = vmax.f32 %v4552_v17, 0.0  ;;  %v4576_v27 = vmax.f32 %v4544_v44, 0.0  ;;  %v4579_v14 = vmax.f32 %v4547_v30, 0.0 }
 0xadb   :  { %4785 = vmatpush.bf16.msrb.mxu0 %v4649_v21  ;;  %4874 = vmatpush.bf16.msrb.mxu1 %v4650_v25  ;;  %v4580_v59 = vmax.f32 %v4548_v58, 0.0  ;;  %v4637_v33 = vpack.c.bf16 %v4577_v35, %v4573_v12  ;;  %v4638_v38 = vpack.c.bf16 %v4578_v16, %v4574_v28 }
 0xadc   :  { %4963 = vmatpush.bf16.msrb.mxu2 %v4651_v15  ;;  %5052 = vmatpush.bf16.msrb.mxu3 %v4652_v45  ;;  %v4643_v48 = vpack.c.bf16 %v4587_v37, %v4583_v61  ;;  %v4644_v9 = vpack.c.bf16 %v4588_v23, %v4584_v24  ;;  %v4639_v62 = vpack.c.bf16 %v4579_v14, %v4575_v40 }
 0xadd   :  { %v4640_v18 = vpack.c.bf16 %v4580_v59, %v4576_v27 }
 0xadf   :  { %4786 = vmatpush.bf16.msrb.mxu0 %v4645_v46  ;;  %4875 = vmatpush.bf16.msrb.mxu1 %v4646_v7 }
 0xae0   :  { %4964 = vmatpush.bf16.msrb.mxu2 %v4647_v0  ;;  %5053 = vmatpush.bf16.msrb.mxu3 %v4648_v55 }
 0xae3   :  { %4787 = vmatpush.bf16.msrb.mxu0 %v4641_v49  ;;  %4876 = vmatpush.bf16.msrb.mxu1 %v4642_v31 }
 0xae4   :  { %4965 = vmatpush.bf16.msrb.mxu2 %v4643_v48  ;;  %5054 = vmatpush.bf16.msrb.mxu3 %v4644_v9 }
 0xae7   :  { %4788 = vmatpush.bf16.msrb.mxu0 %v4637_v33  ;;  %4877 = vmatpush.bf16.msrb.mxu1 %v4638_v38 }
 0xae8   :  { %4966 = vmatpush.bf16.msrb.mxu2 %v4639_v62  ;;  %5055 = vmatpush.bf16.msrb.mxu3 %v4640_v18 }
 0xaea   :  { %7542 = vmatmul.msk.bf16.vlgmr.msrb.gmra.mxu0 %vm3988_vm9, %v7714_v13  ;;  %7558 = vmatmul.msk.bf16.vlgmr.msrb.gmra.mxu1 %vm3988_vm9, %v7714_v13 }
 0xaeb   :  { %7574 = vmatmul.msk.bf16.vlgmr.msrb.gmra.mxu2 %vm3988_vm9, %v7714_v13  ;;  %7590 = vmatmul.msk.bf16.vlgmr.msrb.gmra.mxu3 %vm3988_vm9, %v7714_v13 }
 0xafa   :  { %7543 = vmatmul.msk.bf16.gmra.mxu0 %vm3988_vm9, %v7715_v1  ;;  %7559 = vmatmul.msk.bf16.gmra.mxu1 %vm3988_vm9, %v7715_v1 }
 0xafb   :  { %7575 = vmatmul.msk.bf16.gmra.mxu2 %vm3988_vm9, %v7715_v1  ;;  %7591 = vmatmul.msk.bf16.gmra.mxu3 %vm3988_vm9, %v7715_v1 }
 0xb0a   :  { %7544 = vmatmul.msk.bf16.gmra.mxu0 %vm3988_vm9, %v7716_v26  ;;  %7560 = vmatmul.msk.bf16.gmra.mxu1 %vm3988_vm9, %v7716_v26 }
 0xb0b   :  { %7576 = vmatmul.msk.bf16.gmra.mxu2 %vm3988_vm9, %v7716_v26  ;;  %7592 = vmatmul.msk.bf16.gmra.mxu3 %vm3988_vm9, %v7716_v26 }
 0xb1a   :  { %7545 = vmatmul.msk.bf16.gmra.mxu0 %vm3988_vm9, %v7717_v50  ;;  %7561 = vmatmul.msk.bf16.gmra.mxu1 %vm3988_vm9, %v7717_v50 }
 0xb1b   :  { %7577 = vmatmul.msk.bf16.gmra.mxu2 %vm3988_vm9, %v7717_v50  ;;  %7593 = vmatmul.msk.bf16.gmra.mxu3 %vm3988_vm9, %v7717_v50 }
 0xb2a   :  { %7546 = vmatmul.msk.bf16.gmra.mxu0 %vm3988_vm9, %v7718_v57  ;;  %7562 = vmatmul.msk.bf16.gmra.mxu1 %vm3988_vm9, %v7718_v57 }
 0xb2b   :  { %7578 = vmatmul.msk.bf16.gmra.mxu2 %vm3988_vm9, %v7718_v57  ;;  %7594 = vmatmul.msk.bf16.gmra.mxu3 %vm3988_vm9, %v7718_v57 }
 0xb3a   :  { %7547 = vmatmul.msk.bf16.gmra.mxu0 %vm3988_vm9, %v7719_v42  ;;  %7563 = vmatmul.msk.bf16.gmra.mxu1 %vm3988_vm9, %v7719_v42 }
 0xb3b   :  { %7579 = vmatmul.msk.bf16.gmra.mxu2 %vm3988_vm9, %v7719_v42  ;;  %7595 = vmatmul.msk.bf16.gmra.mxu3 %vm3988_vm9, %v7719_v42 }
 0xb4a   :  { %7548 = vmatmul.msk.bf16.gmra.mxu0 %vm3988_vm9, %v7720_v51  ;;  %7564 = vmatmul.msk.bf16.gmra.mxu1 %vm3988_vm9, %v7720_v51 }
 0xb4b   :  { %7580 = vmatmul.msk.bf16.gmra.mxu2 %vm3988_vm9, %v7720_v51  ;;  %7596 = vmatmul.msk.bf16.gmra.mxu3 %vm3988_vm9, %v7720_v51 }
 0xb5a   :  { %7549 = vmatmul.msk.bf16.gmra.mxu0 %vm3988_vm9, %v7721_v20  ;;  %7565 = vmatmul.msk.bf16.gmra.mxu1 %vm3988_vm9, %v7721_v20 }
 0xb5b   :  { %7581 = vmatmul.msk.bf16.gmra.mxu2 %vm3988_vm9, %v7721_v20  ;;  %7597 = vmatmul.msk.bf16.gmra.mxu3 %vm3988_vm9, %v7721_v20 }
 0xb67   :  { %v12102_v56 = vpop.f32.mrf.mxu0  ;;  %v12104_v34 = vpop.f32.mrf.mxu1 }
 0xb68   :  { %15080 = vst [vmem:[#allocation72_spill] sm:$0xff] %v12102_v56  ;;  %v5329_v29 = vmul.f32 %v12102_v56, %v12102_v56  ;;  %v5330_v39 = vmul.f32 %v12104_v34, %v12104_v34  ;;  %v5137_v43 = vadd.f32 %v12104_v34, %v12102_v56 }
 0xb69   :  { %15081 = vst [vmem:[#allocation73_spill] sm:$0xff] %v12104_v34 }
 0xb6a   :  { %7550 = vmatmul.msk.bf16.gmra.mxu0 %vm3988_vm9, %v7722_v22  ;;  %7566 = vmatmul.msk.bf16.gmra.mxu1 %vm3988_vm9, %v7722_v22  ;;  %v5457_v52 = vadd.f32 %v5330_v39, %v5329_v29 }
 0xb6b   :  { %7582 = vmatmul.msk.bf16.gmra.mxu2 %vm3988_vm9, %v7722_v22  ;;  %7598 = vmatmul.msk.bf16.gmra.mxu3 %vm3988_vm9, %v7722_v22 }
 0xb6e   :  { %v12116_v21 = vpop.f32.mrf.mxu2  ;;  %v12118_v25 = vpop.f32.mrf.mxu3 }
 0xb6f   :  { %15082 = vst [vmem:[#allocation84_spill] sm:$0xff] %v12116_v21  ;;  %v5138_v15 = vadd.f32 %v5137_v43, %v12116_v21  ;;  %v5331_v45 = vmul.f32 %v12116_v21, %v12116_v21  ;;  %v5332_v10 = vmul.f32 %v12118_v25, %v12118_v25  ;;  %v12125_v6 = vpop.f32.mrf.mxu0  ;;  %v12127_v36 = vpop.f32.mrf.mxu1 }
 0xb70   :  { %15083 = vst [vmem:[#allocation80_spill] sm:$0xff] %v12118_v25  ;;  %v5333_v63 = vmul.f32 %v12125_v6, %v12125_v6  ;;  %v5334_v60 = vmul.f32 %v12127_v36, %v12127_v36  ;;  %v5142_v11 = vadd.f32 %v12127_v36, %v12125_v6 }
 0xb71   :  { %15084 = vst [vmem:[#allocation81_spill] sm:$0xff] %v12125_v6  ;;  %v5458_v17 = vadd.f32 %v5457_v52, %v5331_v45  ;;  %v5139_v2 = vadd.f32 %v5138_v15, %v12118_v25 }
 0xb72   :  { %15085 = vst [vmem:[#allocation77_spill] sm:$0xff] %v12127_v36  ;;  %v5462_v23 = vadd.f32 %v5334_v60, %v5333_v63 }
 0xb73   :  { %5140 = vadd.xlane.f32.xlu0 %v5139_v2  ;;  %v5459_v4 = vadd.f32 %v5458_v17, %v5332_v10 }
 0xb75   :  { %5460 = vadd.xlane.f32.xlu1 %v5459_v4 }
 0xb76   :  { %v12136_v41 = vpop.f32.mrf.mxu2  ;;  %v12138_v37 = vpop.f32.mrf.mxu3 }
 0xb77   :  { %15086 = vst [vmem:[#allocation86_spill] sm:$0xff] %v12136_v41  ;;  %v5143_v46 = vadd.f32 %v5142_v11, %v12136_v41  ;;  %v5335_v7 = vmul.f32 %v12136_v41, %v12136_v41  ;;  %v12146_v8 = vpop.f32.mrf.mxu0  ;;  %v12148_v0 = vpop.f32.mrf.mxu1  ;;  %v5336_v55 = vmul.f32 %v12138_v37, %v12138_v37 }
 0xb78   :  { %15087 = vst [vmem:[#allocation87_spill] sm:$0xff] %v12138_v37  ;;  %v5337_v19 = vmul.f32 %v12146_v8, %v12146_v8  ;;  %v5338_v44 = vmul.f32 %v12148_v0, %v12148_v0  ;;  %v5147_v5 = vadd.f32 %v12148_v0, %v12146_v8 }
 0xb79   :  { %v5144_v54 = vadd.f32 %v5143_v46, %v12138_v37  ;;  %v5463_v3 = vadd.f32 %v5462_v23, %v5335_v7 }
 0xb7a   :  { %7551 = vmatmul.msk.bf16.gmra.mxu0 %vm3988_vm9, %v7723_v32  ;;  %7567 = vmatmul.msk.bf16.gmra.mxu1 %vm3988_vm9, %v7723_v32  ;;  %v5467_v61 = vadd.f32 %v5338_v44, %v5337_v19 }
 0xb7b   :  { %7583 = vmatmul.msk.bf16.gmra.mxu2 %vm3988_vm9, %v7723_v32  ;;  %7599 = vmatmul.msk.bf16.gmra.mxu3 %vm3988_vm9, %v7723_v32  ;;  %v5464_v47 = vadd.f32 %v5463_v3, %v5336_v55 }
 0xb7c   :  { %5145 = vadd.xlane.f32.xlu2 %v5144_v54 }
 0xb7d   :  { %5465 = vadd.xlane.f32.xlu0 %v5464_v47 }
 0xb7e   :  { %v12163_v24 = vpop.f32.mrf.mxu2  ;;  %v12165_v30 = vpop.f32.mrf.mxu3 }
 0xb7f   :  { %15088 = vst [vmem:[#allocation82_spill] sm:$0xff] %v12165_v30  ;;  %v5148_v58 = vadd.f32 %v5147_v5, %v12163_v24  ;;  %v5339_v49 = vmul.f32 %v12163_v24, %v12163_v24  ;;  %v5340_v31 = vmul.f32 %v12165_v30, %v12165_v30  ;;  %v12172_v12 = vpop.f32.mrf.mxu0  ;;  %v12174_v28 = vpop.f32.mrf.mxu1 }
 0xb80   :  { %15089 = vst [vmem:[#allocation83_spill] sm:$0xff] %v12172_v12  ;;  %v5341_v40 = vmul.f32 %v12172_v12, %v12172_v12  ;;  %v5342_v27 = vmul.f32 %v12174_v28, %v12174_v28  ;;  %v5152_v16 = vadd.f32 %v12174_v28, %v12172_v12 }
 0xb81   :  { %15090 = vst [vmem:[#allocation85_spill] sm:$0xff] %v12174_v28  ;;  %v5468_v48 = vadd.f32 %v5467_v61, %v5339_v49  ;;  %v5149_v9 = vadd.f32 %v5148_v58, %v12165_v30 }
 0xb82   :  { %v5472_v33 = vadd.f32 %v5342_v27, %v5341_v40 }
 0xb83   :  { %5150 = vadd.xlane.f32.xlu1 %v5149_v9  ;;  %v5469_v35 = vadd.f32 %v5468_v48, %v5340_v31 }
 0xb85   :  { %5470 = vadd.xlane.f32.xlu2 %v5469_v35 }
 0xb86   :  { %v12183_v14 = vpop.f32.mrf.mxu2  ;;  %v12185_v59 = vpop.f32.mrf.mxu3 }
 0xb87   :  { %15091 = vst [vmem:[#allocation88_spill] sm:$0xff] %v12183_v14  ;;  %v5153_v38 = vadd.f32 %v5152_v16, %v12183_v14  ;;  %v5343_v62 = vmul.f32 %v12183_v14, %v12183_v14  ;;  %v12190_v18 = vpop.f32.mrf.mxu0  ;;  %v12192_v13 = vpop.f32.mrf.mxu1  ;;  %v5344_v1 = vmul.f32 %v12185_v59, %v12185_v59 }
 0xb88   :  { %15092 = vst [vmem:[#allocation22_spill] sm:$0xff] %v12185_v59  ;;  %v5345_v26 = vmul.f32 %v12190_v18, %v12190_v18  ;;  %v5346_v50 = vmul.f32 %v12192_v13, %v12192_v13  ;;  %v5157_v51 = vadd.f32 %v12192_v13, %v12190_v18 }
 0xb89   :  { %15093 = vst [vmem:[#allocation21_spill] sm:$0xff] %v12190_v18  ;;  %v5473_v57 = vadd.f32 %v5472_v33, %v5343_v62  ;;  %v5154_v42 = vadd.f32 %v5153_v38, %v12185_v59 }
 0xb8a   :  { %15094 = vst [vmem:[#allocation89_spill] sm:$0xff] %v12192_v13  ;;  %v5477_v22 = vadd.f32 %v5346_v50, %v5345_v26 }
 0xb8b   :  { %v5474_v20 = vadd.f32 %v5473_v57, %v5344_v1  ;;  %5155 = vadd.xlane.f32.xlu0 %v5154_v42  ;;  %v7724_v1 = vld [vmem:[%s14291_s4 + $0x50] sm:$0xff] }
 0xb8c   :  { %7584 = vmatmul.msk.bf16.gmra.mxu2 %vm3988_vm9, %v7724_v1  ;;  %7600 = vmatmul.msk.bf16.gmra.mxu3 %vm3988_vm9, %v7724_v1 }
 0xb8d   :  { %5475 = vadd.xlane.f32.xlu1 %v5474_v20  ;;  %7552 = vmatmul.msk.bf16.gmra.mxu0 %vm3988_vm9, %v7724_v1 }
 0xb8e   :  { %v12203_v29 = vpop.f32.mrf.mxu2  ;;  %v12205_v39 = vpop.f32.mrf.mxu3  ;;  %7568 = vmatmul.msk.bf16.gmra.mxu1 %vm3988_vm9, %v7724_v1 }
 0xb8f   :  { %15095 = vst [vmem:[#allocation96_spill] sm:$0xff] %v12203_v29  ;;  %v5158_v43 = vadd.f32 %v5157_v51, %v12203_v29  ;;  %v5347_v52 = vmul.f32 %v12203_v29, %v12203_v29  ;;  %v5348_v15 = vmul.f32 %v12205_v39, %v12205_v39  ;;  %v12212_v45 = vpop.f32.mrf.mxu1  ;;  %v12214_v10 = vpop.f32.mrf.mxu0 }
 0xb90   :  { %15096 = vst [vmem:[#allocation92_spill] sm:$0xff] %v12205_v39  ;;  %v5350_v63 = vmul.f32 %v12212_v45, %v12212_v45  ;;  %v5349_v60 = vmul.f32 %v12214_v10, %v12214_v10  ;;  %v5162_v11 = vadd.f32 %v12212_v45, %v12214_v10 }
 0xb91   :  { %15097 = vst [vmem:[#allocation93_spill] sm:$0xff] %v12212_v45  ;;  %v5478_v17 = vadd.f32 %v5477_v22, %v5347_v52  ;;  %v5159_v2 = vadd.f32 %v5158_v43, %v12205_v39 }
 0xb92   :  { %15098 = vst [vmem:[#allocation98_spill] sm:$0xff] %v12214_v10  ;;  %v5482_v7 = vadd.f32 %v5350_v63, %v5349_v60 }
 0xb93   :  { %5160 = vadd.xlane.f32.xlu2 %v5159_v2  ;;  %v5479_v4 = vadd.f32 %v5478_v17, %v5348_v15 }
 0xb95   :  { %5480 = vadd.xlane.f32.xlu0 %v5479_v4 }
 0xb96   :  { %v12223_v23 = vpop.f32.mrf.mxu2  ;;  %v12225_v46 = vpop.f32.mrf.mxu3 }
 0xb97   :  { %15099 = vst [vmem:[#allocation94_spill] sm:$0xff] %v12223_v23  ;;  %v5163_v32 = vadd.f32 %v5162_v11, %v12223_v23  ;;  %v5351_v55 = vmul.f32 %v12223_v23, %v12223_v23  ;;  %v12230_v19 = vpop.f32.mrf.mxu0  ;;  %v12232_v44 = vpop.f32.mrf.mxu1  ;;  %v5352_v54 = vmul.f32 %v12225_v46, %v12225_v46 }
 0xb98   :  { %15100 = vst [vmem:[#allocation90_spill] sm:$0xff] %v12225_v46  ;;  %v5353_v3 = vmul.f32 %v12230_v19, %v12230_v19  ;;  %v5354_v5 = vmul.f32 %v12232_v44, %v12232_v44  ;;  %v5167_v58 = vadd.f32 %v12232_v44, %v12230_v19 }
 0xb99   :  { %15101 = vst [vmem:[#allocation91_spill] sm:$0xff] %v12230_v19  ;;  %v5483_v47 = vadd.f32 %v5482_v7, %v5351_v55  ;;  %v5164_v61 = vadd.f32 %v5163_v32, %v12225_v46 }
 0xb9a   :  { %15102 = vst [vmem:[#allocation95_spill] sm:$0xff] %v12232_v44  ;;  %v5487_v31 = vadd.f32 %v5354_v5, %v5353_v3 }
 0xb9b   :  { %v5484_v49 = vadd.f32 %v5483_v47, %v5352_v54  ;;  %5165 = vadd.xlane.f32.xlu1 %v5164_v61 }
 0xb9d   :  { %5485 = vadd.xlane.f32.xlu2 %v5484_v49 }
 0xb9e   :  { %v12243_v48 = vpop.f32.mrf.mxu2  ;;  %v12245_v9 = vpop.f32.mrf.mxu3 }
 0xb9f   :  { %15103 = vst [vmem:[#allocation50_spill] sm:$0xff] %v12243_v48  ;;  %v5168_v40 = vadd.f32 %v5167_v58, %v12243_v48  ;;  %v5355_v27 = vmul.f32 %v12243_v48, %v12243_v48  ;;  %v5356_v35 = vmul.f32 %v12245_v9, %v12245_v9  ;;  %v12252_v16 = vpop.f32.mrf.mxu0  ;;  %v12254_v33 = vpop.f32.mrf.mxu1 }
 0xba0   :  { %15104 = vst [vmem:[#allocation51_spill] sm:$0xff] %v12245_v9  ;;  %v5357_v26 = vmul.f32 %v12252_v16, %v12252_v16  ;;  %v5358_v50 = vmul.f32 %v12254_v33, %v12254_v33  ;;  %v5172_v42 = vadd.f32 %v12254_v33, %v12252_v16 }
 0xba1   :  { %15105 = vst [vmem:[#allocation113_spill] sm:$0xff] %v12252_v16  ;;  %v5488_v38 = vadd.f32 %v5487_v31, %v5355_v27  ;;  %v5169_v62 = vadd.f32 %v5168_v40, %v12245_v9  ;;  %v7725_v27 = vld [vmem:[%s14291_s4 + $0x58] sm:$0xff] }
 0xba2   :  { %15106 = vst [vmem:[#allocation114_spill] sm:$0xff] %v12254_v33  ;;  %v5492_v22 = vadd.f32 %v5358_v50, %v5357_v26  ;;  %7585 = vmatmul.msk.bf16.gmra.mxu2 %vm3988_vm9, %v7725_v27  ;;  %7601 = vmatmul.msk.bf16.gmra.mxu3 %vm3988_vm9, %v7725_v27 }
 0xba3   :  { %v5489_v57 = vadd.f32 %v5488_v38, %v5356_v35  ;;  %5170 = vadd.xlane.f32.xlu0 %v5169_v62  ;;  %7553 = vmatmul.msk.bf16.gmra.mxu0 %vm3988_vm9, %v7725_v27 }
 0xba4   :  { %7569 = vmatmul.msk.bf16.gmra.mxu1 %vm3988_vm9, %v7725_v27 }
 0xba5   :  { %5490 = vadd.xlane.f32.xlu1 %v5489_v57 }
 0xba6   :  { %v12270_v51 = vpop.f32.mrf.mxu2  ;;  %v12272_v20 = vpop.f32.mrf.mxu3 }
 0xba7   :  { %15107 = vst [vmem:[#allocation54_spill] sm:$0xff] %v12270_v51  ;;  %v5173_v43 = vadd.f32 %v5172_v42, %v12270_v51  ;;  %v5359_v52 = vmul.f32 %v12270_v51, %v12270_v51  ;;  %v12277_v15 = vpop.f32.mrf.mxu0  ;;  %v12279_v17 = vpop.f32.mrf.mxu1  ;;  %v5360_v2 = vmul.f32 %v12272_v20, %v12272_v20 }
 0xba8   :  { %15108 = vst [vmem:[#allocation55_spill] sm:$0xff] %v12272_v20  ;;  %v5361_v63 = vmul.f32 %v12277_v15, %v12277_v15  ;;  %v5362_v60 = vmul.f32 %v12279_v17, %v12279_v17  ;;  %v5177_v7 = vadd.f32 %v12279_v17, %v12277_v15 }
 0xba9   :  { %15109 = vst [vmem:[#allocation117_spill] sm:$0xff] %v12277_v15  ;;  %v5174_v4 = vadd.f32 %v5173_v43, %v12272_v20  ;;  %v5493_v11 = vadd.f32 %v5492_v22, %v5359_v52 }
 0xbaa   :  { %15110 = vst [vmem:[#allocation118_spill] sm:$0xff] %v12279_v17  ;;  %v5497_v55 = vadd.f32 %v5362_v60, %v5361_v63 }
 0xbab   :  { %5175 = vadd.xlane.f32.xlu2 %v5174_v4  ;;  %v5494_v32 = vadd.f32 %v5493_v11, %v5360_v2 }
 0xbad   :  { %5495 = vadd.xlane.f32.xlu0 %v5494_v32 }
 0xbae   :  { %v12290_v54 = vpop.f32.mrf.mxu2  ;;  %v12292_v3 = vpop.f32.mrf.mxu3 }
 0xbaf   :  { %15111 = vst [vmem:[#allocation58_spill] sm:$0xff] %v12290_v54  ;;  %v5178_v5 = vadd.f32 %v5177_v7, %v12290_v54  ;;  %v5363_v47 = vmul.f32 %v12290_v54, %v12290_v54  ;;  %v5364_v61 = vmul.f32 %v12292_v3, %v12292_v3  ;;  %v12299_v58 = vpop.f32.mrf.mxu0  ;;  %v12301_v49 = vpop.f32.mrf.mxu1 }
 0xbb0   :  { %15112 = vst [vmem:[#allocation59_spill] sm:$0xff] %v12292_v3  ;;  %v5365_v35 = vmul.f32 %v12299_v58, %v12299_v58  ;;  %v5366_v38 = vmul.f32 %v12301_v49, %v12301_v49  ;;  %v5182_v1 = vadd.f32 %v12301_v49, %v12299_v58 }
 0xbb1   :  { %15113 = vst [vmem:[#allocation121_spill] sm:$0xff] %v12299_v58  ;;  %v5498_v31 = vadd.f32 %v5497_v55, %v5363_v47  ;;  %v5179_v40 = vadd.f32 %v5178_v5, %v12292_v3 }
 0xbb2   :  { %15114 = vst [vmem:[#allocation122_spill] sm:$0xff] %v12301_v49  ;;  %v5502_v57 = vadd.f32 %v5366_v38, %v5365_v35 }
 0xbb3   :  { %v5499_v62 = vadd.f32 %v5498_v31, %v5364_v61  ;;  %5180 = vadd.xlane.f32.xlu1 %v5179_v40 }
 0xbb5   :  { %5500 = vadd.xlane.f32.xlu2 %v5499_v62 }
 0xbb6   :  { %v12317_v26 = vpop.f32.mrf.mxu2  ;;  %v12319_v50 = vpop.f32.mrf.mxu3 }
 0xbb7   :  { %15115 = vst [vmem:[#allocation44_spill] sm:$0xff] %v12317_v26  ;;  %v5183_v42 = vadd.f32 %v5182_v1, %v12317_v26  ;;  %v5367_v22 = vmul.f32 %v12317_v26, %v12317_v26  ;;  %v12324_v43 = vpop.f32.mrf.mxu0  ;;  %v12326_v52 = vpop.f32.mrf.mxu1  ;;  %v5368_v2 = vmul.f32 %v12319_v50, %v12319_v50 }
 0xbb8   :  { %15116 = vst [vmem:[#allocation45_spill] sm:$0xff] %v12319_v50  ;;  %v5369_v4 = vmul.f32 %v12324_v43, %v12324_v43  ;;  %v5370_v11 = vmul.f32 %v12326_v52, %v12326_v52  ;;  %v5187_v7 = vadd.f32 %v12326_v52, %v12324_v43 }
 0xbb9   :  { %15117 = vst [vmem:[#allocation52_spill] sm:$0xff] %v12324_v43  ;;  %v5503_v63 = vadd.f32 %v5502_v57, %v5367_v22  ;;  %v5184_v60 = vadd.f32 %v5183_v42, %v12319_v50 }
 0xbba   :  { %15118 = vst [vmem:[#allocation107_spill] sm:$0xff] %v12326_v52  ;;  %v5507_v55 = vadd.f32 %v5370_v11, %v5369_v4 }
 0xbbb   :  { %v5504_v32 = vadd.f32 %v5503_v63, %v5368_v2  ;;  %5185 = vadd.xlane.f32.xlu0 %v5184_v60 }
 0xbbd   :  { %5505 = vadd.xlane.f32.xlu1 %v5504_v32 }
 0xbbe   :  { %v12337_v5 = vpop.f32.mrf.mxu2  ;;  %v12339_v47 = vpop.f32.mrf.mxu3 }
 0xbbf   :  { %15119 = vst [vmem:[#allocation108_spill] sm:$0xff] %v12337_v5  ;;  %v5188_v61 = vadd.f32 %v5187_v7, %v12337_v5  ;;  %v5371_v31 = vmul.f32 %v12337_v5, %v12337_v5  ;;  %v5372_v40 = vmul.f32 %v12339_v47, %v12339_v47  ;;  %v12346_v27 = vpop.f32.mrf.mxu0  ;;  %v12348_v35 = vpop.f32.mrf.mxu1 }
 0xbc0   :  { %15120 = vst [vmem:[#allocation53_spill] sm:$0xff] %v12339_v47  ;;  %v5373_v1 = vmul.f32 %v12346_v27, %v12346_v27  ;;  %v5374_v57 = vmul.f32 %v12348_v35, %v12348_v35  ;;  %v5192_v22 = vadd.f32 %v12348_v35, %v12346_v27 }
 0xbc1   :  { %15121 = vst [vmem:[#allocation48_spill] sm:$0xff] %v12346_v27  ;;  %v5508_v38 = vadd.f32 %v5507_v55, %v5371_v31  ;;  %v5189_v62 = vadd.f32 %v5188_v61, %v12339_v47 }
 0xbc2   :  { %15122 = vst [vmem:[#allocation49_spill] sm:$0xff] %v12348_v35  ;;  %v5512_v60 = vadd.f32 %v5374_v57, %v5373_v1 }
 0xbc3   :  { %5190 = vadd.xlane.f32.xlu2 %v5189_v62  ;;  %v5509_v42 = vadd.f32 %v5508_v38, %v5372_v40 }
 0xbc5   :  { %5510 = vadd.xlane.f32.xlu0 %v5509_v42 }
 0xbc6   :  { %v12357_v2 = vpop.f32.mrf.mxu2  ;;  %v12359_v63 = vpop.f32.mrf.mxu3 }
 0xbc7   :  { %15123 = vst [vmem:[#allocation115_spill] sm:$0xff] %v12357_v2  ;;  %v5193_v4 = vadd.f32 %v5192_v22, %v12357_v2  ;;  %v5375_v11 = vmul.f32 %v12357_v2, %v12357_v2  ;;  %v12364_v7 = vpop.f32.mrf.mxu0  ;;  %v12366_v32 = vpop.f32.mrf.mxu1  ;;  %v5376_v55 = vmul.f32 %v12359_v63, %v12359_v63 }
 0xbc8   :  { %15124 = vst [vmem:[#allocation111_spill] sm:$0xff] %v12359_v63  ;;  %v5377_v40 = vmul.f32 %v12364_v7, %v12364_v7  ;;  %v5378_v38 = vmul.f32 %v12366_v32, %v12366_v32  ;;  %v5197_v62 = vadd.f32 %v12366_v32, %v12364_v7 }
 0xbc9   :  { %15125 = vst [vmem:[#allocation116_spill] sm:$0xff] %v12364_v7  ;;  %v5513_v61 = vadd.f32 %v5512_v60, %v5375_v11  ;;  %v5194_v31 = vadd.f32 %v5193_v4, %v12359_v63 }
 0xbca   :  { %15126 = vst [vmem:[#allocation112_spill] sm:$0xff] %v12366_v32  ;;  %v5517_v57 = vadd.f32 %v5378_v38, %v5377_v40 }
 0xbcb   :  { %v5514_v1 = vadd.f32 %v5513_v61, %v5376_v55  ;;  %5195 = vadd.xlane.f32.xlu1 %v5194_v31 }
 0xbcd   :  { %5515 = vadd.xlane.f32.xlu2 %v5514_v1 }
 0xbce   :  { %v12377_v42 = vpop.f32.mrf.mxu2  ;;  %v12379_v22 = vpop.f32.mrf.mxu3 }
 0xbcf   :  { %15127 = vst [vmem:[#allocation62_spill] sm:$0xff] %v12377_v42  ;;  %v5198_v60 = vadd.f32 %v5197_v62, %v12377_v42  ;;  %v5379_v4 = vmul.f32 %v12377_v42, %v12377_v42  ;;  %v5380_v11 = vmul.f32 %v12379_v22, %v12379_v22  ;;  %v12386_v50 = vpop.f32.mrf.mxu0  ;;  %v12388_v26 = vpop.f32.mrf.mxu1 }
 0xbd0   :  { %15128 = vst [vmem:[#allocation63_spill] sm:$0xff] %v12379_v22  ;;  %v5381_v31 = vmul.f32 %v12386_v50, %v12386_v50  ;;  %v5382_v40 = vmul.f32 %v12388_v26, %v12388_v26  ;;  %v5202_v62 = vadd.f32 %v12388_v26, %v12386_v50 }
 0xbd1   :  { %15129 = vst [vmem:[#allocation123_spill] sm:$0xff] %v12386_v50  ;;  %v5518_v55 = vadd.f32 %v5517_v57, %v5379_v4  ;;  %v5199_v61 = vadd.f32 %v5198_v60, %v12379_v22 }
 0xbd2   :  { %15130 = vst [vmem:[#allocation124_spill] sm:$0xff] %v12388_v26  ;;  %v5522_v32 = vadd.f32 %v5382_v40, %v5381_v31 }
 0xbd3   :  { %v5519_v38 = vadd.f32 %v5518_v55, %v5380_v11  ;;  %5200 = vadd.xlane.f32.xlu0 %v5199_v61 }
 0xbd5   :  { %5520 = vadd.xlane.f32.xlu1 %v5519_v38 }
 0xbd6   :  { %v12397_v1 = vpop.f32.mrf.mxu2  ;;  %v12399_v42 = vpop.f32.mrf.mxu3 }
 0xbd7   :  { %15131 = vst [vmem:[#allocation66_spill] sm:$0xff] %v12397_v1  ;;  %v5203_v57 = vadd.f32 %v5202_v62, %v12397_v1  ;;  %v5383_v60 = vmul.f32 %v12397_v1, %v12397_v1  ;;  %v12404_v4 = vpop.f32.mrf.mxu0  ;;  %v12406_v22 = vpop.f32.mrf.mxu1  ;;  %v5384_v11 = vmul.f32 %v12399_v42, %v12399_v42 }
 0xbd8   :  { %15132 = vst [vmem:[#allocation67_spill] sm:$0xff] %v12399_v42  ;;  %v5385_v38 = vmul.f32 %v12404_v4, %v12404_v4  ;;  %v5386_v31 = vmul.f32 %v12406_v22, %v12406_v22  ;;  %v5207_v40 = vadd.f32 %v12406_v22, %v12404_v4 }
 0xbd9   :  { %15133 = vst [vmem:[#allocation60_spill] sm:$0xff] %v12404_v4  ;;  %v5523_v55 = vadd.f32 %v5522_v32, %v5383_v60  ;;  %v5204_v61 = vadd.f32 %v5203_v57, %v12399_v42 }
 0xbda   :  { %15134 = vst [vmem:[#allocation61_spill] sm:$0xff] %v12406_v22  ;;  %v5527_v7 = vadd.f32 %v5386_v31, %v5385_v38 }
 0xbdb   :  { %5205 = vadd.xlane.f32.xlu2 %v5204_v61  ;;  %v5524_v62 = vadd.f32 %v5523_v55, %v5384_v11 }
 0xbdd   :  { %5525 = vadd.xlane.f32.xlu0 %v5524_v62 }
 0xbde   :  { %v12417_v49 = vpop.f32.mrf.mxu2  ;;  %v12419_v58 = vpop.f32.mrf.mxu3 }
 0xbdf   :  { %15135 = vst [vmem:[#allocation64_spill] sm:$0xff] %v12417_v49  ;;  %v5208_v32 = vadd.f32 %v5207_v40, %v12417_v49  ;;  %v5387_v57 = vmul.f32 %v12417_v49, %v12417_v49  ;;  %v5388_v60 = vmul.f32 %v12419_v58, %v12419_v58  ;;  %v12426_v9 = vpop.f32.mrf.mxu0  ;;  %v12428_v48 = vpop.f32.mrf.mxu1 }
 0xbe0   :  { %15136 = vst [vmem:[#allocation65_spill] sm:$0xff] %v12419_v58  ;;  %v5389_v55 = vmul.f32 %v12426_v9, %v12426_v9  ;;  %v5390_v38 = vmul.f32 %v12428_v48, %v12428_v48  ;;  %v5212_v40 = vadd.f32 %v12428_v48, %v12426_v9 }
 0xbe1   :  { %15137 = vst [vmem:[#allocation56_spill] sm:$0xff] %v12426_v9  ;;  %v5528_v61 = vadd.f32 %v5527_v7, %v5387_v57  ;;  %v5209_v11 = vadd.f32 %v5208_v32, %v12419_v58 }
 0xbe2   :  { %15138 = vst [vmem:[#allocation57_spill] sm:$0xff] %v12428_v48  ;;  %v5532_v22 = vadd.f32 %v5390_v38, %v5389_v55 }
 0xbe3   :  { %v5529_v31 = vadd.f32 %v5528_v61, %v5388_v60  ;;  %5210 = vadd.xlane.f32.xlu1 %v5209_v11 }
 0xbe5   :  { %5530 = vadd.xlane.f32.xlu2 %v5529_v31 }
 0xbe6   :  { %v12437_v62 = vpop.f32.mrf.mxu2  ;;  %v12439_v49 = vpop.f32.mrf.mxu3 }
 0xbe7   :  { %15139 = vst [vmem:[#allocation119_spill] sm:$0xff] %v12437_v62  ;;  %v5213_v7 = vadd.f32 %v5212_v40, %v12437_v62  ;;  %v5391_v32 = vmul.f32 %v12437_v62, %v12437_v62  ;;  %v12444_v57 = vpop.f32.mrf.mxu0  ;;  %v12446_v58 = vpop.f32.mrf.mxu1  ;;  %v5392_v60 = vmul.f32 %v12439_v49, %v12439_v49 }
 0xbe8   :  { %15140 = vst [vmem:[#allocation120_spill] sm:$0xff] %v12439_v49  ;;  %v5393_v61 = vmul.f32 %v12444_v57, %v12444_v57  ;;  %v5394_v11 = vmul.f32 %v12446_v58, %v12446_v58  ;;  %v5141_v31 = vpop.xlane.xlu0 %5140  ;;  %v5461_v55 = vpop.xlane.xlu1 %5460  ;;  %v5217_v9 = vadd.f32 %v12446_v58, %v12444_v57 }
 0xbe9   :  { %15141 = vst [vmem:[#allocation138_spill] sm:$0xff] %v12444_v57  ;;  %v5533_v38 = vadd.f32 %v5532_v22, %v5391_v32  ;;  %v5214_v40 = vadd.f32 %v5213_v7, %v12439_v49  ;;  %v12456_v62 = vmul.f32 %v5141_v31, %v15079_v53  ;;  %v5681_v48 = vmul.f32 %v5461_v55, %v15079_v53 }
 0xbea   :  { %15142 = vst [vmem:[#allocation125_spill] sm:$0xff] %v12446_v58  ;;  %v5537_v19 = vadd.f32 %v5394_v11, %v5393_v61 }
 0xbeb   :  { %v5713_v4 = vmul.f32 %v12456_v62, %v12456_v62  ;;  %v5534_v44 = vadd.f32 %v5533_v38, %v5392_v60  ;;  %5215 = vadd.xlane.f32.xlu0 %v5214_v40 }
 0xbed   :  { %5535 = vadd.xlane.f32.xlu1 %v5534_v44  ;;  %v5745_v39 = vsub.f32 %v5681_v48, %v5713_v4  ;;  %v7726_v48 = vld [vmem:[%s14291_s4 + $0x60] sm:$0xff] }
 0xbee   :  { %v12463_v29 = vpop.f32.mrf.mxu2  ;;  %v12465_v22 = vpop.f32.mrf.mxu3  ;;  %7586 = vmatmul.msk.bf16.gmra.mxu2 %vm3988_vm9, %v7726_v48  ;;  %7602 = vmatmul.msk.bf16.gmra.mxu3 %vm3988_vm9, %v7726_v48 }
 0xbef   :  { %15143 = vst [vmem:[#allocation46_spill] sm:$0xff] %v12463_v29  ;;  %v5218_v7 = vadd.f32 %v5217_v9, %v12463_v29  ;;  %v5395_v32 = vmul.f32 %v12463_v29, %v12463_v29  ;;  %v5396_v31 = vmul.f32 %v12465_v22, %v12465_v22  ;;  %v12472_v55 = vpop.f32.mrf.mxu1  ;;  %v12474_v58 = vpop.f32.mrf.mxu0  ;;  %v5777_v60 = vmax.f32 %v5745_v39, 0.0  ;;  %7554 = vmatmul.msk.bf16.gmra.mxu0 %vm3988_vm9, %v7726_v48 }
 0xbf0   :  { %15144 = vst [vmem:[#allocation126_spill] sm:$0xff] %v12465_v22  ;;  %v5146_v61 = vpop.xlane.xlu2 %5145  ;;  %v5466_v44 = vpop.xlane.xlu0 %5465  ;;  %v5398_v40 = vmul.f32 %v12472_v55, %v12472_v55  ;;  %v5397_v39 = vmul.f32 %v12474_v58, %v12474_v58  ;;  %7570 = vmatmul.msk.bf16.gmra.mxu1 %vm3988_vm9, %v7726_v48 }
 0xbf1   :  { %15145 = vst [vmem:[#allocation139_spill] sm:$0xff] %v12472_v55  ;;  %v5538_v4 = vadd.f32 %v5537_v19, %v5395_v32  ;;  %v5219_v9 = vadd.f32 %v5218_v7, %v12465_v22  ;;  %v12480_v11 = vadd.f32 1e-05, %v5777_v60  ;;  %v12483_v38 = vmul.f32 %v5146_v61, %v15079_v53 }
 0xbf2   :  { %15146 = vst [vmem:[#allocation47_spill] sm:$0xff] %v12474_v58  ;;  %v5682_v29 = vmul.f32 %v5466_v44, %v15079_v53  ;;  %v5222_v32 = vadd.f32 %v12472_v55, %v12474_v58  ;;  %v5542_v22 = vadd.f32 %v5398_v40, %v5397_v39 }
 0xbf3   :  { %5220 = vadd.xlane.f32.xlu2 %v5219_v9  ;;  %7910 = vrsqrt.f32 %v12480_v11  ;;  %v5714_v19 = vmul.f32 %v12483_v38, %v12483_v38  ;;  %v5539_v7 = vadd.f32 %v5538_v4, %v5396_v31  ;;  %v14530_v9 = vmov 6  }
 0xbf4   :  { %7782 = vset.pattern.permute.xlu1 %v14530_v9  ;;  %7784 = vset.pattern.permute.xlu0 %v14530_v9  ;;  %vm5847_vm4 = vweird.f32 %v12480_v11 }
 0xbf5   :  { %5540 = vadd.xlane.f32.xlu0 %v5539_v7  ;;  %v5746_v60 = vsub.f32 %v5682_v29, %v5714_v19  ;;  %7783 = vset.pattern.permute.xlu2 %v14530_v9 }
 0xbf6   :  { %v12499_v61 = vpop.f32.mrf.mxu2  ;;  %v12501_v44 = vpop.f32.mrf.mxu3 }
 0xbf7   :  { %15147 = vst [vmem:[#allocation35_spill] sm:$0xff] %v12499_v61  ;;  %v5223_v31 = vadd.f32 %v5222_v32, %v12499_v61  ;;  %v5399_v48 = vmul.f32 %v12499_v61, %v12499_v61  ;;  %v12508_v4 = vpop.f32.mrf.mxu1  ;;  %v12510_v57 = vpop.f32.mrf.mxu0  ;;  %v5400_v29 = vmul.f32 %v12501_v44, %v12501_v44  ;;  %v5778_v32 = vmax.f32 %v5746_v60, 0.0 }
 0xbf8   :  { %15148 = vst [vmem:[#allocation12_spill] sm:$0xff] %v12501_v44  ;;  %v5402_v19 = vmul.f32 %v12508_v4, %v12508_v4  ;;  %v5401_v40 = vmul.f32 %v12510_v57, %v12510_v57  ;;  %v5151_v39 = vpop.xlane.xlu1 %5150  ;;  %v5471_v7 = vpop.xlane.xlu2 %5470  ;;  %v5227_v18 = vadd.f32 %v12508_v4, %v12510_v57 }
 0xbf9   :  { %15149 = vst [vmem:[#allocation140_spill] sm:$0xff] %v12508_v4  ;;  %v7911_v49 = vpop.eup %7910  ;;  %v5543_v61 = vadd.f32 %v5542_v22, %v5399_v48  ;;  %v5224_v55 = vadd.f32 %v5223_v31, %v12501_v44  ;;  %v12521_v58 = vmul.f32 %v5151_v39, %v15079_v53  ;;  %v5683_v9 = vmul.f32 %v5471_v7, %v15079_v53 }
 0xbfa   :  { %15150 = vst [vmem:[#allocation16_spill] sm:$0xff] %v12510_v57  ;;  %v5842_v13 = vmul.f32 %v7911_v49, %v12480_v11  ;;  %v5810_v35 = vadd.f32 1e-05, %v5778_v32  ;;  %v5547_v22 = vadd.f32 %v5402_v19, %v5401_v40  ;;  %vm5848_vm3 = vweird.f32 %v7911_v49 }
 0xbfb   :  { %v5544_v63 = vadd.f32 %v5543_v61, %v5400_v29  ;;  %5225 = vadd.xlane.f32.xlu1 %v5224_v55  ;;  %v5715_v2 = vmul.f32 %v12521_v58, %v12521_v58  ;;  %vm5849_vm5 = vmor %vm5847_vm4, %vm5848_vm3 }
 0xbfc   :  { %v5843_v60 = vmul.f32 %v7911_v49, %v5842_v13  ;;  %7912 = vrsqrt.f32 %v5810_v35  ;;  %vm5857_vm11 = vweird.f32 %v5810_v35 }
 0xbfd   :  { %5545 = vadd.xlane.f32.xlu2 %v5544_v63  ;;  %v5747_v31 = vsub.f32 %v5683_v9, %v5715_v2 }
 0xbfe   :  { %v12529_v48 = vpop.f32.mrf.mxu2  ;;  %v12531_v39 = vpop.f32.mrf.mxu3  ;;  %v5844_v19 = vmul.f32 0.5, %v5843_v60 }
 0xbff   :  { %15151 = vst [vmem:[#allocation42_spill] sm:$0xff] %v12529_v48  ;;  %v5228_v7 = vadd.f32 %v5227_v18, %v12529_v48  ;;  %v5403_v44 = vmul.f32 %v12529_v48, %v12529_v48  ;;  %v5404_v55 = vmul.f32 %v12531_v39, %v12531_v39  ;;  %v12538_v61 = vpop.f32.mrf.mxu1  ;;  %v5779_v29 = vmax.f32 %v5747_v31, 0.0  ;;  %v12540_v13 = vpop.f32.mrf.mxu0 }
 0xc00   :  { %15152 = vst [vmem:[#allocation43_spill] sm:$0xff] %v12531_v39  ;;  %v5406_v2 = vmul.f32 %v12538_v61, %v12538_v61  ;;  %v5405_v40 = vmul.f32 %v12540_v13, %v12540_v13  ;;  %v5845_v48 = vsub.f32 1.5, %v5844_v19 }
 0xc01   :  { %15153 = vst [vmem:[#allocation40_spill] sm:$0xff] %v12538_v61  ;;  %v5548_v63 = vadd.f32 %v5547_v22, %v5403_v44  ;;  %v5229_v9 = vadd.f32 %v5228_v7, %v12531_v39  ;;  %v5811_v18 = vadd.f32 1e-05, %v5779_v29 }
 0xc02   :  { %15154 = vst [vmem:[#allocation13_spill] sm:$0xff] %v12540_v13  ;;  %v5552_v4 = vadd.f32 %v5406_v2, %v5405_v40  ;;  %v7913_v31 = vpop.eup %7912  ;;  %v5846_v7 = vmul.f32 %v7911_v49, %v5845_v48 }
 0xc03   :  { %7914 = vrsqrt.f32 %v5811_v18  ;;  %v5549_v32 = vadd.f32 %v5548_v63, %v5404_v55  ;;  %5230 = vadd.xlane.f32.xlu0 %v5229_v9  ;;  %v5852_v55 = vmul.f32 %v7913_v31, %v5810_v35  ;;  %vm5858_vm7 = vweird.f32 %v7913_v31 }
 0xc04   :  { %v5850_v9 = vsel %vm5849_vm5, %v7911_v49, %v5846_v7  ;;  %vm5867_vm8 = vweird.f32 %v5811_v18  ;;  %vm5859_vm12 = vmor %vm5857_vm11, %vm5858_vm7  ;;  %v5156_v7 = vpop.xlane.xlu0 %5155 }
 0xc05   :  { %5550 = vadd.xlane.f32.xlu1 %v5549_v32  ;;  %v5853_v40 = vmul.f32 %v7913_v31, %v5852_v55  ;;  %v8000_v32 = vld [vmem:[%s14288_s5] sm:$0xff] }
 0xc06   :  { %v12547_v57 = vpop.f32.mrf.mxu2  ;;  %v12549_v60 = vpop.f32.mrf.mxu3  ;;  %v6161_v27 = vmul.f32 %v8000_v32, %v5850_v9 }
 0xc07   :  { %15155 = vst [vmem:[#allocation34_spill] sm:$0xff] %v12547_v57  ;;  %v5407_v44 = vmul.f32 %v12547_v57, %v12547_v57  ;;  %v5408_v22 = vmul.f32 %v12549_v60, %v12549_v60  ;;  %v5854_v48 = vmul.f32 0.5, %v5853_v40  ;;  %v5232_v40 = vadd.f32 %v12538_v61, %v12540_v13 }
 0xc08   :  { %15156 = vst [vmem:[#allocation41_spill] sm:$0xff] %v12549_v60  ;;  %v6193_v41 = vmul.f32 %v6161_v27, %v12456_v62  ;;  %v8001_v62 = vld [vmem:[%s14288_s5 + $0x10] sm:$0xff] }
 0xc09   :  { %v7915_v29 = vpop.eup %7914  ;;  %v5553_v39 = vadd.f32 %v5552_v4, %v5407_v44  ;;  %v5855_v44 = vsub.f32 1.5, %v5854_v48 }
 0xc0a   :  { %v5862_v19 = vmul.f32 %v7915_v29, %v5811_v18  ;;  %vm5868_vm6 = vweird.f32 %v7915_v29  ;;  %v12580_v9 = vpop.f32.mrf.mxu0 }
 0xc0b   :  { %v5554_v2 = vadd.f32 %v5553_v39, %v5408_v22  ;;  %v5856_v39 = vmul.f32 %v7913_v31, %v5855_v44  ;;  %vm5869_vm10 = vmor %vm5867_vm8, %vm5868_vm6  ;;  %15157 = vst [vmem:[#allocation31_spill] sm:$0xff] %v12580_v9  ;;  %v12587_v32 = vpop.f32.mrf.mxu1 }
 0xc0c   :  { %v5863_v63 = vmul.f32 %v7915_v29, %v5862_v19  ;;  %v5476_v19 = vpop.xlane.xlu1 %5475  ;;  %15158 = vst [vmem:[#allocation23_spill] sm:$0xff] %v12587_v32 }
 0xc0d   :  { %5555 = vadd.xlane.f32.xlu0 %v5554_v2  ;;  %v5860_v22 = vsel %vm5859_vm12, %v7913_v31, %v5856_v39 }
 0xc0e   :  { %v5864_v37 = vmul.f32 0.5, %v5863_v63  ;;  %v5161_v63 = vpop.xlane.xlu2 %5160 }
 0xc0f   :  { %v12599_v44 = vpop.f32.mrf.mxu2 }
 0xc10   :  { %v5865_v4 = vsub.f32 1.5, %v5864_v37  ;;  %15159 = vst [vmem:[#allocation32_spill] sm:$0xff] %v12599_v44 }
 0xc12   :  { %v5866_v11 = vmul.f32 %v7915_v29, %v5865_v4  ;;  %v5233_v4 = vadd.f32 %v5232_v40, %v12547_v57 }
 0xc14   :  { %v5870_v49 = vsel %vm5869_vm10, %v7915_v29, %v5866_v11  ;;  %v12573_v31 = vpop.xlane.xlu1 %5165 }
 0xc15   :  { %6257 = vrot.lane.b32.xlu2 %v6193_v41, %s8049_s21  ;;  %v6163_v37 = vmul.f32 %v8001_v62, %v5870_v49  ;;  %v8002_v41 = vld [vmem:[%s14288_s5 + $0x8] sm:$0xff]  ;;  %v5234_v62 = vadd.f32 %v5233_v4, %v12549_v60  ;;  %v7728_v4 = vld [vmem:[%s14291_s4 + $0x70] sm:$0xff] }
 0xc16   :  { %v12567_v55 = vmul.f32 %v8002_v41, %v5860_v22  ;;  %v12607_v22 = vmul.f32 %v5156_v7, %v15079_v53  ;;  %v12612_v41 = vpop.f32.mrf.mxu0 }
 0xc17   :  { %v6195_v18 = vmul.f32 %v6163_v37, %v12521_v58  ;;  %v12590_v58 = vmul.f32 %v5161_v63, %v15079_v53  ;;  %15161 = vst [vmem:[#allocation129_spill] sm:$0xff] %v12612_v41  ;;  %v12626_v60 = vpop.f32.mrf.mxu2  ;;  %v5413_v61 = vmul.f32 %v12612_v41, %v12612_v41 }
 0xc18   :  { %v6194_v35 = vmul.f32 %v12567_v55, %v12483_v38  ;;  %v7727_v38 = vld [vmem:[%s14291_s4 + $0x68] sm:$0xff]  ;;  %15163 = vst [vmem:[#allocation24_spill] sm:$0xff] %v12626_v60 }
 0xc19   :  { %7587 = vmatmul.msk.bf16.gmra.mxu2 %vm3988_vm9, %v7727_v38  ;;  %7603 = vmatmul.msk.bf16.gmra.mxu3 %vm3988_vm9, %v7727_v38  ;;  %v5717_v49 = vmul.f32 %v12590_v58, %v12590_v58 }
 0xc1a   :  { %7555 = vmatmul.msk.bf16.gmra.mxu0 %vm3988_vm9, %v7727_v38  ;;  %7571 = vmatmul.msk.bf16.gmra.mxu1 %vm3988_vm9, %v7727_v38  ;;  %v5684_v38 = vmul.f32 %v5476_v19, %v15079_v53 }
 0xc1c   :  { %v12578_v2 = vpop.xlane.xlu1 %5490 }
 0xc1e   :  { %6387 = vperm.xlu1 %7782, %v6161_v27   ;;  %v5481_v27 = vpop.xlane.xlu0 %5480 }
 0xc1f   :  { %v5685_v39 = vmul.f32 %v5481_v27, %v15079_v53  ;;  %v5716_v27 = vmul.f32 %v12607_v22, %v12607_v22 }
 0xc21   :  { %6397 = vperm.xlu0 %7784, %v6163_v37   ;;  %v12610_v37 = vpop.f32.mrf.mxu3 }
 0xc22   :  { %15160 = vst [vmem:[#allocation15_spill] sm:$0xff] %v12610_v37 }
 0xc25   :  { %v12662_v17 = vpop.f32.mrf.mxu2 }
 0xc26   :  { %6259 = vrot.lane.b32.xlu1 %v6194_v35, %s8049_s21  ;;  %v12576_v29 = vpop.xlane.xlu0 %5170  ;;  %v12601_v11 = vpop.xlane.xlu1 %5180  ;;  %v5749_v35 = vsub.f32 %v5685_v39, %v5717_v49  ;;  %v5748_v39 = vsub.f32 %v5684_v38, %v5716_v27  ;;  %v5237_v49 = vadd.f32 %v12587_v32, %v12580_v9  ;;  %15167 = vst [vmem:[#allocation37_spill] sm:$0xff] %v12662_v17 }
 0xc27   :  { %v12642_v38 = vpop.f32.mrf.mxu0  ;;  %v5419_v1 = vmul.f32 %v12662_v17, %v12662_v17 }
 0xc28   :  { %v5781_v7 = vmax.f32 %v5749_v35, 0.0  ;;  %v5780_v35 = vmax.f32 %v5748_v39, 0.0  ;;  %15165 = vst [vmem:[#allocation135_spill] sm:$0xff] %v12642_v38  ;;  %v5417_v3 = vmul.f32 %v12642_v38, %v12642_v38 }
 0xc29   :  { %6261 = vrot.lane.b32.xlu0 %v6195_v18, %s8049_s21  ;;  %v12614_v18 = vpop.f32.mrf.mxu1  ;;  %7588 = vmatmul.msk.bf16.gmra.mxu2 %vm3988_vm9, %v7728_v4  ;;  %v12634_v19 = vpop.f32.mrf.mxu3 }
 0xc2a   :  { %15162 = vst [vmem:[#allocation28_spill] sm:$0xff] %v12614_v18  ;;  %7604 = vmatmul.msk.bf16.gmra.mxu3 %vm3988_vm9, %v7728_v4  ;;  %7556 = vmatmul.msk.bf16.gmra.mxu0 %vm3988_vm9, %v7728_v4  ;;  %v5242_v27 = vadd.f32 %v12614_v18, %v12612_v41  ;;  %v5414_v13 = vmul.f32 %v12614_v18, %v12614_v18 }
 0xc2b   :  { %15164 = vst [vmem:[#allocation134_spill] sm:$0xff] %v12634_v19  ;;  %7572 = vmatmul.msk.bf16.gmra.mxu1 %vm3988_vm9, %v7728_v4  ;;  %v5812_v4 = vadd.f32 1e-05, %v5780_v35  ;;  %v5415_v18 = vmul.f32 %v12626_v60, %v12626_v60 }
 0xc2c   :  { %v5243_v39 = vadd.f32 %v5242_v27, %v12626_v60  ;;  %v5562_v54 = vadd.f32 %v5414_v13, %v5413_v61 }
 0xc2d   :  { %vm5877_vm1 = vweird.f32 %v5812_v4 }
 0xc2e   :  { %v12594_v48 = vpop.xlane.xlu0 %5495  ;;  %v5244_v35 = vadd.f32 %v5243_v39, %v12634_v19  ;;  %v5563_v26 = vadd.f32 %v5562_v54, %v5415_v18 }
 0xc30   :  { %v12621_v40 = vpop.xlane.xlu1 %5505 }
 0xc31   :  { %v12649_v36 = vpop.f32.mrf.mxu1  ;;  %v12671_v61 = vpop.f32.mrf.mxu3 }
 0xc32   :  { %15166 = vst [vmem:[#allocation36_spill] sm:$0xff] %v12649_v36  ;;  %v5420_v39 = vmul.f32 %v12671_v61, %v12671_v61 }
 0xc33   :  { %15168 = vst [vmem:[#allocation69_spill] sm:$0xff] %v12671_v61 }
 0xc36   :  { %v12616_v63 = vpop.xlane.xlu0 %5185 }
 0xc3e   :  { %5235 = vadd.xlane.f32.xlu2 %v5234_v62  ;;  %v12630_v62 = vadd.f32 1e-05, %v5781_v7  ;;  %v12636_v57 = vpop.xlane.xlu0 %5510  ;;  %v5238_v7 = vadd.f32 %v5237_v49, %v12599_v44  ;;  %v12651_v6 = vpop.xlane.xlu1 %5195  ;;  %v5418_v49 = vmul.f32 %v12649_v36, %v12649_v36 }
 0xc40   :  { %7916 = vrsqrt.f32 %v12630_v62  ;;  %v5239_v41 = vadd.f32 %v5238_v7, %v12610_v37  ;;  %v5567_v27 = vadd.f32 %v5418_v49, %v5417_v3  ;;  %v5416_v7 = vmul.f32 %v12634_v19, %v12634_v19 }
 0xc41   :  { %7918 = vrsqrt.f32 %v5812_v4  ;;  %vm5887_vm14 = vweird.f32 %v12630_v62 }
 0xc42   :  { %v5568_v50 = vadd.f32 %v5567_v27, %v5419_v1  ;;  %v5564_v3 = vadd.f32 %v5563_v26, %v5416_v7 }
 0xc44   :  { %v5569_v18 = vadd.f32 %v5568_v50, %v5420_v39 }
 0xc46   :  { %v12664_v15 = vpop.xlane.xlu0 %5200  ;;  %v7917_v42 = vpop.eup %7916 }
 0xc47   :  { %v5882_v60 = vmul.f32 %v7917_v42, %v12630_v62  ;;  %v7919_v49 = vpop.eup %7918  ;;  %vm5888_vm13 = vweird.f32 %v7917_v42 }
 0xc48   :  { %v12673_v13 = vpop.xlane.xlu1 %5520  ;;  %vm5889_vm15 = vmor %vm5887_vm14, %vm5888_vm13  ;;  %vm5878_vm0 = vweird.f32 %v7919_v49 }
 0xc49   :  { %v5883_v46 = vmul.f32 %v7917_v42, %v5882_v60  ;;  %vm5879_vm2 = vmor %vm5877_vm1, %vm5878_vm0 }
 0xc4b   :  { %v5884_v23 = vmul.f32 0.5, %v5883_v46 }
 0xc50   :  { %5240 = vadd.xlane.f32.xlu1 %v5239_v41  ;;  %v12679_v54 = vpop.xlane.xlu0 %5525  ;;  %v5872_v41 = vmul.f32 %v7919_v49, %v5812_v4  ;;  %v8004_v4 = vld [vmem:[%s14288_s5 + $0x18] sm:$0xff] }
 0xc52   :  { %v5873_v45 = vmul.f32 %v7919_v49, %v5872_v41 }
 0xc53   :  { %5245 = vadd.xlane.f32.xlu0 %v5244_v35  ;;  %v5885_v35 = vsub.f32 1.5, %v5884_v23 }
 0xc54   :  { %v5874_v10 = vmul.f32 0.5, %v5873_v45  ;;  %v8003_v45 = vld [vmem:[%s14288_s5 + $0x20] sm:$0xff] }
 0xc56   :  { %6392 = vperm.xlu2 %7783, %v12567_v55   ;;  %v12681_v19 = vpop.xlane.xlu1 %5210  ;;  %v5886_v55 = vmul.f32 %v7917_v42, %v5885_v35  ;;  %v5875_v50 = vsub.f32 1.5, %v5874_v10  ;;  %v5410_v35 = vmul.f32 %v12587_v32, %v12587_v32 }
 0xc58   :  { %5565 = vadd.xlane.f32.xlu1 %v5564_v3  ;;  %v5890_v46 = vsel %vm5889_vm15, %v7917_v42, %v5886_v55  ;;  %v5876_v23 = vmul.f32 %v7919_v49, %v5875_v50  ;;  %v5409_v42 = vmul.f32 %v12580_v9, %v12580_v9  ;;  %v5486_v55 = vpop.xlane.xlu2 %5485 }
 0xc5a   :  { %v5880_v41 = vsel %vm5879_vm2, %v7919_v49, %v5876_v23 }
 0xc5b   :  { %5570 = vadd.xlane.f32.xlu0 %v5569_v18  ;;  %v12689_v18 = vmul.f32 %v8003_v45, %v5890_v46  ;;  %v5412_v45 = vmul.f32 %v12610_v37, %v12610_v37 }
 0xc5d   :  { %v6197_v10 = vmul.f32 %v12689_v18, %v12590_v58 }
 0xc5e   :  { %v5216_v1 = vpop.xlane.xlu0 %5215 }
 0xc5f   :  { %v5664_v27 = vmul.f32 %v5216_v1, %v15079_v53  ;;  %v12703_v1 = vmul.f32 %v8004_v4, %v5880_v41 }
 0xc60   :  { %v5536_v26 = vpop.xlane.xlu1 %5535  ;;  %v5176_v37 = vpop.xlane.xlu2 %5175 }
 0xc61   :  { %v5728_v7 = vmul.f32 %v5664_v27, %v5664_v27  ;;  %v5696_v60 = vmul.f32 %v5536_v26, %v15079_v53 }
 0xc63   :  { %v5760_v59 = vsub.f32 %v5696_v60, %v5728_v7  ;;  %v5557_v7 = vadd.f32 %v5410_v35, %v5409_v42  ;;  %v5411_v60 = vmul.f32 %v12599_v44, %v12599_v44  ;;  %v12729_v44 = vmul.f32 %v12573_v31, %v15079_v53 }
 0xc64   :  { %v5686_v31 = vmul.f32 %v5486_v55, %v15079_v53 }
 0xc65   :  { %v5792_v39 = vmax.f32 %v5760_v59, 0.0  ;;  %v5558_v23 = vadd.f32 %v5557_v7, %v5411_v60 }
 0xc67   :  { %v5824_v3 = vadd.f32 1e-05, %v5792_v39  ;;  %v5559_v7 = vadd.f32 %v5558_v23, %v5412_v45  ;;  %v12737_v23 = vmul.f32 %v5176_v37, %v15079_v53  ;;  %v7729_v45 = vld [vmem:[%s14291_s4 + $0x78] sm:$0xff] }
 0xc68   :  { %v12693_v62 = vpop.xlane.xlu0 %5540  ;;  %7589 = vmatmul.msk.bf16.gmra.mxu2 %vm3988_vm9, %v7729_v45  ;;  %7605 = vmatmul.msk.bf16.gmra.mxu3 %vm3988_vm9, %v7729_v45 }
 0xc69   :  { %7920 = vrsqrt.f32 %v5824_v3  ;;  %vm5997_vm4 = vweird.f32 %v5824_v3  ;;  %v5720_v37 = vmul.f32 %v12737_v23, %v12737_v23  ;;  %7557 = vmatmul.msk.bf16.gmra.mxu0 %vm3988_vm9, %v7729_v45  ;;  %7573 = vmatmul.msk.bf16.gmra.mxu1 %vm3988_vm9, %v7729_v45 }
 0xc6e   :  { %v12705_v26 = vpop.xlane.xlu1 %5225 }
 0xc6f   :  { %v7921_v59 = vpop.eup %7920  ;;  %6265 = vrot.lane.b32.xlu0 %v6197_v10, %s8049_s21 }
 0xc70   :  { %v5992_v49 = vmul.f32 %v7921_v59, %v5824_v3  ;;  %vm5998_vm3 = vweird.f32 %v7921_v59 }
 0xc71   :  { %6402 = vperm.xlu1 %7782, %v12703_v1   ;;  %vm5999_vm5 = vmor %vm5997_vm4, %vm5998_vm3 }
 0xc72   :  { %v5993_v58 = vmul.f32 %v7921_v59, %v5992_v49  ;;  %v12718_v49 = vpop.f32.mrf.mxu1 }
 0xc73   :  { %15169 = vst [vmem:[#allocation38_spill] sm:$0xff] %v12718_v49  ;;  %v5422_v30 = vmul.f32 %v12718_v49, %v12718_v49 }
 0xc74   :  { %v5994_v50 = vmul.f32 0.5, %v5993_v58  ;;  %v12720_v58 = vpop.f32.mrf.mxu0 }
 0xc75   :  { %15170 = vst [vmem:[#allocation39_spill] sm:$0xff] %v12720_v58 }
 0xc76   :  { %v5995_v39 = vsub.f32 1.5, %v5994_v50  ;;  %v5231_v46 = vpop.xlane.xlu0 %5230 }
 0xc77   :  { %v12713_v41 = vmul.f32 %v5231_v46, %v15079_v53  ;;  %v8005_v46 = vld [vmem:[%s14288_s5 + $0x78] sm:$0xff] }
 0xc78   :  { %v5551_v10 = vpop.xlane.xlu1 %5550  ;;  %v5996_v4 = vmul.f32 %v7921_v59, %v5995_v39 }
 0xc79   :  { %v5731_v42 = vmul.f32 %v12713_v41, %v12713_v41  ;;  %v5699_v35 = vmul.f32 %v5551_v10, %v15079_v53  ;;  %v12731_v10 = vpop.f32.mrf.mxu2 }
 0xc7a   :  { %v6000_v50 = vsel %vm5999_vm5, %v7921_v59, %v5996_v4  ;;  %15172 = vst [vmem:[#allocation14_spill] sm:$0xff] %v12731_v10  ;;  %v5718_v4 = vmul.f32 %v12729_v44, %v12729_v44 }
 0xc7b   :  { %v5763_v60 = vsub.f32 %v5699_v35, %v5731_v42  ;;  %v12725_v39 = vmul.f32 %v8005_v46, %v6000_v50  ;;  %v12745_v42 = vpop.f32.mrf.mxu3  ;;  %v12753_v35 = vpop.f32.mrf.mxu1 }
 0xc7c   :  { %15174 = vst [vmem:[#allocation5_spill] sm:$0xff] %v12745_v42  ;;  %v5750_v55 = vsub.f32 %v5686_v31, %v5718_v4 }
 0xc7d   :  { %15171 = vst [vmem:[#allocation68_spill] sm:$0xff] %v12725_v39  ;;  %v5795_v3 = vmax.f32 %v5763_v60, 0.0  ;;  %v12734_v32 = vmul.f32 %v12725_v39, %v5664_v27  ;;  %v5688_v27 = vmul.f32 %v12594_v48, %v15079_v53 }
 0xc7e   :  { %15175 = vst [vmem:[#allocation71_spill] sm:$0xff] %v12753_v35 }
 0xc7f   :  { %15173 = vst [vmem:[#allocation6_spill] sm:$0xff] %v12734_v32  ;;  %5560 = vadd.xlane.f32.xlu2 %v5559_v7  ;;  %v5827_v59 = vadd.f32 1e-05, %v5795_v3  ;;  %v12755_v7 = vpop.f32.mrf.mxu0  ;;  %v5752_v50 = vsub.f32 %v5688_v27, %v5720_v37  ;;  %v5782_v3 = vmax.f32 %v5750_v55, 0.0  ;;  %v5252_v27 = vadd.f32 %v12718_v49, %v12720_v58 }
 0xc80   :  { %15176 = vst [vmem:[#allocation133_spill] sm:$0xff] %v12755_v7  ;;  %v5257_v25 = vadd.f32 %v12753_v35, %v12755_v7  ;;  %v12799_v43 = vpop.xlane.xlu0 %5555 }
 0xc81   :  { %7922 = vrsqrt.f32 %v5827_v59  ;;  %v12759_v48 = vpop.f32.mrf.mxu2  ;;  %v5784_v14 = vmax.f32 %v5752_v50, 0.0  ;;  %vm6027_vm6 = vweird.f32 %v5827_v59  ;;  %v5814_v21 = vadd.f32 1e-05, %v5782_v3 }
 0xc82   :  { %15177 = vst [vmem:[#allocation8_spill] sm:$0xff] %v12759_v48 }
 0xc83   :  { %v12761_v12 = vpop.f32.mrf.mxu3  ;;  %v12767_v4 = vpop.f32.mrf.mxu1  ;;  %v5816_v31 = vadd.f32 1e-05, %v5784_v14  ;;  %7924 = vrsqrt.f32 %v5814_v21  ;;  %v5253_v14 = vadd.f32 %v5252_v27, %v12731_v10  ;;  %vm5897_vm11 = vweird.f32 %v5814_v21 }
 0xc84   :  { %15178 = vst [vmem:[#allocation78_spill] sm:$0xff] %v12761_v12  ;;  %v5430_v55 = vmul.f32 %v12767_v4, %v12767_v4 }
 0xc85   :  { %15180 = vst [vmem:[#allocation79_spill] sm:$0xff] %v12767_v4  ;;  %7926 = vrsqrt.f32 %v5816_v31  ;;  %vm5917_vm13 = vweird.f32 %v5816_v31 }
 0xc87   :  { %v7923_v60 = vpop.eup %7922  ;;  %v12765_v45 = vpop.f32.mrf.mxu0 }
 0xc88   :  { %v6022_v46 = vmul.f32 %v7923_v60, %v5827_v59  ;;  %vm6028_vm7 = vweird.f32 %v7923_v60  ;;  %15179 = vst [vmem:[#allocation33_spill] sm:$0xff] %v12765_v45  ;;  %v5429_v59 = vmul.f32 %v12765_v45, %v12765_v45 }
 0xc89   :  { %vm6029_vm9 = vmor %vm6027_vm6, %vm6028_vm7 }
 0xc8a   :  { %v6023_v9 = vmul.f32 %v7923_v60, %v6022_v46  ;;  %v8006_v46 = vld [vmem:[%s14288_s5 + $0x90] sm:$0xff]  ;;  %v5582_v56 = vadd.f32 %v5430_v55, %v5429_v59 }
 0xc8b   :  { %v12793_v27 = vpop.f32.mrf.mxu3 }
 0xc8c   :  { %v6024_v28 = vmul.f32 0.5, %v6023_v9  ;;  %v5258_v9 = vadd.f32 %v5257_v25, %v12759_v48  ;;  %v6196_v25 = vmul.f32 %v12703_v1, %v12607_v22  ;;  %15184 = vst [vmem:[#allocation30_spill] sm:$0xff] %v12793_v27  ;;  %v5432_v1 = vmul.f32 %v12793_v27, %v12793_v27 }
 0xc8e   :  { %v6025_v34 = vsub.f32 1.5, %v6024_v28  ;;  %v12776_v28 = vpop.f32.mrf.mxu2  ;;  %v5259_v3 = vadd.f32 %v5258_v9, %v12761_v12 }
 0xc8f   :  { %15181 = vst [vmem:[#allocation141_spill] sm:$0xff] %v12776_v28  ;;  %v5431_v47 = vmul.f32 %v12776_v28, %v12776_v28 }
 0xc90   :  { %v6026_v37 = vmul.f32 %v7923_v60, %v6025_v34 }
 0xc91   :  { %v5583_v22 = vadd.f32 %v5582_v56, %v5431_v47 }
 0xc92   :  { %v6030_v50 = vsel %vm6029_vm9, %v7923_v60, %v6026_v37  ;;  %v5254_v37 = vadd.f32 %v5253_v14, %v12745_v42 }
 0xc93   :  { %v12782_v34 = vmul.f32 %v8006_v46, %v6030_v50  ;;  %v7925_v50 = vpop.eup %7924  ;;  %v5584_v55 = vadd.f32 %v5583_v22, %v5432_v1 }
 0xc94   :  { %v7927_v46 = vpop.eup %7926  ;;  %v5892_v9 = vmul.f32 %v7925_v50, %v5814_v21  ;;  %vm5898_vm8 = vweird.f32 %v7925_v50  ;;  %v5247_v21 = vadd.f32 %v12649_v36, %v12642_v38 }
 0xc95   :  { %15182 = vst [vmem:[#allocation70_spill] sm:$0xff] %v12782_v34  ;;  %v12791_v60 = vmul.f32 %v12782_v34, %v12713_v41  ;;  %v5912_v59 = vmul.f32 %v7927_v46, %v5816_v31  ;;  %vm5918_vm10 = vweird.f32 %v7927_v46  ;;  %vm5899_vm12 = vmor %vm5897_vm11, %vm5898_vm8  ;;  %v12814_v31 = vpop.permute.xlu0 %6397 }
 0xc96   :  { %v5893_v5 = vmul.f32 %v7925_v50, %v5892_v9  ;;  %vm5919_vm14 = vmor %vm5917_vm13, %vm5918_vm10 }
 0xc97   :  { %15183 = vst [vmem:[#allocation109_spill] sm:$0xff] %v12791_v60  ;;  %6263 = vrot.lane.b32.xlu2 %v6196_v25, %s8049_s21  ;;  %v5913_v41 = vmul.f32 %v7927_v46, %v5912_v59 }
 0xc98   :  { %v5894_v60 = vmul.f32 0.5, %v5893_v5  ;;  %v8007_v5 = vld [vmem:[%s14288_s5 + $0x28] sm:$0xff] }
 0xc99   :  { %5260 = vadd.xlane.f32.xlu0 %v5259_v3  ;;  %v5914_v34 = vmul.f32 0.5, %v5913_v41 }
 0xc9a   :  { %v5895_v52 = vsub.f32 1.5, %v5894_v60 }
 0xc9b   :  { %5255 = vadd.xlane.f32.xlu1 %v5254_v37  ;;  %v5915_v14 = vsub.f32 1.5, %v5914_v34  ;;  %v12801_v37 = vpop.permute.xlu1 %6387  ;;  %v12809_v34 = vld [vmem:[%s14288_s5 + $0x38] sm:$0xff] }
 0xc9c   :  { %v5896_v25 = vmul.f32 %v7925_v50, %v5895_v52  ;;  %15185 = vst [vmem:[#allocation110_spill] sm:$0xff] %v12801_v37 }
 0xc9d   :  { %v5916_v3 = vmul.f32 %v7927_v46, %v5915_v14  ;;  %v12824_v59 = vpop.permute.xlu0 %6261 }
 0xc9e   :  { %v5900_v56 = vsel %vm5899_vm12, %v7925_v50, %v5896_v25  ;;  %v5248_v50 = vadd.f32 %v5247_v21, %v12662_v17  ;;  %v12828_v25 = vpop.f32.mrf.mxu1 }
 0xc9f   :  { %v5920_v47 = vsel %vm5919_vm14, %v7927_v46, %v5916_v3  ;;  %v6166_v60 = vmul.f32 %v8007_v5, %v5900_v56  ;;  %15187 = vst [vmem:[#allocation128_spill] sm:$0xff] %v12828_v25  ;;  %v12837_v5 = vpop.f32.mrf.mxu2 }
 0xca0   :  { %v6168_v52 = vmul.f32 %v12809_v34, %v5920_v47  ;;  %v5249_v9 = vadd.f32 %v5248_v50, %v12671_v61  ;;  %15189 = vst [vmem:[#allocation137_spill] sm:$0xff] %v12837_v5  ;;  %v12843_v50 = vpop.f32.mrf.mxu3 }
 0xca1   :  { %5585 = vadd.xlane.f32.xlu0 %v5584_v55  ;;  %v6198_v46 = vmul.f32 %v6166_v60, %v12729_v44  ;;  %v5501_v55 = vpop.xlane.xlu2 %5500 }
 0xca2   :  { %v6200_v22 = vmul.f32 %v6168_v52, %v12737_v23  ;;  %v12833_v23 = vpop.f32.mrf.mxu0 }
 0xca3   :  { %v12819_v1 = vpop.permute.xlu1 %6259  ;;  %15188 = vst [vmem:[#allocation4_spill] sm:$0xff] %v12833_v23 }
 0xca4   :  { %15186 = vst [vmem:[#allocation10_spill] sm:$0xff] %v12819_v1  ;;  %v5427_v1 = vmul.f32 %v12759_v48, %v12759_v48 }
 0xca6   :  { %v12853_v61 = vpop.f32.mrf.mxu1 }
 0xca7   :  { %15190 = vst [vmem:[#allocation17_spill] sm:$0xff] %v12853_v61  ;;  %v12864_v17 = vpop.f32.mrf.mxu2 }
 0xca8   :  { %15192 = vst [vmem:[#allocation132_spill] sm:$0xff] %v12864_v17 }
 0xca9   :  { %v5191_v3 = vpop.xlane.xlu2 %5190 }
 0xcaf   :  { %v12886_v20 = vpop.f32.mrf.mxu2 }
 0xcb0   :  { %15196 = vst [vmem:[#allocation19_spill] sm:$0xff] %v12886_v20 }
 0xcb4   :  { %6412 = vperm.xlu1 %7782, %v6166_v60  }
 0xcb5   :  { %6422 = vperm.xlu0 %7784, %v6168_v52   ;;  %v12841_v52 = vmul.f32 %v5191_v3, %v15079_v53 }
 0xcbc   :  { %6267 = vrot.lane.b32.xlu1 %v6198_v46, %s8049_s21 }
 0xcbd   :  { %6271 = vrot.lane.b32.xlu0 %v6200_v22, %s8049_s21  ;;  %v12847_v22 = vmul.f32 %v12601_v11, %v15079_v53  ;;  %v5426_v11 = vmul.f32 %v12753_v35, %v12753_v35 }
 0xcc0   :  { %5250 = vadd.xlane.f32.xlu2 %v5249_v9  ;;  %v5691_v9 = vmul.f32 %v12636_v57, %v15079_v53  ;;  %v5425_v57 = vmul.f32 %v12755_v7, %v12755_v7 }
 0xcc2   :  { %v5577_v37 = vadd.f32 %v5426_v11, %v5425_v57 }
 0xcc3   :  { %v12826_v41 = vpop.xlane.xlu1 %5240 }
 0xcc6   :  { %v5246_v14 = vpop.xlane.xlu0 %5245 }
 0xcc7   :  { %v12831_v44 = vmul.f32 %v5246_v14, %v15079_v53  ;;  %v5723_v14 = vmul.f32 %v12841_v52, %v12841_v52 }
 0xcc9   :  { %v5734_v56 = vmul.f32 %v12831_v44, %v12831_v44 }
 0xccb   :  { %v5566_v47 = vpop.xlane.xlu1 %5565 }
 0xccc   :  { %v5702_v60 = vmul.f32 %v5566_v47, %v15079_v53  ;;  %v12855_v47 = vpop.f32.mrf.mxu0 }
 0xccd   :  { %15191 = vst [vmem:[#allocation11_spill] sm:$0xff] %v12855_v47 }
 0xcce   :  { %v5766_v21 = vsub.f32 %v5702_v60, %v5734_v56  ;;  %v5721_v56 = vmul.f32 %v12847_v22, %v12847_v22  ;;  %v5689_v60 = vmul.f32 %v5501_v55, %v15079_v53  ;;  %v5272_v55 = vadd.f32 %v12853_v61, %v12855_v47 }
 0xcd0   :  { %v5798_v46 = vmax.f32 %v5766_v21, 0.0  ;;  %v5755_v21 = vsub.f32 %v5691_v9, %v5723_v14  ;;  %v5753_v36 = vsub.f32 %v5689_v60, %v5721_v56  ;;  %v12871_v9 = vpop.f32.mrf.mxu3  ;;  %v12873_v14 = vpop.f32.mrf.mxu1  ;;  %v5578_v56 = vadd.f32 %v5577_v37, %v5427_v1 }
 0xcd1   :  { %15193 = vst [vmem:[#allocation3_spill] sm:$0xff] %v12871_v9  ;;  %v5428_v60 = vmul.f32 %v12761_v12, %v12761_v12  ;;  %v5442_v11 = vmul.f32 %v12873_v14, %v12873_v14  ;;  %v5267_v37 = vadd.f32 %v12828_v25, %v12833_v23 }
 0xcd2   :  { %v5830_v3 = vadd.f32 1e-05, %v5798_v46  ;;  %v5787_v38 = vmax.f32 %v5755_v21, 0.0  ;;  %15194 = vst [vmem:[#allocation127_spill] sm:$0xff] %v12873_v14  ;;  %v5785_v32 = vmax.f32 %v5753_v36, 0.0  ;;  %v5273_v21 = vadd.f32 %v5272_v55, %v12864_v17 }
 0xcd3   :  { %v5579_v1 = vadd.f32 %v5578_v56, %v5428_v60  ;;  %v5268_v51 = vadd.f32 %v5267_v37, %v12837_v5 }
 0xcd4   :  { %7928 = vrsqrt.f32 %v5830_v3  ;;  %v12875_v7 = vpop.f32.mrf.mxu0  ;;  %v12877_v39 = vadd.f32 1e-05, %v5787_v38  ;;  %vm6057_vm15 = vweird.f32 %v5830_v3  ;;  %v5817_v36 = vadd.f32 1e-05, %v5785_v32 }
 0xcd5   :  { %15195 = vst [vmem:[#allocation18_spill] sm:$0xff] %v12875_v7  ;;  %v5441_v57 = vmul.f32 %v12875_v7, %v12875_v7  ;;  %v5274_v55 = vadd.f32 %v5273_v21, %v12871_v9  ;;  %v5269_v37 = vadd.f32 %v5268_v51, %v12843_v50 }
 0xcd6   :  { %7930 = vrsqrt.f32 %v12877_v39  ;;  %vm5947_vm3 = vweird.f32 %v12877_v39  ;;  %vm5927_vm6 = vweird.f32 %v5817_v36 }
 0xcd7   :  { %7932 = vrsqrt.f32 %v5817_v36 }
 0xcd8   :  { %6407 = vperm.xlu2 %7783, %v12689_v18   ;;  %v12898_v32 = vpop.f32.mrf.mxu3 }
 0xcd9   :  { %15197 = vst [vmem:[#allocation2_spill] sm:$0xff] %v12898_v32 }
 0xcda   :  { %v7929_v46 = vpop.eup %7928 }
 0xcdb   :  { %v6052_v35 = vmul.f32 %v7929_v46, %v5830_v3  ;;  %vm6058_vm0 = vweird.f32 %v7929_v46  ;;  %v5443_v3 = vmul.f32 %v12886_v20, %v12886_v20 }
 0xcdc   :  { %vm6059_vm1 = vmor %vm6057_vm15, %vm6058_vm0  ;;  %v7931_v60 = vpop.eup %7930 }
 0xcdd   :  { %v6053_v18 = vmul.f32 %v7929_v46, %v6052_v35  ;;  %v12891_v35 = vmul.f32 %v12576_v29, %v15079_v53  ;;  %v8009_v29 = vld [vmem:[%s14288_s5 + $0xa8] sm:$0xff]  ;;  %vm5948_vm2 = vweird.f32 %v7931_v60 }
 0xcde   :  { %vm5949_vm4 = vmor %vm5947_vm3, %vm5948_vm2 }
 0xcdf   :  { %v6054_v48 = vmul.f32 0.5, %v6053_v18  ;;  %v5597_v18 = vadd.f32 %v5442_v11, %v5441_v57  ;;  %v5719_v21 = vmul.f32 %v12891_v35, %v12891_v35  ;;  %v5687_v11 = vmul.f32 %v12578_v2, %v15079_v53 }
 0xce1   :  { %v6055_v38 = vsub.f32 1.5, %v6054_v48  ;;  %v5598_v57 = vadd.f32 %v5597_v18, %v5443_v3 }
 0xce3   :  { %v6056_v12 = vmul.f32 %v7929_v46, %v6055_v38  ;;  %v5942_v38 = vmul.f32 %v7931_v60, %v12877_v39 }
 0xce5   :  { %v6060_v48 = vsel %vm6059_vm1, %v7929_v46, %v6056_v12  ;;  %v5444_v12 = vmul.f32 %v12898_v32, %v12898_v32  ;;  %v5943_v16 = vmul.f32 %v7931_v60, %v5942_v38 }
 0xce6   :  { %5580 = vadd.xlane.f32.xlu1 %v5579_v1  ;;  %v12904_v56 = vmul.f32 %v8009_v29, %v6060_v48  ;;  %v7933_v1 = vpop.eup %7932  ;;  %v5751_v48 = vsub.f32 %v5687_v11, %v5719_v21  ;;  %v5423_v21 = vmul.f32 %v12731_v10, %v12731_v10 }
 0xce7   :  { %5275 = vadd.xlane.f32.xlu0 %v5274_v55  ;;  %v5599_v29 = vadd.f32 %v5598_v57, %v5444_v12  ;;  %v5922_v33 = vmul.f32 %v7933_v1, %v5817_v36  ;;  %v5944_v18 = vmul.f32 0.5, %v5943_v16  ;;  %v5424_v16 = vmul.f32 %v12745_v42, %v12745_v42 }
 0xce8   :  { %15198 = vst [vmem:[#allocation130_spill] sm:$0xff] %v12904_v56  ;;  %v12914_v46 = vmul.f32 %v12904_v56, %v12831_v44  ;;  %v5783_v2 = vmax.f32 %v5751_v48, 0.0  ;;  %v5421_v44 = vmul.f32 %v12720_v58, %v12720_v58  ;;  %vm5928_vm5 = vweird.f32 %v7933_v1 }
 0xce9   :  { %v5923_v55 = vmul.f32 %v7933_v1, %v5922_v33  ;;  %v5945_v56 = vsub.f32 1.5, %v5944_v18  ;;  %vm5929_vm7 = vmor %vm5927_vm6, %vm5928_vm5 }
 0xcea   :  { %15199 = vst [vmem:[#allocation25_spill] sm:$0xff] %v12914_v46  ;;  %v5815_v3 = vadd.f32 1e-05, %v5783_v2  ;;  %v5572_v51 = vadd.f32 %v5422_v30, %v5421_v44  ;;  %v12930_v30 = vld [vmem:[%s14288_s5 + $0x50] sm:$0xff]  ;;  %v5516_v2 = vpop.xlane.xlu2 %5515 }
 0xceb   :  { %v5924_v46 = vmul.f32 0.5, %v5923_v55  ;;  %v5946_v57 = vmul.f32 %v7931_v60, %v5945_v56 }
 0xcec   :  { %7934 = vrsqrt.f32 %v5815_v3  ;;  %v5573_v12 = vadd.f32 %v5572_v51, %v5423_v21  ;;  %vm5907_vm8 = vweird.f32 %v5815_v3 }
 0xced   :  { %v5925_v11 = vsub.f32 1.5, %v5924_v46  ;;  %v5950_v38 = vsel %vm5949_vm4, %v7931_v60, %v5946_v57  ;;  %v12936_v60 = vld [vmem:[%s14288_s5 + $0x40] sm:$0xff] }
 0xcee   :  { %5270 = vadd.xlane.f32.xlu1 %v5269_v37  ;;  %v5574_v48 = vadd.f32 %v5573_v12, %v5424_v16  ;;  %v6171_v56 = vmul.f32 %v12930_v30, %v5950_v38  ;;  %15200 = vst [vmem:[#allocation20_spill] sm:$0xff] %v12936_v60  ;;  %v12945_v12 = vpop.f32.mrf.mxu0  ;;  %v12947_v16 = vpop.f32.mrf.mxu1 }
 0xcef   :  { %5600 = vadd.xlane.f32.xlu0 %v5599_v29  ;;  %v5926_v37 = vmul.f32 %v7933_v1, %v5925_v11  ;;  %15201 = vst [vmem:[#allocation103_spill] sm:$0xff] %v12945_v12 }
 0xcf0   :  { %v6203_v18 = vmul.f32 %v6171_v56, %v12841_v52  ;;  %15202 = vst [vmem:[#allocation27_spill] sm:$0xff] %v12947_v16  ;;  %v8012_v52 = vld [vmem:[%s14288_s5 + $0x30] sm:$0xff] }
 0xcf1   :  { %v5930_v46 = vsel %vm5929_vm7, %v7933_v1, %v5926_v37  ;;  %v12955_v37 = vpop.f32.mrf.mxu2 }
 0xcf2   :  { %v7935_v33 = vpop.eup %7934  ;;  %v6169_v36 = vmul.f32 %v12936_v60, %v5930_v46  ;;  %v5206_v51 = vpop.xlane.xlu2 %5205  ;;  %15203 = vst [vmem:[#allocation136_spill] sm:$0xff] %v12955_v37 }
 0xcf3   :  { %v5902_v29 = vmul.f32 %v7935_v33, %v5815_v3  ;;  %vm5908_vm9 = vweird.f32 %v7935_v33 }
 0xcf4   :  { %v6201_v1 = vmul.f32 %v6169_v36, %v12847_v22  ;;  %vm5909_vm10 = vmor %vm5907_vm8, %vm5908_vm9  ;;  %v12953_v22 = vmul.f32 %v5206_v51, %v15079_v53 }
 0xcf5   :  { %v5903_v39 = vmul.f32 %v7935_v33, %v5902_v29  ;;  %v12961_v29 = vpop.f32.mrf.mxu3 }
 0xcf6   :  { %15204 = vst [vmem:[#allocation105_spill] sm:$0xff] %v12961_v29  ;;  %v12964_v46 = vpop.f32.mrf.mxu0 }
 0xcf7   :  { %v5904_v55 = vmul.f32 0.5, %v5903_v39  ;;  %15205 = vst [vmem:[#allocation104_spill] sm:$0xff] %v12964_v46  ;;  %v12966_v39 = vpop.f32.mrf.mxu1 }
 0xcf8   :  { %15206 = vst [vmem:[#allocation106_spill] sm:$0xff] %v12966_v39 }
 0xcf9   :  { %v5905_v44 = vsub.f32 1.5, %v5904_v55 }
 0xcfa   :  { %v12943_v11 = vpop.xlane.xlu2 %5530 }
 0xcfb   :  { %v5906_v21 = vmul.f32 %v7935_v33, %v5905_v44 }
 0xcfd   :  { %v5910_v57 = vsel %vm5909_vm10, %v7935_v33, %v5906_v21  ;;  %v5726_v33 = vmul.f32 %v12953_v22, %v12953_v22  ;;  %v5438_v21 = vmul.f32 %v12853_v61, %v12853_v61 }
 0xcfe   :  { %v6167_v38 = vmul.f32 %v8012_v52, %v5910_v57  ;;  %v12984_v57 = vpop.f32.mrf.mxu3 }
 0xcff   :  { %15208 = vst [vmem:[#allocation26_spill] sm:$0xff] %v12984_v57 }
 0xd01   :  { %5575 = vadd.xlane.f32.xlu2 %v5574_v48  ;;  %v5694_v48 = vmul.f32 %v12679_v54, %v15079_v53  ;;  %v12975_v54 = vpop.f32.mrf.mxu2 }
 0xd02   :  { %v5221_v3 = vpop.xlane.xlu2 %5220  ;;  %15207 = vst [vmem:[#allocation29_spill] sm:$0xff] %v12975_v54 }
 0xd03   :  { %6437 = vperm.xlu0 %7784, %v6171_v56   ;;  %v6199_v56 = vmul.f32 %v6167_v38, %v12891_v35  ;;  %v5758_v55 = vsub.f32 %v5694_v48, %v5726_v33  ;;  %v5692_v35 = vmul.f32 %v5516_v2, %v15079_v53  ;;  %v12991_v48 = vmul.f32 %v5221_v3, %v15079_v53  ;;  %v12993_v33 = vpop.f32.mrf.mxu0  ;;  %v12995_v2 = vpop.f32.mrf.mxu1 }
 0xd04   :  { %15209 = vst [vmem:[#allocation101_spill] sm:$0xff] %v12993_v33  ;;  %v5697_v3 = vmul.f32 %v12693_v62, %v15079_v53 }
 0xd05   :  { %v5790_v51 = vmax.f32 %v5758_v55, 0.0  ;;  %15210 = vst [vmem:[#allocation102_spill] sm:$0xff] %v12995_v2  ;;  %v5439_v55 = vmul.f32 %v12864_v17, %v12864_v17 }
 0xd06   :  { %v13024_v60 = vpop.f32.mrf.mxu3 }
 0xd07   :  { %6427 = vperm.xlu1 %7782, %v6169_v36   ;;  %v12971_v36 = vmul.f32 %v12651_v6, %v15079_v53  ;;  %v5287_v6 = vadd.f32 %v12966_v39, %v12964_v46  ;;  %15212 = vst [vmem:[#allocation100_spill] sm:$0xff] %v13024_v60 }
 0xd09   :  { %v5724_v44 = vmul.f32 %v12971_v36, %v12971_v36  ;;  %v5288_v61 = vadd.f32 %v5287_v6, %v12975_v54  ;;  %v5440_v6 = vmul.f32 %v12871_v9, %v12871_v9 }
 0xd0b   :  { %6277 = vrot.lane.b32.xlu0 %v6203_v18, %s8049_s21  ;;  %v12973_v18 = vpop.xlane.xlu2 %5545  ;;  %v5756_v52 = vsub.f32 %v5692_v35, %v5724_v44  ;;  %v5454_v44 = vmul.f32 %v12995_v2, %v12995_v2  ;;  %v5289_v42 = vadd.f32 %v5288_v61, %v12984_v57  ;;  %v5282_v61 = vadd.f32 %v12947_v16, %v12945_v12 }
 0xd0d   :  { %v5788_v35 = vmax.f32 %v5756_v52, 0.0  ;;  %v13020_v52 = vmul.f32 %v12616_v63, %v15079_v53 }
 0xd0f   :  { %6273 = vrot.lane.b32.xlu1 %v6201_v1, %s8049_s21  ;;  %v5437_v1 = vmul.f32 %v12855_v47, %v12855_v47  ;;  %v5453_v47 = vmul.f32 %v12993_v33, %v12993_v33  ;;  %v13022_v49 = vadd.f32 1e-05, %v5788_v35  ;;  %v13028_v33 = vpop.permute.xlu1 %6402  ;;  %v5722_v63 = vmul.f32 %v13020_v52, %v13020_v52 }
 0xd10   :  { %15213 = vst [vmem:[#allocation131_spill] sm:$0xff] %v13028_v33 }
 0xd11   :  { %v5612_v10 = vadd.f32 %v5454_v44, %v5453_v47  ;;  %v5690_v44 = vmul.f32 %v12621_v40, %v15079_v53  ;;  %vm5957_vm15 = vweird.f32 %v13022_v49 }
 0xd17   :  { %v13047_v33 = vpop.xlane.xlu1 %5255 }
 0xd19   :  { %6417 = vperm.xlu2 %7783, %v6167_v38   ;;  %v12988_v38 = vadd.f32 1e-05, %v5790_v51  ;;  %v5729_v51 = vmul.f32 %v12991_v48, %v12991_v48 }
 0xd1b   :  { %7936 = vrsqrt.f32 %v12988_v38  ;;  %v5761_v58 = vsub.f32 %v5697_v3, %v5729_v51  ;;  %vm5977_vm12 = vweird.f32 %v12988_v38 }
 0xd1c   :  { %7938 = vrsqrt.f32 %v13022_v49 }
 0xd1d   :  { %v5793_v3 = vmax.f32 %v5761_v58, 0.0 }
 0xd1f   :  { %v13042_v9 = vadd.f32 1e-05, %v5793_v3 }
 0xd21   :  { %6269 = vrot.lane.b32.xlu2 %v6199_v56, %s8049_s21  ;;  %v5592_v56 = vadd.f32 %v5438_v21, %v5437_v1  ;;  %v13009_v1 = vpop.permute.xlu2 %6257  ;;  %v13011_v21 = vpop.f32.mrf.mxu2  ;;  %7940 = vrsqrt.f32 %v13042_v9  ;;  %vm6007_vm2 = vweird.f32 %v13042_v9 }
 0xd22   :  { %15211 = vst [vmem:[#allocation99_spill] sm:$0xff] %v13011_v21  ;;  %v5455_v62 = vmul.f32 %v13011_v21, %v13011_v21  ;;  %v13026_v2 = vpop.eup %7936 }
 0xd23   :  { %v5593_v17 = vadd.f32 %v5592_v56, %v5439_v55  ;;  %v5456_v56 = vmul.f32 %v13024_v60, %v13024_v60  ;;  %v5972_v51 = vmul.f32 %v13026_v2, %v12988_v38  ;;  %vm5978_vm11 = vweird.f32 %v13026_v2 }
 0xd24   :  { %v5613_v47 = vadd.f32 %v5612_v10, %v5455_v62  ;;  %v5754_v62 = vsub.f32 %v5690_v44, %v5722_v63  ;;  %v13057_v63 = vpop.xlane.xlu0 %5570  ;;  %vm5979_vm13 = vmor %vm5977_vm12, %vm5978_vm11 }
 0xd25   :  { %v5594_v55 = vadd.f32 %v5593_v17, %v5440_v6  ;;  %v5973_v17 = vmul.f32 %v13026_v2, %v5972_v51  ;;  %v13045_v6 = vpop.eup %7938 }
 0xd26   :  { %v5614_v10 = vadd.f32 %v5613_v47, %v5456_v56  ;;  %v5786_v58 = vmax.f32 %v5754_v62, 0.0  ;;  %v5262_v56 = vadd.f32 %v12767_v4, %v12765_v45  ;;  %v5434_v4 = vmul.f32 %v12828_v25, %v12828_v25 }
 0xd27   :  { %v5974_v47 = vmul.f32 0.5, %v5973_v17  ;;  %v5433_v17 = vmul.f32 %v12833_v23, %v12833_v23  ;;  %v5435_v45 = vmul.f32 %v12837_v5, %v12837_v5  ;;  %vm5958_vm14 = vweird.f32 %v13045_v6 }
 0xd28   :  { %v13059_v44 = vadd.f32 1e-05, %v5786_v58  ;;  %vm5959_vm0 = vmor %vm5957_vm15, %vm5958_vm14 }
 0xd29   :  { %v5236_v35 = vpop.xlane.xlu2 %5235  ;;  %v5975_v51 = vsub.f32 1.5, %v5974_v47  ;;  %v13077_v47 = vpop.permute.xlu1 %6412 }
 0xd2a   :  { %v13066_v62 = vmul.f32 %v5236_v35, %v15079_v53  ;;  %7942 = vrsqrt.f32 %v13059_v44  ;;  %vm5937_vm5 = vweird.f32 %v13059_v44 }
 0xd2b   :  { %v5976_v58 = vmul.f32 %v13026_v2, %v5975_v51 }
 0xd2d   :  { %v5980_v23 = vsel %vm5979_vm13, %v13026_v2, %v5976_v58 }
 0xd35   :  { %5290 = vadd.xlane.f32.xlu0 %v5289_v42  ;;  %v5283_v42 = vadd.f32 %v5282_v61, %v12955_v37  ;;  %v5952_v61 = vmul.f32 %v13045_v6, %v13022_v49  ;;  %v13123_v49 = vld [vmem:[%s14288_s5 + $0x58] sm:$0xff] }
 0xd37   :  { %v5284_v40 = vadd.f32 %v5283_v42, %v12961_v29  ;;  %v5953_v3 = vmul.f32 %v13045_v6, %v5952_v61  ;;  %v13062_v42 = vpop.eup %7940 }
 0xd38   :  { %v6002_v61 = vmul.f32 %v13062_v42, %v13042_v9  ;;  %vm6008_vm1 = vweird.f32 %v13062_v42 }
 0xd39   :  { %5595 = vadd.xlane.f32.xlu1 %v5594_v55  ;;  %v13055_v55 = vpop.permute.xlu2 %6392  ;;  %vm6009_vm3 = vmor %vm6007_vm2, %vm6008_vm1 }
 0xd3a   :  { %15214 = vst [vmem:[#allocation74_spill] sm:$0xff] %v13055_v55  ;;  %v5436_v55 = vmul.f32 %v12843_v50, %v12843_v50 }
 0xd3d   :  { %5615 = vadd.xlane.f32.xlu0 %v5614_v10  ;;  %v5263_v10 = vadd.f32 %v5262_v56, %v12776_v28  ;;  %v5732_v56 = vmul.f32 %v13066_v62, %v13066_v62  ;;  %v5587_v28 = vadd.f32 %v5434_v4, %v5433_v17  ;;  %v6003_v4 = vmul.f32 %v13062_v42, %v6002_v61 }
 0xd3f   :  { %v5264_v35 = vadd.f32 %v5263_v10, %v12793_v27  ;;  %v13090_v10 = vpop.permute.xlu0 %6265  ;;  %v13092_v27 = vpop.eup %7942  ;;  %v5588_v5 = vadd.f32 %v5587_v28, %v5435_v45  ;;  %v6004_v2 = vmul.f32 0.5, %v6003_v4 }
 0xd40   :  { %v5932_v45 = vmul.f32 %v13092_v27, %v13059_v44  ;;  %v13107_v28 = vpop.permute.xlu1 %6267  ;;  %vm5938_vm4 = vweird.f32 %v13092_v27  ;;  %v14627_v44 = vmov 7  }
 0xd41   :  { %5285 = vadd.xlane.f32.xlu1 %v5284_v40  ;;  %v5954_v40 = vmul.f32 0.5, %v5953_v3  ;;  %v13084_v25 = vpop.xlane.xlu2 %5560  ;;  %v5700_v3 = vmul.f32 %v12799_v43, %v15079_v53  ;;  %v13101_v43 = vld [vmem:[%s14288_s5 + $0x68] sm:$0xff]  ;;  %v5589_v58 = vadd.f32 %v5588_v5, %v5436_v55  ;;  %vm5939_vm6 = vmor %vm5937_vm5, %vm5938_vm4 }
 0xd42   :  { %v6174_v38 = vmul.f32 %v13101_v43, %v5980_v23 }
 0xd43   :  { %v5955_v51 = vsub.f32 1.5, %v5954_v40  ;;  %v5764_v17 = vsub.f32 %v5700_v3, %v5732_v56  ;;  %v6005_v3 = vsub.f32 1.5, %v6004_v2 }
 0xd44   :  { %v6206_v4 = vmul.f32 %v6174_v38, %v12953_v22 }
 0xd45   :  { %v5796_v40 = vmax.f32 %v5764_v17, 0.0  ;;  %v6006_v2 = vmul.f32 %v13062_v42, %v6005_v3 }
 0xd47   :  { %v5261_v56 = vpop.xlane.xlu0 %5260  ;;  %v13112_v23 = vadd.f32 1e-05, %v5796_v40 }
 0xd48   :  { %v13115_v5 = vmul.f32 %v5261_v56, %v15079_v53 }
 0xd49   :  { %v13110_v61 = vpop.permute.xlu2 %6263  ;;  %7944 = vrsqrt.f32 %v13112_v23  ;;  %vm6037_vm9 = vweird.f32 %v13112_v23 }
 0xd4a   :  { %5265 = vadd.xlane.f32.xlu2 %v5264_v35  ;;  %v5956_v35 = vmul.f32 %v13045_v6, %v5955_v51  ;;  %v5933_v51 = vmul.f32 %v13092_v27, %v5932_v45 }
 0xd4c   :  { %v5960_v55 = vsel %vm5959_vm0, %v13045_v6, %v5956_v35  ;;  %v5737_v6 = vmul.f32 %v13115_v5, %v13115_v5  ;;  %v5934_v40 = vmul.f32 0.5, %v5933_v51  ;;  %v6010_v35 = vsel %vm6009_vm3, %v13062_v42, %v6006_v2  ;;  %v8015_v51 = vld [vmem:[%s14288_s5 + $0x80] sm:$0xff] }
 0xd4d   :  { %v6172_v17 = vmul.f32 %v13123_v49, %v5960_v55  ;;  %v5703_v42 = vmul.f32 %v13057_v63, %v15079_v53 }
 0xd4e   :  { %v5935_v56 = vsub.f32 1.5, %v5934_v40 }
 0xd4f   :  { %v7945_v55 = vpop.eup %7944  ;;  %v6204_v9 = vmul.f32 %v6172_v17, %v12971_v36 }
 0xd50   :  { %vm6038_vm7 = vweird.f32 %v7945_v55 }
 0xd51   :  { %6452 = vperm.xlu0 %7784, %v6174_v38   ;;  %v5251_v38 = vpop.xlane.xlu2 %5250  ;;  %vm6039_vm8 = vmor %vm6037_vm9, %vm6038_vm7 }
 0xd52   :  { %5590 = vadd.xlane.f32.xlu2 %v5589_v58  ;;  %v13136_v3 = vmul.f32 %v5251_v38, %v15079_v53  ;;  %v13151_v38 = vpop.xlane.xlu0 %5585 }
 0xd54   :  { %v5735_v2 = vmul.f32 %v13136_v3, %v13136_v3 }
 0xd59   :  { %6283 = vrot.lane.b32.xlu0 %v6206_v4, %s8049_s21  ;;  %v5581_v22 = vpop.xlane.xlu1 %5580  ;;  %v6177_v4 = vmul.f32 %v8015_v51, %v6010_v35  ;;  %v13158_v51 = vld [vmem:[%s14288_s5 + $0x48] sm:$0xff] }
 0xd5a   :  { %6442 = vperm.xlu1 %7782, %v6172_v17   ;;  %v5705_v58 = vmul.f32 %v5581_v22, %v15079_v53  ;;  %v6032_v22 = vmul.f32 %v7945_v55, %v13112_v23  ;;  %v5767_v17 = vsub.f32 %v5703_v42, %v5735_v2  ;;  %v8017_v42 = vld [vmem:[%s14288_s5 + $0x10] sm:$0xff]  ;;  %v5449_v23 = vmul.f32 %v12964_v46, %v12964_v46 }
 0xd5b   :  { %v6209_v63 = vmul.f32 %v6177_v4, %v12991_v48  ;;  %v13165_v48 = vpop.permute.xlu0 %6422  ;;  %v6355_v2 = vsub.f32 %v8017_v42, %v12824_v59  ;;  %v15215_v42 = vmov 6  }
 0xd5c   :  { %v5769_v45 = vsub.f32 %v5705_v58, %v5737_v6  ;;  %v5936_v6 = vmul.f32 %v13092_v27, %v5935_v56  ;;  %v6033_v36 = vmul.f32 %v7945_v55, %v6032_v22 }
 0xd5e   :  { %v5801_v40 = vmax.f32 %v5769_v45, 0.0  ;;  %v5940_v58 = vsel %vm5939_vm6, %v13092_v27, %v5936_v6  ;;  %v6034_v45 = vmul.f32 0.5, %v6033_v36 }
 0xd5f   :  { %v6170_v56 = vmul.f32 %v13158_v51, %v5940_v58 }
 0xd60   :  { %v5833_v35 = vadd.f32 1e-05, %v5801_v40  ;;  %v6035_v27 = vsub.f32 1.5, %v6034_v45  ;;  %v8018_v45 = vld [vmem:[%s14288_s5 + $0x98] sm:$0xff] }
 0xd61   :  { %6467 = vperm.xlu0 %7784, %v6177_v4   ;;  %v13169_v4 = vmul.f32 %v12681_v19, %v15079_v53  ;;  %v6202_v40 = vmul.f32 %v6170_v56, %v13020_v52 }
 0xd62   :  { %6279 = vrot.lane.b32.xlu1 %v6204_v9, %s8049_s21  ;;  %v5799_v9 = vmax.f32 %v5767_v17, 0.0  ;;  %7946 = vrsqrt.f32 %v5833_v35  ;;  %v6036_v36 = vmul.f32 %v7945_v55, %v6035_v27  ;;  %v5695_v17 = vmul.f32 %v12943_v11, %v15079_v53 }
 0xd63   :  { %v5727_v19 = vmul.f32 %v13169_v4, %v13169_v4  ;;  %v6272_v27 = vpop.permute.xlu0 %6271  ;;  %vm6087_vm10 = vweird.f32 %v5833_v35 }
 0xd64   :  { %v13163_v22 = vadd.f32 1e-05, %v5799_v9  ;;  %v6040_v59 = vsel %vm6039_vm8, %v7945_v55, %v6036_v36  ;;  %v5450_v55 = vmul.f32 %v12966_v39, %v12966_v39 }
 0xd65   :  { %v5759_v52 = vsub.f32 %v5695_v17, %v5727_v19  ;;  %v6180_v9 = vmul.f32 %v8018_v45, %v6040_v59  ;;  %v5451_v45 = vmul.f32 %v12975_v54, %v12975_v54 }
 0xd66   :  { %7948 = vrsqrt.f32 %v13163_v22  ;;  %v5607_v59 = vadd.f32 %v5450_v55, %v5449_v23  ;;  %v8019_v23 = vld [vmem:[%s14288_s5 + $0xc0] sm:$0xff]  ;;  %vm6067_vm14 = vweird.f32 %v13163_v22 }
 0xd67   :  { %v5791_v11 = vmax.f32 %v5759_v52, 0.0 }
 0xd68   :  { %v7947_v6 = vpop.eup %7946 }
 0xd69   :  { %6289 = vrot.lane.b32.xlu0 %v6209_v63, %s8049_s21  ;;  %v6082_v58 = vmul.f32 %v7947_v6, %v5833_v35  ;;  %v13192_v19 = vadd.f32 1e-05, %v5791_v11  ;;  %vm6088_vm11 = vweird.f32 %v7947_v6 }
 0xd6a   :  { %6432 = vperm.xlu2 %7783, %v6170_v56   ;;  %7787 = vset.pattern.permute.xlu0 %v14627_v44  ;;  %vm6089_vm12 = vmor %vm6087_vm10, %vm6088_vm11 }
 0xd6b   :  { %v6083_v56 = vmul.f32 %v7947_v6, %v6082_v58  ;;  %v6212_v58 = vmul.f32 %v6180_v9, %v13066_v62  ;;  %v13197_v52 = vpop.xlane.xlu0 %5275  ;;  %7950 = vrsqrt.f32 %v13192_v19  ;;  %v5608_v62 = vadd.f32 %v5607_v59, %v5451_v45 }
 0xd6c   :  { %v7949_v63 = vpop.eup %7948  ;;  %vm5987_vm1 = vweird.f32 %v13192_v19 }
 0xd6d   :  { %vm6068_vm13 = vweird.f32 %v7949_v63 }
 0xd6e   :  { %vm6069_vm15 = vmor %vm6067_vm14, %vm6068_vm13 }
 0xd71   :  { %6685 = vperm.xlu0 %7787, %v6355_v2   ;;  %v6062_v2 = vmul.f32 %v7949_v63, %v13163_v22  ;;  %v7951_v45 = vpop.eup %7950 }
 0xd72   :  { %6275 = vrot.lane.b32.xlu2 %v6202_v40, %s8049_s21  ;;  %v6084_v40 = vmul.f32 0.5, %v6083_v56  ;;  %vm5988_vm0 = vweird.f32 %v7951_v45 }
 0xd73   :  { %v6063_v36 = vmul.f32 %v7949_v63, %v6062_v2  ;;  %v13202_v2 = vmul.f32 %v12664_v15, %v15079_v53  ;;  %vm5989_vm2 = vmor %vm5987_vm1, %vm5988_vm0 }
 0xd74   :  { %v6085_v17 = vsub.f32 1.5, %v6084_v40 }
 0xd75   :  { %v6064_v56 = vmul.f32 0.5, %v6063_v36  ;;  %v5725_v15 = vmul.f32 %v13202_v2, %v13202_v2  ;;  %v5693_v36 = vmul.f32 %v12673_v13, %v15079_v53 }
 0xd76   :  { %v6086_v35 = vmul.f32 %v7947_v6, %v6085_v17  ;;  %v13219_v17 = vmul.f32 %v12705_v26, %v15079_v53  ;;  %v5982_v26 = vmul.f32 %v7951_v45, %v13192_v19 }
 0xd77   :  { %v6065_v40 = vsub.f32 1.5, %v6064_v56 }
 0xd78   :  { %v6090_v11 = vsel %vm6089_vm12, %v7947_v6, %v6086_v35  ;;  %v13226_v35 = vpop.xlane.xlu0 %5600  ;;  %v5730_v13 = vmul.f32 %v13219_v17, %v13219_v17 }
 0xd79   :  { %7792 = vset.pattern.permute.xlu0 %v15215_v42  ;;  %v13211_v55 = vmul.f32 %v8019_v23, %v6090_v11  ;;  %v6066_v56 = vmul.f32 %v7949_v63, %v6065_v40  ;;  %v5757_v11 = vsub.f32 %v5693_v36, %v5725_v15  ;;  %v13234_v40 = vpop.xlane.xlu1 %5270  ;;  %v5277_v23 = vadd.f32 %v12873_v14, %v12875_v7  ;;  %v8020_v15 = vld [vmem:[%s14288_s5 + $0xb0] sm:$0xff] }
 0xd7a   :  { %6482 = vperm.xlu0 %7792, %v6180_v9   ;;  %v5452_v9 = vmul.f32 %v12984_v57, %v12984_v57  ;;  %v15219_v14 = vmov 7  }
 0xd7b   :  { %v13224_v59 = vmul.f32 %v13211_v55, %v13115_v5  ;;  %v6070_v5 = vsel %vm6069_vm15, %v7949_v63, %v6066_v56  ;;  %v5445_v56 = vmul.f32 %v12945_v12, %v12945_v12 }
 0xd7c   :  { %v5609_v6 = vadd.f32 %v5608_v62, %v5452_v9  ;;  %v5983_v62 = vmul.f32 %v7951_v45, %v5982_v26  ;;  %v6183_v36 = vmul.f32 %v8020_v15, %v6070_v5 }
 0xd7e   :  { %v5984_v22 = vmul.f32 0.5, %v5983_v62  ;;  %v6215_v62 = vmul.f32 %v6183_v36, %v13136_v3 }
 0xd82   :  { %6295 = vrot.lane.b32.xlu0 %v6212_v58, %s8049_s21  ;;  %v6360_v58 = vsub.f32 %v12809_v34, %v6272_v27  ;;  %v5698_v34 = vmul.f32 %v12973_v18, %v15079_v53  ;;  %v5789_v27 = vmax.f32 %v5757_v11, 0.0  ;;  %v5446_v11 = vmul.f32 %v12947_v16, %v12947_v16 }
 0xd83   :  { %7795 = vset.pattern.permute.xlu0 %v14627_v44 }
 0xd84   :  { %v5762_v9 = vsub.f32 %v5698_v34, %v5730_v13  ;;  %v13242_v18 = vadd.f32 1e-05, %v5789_v27  ;;  %v5985_v13 = vsub.f32 1.5, %v5984_v22  ;;  %v5602_v5 = vadd.f32 %v5446_v11, %v5445_v56 }
 0xd85   :  { %v5447_v27 = vmul.f32 %v12955_v37, %v12955_v37 }
 0xd86   :  { %v5794_v63 = vmax.f32 %v5762_v9, 0.0  ;;  %7952 = vrsqrt.f32 %v13242_v18  ;;  %v13258_v9 = vpop.permute.xlu2 %6407  ;;  %v5986_v15 = vmul.f32 %v7951_v45, %v5985_v13  ;;  %v13275_v13 = vld [vmem:[%s14288_s5 + $0x70] sm:$0xff]  ;;  %vm5967_vm4 = vweird.f32 %v13242_v18 }
 0xd87   :  { %v5603_v22 = vadd.f32 %v5602_v5, %v5447_v27 }
 0xd88   :  { %v13252_v26 = vadd.f32 1e-05, %v5794_v63  ;;  %v5448_v63 = vmul.f32 %v12961_v29, %v12961_v29  ;;  %v8022_v29 = vld [vmem:[%s14288_s5] sm:$0xff] }
 0xd8a   :  { %6710 = vperm.xlu0 %7795, %v6360_v58   ;;  %v13244_v58 = vpop.permute.xlu0 %6437  ;;  %7954 = vrsqrt.f32 %v13252_v26  ;;  %vm6017_vm7 = vweird.f32 %v13252_v26 }
 0xd8c   :  { %5610 = vadd.xlane.f32.xlu1 %v5609_v6  ;;  %v5278_v6 = vadd.f32 %v5277_v23, %v12886_v20  ;;  %v13260_v23 = vpop.permute.xlu1 %6427 }
 0xd8e   :  { %v5279_v34 = vadd.f32 %v5278_v6, %v12898_v32  ;;  %v7953_v6 = vpop.eup %7952  ;;  %v13268_v56 = vpop.xlane.xlu2 %5575 }
 0xd8f   :  { %v5962_v57 = vmul.f32 %v7953_v6, %v13242_v18  ;;  %vm5968_vm3 = vweird.f32 %v7953_v6 }
 0xd90   :  { %vm5969_vm5 = vmor %vm5967_vm4, %vm5968_vm3 }
 0xd91   :  { %v5963_v27 = vmul.f32 %v7953_v6, %v5962_v57 }
 0xd92   :  { %7796 = vset.pattern.permute.xlu0 %v15215_v42  ;;  %v6278_v3 = vpop.permute.xlu0 %6277 }
 0xd93   :  { %6497 = vperm.xlu0 %7796, %v6183_v36   ;;  %v5990_v36 = vsel %vm5989_vm2, %v7951_v45, %v5986_v15  ;;  %v6363_v11 = vsub.f32 %v12930_v30, %v6278_v3  ;;  %v13283_v30 = vmul.f32 %v13197_v52, %v15079_v53 }
 0xd94   :  { %v6175_v19 = vmul.f32 %v13275_v13, %v5990_v36  ;;  %v13278_v5 = vpop.permute.xlu1 %6273 }
 0xd95   :  { %v5740_v3 = vmul.f32 %v13283_v30, %v13283_v30 }
 0xd96   :  { %v13291_v36 = vpop.permute.xlu2 %6417 }
 0xd9b   :  { %5280 = vadd.xlane.f32.xlu2 %v5279_v34  ;;  %6301 = vrot.lane.b32.xlu0 %v6215_v62, %s8049_s21  ;;  %v5604_v34 = vadd.f32 %v5603_v22, %v5448_v63  ;;  %v7955_v62 = vpop.eup %7954  ;;  %v13287_v22 = vmul.f32 %v12826_v41, %v15079_v53  ;;  %v5964_v63 = vmul.f32 0.5, %v5963_v27 }
 0xd9c   :  { %7801 = vset.pattern.permute.xlu0 %v14627_v44  ;;  %v6012_v45 = vmul.f32 %v7955_v62, %v13252_v26  ;;  %vm6018_vm6 = vweird.f32 %v7955_v62  ;;  %v13325_v26 = vld [vmem:[%s14288_s5 + $0x88] sm:$0xff] }
 0xd9d   :  { %v5733_v52 = vmul.f32 %v13287_v22, %v13287_v22  ;;  %v5965_v27 = vsub.f32 1.5, %v5964_v63  ;;  %vm6019_vm9 = vmor %vm6017_vm7, %vm6018_vm6 }
 0xd9e   :  { %v6013_v15 = vmul.f32 %v7955_v62, %v6012_v45  ;;  %v5701_v45 = vmul.f32 %v13084_v25, %v15079_v53  ;;  %v6353_v25 = vsub.f32 %v8022_v29, %v13009_v1  ;;  %v13317_v29 = vld [vmem:[%s14288_s5 + $0x60] sm:$0xff] }
 0xda0   :  { %v5765_v39 = vsub.f32 %v5701_v45, %v5733_v52 }
 0xda2   :  { %v5797_v63 = vmax.f32 %v5765_v39, 0.0 }
 0xda3   :  { %5605 = vadd.xlane.f32.xlu2 %v5604_v34  ;;  %6725 = vperm.xlu0 %7801, %v6363_v11   ;;  %v6207_v11 = vmul.f32 %v6175_v19, %v13169_v4  ;;  %v6014_v34 = vmul.f32 0.5, %v6013_v15  ;;  %v5966_v15 = vmul.f32 %v7953_v6, %v5965_v27 }
 0xda4   :  { %v13312_v52 = vadd.f32 1e-05, %v5797_v63 }
 0xda5   :  { %6457 = vperm.xlu1 %7782, %v6175_v19   ;;  %v6015_v19 = vsub.f32 1.5, %v6014_v34  ;;  %v5970_v34 = vsel %vm5969_vm5, %v7953_v6, %v5966_v15 }
 0xda6   :  { %vm6047_vm15 = vweird.f32 %v13312_v52 }
 0xda8   :  { %v13302_v54 = vpop.xlane.xlu0 %5290 }
 0xdab   :  { %7802 = vset.pattern.permute.xlu0 %v15215_v42 }
 0xdac   :  { %v5596_v57 = vpop.xlane.xlu1 %5595 }
 0xdad   :  { %6285 = vrot.lane.b32.xlu1 %v6207_v11, %s8049_s21  ;;  %v5708_v41 = vmul.f32 %v5596_v57, %v15079_v53  ;;  %v13309_v57 = vpop.permute.xlu2 %6269 }
 0xdae   :  { %7785 = vset.pattern.permute.xlu1 %v14627_v44 }
 0xdaf   :  { %v5772_v4 = vsub.f32 %v5708_v41, %v5740_v3  ;;  %v6016_v3 = vmul.f32 %v7955_v62, %v6015_v19 }
 0xdb0   :  { %v13320_v1 = vpop.xlane.xlu0 %5615 }
 0xdb1   :  { %v5804_v46 = vmax.f32 %v5772_v4, 0.0  ;;  %v6020_v39 = vsel %vm6019_vm9, %v7955_v62, %v6016_v3  ;;  %v5706_v62 = vmul.f32 %v13151_v38, %v15079_v53 }
 0xdb2   :  { %v6178_v6 = vmul.f32 %v13325_v26, %v6020_v39 }
 0xdb3   :  { %v5836_v11 = vadd.f32 1e-05, %v5804_v46  ;;  %v6173_v46 = vmul.f32 %v13317_v29, %v5970_v34 }
 0xdb5   :  { %6675 = vperm.xlu1 %7785, %v6353_v25   ;;  %7956 = vrsqrt.f32 %v5836_v11  ;;  %vm6117_vm8 = vweird.f32 %v5836_v11  ;;  %v6205_v25 = vmul.f32 %v6173_v46, %v13202_v2  ;;  %v5704_v2 = vmul.f32 %v13268_v56, %v15079_v53 }
 0xdb6   :  { %7958 = vrsqrt.f32 %v13312_v52 }
 0xdbb   :  { %v7957_v18 = vpop.eup %7956  ;;  %6447 = vperm.xlu2 %7783, %v6173_v46  }
 0xdbc   :  { %v6112_v45 = vmul.f32 %v7957_v18, %v5836_v11  ;;  %vm6118_vm10 = vweird.f32 %v7957_v18  ;;  %v7959_v34 = vpop.eup %7958 }
 0xdbd   :  { %v5266_v41 = vpop.xlane.xlu2 %5265  ;;  %7788 = vset.pattern.permute.xlu1 %v15215_v42  ;;  %vm6119_vm11 = vmor %vm6117_vm8, %vm6118_vm10  ;;  %v6042_v11 = vmul.f32 %v7959_v34, %v13312_v52  ;;  %vm6048_vm13 = vweird.f32 %v7959_v34  ;;  %v13395_v52 = vld [vmem:[%s14288_s5 + $0xa0] sm:$0xff] }
 0xdbe   :  { %v6113_v27 = vmul.f32 %v7957_v18, %v6112_v45  ;;  %v13331_v4 = vmul.f32 %v5266_v41, %v15079_v53  ;;  %6472 = vperm.xlu1 %7788, %v6178_v6   ;;  %v13343_v45 = vmul.f32 %v13047_v33, %v15079_v53  ;;  %v6210_v41 = vmul.f32 %v6178_v6, %v13219_v17  ;;  %v8025_v17 = vld [vmem:[%s14288_s5 + $0xd8] sm:$0xff]  ;;  %vm6049_vm1 = vmor %vm6047_vm15, %vm6048_vm13 }
 0xdc0   :  { %v6114_v19 = vmul.f32 0.5, %v6113_v27  ;;  %v5738_v15 = vmul.f32 %v13331_v4, %v13331_v4  ;;  %v5736_v33 = vmul.f32 %v13343_v45, %v13343_v45 }
 0xdc2   :  { %v6115_v63 = vsub.f32 1.5, %v6114_v19  ;;  %v5770_v3 = vsub.f32 %v5706_v62, %v5738_v15  ;;  %v6043_v19 = vmul.f32 %v7959_v34, %v6042_v11  ;;  %v5768_v15 = vsub.f32 %v5704_v2, %v5736_v33 }
 0xdc3   :  { %6281 = vrot.lane.b32.xlu2 %v6205_v25, %s8049_s21  ;;  %v13339_v39 = vpop.permute.xlu0 %6452 }
 0xdc4   :  { %v5802_v38 = vmax.f32 %v5770_v3, 0.0  ;;  %v6116_v27 = vmul.f32 %v7957_v18, %v6115_v63 }
 0xdc6   :  { %v5834_v46 = vadd.f32 1e-05, %v5802_v38  ;;  %6291 = vrot.lane.b32.xlu1 %v6210_v41, %s8049_s21  ;;  %v6120_v62 = vsel %vm6119_vm11, %v7957_v18, %v6116_v27  ;;  %v8026_v18 = vld [vmem:[%s14288_s5 + $0x18] sm:$0xff]  ;;  %v6044_v38 = vmul.f32 0.5, %v6043_v19  ;;  %v5800_v41 = vmax.f32 %v5768_v15, 0.0 }
 0xdc7   :  { %7789 = vset.pattern.permute.xlu1 %v14627_v44  ;;  %v13356_v6 = vmul.f32 %v8025_v17, %v6120_v62  ;;  %v6356_v63 = vsub.f32 %v8026_v18, %v13110_v61  ;;  %v8027_v17 = vld [vmem:[%s14288_s5 + $0x28] sm:$0xff] }
 0xdc8   :  { %7960 = vrsqrt.f32 %v5834_v46  ;;  %v6045_v11 = vsub.f32 1.5, %v6044_v38  ;;  %v13368_v2 = vadd.f32 1e-05, %v5800_v41  ;;  %v6358_v44 = vsub.f32 %v8027_v17, %v13107_v28  ;;  %v13381_v18 = vld [vmem:[%s14288_s5 + $0xc8] sm:$0xff] }
 0xdc9   :  { %v13360_v56 = vmul.f32 %v13356_v6, %v13283_v30  ;;  %vm6097_vm14 = vweird.f32 %v5834_v46 }
 0xdca   :  { %7962 = vrsqrt.f32 %v13368_v2  ;;  %v6046_v61 = vmul.f32 %v7959_v34, %v6045_v11  ;;  %v6555_v11 = vmul.f32 %v12814_v31, %v12163_v24  ;;  %vm6077_vm3 = vweird.f32 %v13368_v2 }
 0xdcb   :  { %v13362_v25 = vpop.permute.xlu0 %6283 }
 0xdce   :  { %v7961_v3 = vpop.eup %7960  ;;  %6690 = vperm.xlu1 %7789, %v6356_v63   ;;  %v6050_v63 = vsel %vm6049_vm1, %v7959_v34, %v6046_v61  ;;  %v15217_v61 = vld [vmem:[#allocation101_spill] sm:$0xff] }
 0xdcf   :  { %v6092_v27 = vmul.f32 %v7961_v3, %v5834_v46  ;;  %vm6098_vm12 = vweird.f32 %v7961_v3  ;;  %v6181_v46 = vmul.f32 %v13395_v52, %v6050_v63 }
 0xdd0   :  { %vm6099_vm0 = vmor %vm6097_vm14, %vm6098_vm12  ;;  %v13386_v41 = vpop.eup %7962 }
 0xdd1   :  { %v6093_v62 = vmul.f32 %v7961_v3, %v6092_v27  ;;  %v6072_v34 = vmul.f32 %v13386_v41, %v13368_v2  ;;  %v6553_v27 = vmul.f32 %v12814_v31, %v12146_v8  ;;  %v6213_v24 = vmul.f32 %v6181_v46, %v13287_v22 }
 0xdd2   :  { %vm6078_vm2 = vweird.f32 %v13386_v41 }
 0xdd3   :  { %v6094_v33 = vmul.f32 0.5, %v6093_v62  ;;  %v13370_v30 = vpop.permute.xlu0 %6467  ;;  %vm6079_vm4 = vmor %vm6077_vm3, %vm6078_vm2 }
 0xdd5   :  { %v6095_v37 = vsub.f32 1.5, %v6094_v33  ;;  %v15216_v33 = vld [vmem:[#allocation82_spill] sm:$0xff] }
 0xdd6   :  { %6700 = vperm.xlu1 %7789, %v6358_v44   ;;  %v5591_v44 = vpop.xlane.xlu2 %5590  ;;  %v6556_v17 = vmul.f32 %v12814_v31, %v15216_v33 }
 0xdd7   :  { %v6096_v19 = vmul.f32 %v7961_v3, %v6095_v37  ;;  %v13390_v37 = vmul.f32 %v13234_v40, %v15079_v53  ;;  %v6554_v40 = vmul.f32 %v12814_v31, %v12148_v0 }
 0xdd9   :  { %v6100_v15 = vsel %vm6099_vm0, %v7961_v3, %v6096_v19  ;;  %v5707_v3 = vmul.f32 %v5591_v44, %v15079_v53  ;;  %v5739_v62 = vmul.f32 %v13390_v37, %v13390_v37  ;;  %v15218_v19 = vld [vmem:[#allocation102_spill] sm:$0xff]  ;;  %v6073_v44 = vmul.f32 %v13386_v41, %v6072_v34 }
 0xdda   :  { %v6186_v28 = vmul.f32 %v13381_v18, %v6100_v15  ;;  %v5292_v15 = vadd.f32 %v15218_v19, %v15217_v61 }
 0xddb   :  { %v13384_v38 = vpop.permute.xlu0 %6289  ;;  %v5771_v8 = vsub.f32 %v5707_v3, %v5739_v62  ;;  %v15220_v3 = vld [vmem:[#allocation20_spill] sm:$0xff] }
 0xddc   :  { %6512 = vperm.xlu0 %7802, %v6186_v28   ;;  %v6218_v63 = vmul.f32 %v6186_v28, %v13331_v4  ;;  %v5293_v31 = vadd.f32 %v5292_v15, %v13011_v21  ;;  %v6074_v4 = vmul.f32 0.5, %v6073_v44 }
 0xddd   :  { %v5803_v28 = vmax.f32 %v5771_v8, 0.0  ;;  %v15224_v8 = vld [vmem:[#allocation55_spill] sm:$0xff] }
 0xdde   :  { %7793 = vset.pattern.permute.xlu1 %v15215_v42 }
 0xddf   :  { %6487 = vperm.xlu1 %7793, %v6181_v46   ;;  %v5835_v22 = vadd.f32 1e-05, %v5803_v28 }
 0xde1   :  { %7964 = vrsqrt.f32 %v5835_v22  ;;  %vm6107_vm6 = vweird.f32 %v5835_v22 }
 0xde3   :  { %v6686_v16 = vpop.permute.xlu0 %6685 }
 0xde4   :  { %v6841_v12 = vadd.f32 %v6686_v16, %v6553_v27  ;;  %v6842_v0 = vadd.f32 %v6686_v16, %v6554_v40  ;;  %v6843_v32 = vadd.f32 %v6686_v16, %v6555_v11  ;;  %v6844_v20 = vadd.f32 %v6686_v16, %v6556_v17  ;;  %6307 = vrot.lane.b32.xlu0 %v6218_v63, %s8049_s21  ;;  %v15223_v63 = vld [vmem:[#allocation54_spill] sm:$0xff] }
 0xde5   :  { %7807 = vset.pattern.permute.xlu0 %v15219_v14  ;;  %v5294_v16 = vadd.f32 %v5293_v31, %v13024_v60  ;;  %v6361_v27 = vsub.f32 %v15220_v3, %v13278_v5  ;;  %v13455_v5 = vld [vmem:[%s14288_s5 + $0xb8] sm:$0xff]  ;;  %v6575_v44 = vmul.f32 %v13165_v48, %v15223_v63  ;;  %v13467_v31 = vpop.permute.xlu2 %6432 }
 0xde6   :  { %v6969_v33 = vmax.f32 %v6841_v12, 0.0  ;;  %v6970_v19 = vmax.f32 %v6842_v0, 0.0  ;;  %v6971_v61 = vmax.f32 %v6843_v32, 0.0  ;;  %v6972_v34 = vmax.f32 %v6844_v20, 0.0  ;;  %v13434_v12 = vpop.xlane.xlu1 %5285 }
 0xde7   :  { %6297 = vrot.lane.b32.xlu1 %v6213_v24, %s8049_s21  ;;  %v6366_v32 = vsub.f32 %v13101_v43, %v13362_v25  ;;  %v6075_v20 = vsub.f32 1.5, %v6074_v4  ;;  %v7965_v62 = vpop.eup %7964  ;;  %v6576_v0 = vmul.f32 %v13165_v48, %v15224_v8 }
 0xde8   :  { %7093 = vst [vmem:[%s14292_s6 + $0x20] sm:$0xff] %v6969_v33  ;;  %7797 = vset.pattern.permute.xlu1 %v15219_v14  ;;  %v6102_v2 = vmul.f32 %v7965_v62, %v5835_v22  ;;  %vm6108_vm5 = vweird.f32 %v7965_v62  ;;  %v13508_v22 = vld [vmem:[%s14288_s5 + $0xd0] sm:$0xff] }
 0xde9   :  { %7094 = vst [vmem:[%s14292_s6 + $0x28] sm:$0xff] %v6970_v19  ;;  %v6076_v43 = vmul.f32 %v13386_v41, %v6075_v20  ;;  %v15222_v19 = vld [vmem:[#allocation114_spill] sm:$0xff]  ;;  %vm6109_vm7 = vmor %vm6107_vm6, %vm6108_vm5 }
 0xdea   :  { %7610 = vst [vmem:[%s14292_s6 + $0x220] sm:$0xff] %v6971_v61  ;;  %v15221_v61 = vld [vmem:[#allocation113_spill] sm:$0xff]  ;;  %v6574_v15 = vmul.f32 %v13165_v48, %v15222_v19  ;;  %v6103_v24 = vmul.f32 %v7965_v62, %v6102_v2 }
 0xdeb   :  { %7611 = vst [vmem:[%s14292_s6 + $0x228] sm:$0xff] %v6972_v34  ;;  %v6080_v25 = vsel %vm6079_vm4, %v13386_v41, %v6076_v43  ;;  %v6573_v41 = vmul.f32 %v13165_v48, %v15221_v61  ;;  %v13477_v48 = vmul.f32 %v13302_v54, %v15079_v53 }
 0xdec   :  { %6740 = vperm.xlu0 %7807, %v6366_v32   ;;  %v13439_v46 = vpop.permute.xlu0 %6482  ;;  %5295 = vadd.xlane.f32.xlu2 %v5294_v16  ;;  %v6184_v17 = vmul.f32 %v13455_v5, %v6080_v25  ;;  %v6104_v25 = vmul.f32 0.5, %v6103_v24 }
 0xded   :  { %v5743_v54 = vmul.f32 %v13477_v48, %v13477_v48  ;;  %v13494_v19 = vpop.permute.xlu2 %6275 }
 0xdee   :  { %v13450_v11 = vpop.permute.xlu1 %6442  ;;  %v6216_v32 = vmul.f32 %v6184_v17, %v13343_v45  ;;  %v6105_v45 = vsub.f32 1.5, %v6104_v25 }
 0xdef   :  { %6715 = vperm.xlu1 %7797, %v6361_v27  }
 0xdf4   :  { %v13447_v40 = vpop.permute.xlu0 %6295  ;;  %7808 = vset.pattern.permute.xlu0 %v15215_v42 }
 0xdf6   :  { %v6280_v20 = vpop.permute.xlu1 %6279 }
 0xdf7   :  { %7798 = vset.pattern.permute.xlu1 %v15215_v42 }
 0xdf8   :  { %6502 = vperm.xlu1 %7798, %v6184_v17   ;;  %v15225_v17 = vld [vmem:[#allocation68_spill] sm:$0xff] }
 0xdfc   :  { %v6711_v33 = vpop.permute.xlu0 %6710 }
 0xdfd   :  { %v6861_v4 = vadd.f32 %v6711_v33, %v6573_v41  ;;  %v6862_v28 = vadd.f32 %v6711_v33, %v6574_v15  ;;  %v6863_v34 = vadd.f32 %v6711_v33, %v6575_v44  ;;  %v6864_v16 = vadd.f32 %v6711_v33, %v6576_v0  ;;  %v15227_v0 = vld [vmem:[#allocation6_spill] sm:$0xff] }
 0xdfe   :  { %v6364_v41 = vsub.f32 %v13123_v49, %v6280_v20  ;;  %v6106_v44 = vmul.f32 %v7965_v62, %v6105_v45 }
 0xdff   :  { %v6989_v3 = vmax.f32 %v6861_v4, 0.0  ;;  %v6990_v27 = vmax.f32 %v6862_v28, 0.0  ;;  %v6991_v43 = vmax.f32 %v6863_v34, 0.0  ;;  %v6992_v61 = vmax.f32 %v6864_v16, 0.0  ;;  %v5611_v15 = vpop.xlane.xlu1 %5610 }
 0xe00   :  { %6303 = vrot.lane.b32.xlu1 %v6216_v32, %s8049_s21  ;;  %v5711_v63 = vmul.f32 %v5611_v15, %v15079_v53  ;;  %v6110_v33 = vsel %vm6109_vm7, %v7965_v62, %v6106_v44  ;;  %v5709_v62 = vmul.f32 %v13226_v35, %v15079_v53  ;;  %v13516_v32 = vmul.f32 %v13434_v12, %v15079_v53 }
 0xe01   :  { %7103 = vst [vmem:[%s14292_s6 + $0x70] sm:$0xff] %v6989_v3  ;;  %7803 = vset.pattern.permute.xlu1 %v15219_v14  ;;  %v6187_v16 = vmul.f32 %v13508_v22, %v6110_v33  ;;  %v8032_v3 = vld [vmem:[%s14288_s5 + $0x8] sm:$0xff] }
 0xe02   :  { %7104 = vst [vmem:[%s14292_s6 + $0x78] sm:$0xff] %v6990_v27  ;;  %v5775_v8 = vsub.f32 %v5711_v63, %v5743_v54  ;;  %v15228_v27 = vld [vmem:[#allocation10_spill] sm:$0xff]  ;;  %v15231_v54 = vld [vmem:[#allocation108_spill] sm:$0xff]  ;;  %v5742_v63 = vmul.f32 %v13516_v32, %v13516_v32 }
 0xe03   :  { %7620 = vst [vmem:[%s14292_s6 + $0x270] sm:$0xff] %v6991_v43  ;;  %v6354_v43 = vsub.f32 %v8032_v3, %v15228_v27  ;;  %v6587_v12 = vmul.f32 %v13244_v58, %v15231_v54 }
 0xe04   :  { %7621 = vst [vmem:[%s14292_s6 + $0x278] sm:$0xff] %v6992_v61  ;;  %6462 = vperm.xlu2 %7783, %v15225_v17   ;;  %v5807_v24 = vmax.f32 %v5775_v8, 0.0  ;;  %v15229_v61 = vld [vmem:[#allocation52_spill] sm:$0xff]  ;;  %v15230_v17 = vld [vmem:[#allocation107_spill] sm:$0xff] }
 0xe05   :  { %v13489_v2 = vpop.permute.xlu0 %6497  ;;  %v6585_v45 = vmul.f32 %v13244_v58, %v15229_v61  ;;  %v6586_v35 = vmul.f32 %v13244_v58, %v15230_v17 }
 0xe06   :  { %15226 = vst [vmem:[#allocation75_spill] sm:$0xff] %v13489_v2  ;;  %v5839_v28 = vadd.f32 1e-05, %v5807_v24 }
 0xe08   :  { %6730 = vperm.xlu1 %7803, %v6364_v41   ;;  %7966 = vrsqrt.f32 %v5839_v28  ;;  %v15232_v41 = vld [vmem:[#allocation53_spill] sm:$0xff]  ;;  %vm6147_vm9 = vweird.f32 %v5839_v28 }
 0xe09   :  { %v6588_v15 = vmul.f32 %v13244_v58, %v15232_v41  ;;  %v6219_v58 = vmul.f32 %v6187_v16, %v13390_v37 }
 0xe0c   :  { %6287 = vrot.lane.b32.xlu2 %v15227_v0, %s8049_s21 }
 0xe0d   :  { %v13499_v4 = vpop.permute.xlu0 %6301  ;;  %7786 = vset.pattern.permute.xlu2 %v15219_v14 }
 0xe0e   :  { %v5281_v49 = vpop.xlane.xlu2 %5280  ;;  %v7967_v0 = vpop.eup %7966 }
 0xe0f   :  { %v13503_v34 = vmul.f32 %v5281_v49, %v15079_v53  ;;  %v6142_v27 = vmul.f32 %v7967_v0, %v5839_v28  ;;  %vm6148_vm8 = vweird.f32 %v7967_v0  ;;  %v13558_v28 = vld [vmem:[%s14288_s5 + $0xf0] sm:$0xff] }
 0xe10   :  { %7804 = vset.pattern.permute.xlu1 %v15215_v42  ;;  %vm6149_vm10 = vmor %vm6147_vm9, %vm6148_vm8 }
 0xe11   :  { %v5741_v20 = vmul.f32 %v13503_v34, %v13503_v34  ;;  %6517 = vperm.xlu1 %7804, %v6187_v16  }
 0xe13   :  { %v5773_v25 = vsub.f32 %v5709_v62, %v5741_v20 }
 0xe14   :  { %6680 = vperm.xlu2 %7786, %v6354_v43  }
 0xe15   :  { %v5805_v44 = vmax.f32 %v5773_v25, 0.0  ;;  %v6726_v8 = vpop.permute.xlu0 %6725  ;;  %v6143_v25 = vmul.f32 %v7967_v0, %v6142_v27 }
 0xe16   :  { %v6873_v24 = vadd.f32 %v6726_v8, %v6585_v45  ;;  %v6874_v33 = vadd.f32 %v6726_v8, %v6586_v35  ;;  %v6875_v49 = vadd.f32 %v6726_v8, %v6587_v12  ;;  %v6876_v62 = vadd.f32 %v6726_v8, %v6588_v15  ;;  %v5606_v20 = vpop.xlane.xlu2 %5605  ;;  %v15233_v12 = vld [vmem:[#allocation70_spill] sm:$0xff] }
 0xe17   :  { %v5837_v3 = vadd.f32 1e-05, %v5805_v44  ;;  %v5710_v61 = vmul.f32 %v5606_v20, %v15079_v53  ;;  %v13535_v17 = vpop.permute.xlu1 %6457  ;;  %v6144_v45 = vmul.f32 0.5, %v6143_v25  ;;  %v15235_v20 = vld [vmem:[#allocation110_spill] sm:$0xff]  ;;  %v15238_v25 = vld [vmem:[#allocation84_spill] sm:$0xff] }
 0xe18   :  { %v7001_v43 = vmax.f32 %v6873_v24, 0.0  ;;  %v7002_v54 = vmax.f32 %v6874_v33, 0.0  ;;  %v7003_v41 = vmax.f32 %v6875_v49, 0.0  ;;  %v7004_v60 = vmax.f32 %v6876_v62, 0.0  ;;  %v15234_v62 = vld [vmem:[#allocation72_spill] sm:$0xff] }
 0xe19   :  { %7968 = vrsqrt.f32 %v5837_v3  ;;  %v5774_v21 = vsub.f32 %v5710_v61, %v5742_v63  ;;  %6309 = vrot.lane.b32.xlu1 %v6219_v58, %s8049_s21  ;;  %v6145_v37 = vsub.f32 1.5, %v6144_v45  ;;  %v6545_v27 = vmul.f32 %v15235_v20, %v15234_v62  ;;  %v15236_v61 = vld [vmem:[#allocation73_spill] sm:$0xff] }
 0xe1a   :  { %7109 = vst [vmem:[%s14292_s6 + $0xa0] sm:$0xff] %v7001_v43  ;;  %v6546_v58 = vmul.f32 %v15235_v20, %v15236_v61  ;;  %v15237_v43 = vld [vmem:[#allocation109_spill] sm:$0xff]  ;;  %v6547_v45 = vmul.f32 %v15235_v20, %v15238_v25  ;;  %vm6127_vm12 = vweird.f32 %v5837_v3  ;;  %v8034_v25 = vld [vmem:[%s14288_s5 + $0x20] sm:$0xff] }
 0xe1b   :  { %7110 = vst [vmem:[%s14292_s6 + $0xa8] sm:$0xff] %v7002_v54  ;;  %v5806_v35 = vmax.f32 %v5774_v21, 0.0  ;;  %v6146_v44 = vmul.f32 %v7967_v0, %v6145_v37  ;;  %v6357_v2 = vsub.f32 %v8034_v25, %v13090_v10 }
 0xe1c   :  { %7626 = vst [vmem:[%s14292_s6 + $0x2a0] sm:$0xff] %v7003_v41  ;;  %7790 = vset.pattern.permute.xlu2 %v15215_v42 }
 0xe1d   :  { %7627 = vst [vmem:[%s14292_s6 + $0x2a8] sm:$0xff] %v7004_v60  ;;  %v5838_v16 = vadd.f32 1e-05, %v5806_v35  ;;  %6477 = vperm.xlu2 %7790, %v15233_v12   ;;  %v6150_v24 = vsel %vm6149_vm10, %v7967_v0, %v6146_v44  ;;  %v15239_v35 = vld [vmem:[#allocation80_spill] sm:$0xff] }
 0xe1e   :  { %v13561_v60 = vmul.f32 %v13558_v28, %v6150_v24  ;;  %v6548_v37 = vmul.f32 %v15235_v20, %v15239_v35 }
 0xe1f   :  { %v7969_v15 = vpop.eup %7968  ;;  %7970 = vrsqrt.f32 %v5838_v16  ;;  %v13553_v63 = vpop.permute.xlu1 %6285  ;;  %vm6137_vm15 = vweird.f32 %v5838_v16 }
 0xe20   :  { %v6122_v21 = vmul.f32 %v7969_v15, %v5837_v3  ;;  %vm6128_vm11 = vweird.f32 %v7969_v15  ;;  %v13572_v41 = vmul.f32 %v13561_v60, %v13477_v48  ;;  %v13585_v3 = vld [vmem:[%s14288_s5 + $0xe0] sm:$0xff] }
 0xe21   :  { %vm6129_vm13 = vmor %vm6127_vm12, %vm6128_vm11 }
 0xe22   :  { %v6123_v8 = vmul.f32 %v7969_v15, %v6122_v21 }
 0xe24   :  { %v6124_v33 = vmul.f32 0.5, %v6123_v8 }
 0xe25   :  { %v7971_v49 = vpop.eup %7970  ;;  %6293 = vrot.lane.b32.xlu2 %v15237_v43, %s8049_s21 }
 0xe26   :  { %v6125_v0 = vsub.f32 1.5, %v6124_v33  ;;  %v6132_v54 = vmul.f32 %v7971_v49, %v5838_v16  ;;  %7791 = vset.pattern.permute.xlu2 %v15219_v14  ;;  %vm6138_vm14 = vweird.f32 %v7971_v49  ;;  %v8037_v16 = vld [vmem:[%s14288_s5 + $0x30] sm:$0xff] }
 0xe27   :  { %v6676_v12 = vpop.permute.xlu1 %6675  ;;  %vm6139_vm0 = vmor %vm6137_vm15, %vm6138_vm14 }
 0xe28   :  { %v6126_v21 = vmul.f32 %v7969_v15, %v6125_v0  ;;  %v6133_v44 = vmul.f32 %v7971_v49, %v6132_v54  ;;  %v6833_v8 = vadd.f32 %v6676_v12, %v6545_v27  ;;  %v6834_v24 = vadd.f32 %v6676_v12, %v6546_v58  ;;  %v13605_v54 = vld [vmem:[%s14288_s5 + $0xe8] sm:$0xff] }
 0xe29   :  { %v6835_v33 = vadd.f32 %v6676_v12, %v6547_v45  ;;  %v6836_v62 = vadd.f32 %v6676_v12, %v6548_v37  ;;  %v6359_v45 = vsub.f32 %v8037_v16, %v13309_v57  ;;  %v15240_v12 = vld [vmem:[#allocation130_spill] sm:$0xff] }
 0xe2a   :  { %v6130_v61 = vsel %vm6129_vm13, %v7969_v15, %v6126_v21  ;;  %v6134_v43 = vmul.f32 0.5, %v6133_v44  ;;  %v6961_v7 = vmax.f32 %v6833_v8, 0.0  ;;  %v6962_v48 = vmax.f32 %v6834_v24, 0.0  ;;  %v15241_v21 = vld [vmem:[#allocation83_spill] sm:$0xff]  ;;  %v15243_v8 = vld [vmem:[#allocation85_spill] sm:$0xff]  ;;  %v15244_v24 = vld [vmem:[#allocation88_spill] sm:$0xff] }
 0xe2b   :  { %v6189_v20 = vmul.f32 %v13585_v3, %v6130_v61  ;;  %v6963_v27 = vmax.f32 %v6835_v33, 0.0  ;;  %v6964_v58 = vmax.f32 %v6836_v62, 0.0  ;;  %v15242_v44 = vld [vmem:[#allocation131_spill] sm:$0xff]  ;;  %v15245_v62 = vld [vmem:[#allocation22_spill] sm:$0xff] }
 0xe2c   :  { %v6135_v0 = vsub.f32 1.5, %v6134_v43  ;;  %7089 = vst [vmem:[%s14292_s6] sm:$0xff] %v6961_v7  ;;  %v6557_v57 = vmul.f32 %v15242_v44, %v15241_v21  ;;  %v6559_v33 = vmul.f32 %v15242_v44, %v15244_v24 }
 0xe2d   :  { %7090 = vst [vmem:[%s14292_s6 + $0x8] sm:$0xff] %v6962_v48  ;;  %6527 = vperm.xlu0 %7808, %v6189_v20   ;;  %6695 = vperm.xlu2 %7791, %v6357_v2   ;;  %v6221_v35 = vmul.f32 %v6189_v20, %v13503_v34  ;;  %v6558_v34 = vmul.f32 %v15242_v44, %v15243_v8 }
 0xe2e   :  { %7606 = vst [vmem:[%s14292_s6 + $0x200] sm:$0xff] %v6963_v27  ;;  %v6136_v10 = vmul.f32 %v7971_v49, %v6135_v0  ;;  %v6367_v27 = vsub.f32 %v13275_v13, %v13553_v63  ;;  %v15248_v13 = vld [vmem:[#allocation93_spill] sm:$0xff] }
 0xe2f   :  { %7607 = vst [vmem:[%s14292_s6 + $0x208] sm:$0xff] %v6964_v58  ;;  %v6566_v63 = vmul.f32 %v13077_v47, %v15248_v13  ;;  %v15255_v13 = vld [vmem:[#allocation117_spill] sm:$0xff] }
 0xe30   :  { %v13600_v15 = vpop.permute.xlu1 %6472  ;;  %v6140_v7 = vsel %vm6139_vm0, %v7971_v49, %v6136_v10 }
 0xe31   :  { %v6190_v2 = vmul.f32 %v13605_v54, %v6140_v7 }
 0xe33   :  { %6532 = vperm.xlu1 %7804, %v6190_v2   ;;  %v6222_v37 = vmul.f32 %v6190_v2, %v13516_v32  ;;  %v6560_v32 = vmul.f32 %v15242_v44, %v15245_v62  ;;  %v15246_v2 = vld [vmem:[#allocation98_spill] sm:$0xff] }
 0xe34   :  { %v6565_v16 = vmul.f32 %v13077_v47, %v15246_v2 }
 0xe35   :  { %6705 = vperm.xlu2 %7791, %v6359_v45   ;;  %6313 = vrot.lane.b32.xlu0 %v6221_v35, %s8049_s21  ;;  %v15247_v45 = vld [vmem:[#allocation25_spill] sm:$0xff]  ;;  %v15249_v35 = vld [vmem:[#allocation94_spill] sm:$0xff] }
 0xe38   :  { %v6292_v49 = vpop.permute.xlu1 %6291 }
 0xe3b   :  { %6315 = vrot.lane.b32.xlu1 %v6222_v37, %s8049_s21  ;;  %v6567_v37 = vmul.f32 %v13077_v47, %v15249_v35 }
 0xe3c   :  { %7809 = vset.pattern.permute.xlu1 %v15219_v14 }
 0xe3d   :  { %7794 = vset.pattern.permute.xlu2 %v15215_v42 }
 0xe3e   :  { %6492 = vperm.xlu2 %7794, %v15240_v12   ;;  %v15250_v12 = vld [vmem:[#allocation90_spill] sm:$0xff] }
 0xe3f   :  { %v6568_v21 = vmul.f32 %v13077_v47, %v15250_v12 }
 0xe40   :  { %v6691_v61 = vpop.permute.xlu1 %6690 }
 0xe41   :  { %v6845_v43 = vadd.f32 %v6691_v61, %v6557_v57  ;;  %v6846_v48 = vadd.f32 %v6691_v61, %v6558_v34  ;;  %v6847_v25 = vadd.f32 %v6691_v61, %v6559_v33  ;;  %v6848_v20 = vadd.f32 %v6691_v61, %v6560_v32 }
 0xe42   :  { %v6370_v33 = vsub.f32 %v13325_v26, %v6292_v49  ;;  %v6362_v61 = vsub.f32 %v13158_v51, %v13494_v19 }
 0xe43   :  { %v6973_v58 = vmax.f32 %v6845_v43, 0.0  ;;  %v6974_v0 = vmax.f32 %v6846_v48, 0.0  ;;  %v6975_v10 = vmax.f32 %v6847_v25, 0.0  ;;  %v6976_v7 = vmax.f32 %v6848_v20, 0.0  ;;  %6745 = vperm.xlu1 %7809, %v6367_v27   ;;  %v13655_v48 = vpop.permute.xlu2 %6447  ;;  %v15251_v27 = vld [vmem:[#allocation123_spill] sm:$0xff] }
 0xe45   :  { %7095 = vst [vmem:[%s14292_s6 + $0x30] sm:$0xff] %v6973_v58  ;;  %v6597_v58 = vmul.f32 %v13339_v39, %v15251_v27 }
 0xe46   :  { %7096 = vst [vmem:[%s14292_s6 + $0x38] sm:$0xff] %v6974_v0  ;;  %6299 = vrot.lane.b32.xlu2 %v15247_v45, %s8049_s21  ;;  %v15252_v0 = vld [vmem:[#allocation124_spill] sm:$0xff] }
 0xe47   :  { %7612 = vst [vmem:[%s14292_s6 + $0x230] sm:$0xff] %v6975_v10  ;;  %7799 = vset.pattern.permute.xlu2 %v15219_v14  ;;  %v6598_v10 = vmul.f32 %v13339_v39, %v15252_v0 }
 0xe48   :  { %7613 = vst [vmem:[%s14292_s6 + $0x238] sm:$0xff] %v6976_v7  ;;  %v6701_v44 = vpop.permute.xlu1 %6700  ;;  %v15253_v7 = vld [vmem:[#allocation66_spill] sm:$0xff] }
 0xe49   :  { %v6853_v57 = vadd.f32 %v6701_v44, %v6565_v16  ;;  %v6854_v8 = vadd.f32 %v6701_v44, %v6566_v63  ;;  %v6855_v34 = vadd.f32 %v6701_v44, %v6567_v37  ;;  %v6856_v24 = vadd.f32 %v6701_v44, %v6568_v21  ;;  %v15254_v16 = vld [vmem:[#allocation67_spill] sm:$0xff] }
 0xe4a   :  { %v6599_v2 = vmul.f32 %v13339_v39, %v15253_v7  ;;  %v6600_v45 = vmul.f32 %v13339_v39, %v15254_v16  ;;  %v6577_v63 = vmul.f32 %v13260_v23, %v15255_v13 }
 0xe4b   :  { %v6981_v62 = vmax.f32 %v6853_v57, 0.0  ;;  %v6982_v32 = vmax.f32 %v6854_v8, 0.0  ;;  %v6983_v47 = vmax.f32 %v6855_v34, 0.0  ;;  %v6984_v43 = vmax.f32 %v6856_v24, 0.0  ;;  %6760 = vperm.xlu1 %7809, %v6370_v33   ;;  %v6282_v19 = vpop.permute.xlu2 %6281  ;;  %v15257_v8 = vld [vmem:[#allocation58_spill] sm:$0xff]  ;;  %v15258_v24 = vld [vmem:[#allocation59_spill] sm:$0xff] }
 0xe4c   :  { %v6579_v34 = vmul.f32 %v13260_v23, %v15257_v8  ;;  %v6580_v39 = vmul.f32 %v13260_v23, %v15258_v24  ;;  %v5712_v33 = vmul.f32 %v13320_v1, %v15079_v53  ;;  %v15261_v8 = vld [vmem:[#allocation77_spill] sm:$0xff]  ;;  %v15262_v24 = vld [vmem:[#allocation86_spill] sm:$0xff] }
 0xe4d   :  { %7099 = vst [vmem:[%s14292_s6 + $0x50] sm:$0xff] %v6981_v62 }
 0xe4e   :  { %7100 = vst [vmem:[%s14292_s6 + $0x58] sm:$0xff] %v6982_v32  ;;  %v13663_v25 = vpop.permute.xlu0 %6512  ;;  %6720 = vperm.xlu2 %7799, %v6362_v61  }
 0xe4f   :  { %7616 = vst [vmem:[%s14292_s6 + $0x250] sm:$0xff] %v6983_v47 }
 0xe50   :  { %7617 = vst [vmem:[%s14292_s6 + $0x258] sm:$0xff] %v6984_v43 }
 0xe51   :  { %v13671_v51 = vpop.permute.xlu1 %6487 }
 0xe56   :  { %v13673_v26 = vpop.permute.xlu0 %6307  ;;  %7800 = vset.pattern.permute.xlu2 %v15215_v42 }
 0xe57   :  { %6507 = vperm.xlu2 %7800, %v13211_v55   ;;  %v15256_v55 = vld [vmem:[#allocation118_spill] sm:$0xff] }
 0xe58   :  { %v6578_v35 = vmul.f32 %v13260_v23, %v15256_v55 }
 0xe59   :  { %v6298_v49 = vpop.permute.xlu1 %6297 }
 0xe5a   :  { %v6373_v20 = vsub.f32 %v13395_v52, %v6298_v49 }
 0xe5c   :  { %6775 = vperm.xlu1 %7809, %v6373_v20  }
 0xe5e   :  { %v6741_v52 = vpop.permute.xlu0 %6740 }
 0xe5f   :  { %v6885_v37 = vadd.f32 %v6741_v52, %v6597_v58  ;;  %v6886_v12 = vadd.f32 %v6741_v52, %v6598_v10  ;;  %v6887_v21 = vadd.f32 %v6741_v52, %v6599_v2  ;;  %v6888_v44 = vadd.f32 %v6741_v52, %v6600_v45  ;;  %6305 = vrot.lane.b32.xlu2 %v13224_v59, %s8049_s21  ;;  %v5296_v57 = vpop.xlane.xlu2 %5295 }
 0xe60   :  { %v13699_v62 = vmul.f32 %v5296_v57, %v15079_v53  ;;  %7805 = vset.pattern.permute.xlu2 %v15219_v14  ;;  %v6365_v10 = vsub.f32 %v13317_v29, %v6282_v19 }
 0xe61   :  { %v7013_v32 = vmax.f32 %v6885_v37, 0.0  ;;  %v7014_v47 = vmax.f32 %v6886_v12, 0.0  ;;  %v7015_v61 = vmax.f32 %v6887_v21, 0.0  ;;  %v7016_v43 = vmax.f32 %v6888_v44, 0.0  ;;  %v6716_v59 = vpop.permute.xlu1 %6715  ;;  %v15259_v21 = vld [vmem:[#allocation81_spill] sm:$0xff]  ;;  %v15260_v44 = vld [vmem:[#allocation74_spill] sm:$0xff] }
 0xe62   :  { %v5744_v49 = vmul.f32 %v13699_v62, %v13699_v62  ;;  %v6865_v20 = vadd.f32 %v6716_v59, %v6577_v63  ;;  %v6866_v27 = vadd.f32 %v6716_v59, %v6578_v35  ;;  %v6867_v58 = vadd.f32 %v6716_v59, %v6579_v34 }
 0xe63   :  { %7115 = vst [vmem:[%s14292_s6 + $0xd0] sm:$0xff] %v7013_v32  ;;  %v6868_v23 = vadd.f32 %v6716_v59, %v6580_v39  ;;  %v6549_v57 = vmul.f32 %v15260_v44, %v15259_v21  ;;  %v6550_v34 = vmul.f32 %v15260_v44, %v15261_v8  ;;  %v15263_v39 = vld [vmem:[#allocation87_spill] sm:$0xff] }
 0xe64   :  { %7116 = vst [vmem:[%s14292_s6 + $0xd8] sm:$0xff] %v7014_v47  ;;  %v5776_v53 = vsub.f32 %v5712_v33, %v5744_v49  ;;  %v6993_v1 = vmax.f32 %v6865_v20, 0.0  ;;  %v6994_v0 = vmax.f32 %v6866_v27, 0.0  ;;  %v6995_v7 = vmax.f32 %v6867_v58, 0.0  ;;  %v15265_v47 = vld [vmem:[#allocation49_spill] sm:$0xff]  ;;  %v15266_v58 = vld [vmem:[#allocation115_spill] sm:$0xff] }
 0xe65   :  { %7632 = vst [vmem:[%s14292_s6 + $0x2d0] sm:$0xff] %v7015_v61  ;;  %v6996_v16 = vmax.f32 %v6868_v23, 0.0  ;;  %v6552_v33 = vmul.f32 %v15260_v44, %v15263_v39  ;;  %v6591_v23 = vmul.f32 %v13450_v11, %v15266_v58  ;;  %v8039_v39 = vld [vmem:[%s14288_s5 + $0x80] sm:$0xff] }
 0xe66   :  { %7633 = vst [vmem:[%s14292_s6 + $0x2d8] sm:$0xff] %v7016_v43  ;;  %v5808_v2 = vmax.f32 %v5776_v53, 0.0  ;;  %v15267_v53 = vld [vmem:[#allocation111_spill] sm:$0xff] }
 0xe67   :  { %7105 = vst [vmem:[%s14292_s6 + $0x80] sm:$0xff] %v6993_v1  ;;  %6735 = vperm.xlu2 %7805, %v6365_v10   ;;  %v13720_v45 = vpop.permute.xlu2 %6462  ;;  %v6592_v1 = vmul.f32 %v13450_v11, %v15267_v53 }
 0xe68   :  { %v5840_v13 = vadd.f32 1e-05, %v5808_v2  ;;  %7106 = vst [vmem:[%s14292_s6 + $0x88] sm:$0xff] %v6994_v0 }
 0xe69   :  { %7622 = vst [vmem:[%s14292_s6 + $0x280] sm:$0xff] %v6995_v7 }
 0xe6a   :  { %7972 = vrsqrt.f32 %v5840_v13  ;;  %7623 = vst [vmem:[%s14292_s6 + $0x288] sm:$0xff] %v6996_v16  ;;  %v13731_v29 = vpop.permute.xlu1 %6502  ;;  %vm6157_vm2 = vweird.f32 %v5840_v13 }
 0xe6f   :  { %7806 = vset.pattern.permute.xlu2 %v15215_v42  ;;  %v13734_v19 = vpop.permute.xlu2 %6287  ;;  %v6551_v42 = vmul.f32 %v15260_v44, %v15262_v24 }
 0xe70   :  { %v7973_v63 = vpop.eup %7972  ;;  %6522 = vperm.xlu2 %7806, %v13356_v6   ;;  %v15264_v6 = vld [vmem:[#allocation48_spill] sm:$0xff] }
 0xe71   :  { %v6152_v55 = vmul.f32 %v7973_v63, %v5840_v13  ;;  %v6589_v32 = vmul.f32 %v13450_v11, %v15264_v6  ;;  %vm6158_vm1 = vweird.f32 %v7973_v63 }
 0xe72   :  { %v6304_v35 = vpop.permute.xlu1 %6303  ;;  %vm6159_vm3 = vmor %vm6157_vm2, %vm6158_vm1 }
 0xe73   :  { %v6153_v52 = vmul.f32 %v7973_v63, %v6152_v55  ;;  %v6376_v37 = vsub.f32 %v13455_v5, %v6304_v35  ;;  %v6590_v5 = vmul.f32 %v13450_v11, %v15265_v47  ;;  %v15269_v47 = vld [vmem:[#allocation89_spill] sm:$0xff] }
 0xe75   :  { %v6154_v12 = vmul.f32 0.5, %v6153_v52  ;;  %6790 = vperm.xlu1 %7809, %v6376_v37  }
 0xe77   :  { %v6155_v61 = vsub.f32 1.5, %v6154_v12  ;;  %v6681_v43 = vpop.permute.xlu2 %6680 }
 0xe78   :  { %v6837_v59 = vadd.f32 %v6681_v43, %v6549_v57  ;;  %v6838_v49 = vadd.f32 %v6681_v43, %v6550_v34  ;;  %v6839_v20 = vadd.f32 %v6681_v43, %v6551_v42  ;;  %v6840_v27 = vadd.f32 %v6681_v43, %v6552_v33  ;;  %6311 = vrot.lane.b32.xlu2 %v13360_v56, %s8049_s21  ;;  %v13759_v56 = vld [vmem:[%s14288_s5 + $0xf8] sm:$0xff]  ;;  %v15271_v43 = vld [vmem:[#allocation92_spill] sm:$0xff] }
 0xe79   :  { %v6156_v0 = vmul.f32 %v7973_v63, %v6155_v61  ;;  %v6369_v33 = vsub.f32 %v8039_v39, %v13384_v38  ;;  %v15270_v61 = vld [vmem:[#allocation96_spill] sm:$0xff]  ;;  %v8040_v38 = vld [vmem:[%s14288_s5 + $0x78] sm:$0xff] }
 0xe7a   :  { %v6965_v10 = vmax.f32 %v6837_v59, 0.0  ;;  %v6966_v7 = vmax.f32 %v6838_v49, 0.0  ;;  %v6967_v2 = vmax.f32 %v6839_v20, 0.0  ;;  %v6968_v16 = vmax.f32 %v6840_v27, 0.0  ;;  %v6731_v55 = vpop.permute.xlu1 %6730  ;;  %v8043_v39 = vld [vmem:[%s14288_s5 + $0xb0] sm:$0xff] }
 0xe7b   :  { %v6160_v35 = vsel %vm6159_vm3, %v7973_v63, %v6156_v0  ;;  %v6877_v52 = vadd.f32 %v6731_v55, %v6589_v32  ;;  %v6878_v37 = vadd.f32 %v6731_v55, %v6590_v5  ;;  %v6879_v12 = vadd.f32 %v6731_v55, %v6591_v23 }
 0xe7c   :  { %v6192_v21 = vmul.f32 %v13759_v56, %v6160_v35  ;;  %7091 = vst [vmem:[%s14292_s6 + $0x10] sm:$0xff] %v6965_v10  ;;  %v6880_v11 = vadd.f32 %v6731_v55, %v6592_v1  ;;  %v6562_v5 = vmul.f32 %v13258_v9, %v15269_v47  ;;  %v15274_v55 = vld [vmem:[#allocation50_spill] sm:$0xff]  ;;  %v8044_v47 = vld [vmem:[%s14288_s5 + $0xa8] sm:$0xff] }
 0xe7d   :  { %7092 = vst [vmem:[%s14292_s6 + $0x18] sm:$0xff] %v6966_v7  ;;  %v7005_v13 = vmax.f32 %v6877_v52, 0.0  ;;  %v7006_v63 = vmax.f32 %v6878_v37, 0.0  ;;  %v7007_v44 = vmax.f32 %v6879_v12, 0.0  ;;  %v6571_v35 = vmul.f32 %v13291_v36, %v15274_v55  ;;  %v15275_v52 = vld [vmem:[#allocation51_spill] sm:$0xff]  ;;  %v8042_v37 = vld [vmem:[%s14288_s5 + $0x90] sm:$0xff] }
 0xe7e   :  { %7608 = vst [vmem:[%s14292_s6 + $0x210] sm:$0xff] %v6967_v2  ;;  %6542 = vperm.xlu0 %7808, %v6192_v21   ;;  %v7008_v57 = vmax.f32 %v6880_v11, 0.0  ;;  %v6224_v24 = vmul.f32 %v6192_v21, %v13699_v62  ;;  %v15268_v62 = vld [vmem:[#allocation21_spill] sm:$0xff]  ;;  %v15273_v2 = vld [vmem:[#allocation95_spill] sm:$0xff] }
 0xe7f   :  { %7609 = vst [vmem:[%s14292_s6 + $0x218] sm:$0xff] %v6968_v16  ;;  %v13774_v8 = vpop.permute.xlu2 %6477  ;;  %v6561_v32 = vmul.f32 %v13258_v9, %v15268_v62  ;;  %v6570_v16 = vmul.f32 %v13291_v36, %v15273_v2  ;;  %v15281_v2 = vld [vmem:[#allocation61_spill] sm:$0xff] }
 0xe80   :  { %7111 = vst [vmem:[%s14292_s6 + $0xb0] sm:$0xff] %v7005_v13  ;;  %6537 = vperm.xlu2 %7806, %v13561_v60  }
 0xe81   :  { %7112 = vst [vmem:[%s14292_s6 + $0xb8] sm:$0xff] %v7006_v63 }
 0xe82   :  { %7628 = vst [vmem:[%s14292_s6 + $0x2b0] sm:$0xff] %v7007_v44 }
 0xe83   :  { %7629 = vst [vmem:[%s14292_s6 + $0x2b8] sm:$0xff] %v7008_v57  ;;  %v13789_v34 = vpop.permute.xlu1 %6517 }
 0xe86   :  { %6319 = vrot.lane.b32.xlu0 %v6224_v24, %s8049_s21 }
 0xe87   :  { %v6294_v42 = vpop.permute.xlu2 %6293  ;;  %7811 = vset.pattern.permute.xlu0 %v15219_v14 }
 0xe88   :  { %6317 = vrot.lane.b32.xlu2 %v13572_v41, %s8049_s21  ;;  %v6563_v41 = vmul.f32 %v13258_v9, %v15270_v61  ;;  %v6371_v12 = vsub.f32 %v8042_v37, %v6294_v42  ;;  %v6375_v42 = vsub.f32 %v8043_v39, %v13499_v4 }
 0xe89   :  { %7810 = vset.pattern.permute.xlu2 %v15219_v14  ;;  %v6564_v14 = vmul.f32 %v13258_v9, %v15271_v43  ;;  %v8041_v9 = vld [vmem:[%s14288_s5 + $0x98] sm:$0xff] }
 0xe8a   :  { %v6372_v10 = vsub.f32 %v8041_v9, %v13447_v40  ;;  %v6572_v40 = vmul.f32 %v13291_v36, %v15275_v52  ;;  %v15276_v43 = vld [vmem:[#allocation121_spill] sm:$0xff] }
 0xe8b   :  { %v6310_v60 = vpop.permute.xlu1 %6309 }
 0xe8c   :  { %v6379_v6 = vsub.f32 %v13508_v22, %v6310_v60  ;;  %v6368_v22 = vsub.f32 %v8040_v38, %v13734_v19  ;;  %v15272_v19 = vld [vmem:[#allocation91_spill] sm:$0xff]  ;;  %v15277_v38 = vld [vmem:[#allocation122_spill] sm:$0xff] }
 0xe8d   :  { %v6569_v7 = vmul.f32 %v13291_v36, %v15272_v19 }
 0xe8e   :  { %6805 = vperm.xlu1 %7809, %v6379_v6   ;;  %6755 = vperm.xlu0 %7811, %v6369_v33   ;;  %v6378_v6 = vsub.f32 %v13381_v18, %v13673_v26  ;;  %v15278_v18 = vld [vmem:[#allocation44_spill] sm:$0xff] }
 0xe8f   :  { %v6696_v59 = vpop.permute.xlu2 %6695  ;;  %v6583_v26 = vmul.f32 %v13467_v31, %v15278_v18 }
 0xe90   :  { %v6849_v49 = vadd.f32 %v6696_v59, %v6561_v32  ;;  %v6850_v20 = vadd.f32 %v6696_v59, %v6562_v5  ;;  %v6851_v27 = vadd.f32 %v6696_v59, %v6563_v41  ;;  %v6852_v58 = vadd.f32 %v6696_v59, %v6564_v14  ;;  %6750 = vperm.xlu2 %7810, %v6368_v22   ;;  %v15279_v59 = vld [vmem:[#allocation45_spill] sm:$0xff] }
 0xe91   :  { %v6581_v14 = vmul.f32 %v13467_v31, %v15276_v43  ;;  %v6582_v22 = vmul.f32 %v13467_v31, %v15277_v38 }
 0xe92   :  { %v6977_v23 = vmax.f32 %v6849_v49, 0.0  ;;  %v6978_v53 = vmax.f32 %v6850_v20, 0.0  ;;  %v6979_v1 = vmax.f32 %v6851_v27, 0.0  ;;  %v6980_v0 = vmax.f32 %v6852_v58, 0.0 }
 0xe93   :  { %v6584_v49 = vmul.f32 %v13467_v31, %v15279_v59 }
 0xe94   :  { %7097 = vst [vmem:[%s14292_s6 + $0x40] sm:$0xff] %v6977_v23 }
 0xe95   :  { %7098 = vst [vmem:[%s14292_s6 + $0x48] sm:$0xff] %v6978_v53 }
 0xe96   :  { %7614 = vst [vmem:[%s14292_s6 + $0x240] sm:$0xff] %v6979_v1  ;;  %6770 = vperm.xlu0 %7811, %v6372_v10  }
 0xe97   :  { %7615 = vst [vmem:[%s14292_s6 + $0x248] sm:$0xff] %v6980_v0  ;;  %v6706_v21 = vpop.permute.xlu2 %6705 }
 0xe98   :  { %v6857_v11 = vadd.f32 %v6706_v21, %v6569_v7  ;;  %v6858_v13 = vadd.f32 %v6706_v21, %v6570_v16  ;;  %v6859_v63 = vadd.f32 %v6706_v21, %v6571_v35  ;;  %v6860_v44 = vadd.f32 %v6706_v21, %v6572_v40  ;;  %6765 = vperm.xlu2 %7810, %v6371_v12   ;;  %v15280_v7 = vld [vmem:[#allocation60_spill] sm:$0xff]  ;;  %v15283_v35 = vld [vmem:[#allocation65_spill] sm:$0xff] }
 0xe99   :  { %v6601_v31 = vmul.f32 %v13535_v17, %v15280_v7  ;;  %v15282_v16 = vld [vmem:[#allocation64_spill] sm:$0xff]  ;;  %v6604_v52 = vmul.f32 %v13535_v17, %v15283_v35  ;;  %v15292_v35 = vld [vmem:[#allocation31_spill] sm:$0xff] }
 0xe9a   :  { %v6985_v36 = vmax.f32 %v6857_v11, 0.0  ;;  %v6986_v57 = vmax.f32 %v6858_v13, 0.0  ;;  %v6987_v24 = vmax.f32 %v6859_v63, 0.0  ;;  %v6988_v60 = vmax.f32 %v6860_v44, 0.0 }
 0xe9b   :  { %v6603_v55 = vmul.f32 %v13535_v17, %v15282_v16 }
 0xe9c   :  { %7101 = vst [vmem:[%s14292_s6 + $0x60] sm:$0xff] %v6985_v36 }
 0xe9d   :  { %7102 = vst [vmem:[%s14292_s6 + $0x68] sm:$0xff] %v6986_v57  ;;  %v15284_v57 = vld [vmem:[#allocation47_spill] sm:$0xff] }
 0xe9e   :  { %7618 = vst [vmem:[%s14292_s6 + $0x260] sm:$0xff] %v6987_v24  ;;  %6785 = vperm.xlu0 %7811, %v6375_v42   ;;  %v6613_v24 = vmul.f32 %v13600_v15, %v15284_v57  ;;  %v15286_v42 = vld [vmem:[#allocation35_spill] sm:$0xff] }
 0xe9f   :  { %7619 = vst [vmem:[%s14292_s6 + $0x268] sm:$0xff] %v6988_v60  ;;  %v13857_v33 = vpop.permute.xlu0 %6527  ;;  %v13859_v4 = vpop.permute.xlu2 %6492  ;;  %v15285_v60 = vld [vmem:[#allocation139_spill] sm:$0xff] }
 0xea0   :  { %v6614_v39 = vmul.f32 %v13600_v15, %v15285_v60 }
 0xea5   :  { %v13863_v62 = vpop.permute.xlu1 %6532 }
 0xea6   :  { %6800 = vperm.xlu0 %7811, %v6378_v6   ;;  %v6615_v6 = vmul.f32 %v13600_v15, %v15286_v42 }
 0xea7   :  { %v6300_v32 = vpop.permute.xlu2 %6299  ;;  %v6314_v61 = vpop.permute.xlu0 %6313 }
 0xea8   :  { %v6374_v5 = vsub.f32 %v8044_v47, %v6300_v32  ;;  %v6381_v41 = vsub.f32 %v13585_v3, %v6314_v61  ;;  %v15287_v32 = vld [vmem:[#allocation12_spill] sm:$0xff] }
 0xea9   :  { %v6616_v47 = vmul.f32 %v13600_v15, %v15287_v32  ;;  %v8046_v32 = vld [vmem:[%s14288_s5 + $0xd8] sm:$0xff] }
 0xeaa   :  { %6780 = vperm.xlu2 %7810, %v6374_v5  }
 0xead   :  { %v6316_v20 = vpop.permute.xlu1 %6315 }
 0xeae   :  { %6815 = vperm.xlu0 %7811, %v6381_v41   ;;  %v6382_v27 = vsub.f32 %v13605_v54, %v6316_v20  ;;  %v6602_v54 = vmul.f32 %v13535_v17, %v15281_v2  ;;  %v15288_v20 = vld [vmem:[#allocation116_spill] sm:$0xff] }
 0xeaf   :  { %v6721_v58 = vpop.permute.xlu2 %6720 }
 0xeb0   :  { %v6869_v23 = vadd.f32 %v6721_v58, %v6581_v14  ;;  %v6870_v53 = vadd.f32 %v6721_v58, %v6582_v22  ;;  %v6871_v3 = vadd.f32 %v6721_v58, %v6583_v26  ;;  %v6872_v1 = vadd.f32 %v6721_v58, %v6584_v49  ;;  %6820 = vperm.xlu1 %7809, %v6382_v27   ;;  %v8045_v22 = vld [vmem:[%s14288_s5 + $0xc0] sm:$0xff]  ;;  %v15289_v58 = vld [vmem:[#allocation112_spill] sm:$0xff] }
 0xeb1   :  { %v6593_v27 = vmul.f32 %v13655_v48, %v15288_v20 }
 0xeb2   :  { %v6997_v0 = vmax.f32 %v6869_v23, 0.0  ;;  %v6998_v9 = vmax.f32 %v6870_v53, 0.0  ;;  %v6999_v10 = vmax.f32 %v6871_v3, 0.0  ;;  %v7000_v19 = vmax.f32 %v6872_v1, 0.0  ;;  %v15290_v53 = vld [vmem:[#allocation62_spill] sm:$0xff]  ;;  %v15291_v1 = vld [vmem:[#allocation63_spill] sm:$0xff] }
 0xeb3   :  { %v6594_v23 = vmul.f32 %v13655_v48, %v15289_v58  ;;  %v6595_v3 = vmul.f32 %v13655_v48, %v15290_v53 }
 0xeb4   :  { %7107 = vst [vmem:[%s14292_s6 + $0x90] sm:$0xff] %v6997_v0  ;;  %v6596_v0 = vmul.f32 %v13655_v48, %v15291_v1  ;;  %v6625_v48 = vmul.f32 %v13671_v51, %v15292_v35 }
 0xeb5   :  { %7108 = vst [vmem:[%s14292_s6 + $0x98] sm:$0xff] %v6998_v9  ;;  %v6746_v40 = vpop.permute.xlu1 %6745 }
 0xeb6   :  { %7624 = vst [vmem:[%s14292_s6 + $0x290] sm:$0xff] %v6999_v10  ;;  %v6889_v37 = vadd.f32 %v6746_v40, %v6601_v31  ;;  %v6890_v12 = vadd.f32 %v6746_v40, %v6602_v54  ;;  %v6891_v21 = vadd.f32 %v6746_v40, %v6603_v55  ;;  %v6892_v11 = vadd.f32 %v6746_v40, %v6604_v52  ;;  %v15293_v52 = vld [vmem:[#allocation23_spill] sm:$0xff] }
 0xeb7   :  { %7625 = vst [vmem:[%s14292_s6 + $0x298] sm:$0xff] %v7000_v19  ;;  %v13898_v13 = vpop.permute.xlu2 %6507  ;;  %v6626_v40 = vmul.f32 %v13671_v51, %v15293_v52 }
 0xeb8   :  { %v7017_v17 = vmax.f32 %v6889_v37, 0.0  ;;  %v7018_v63 = vmax.f32 %v6890_v12, 0.0  ;;  %v7019_v44 = vmax.f32 %v6891_v21, 0.0  ;;  %v7020_v36 = vmax.f32 %v6892_v11, 0.0  ;;  %v15294_v37 = vld [vmem:[#allocation32_spill] sm:$0xff]  ;;  %v15295_v21 = vld [vmem:[#allocation15_spill] sm:$0xff] }
 0xeb9   :  { %v6627_v12 = vmul.f32 %v13671_v51, %v15294_v37  ;;  %v6628_v11 = vmul.f32 %v13671_v51, %v15295_v21 }
 0xeba   :  { %7117 = vst [vmem:[%s14292_s6 + $0xe0] sm:$0xff] %v7017_v17 }
 0xebb   :  { %7118 = vst [vmem:[%s14292_s6 + $0xe8] sm:$0xff] %v7018_v63 }
 0xebc   :  { %7634 = vst [vmem:[%s14292_s6 + $0x2e0] sm:$0xff] %v7019_v44 }
 0xebd   :  { %7635 = vst [vmem:[%s14292_s6 + $0x2e8] sm:$0xff] %v7020_v36  ;;  %v6761_v5 = vpop.permute.xlu1 %6760 }
 0xebe   :  { %v6901_v61 = vadd.f32 %v6761_v5, %v6613_v24  ;;  %v6902_v41 = vadd.f32 %v6761_v5, %v6614_v39  ;;  %v6903_v43 = vadd.f32 %v6761_v5, %v6615_v6  ;;  %v6904_v14 = vadd.f32 %v6761_v5, %v6616_v47 }
 0xebf   :  { %v6306_v38 = vpop.permute.xlu2 %6305 }
 0xec0   :  { %v6377_v18 = vsub.f32 %v8045_v22, %v6306_v38  ;;  %v7029_v15 = vmax.f32 %v6901_v61, 0.0  ;;  %v7030_v26 = vmax.f32 %v6902_v41, 0.0  ;;  %v7031_v59 = vmax.f32 %v6903_v43, 0.0  ;;  %v15296_v61 = vld [vmem:[#allocation39_spill] sm:$0xff]  ;;  %v15297_v43 = vld [vmem:[#allocation38_spill] sm:$0xff] }
 0xec1   :  { %v7032_v49 = vmax.f32 %v6904_v14, 0.0  ;;  %v6637_v41 = vmul.f32 %v13731_v29, %v15296_v61  ;;  %v6638_v14 = vmul.f32 %v13731_v29, %v15297_v43  ;;  %v15298_v38 = vld [vmem:[#allocation14_spill] sm:$0xff] }
 0xec2   :  { %6795 = vperm.xlu2 %7810, %v6377_v18   ;;  %7123 = vst [vmem:[%s14292_s6 + $0x110] sm:$0xff] %v7029_v15  ;;  %v6639_v22 = vmul.f32 %v13731_v29, %v15298_v38  ;;  %v15299_v18 = vld [vmem:[#allocation5_spill] sm:$0xff]  ;;  %v15308_v38 = vld [vmem:[#allocation4_spill] sm:$0xff] }
 0xec3   :  { %7124 = vst [vmem:[%s14292_s6 + $0x118] sm:$0xff] %v7030_v26  ;;  %v6640_v15 = vmul.f32 %v13731_v29, %v15299_v18  ;;  %v15300_v29 = vld [vmem:[#allocation56_spill] sm:$0xff] }
 0xec4   :  { %7640 = vst [vmem:[%s14292_s6 + $0x310] sm:$0xff] %v7031_v59 }
 0xec5   :  { %7641 = vst [vmem:[%s14292_s6 + $0x318] sm:$0xff] %v7032_v49 }
 0xec7   :  { %v6736_v9 = vpop.permute.xlu2 %6735 }
 0xec8   :  { %v6881_v10 = vadd.f32 %v6736_v9, %v6593_v27  ;;  %v6882_v19 = vadd.f32 %v6736_v9, %v6594_v23  ;;  %v6883_v7 = vadd.f32 %v6736_v9, %v6595_v3  ;;  %v6884_v31 = vadd.f32 %v6736_v9, %v6596_v0 }
 0xec9   :  { %v6605_v9 = vmul.f32 %v13720_v45, %v15300_v29 }
 0xeca   :  { %v7009_v2 = vmax.f32 %v6881_v10, 0.0  ;;  %v7010_v54 = vmax.f32 %v6882_v19, 0.0  ;;  %v7011_v16 = vmax.f32 %v6883_v7, 0.0  ;;  %v7012_v55 = vmax.f32 %v6884_v31, 0.0  ;;  %v15301_v10 = vld [vmem:[#allocation57_spill] sm:$0xff]  ;;  %v15303_v31 = vld [vmem:[#allocation120_spill] sm:$0xff] }
 0xecb   :  { %v6606_v19 = vmul.f32 %v13720_v45, %v15301_v10 }
 0xecc   :  { %7113 = vst [vmem:[%s14292_s6 + $0xc0] sm:$0xff] %v7009_v2  ;;  %v6608_v2 = vmul.f32 %v13720_v45, %v15303_v31 }
 0xecd   :  { %7114 = vst [vmem:[%s14292_s6 + $0xc8] sm:$0xff] %v7010_v54 }
 0xece   :  { %7630 = vst [vmem:[%s14292_s6 + $0x2c0] sm:$0xff] %v7011_v16  ;;  %v6776_v17 = vpop.permute.xlu1 %6775 }
 0xecf   :  { %7631 = vst [vmem:[%s14292_s6 + $0x2c8] sm:$0xff] %v7012_v55  ;;  %v6913_v63 = vadd.f32 %v6776_v17, %v6625_v48  ;;  %v6914_v44 = vadd.f32 %v6776_v17, %v6626_v40  ;;  %v6915_v36 = vadd.f32 %v6776_v17, %v6627_v12  ;;  %v6916_v57 = vadd.f32 %v6776_v17, %v6628_v11  ;;  %v13963_v24 = vpop.permute.xlu2 %6522  ;;  %v15305_v17 = vld [vmem:[#allocation140_spill] sm:$0xff] }
 0xed1   :  { %v7041_v51 = vmax.f32 %v6913_v63, 0.0  ;;  %v7042_v60 = vmax.f32 %v6914_v44, 0.0  ;;  %v7043_v39 = vmax.f32 %v6915_v36, 0.0  ;;  %v7044_v42 = vmax.f32 %v6916_v57, 0.0  ;;  %v15306_v44 = vld [vmem:[#allocation42_spill] sm:$0xff]  ;;  %v15307_v57 = vld [vmem:[#allocation43_spill] sm:$0xff] }
 0xed2   :  { %v6618_v63 = vmul.f32 %v13774_v8, %v15305_v17  ;;  %v6619_v36 = vmul.f32 %v13774_v8, %v15306_v44  ;;  %v15318_v17 = vld [vmem:[#allocation134_spill] sm:$0xff] }
 0xed3   :  { %7129 = vst [vmem:[%s14292_s6 + $0x140] sm:$0xff] %v7041_v51  ;;  %v6620_v51 = vmul.f32 %v13774_v8, %v15307_v57  ;;  %v15319_v57 = vld [vmem:[#allocation13_spill] sm:$0xff] }
 0xed4   :  { %7130 = vst [vmem:[%s14292_s6 + $0x148] sm:$0xff] %v7042_v60 }
 0xed5   :  { %7646 = vst [vmem:[%s14292_s6 + $0x340] sm:$0xff] %v7043_v39 }
 0xed6   :  { %7647 = vst [vmem:[%s14292_s6 + $0x348] sm:$0xff] %v7044_v42 }
 0xed7   :  { %v6312_v6 = vpop.permute.xlu2 %6311 }
 0xed8   :  { %v6380_v47 = vsub.f32 %v8046_v32, %v6312_v6 }
 0xeda   :  { %6810 = vperm.xlu2 %7810, %v6380_v47  }
 0xedf   :  { %v13980_v5 = vpop.permute.xlu2 %6537 }
 0xee7   :  { %v6791_v26 = vpop.permute.xlu1 %6790  ;;  %v6318_v59 = vpop.permute.xlu2 %6317 }
 0xee8   :  { %v6925_v49 = vadd.f32 %v6791_v26, %v6637_v41  ;;  %v6926_v20 = vadd.f32 %v6791_v26, %v6638_v14  ;;  %v6927_v27 = vadd.f32 %v6791_v26, %v6639_v22  ;;  %v6928_v58 = vadd.f32 %v6791_v26, %v6640_v15  ;;  %v15309_v22 = vld [vmem:[#allocation128_spill] sm:$0xff]  ;;  %v15310_v15 = vld [vmem:[#allocation137_spill] sm:$0xff] }
 0xee9   :  { %v6383_v23 = vsub.f32 %v13558_v28, %v6318_v59  ;;  %v15302_v28 = vld [vmem:[#allocation119_spill] sm:$0xff]  ;;  %v6650_v18 = vmul.f32 %v13789_v34, %v15309_v22  ;;  %v6651_v26 = vmul.f32 %v13789_v34, %v15310_v15  ;;  %v6652_v59 = vmul.f32 %v13789_v34, %v12843_v50  ;;  %v15314_v50 = vld [vmem:[#allocation126_spill] sm:$0xff] }
 0xeea   :  { %v7053_v53 = vmax.f32 %v6925_v49, 0.0  ;;  %v7054_v3 = vmax.f32 %v6926_v20, 0.0  ;;  %v7055_v1 = vmax.f32 %v6927_v27, 0.0  ;;  %v7056_v0 = vmax.f32 %v6928_v58, 0.0  ;;  %v15311_v49 = vld [vmem:[#allocation138_spill] sm:$0xff]  ;;  %v15312_v27 = vld [vmem:[#allocation125_spill] sm:$0xff] }
 0xeeb   :  { %6825 = vperm.xlu2 %7810, %v6383_v23   ;;  %v6607_v7 = vmul.f32 %v13720_v45, %v15302_v28  ;;  %v15304_v45 = vld [vmem:[#allocation16_spill] sm:$0xff]  ;;  %v6609_v20 = vmul.f32 %v13370_v30, %v15311_v49  ;;  %v6610_v58 = vmul.f32 %v13370_v30, %v15312_v27  ;;  %v15313_v23 = vld [vmem:[#allocation46_spill] sm:$0xff]  ;;  %v15323_v49 = vld [vmem:[#allocation135_spill] sm:$0xff] }
 0xeec   :  { %7135 = vst [vmem:[%s14292_s6 + $0x170] sm:$0xff] %v7053_v53  ;;  %v6617_v11 = vmul.f32 %v13774_v8, %v15304_v45  ;;  %v6611_v53 = vmul.f32 %v13370_v30, %v15313_v23  ;;  %v15325_v23 = vld [vmem:[#allocation36_spill] sm:$0xff] }
 0xeed   :  { %7136 = vst [vmem:[%s14292_s6 + $0x178] sm:$0xff] %v7054_v3 }
 0xeee   :  { %7652 = vst [vmem:[%s14292_s6 + $0x370] sm:$0xff] %v7055_v1 }
 0xeef   :  { %7653 = vst [vmem:[%s14292_s6 + $0x378] sm:$0xff] %v7056_v0  ;;  %v6751_v54 = vpop.permute.xlu2 %6750 }
 0xef0   :  { %v6893_v16 = vadd.f32 %v6751_v54, %v6605_v9  ;;  %v6894_v55 = vadd.f32 %v6751_v54, %v6606_v19  ;;  %v6895_v35 = vadd.f32 %v6751_v54, %v6607_v7  ;;  %v6896_v48 = vadd.f32 %v6751_v54, %v6608_v2  ;;  %v14011_v52 = vpop.permute.xlu0 %6542  ;;  %v15315_v19 = vld [vmem:[#allocation129_spill] sm:$0xff] }
 0xef1   :  { %v6629_v28 = vmul.f32 %v13859_v4, %v15315_v19 }
 0xef2   :  { %v7021_v40 = vmax.f32 %v6893_v16, 0.0  ;;  %v7022_v37 = vmax.f32 %v6894_v55, 0.0  ;;  %v7023_v12 = vmax.f32 %v6895_v35, 0.0  ;;  %v7024_v21 = vmax.f32 %v6896_v48, 0.0  ;;  %v15316_v35 = vld [vmem:[#allocation28_spill] sm:$0xff] }
 0xef3   :  { %v6630_v48 = vmul.f32 %v13859_v4, %v15316_v35 }
 0xef4   :  { %7119 = vst [vmem:[%s14292_s6 + $0xf0] sm:$0xff] %v7021_v40 }
 0xef5   :  { %7120 = vst [vmem:[%s14292_s6 + $0xf8] sm:$0xff] %v7022_v37 }
 0xef6   :  { %7636 = vst [vmem:[%s14292_s6 + $0x2f0] sm:$0xff] %v7023_v12 }
 0xef7   :  { %7637 = vst [vmem:[%s14292_s6 + $0x2f8] sm:$0xff] %v7024_v21  ;;  %v6766_v60 = vpop.permute.xlu2 %6765  ;;  %v15317_v21 = vld [vmem:[#allocation24_spill] sm:$0xff] }
 0xef8   :  { %v6905_v39 = vadd.f32 %v6766_v60, %v6617_v11  ;;  %v6906_v42 = vadd.f32 %v6766_v60, %v6618_v63  ;;  %v6907_v6 = vadd.f32 %v6766_v60, %v6619_v36  ;;  %v6908_v32 = vadd.f32 %v6766_v60, %v6620_v51  ;;  %v6320_v47 = vpop.permute.xlu0 %6319 }
 0xef9   :  { %v6384_v61 = vsub.f32 %v13759_v56, %v6320_v47  ;;  %v6649_v56 = vmul.f32 %v13789_v34, %v15308_v38  ;;  %v6612_v34 = vmul.f32 %v13370_v30, %v15314_v50  ;;  %v6631_v45 = vmul.f32 %v13859_v4, %v15317_v21  ;;  %v15331_v21 = vld [vmem:[#allocation30_spill] sm:$0xff] }
 0xefa   :  { %v7033_v41 = vmax.f32 %v6905_v39, 0.0  ;;  %v7034_v43 = vmax.f32 %v6906_v42, 0.0  ;;  %v7035_v14 = vmax.f32 %v6907_v6, 0.0  ;;  %v7036_v8 = vmax.f32 %v6908_v32, 0.0  ;;  %v15320_v42 = vld [vmem:[#allocation40_spill] sm:$0xff] }
 0xefb   :  { %6830 = vperm.xlu0 %7811, %v6384_v61   ;;  %v6632_v63 = vmul.f32 %v13859_v4, %v15318_v17  ;;  %v6621_v51 = vmul.f32 %v13439_v46, %v15319_v57  ;;  %v6622_v6 = vmul.f32 %v13439_v46, %v15320_v42  ;;  %v15321_v61 = vld [vmem:[#allocation34_spill] sm:$0xff] }
 0xefc   :  { %7125 = vst [vmem:[%s14292_s6 + $0x120] sm:$0xff] %v7033_v41  ;;  %v6623_v41 = vmul.f32 %v13439_v46, %v15321_v61  ;;  %v15335_v42 = vld [vmem:[#allocation78_spill] sm:$0xff] }
 0xefd   :  { %7126 = vst [vmem:[%s14292_s6 + $0x128] sm:$0xff] %v7034_v43 }
 0xefe   :  { %7642 = vst [vmem:[%s14292_s6 + $0x320] sm:$0xff] %v7035_v14 }
 0xeff   :  { %7643 = vst [vmem:[%s14292_s6 + $0x328] sm:$0xff] %v7036_v8  ;;  %v15322_v8 = vld [vmem:[#allocation41_spill] sm:$0xff] }
 0xf00   :  { %v6806_v3 = vpop.permute.xlu1 %6805  ;;  %v6756_v1 = vpop.permute.xlu0 %6755  ;;  %v6624_v38 = vmul.f32 %v13439_v46, %v15322_v8 }
 0xf01   :  { %v6937_v0 = vadd.f32 %v6806_v3, %v6649_v56  ;;  %v6938_v29 = vadd.f32 %v6806_v3, %v6650_v18  ;;  %v6939_v9 = vadd.f32 %v6806_v3, %v6651_v26  ;;  %v6940_v10 = vadd.f32 %v6806_v3, %v6652_v59  ;;  %v15326_v3 = vld [vmem:[#allocation37_spill] sm:$0xff] }
 0xf02   :  { %v6897_v7 = vadd.f32 %v6756_v1, %v6609_v20  ;;  %v6898_v31 = vadd.f32 %v6756_v1, %v6610_v58  ;;  %v6899_v55 = vadd.f32 %v6756_v1, %v6611_v53  ;;  %v6900_v37 = vadd.f32 %v6756_v1, %v6612_v34  ;;  %v15324_v20 = vld [vmem:[#allocation75_spill] sm:$0xff] }
 0xf03   :  { %v7065_v2 = vmax.f32 %v6937_v0, 0.0  ;;  %v7066_v54 = vmax.f32 %v6938_v29, 0.0  ;;  %v7067_v16 = vmax.f32 %v6939_v9, 0.0  ;;  %v7068_v40 = vmax.f32 %v6940_v10, 0.0  ;;  %v15327_v0 = vld [vmem:[#allocation69_spill] sm:$0xff] }
 0xf04   :  { %v6781_v12 = vpop.permute.xlu2 %6780  ;;  %v7025_v30 = vmax.f32 %v6897_v7, 0.0  ;;  %v7026_v44 = vmax.f32 %v6898_v31, 0.0  ;;  %v7027_v60 = vmax.f32 %v6899_v55, 0.0  ;;  %v7028_v4 = vmax.f32 %v6900_v37, 0.0  ;;  %v15328_v55 = vld [vmem:[#allocation33_spill] sm:$0xff] }
 0xf05   :  { %7141 = vst [vmem:[%s14292_s6 + $0x1a0] sm:$0xff] %v7065_v2  ;;  %v6917_v11 = vadd.f32 %v6781_v12, %v6629_v28  ;;  %v6918_v36 = vadd.f32 %v6781_v12, %v6630_v48  ;;  %v6919_v39 = vadd.f32 %v6781_v12, %v6631_v45  ;;  %v6920_v32 = vadd.f32 %v6781_v12, %v6632_v63  ;;  %v15329_v48 = vld [vmem:[#allocation79_spill] sm:$0xff]  ;;  %v15330_v37 = vld [vmem:[#allocation141_spill] sm:$0xff] }
 0xf06   :  { %7142 = vst [vmem:[%s14292_s6 + $0x1a8] sm:$0xff] %v7066_v54  ;;  %v6633_v27 = vmul.f32 %v15324_v20, %v15323_v49  ;;  %v6634_v53 = vmul.f32 %v15324_v20, %v15325_v23  ;;  %v6635_v1 = vmul.f32 %v15324_v20, %v15326_v3  ;;  %v6636_v29 = vmul.f32 %v15324_v20, %v15327_v0  ;;  %v15340_v0 = vld [vmem:[#allocation103_spill] sm:$0xff] }
 0xf07   :  { %7658 = vst [vmem:[%s14292_s6 + $0x3a0] sm:$0xff] %v7067_v16  ;;  %v7045_v43 = vmax.f32 %v6917_v11, 0.0  ;;  %v7046_v56 = vmax.f32 %v6918_v36, 0.0  ;;  %v7047_v18 = vmax.f32 %v6919_v39, 0.0  ;;  %v7048_v26 = vmax.f32 %v6920_v32, 0.0  ;;  %v15332_v36 = vld [vmem:[#allocation133_spill] sm:$0xff] }
 0xf08   :  { %7659 = vst [vmem:[%s14292_s6 + $0x3a8] sm:$0xff] %v7068_v40  ;;  %v6771_v47 = vpop.permute.xlu0 %6770  ;;  %v6645_v35 = vmul.f32 %v13663_v25, %v15328_v55  ;;  %v6646_v40 = vmul.f32 %v13663_v25, %v15329_v48  ;;  %v6647_v12 = vmul.f32 %v13663_v25, %v15330_v37  ;;  %v6648_v45 = vmul.f32 %v13663_v25, %v15331_v21  ;;  %v15334_v25 = vld [vmem:[#allocation8_spill] sm:$0xff] }
 0xf09   :  { %7121 = vst [vmem:[%s14292_s6 + $0x100] sm:$0xff] %v7025_v30  ;;  %v6909_v14 = vadd.f32 %v6771_v47, %v6621_v51  ;;  %v6910_v22 = vadd.f32 %v6771_v47, %v6622_v6  ;;  %v6911_v15 = vadd.f32 %v6771_v47, %v6623_v41  ;;  %v6912_v59 = vadd.f32 %v6771_v47, %v6624_v38  ;;  %v15333_v51 = vld [vmem:[#allocation71_spill] sm:$0xff] }
 0xf0a   :  { %7122 = vst [vmem:[%s14292_s6 + $0x108] sm:$0xff] %v7026_v44  ;;  %v6641_v57 = vmul.f32 %v13898_v13, %v15332_v36  ;;  %v6643_v39 = vmul.f32 %v13898_v13, %v15334_v25  ;;  %v6644_v6 = vmul.f32 %v13898_v13, %v15335_v42  ;;  %v15347_v36 = vld [vmem:[#allocation3_spill] sm:$0xff] }
 0xf0b   :  { %7638 = vst [vmem:[%s14292_s6 + $0x300] sm:$0xff] %v7027_v60  ;;  %v7037_v46 = vmax.f32 %v6909_v14, 0.0  ;;  %v7038_v58 = vmax.f32 %v6910_v22, 0.0  ;;  %v7039_v9 = vmax.f32 %v6911_v15, 0.0  ;;  %v7040_v10 = vmax.f32 %v6912_v59, 0.0  ;;  %v15339_v59 = vld [vmem:[#allocation2_spill] sm:$0xff] }
 0xf0c   :  { %7639 = vst [vmem:[%s14292_s6 + $0x308] sm:$0xff] %v7028_v4  ;;  %v6642_v60 = vmul.f32 %v13898_v13, %v15333_v51  ;;  %v15338_v13 = vld [vmem:[#allocation19_spill] sm:$0xff] }
 0xf0d   :  { %7131 = vst [vmem:[%s14292_s6 + $0x150] sm:$0xff] %v7045_v43 }
 0xf0e   :  { %7132 = vst [vmem:[%s14292_s6 + $0x158] sm:$0xff] %v7046_v56  ;;  %v15336_v56 = vld [vmem:[#allocation18_spill] sm:$0xff] }
 0xf0f   :  { %7648 = vst [vmem:[%s14292_s6 + $0x350] sm:$0xff] %v7047_v18  ;;  %v6657_v22 = vmul.f32 %v13857_v33, %v15336_v56  ;;  %v15337_v18 = vld [vmem:[#allocation127_spill] sm:$0xff] }
 0xf10   :  { %7649 = vst [vmem:[%s14292_s6 + $0x358] sm:$0xff] %v7048_v26  ;;  %v6786_v50 = vpop.permute.xlu0 %6785  ;;  %v6658_v15 = vmul.f32 %v13857_v33, %v15337_v18  ;;  %v6659_v26 = vmul.f32 %v13857_v33, %v15338_v13 }
 0xf11   :  { %7127 = vst [vmem:[%s14292_s6 + $0x130] sm:$0xff] %v7037_v46  ;;  %v6921_v34 = vadd.f32 %v6786_v50, %v6633_v27  ;;  %v6922_v19 = vadd.f32 %v6786_v50, %v6634_v53  ;;  %v6923_v28 = vadd.f32 %v6786_v50, %v6635_v1  ;;  %v6924_v7 = vadd.f32 %v6786_v50, %v6636_v29  ;;  %v15342_v50 = vld [vmem:[#allocation136_spill] sm:$0xff] }
 0xf12   :  { %7128 = vst [vmem:[%s14292_s6 + $0x138] sm:$0xff] %v7038_v58  ;;  %v6660_v46 = vmul.f32 %v13857_v33, %v15339_v59  ;;  %v6661_v29 = vmul.f32 %v13863_v62, %v15340_v0 }
 0xf13   :  { %7644 = vst [vmem:[%s14292_s6 + $0x330] sm:$0xff] %v7039_v9  ;;  %v7049_v31 = vmax.f32 %v6921_v34, 0.0  ;;  %v7050_v2 = vmax.f32 %v6922_v19, 0.0  ;;  %v7051_v54 = vmax.f32 %v6923_v28, 0.0  ;;  %v7052_v16 = vmax.f32 %v6924_v7, 0.0  ;;  %v15341_v9 = vld [vmem:[#allocation27_spill] sm:$0xff] }
 0xf14   :  { %7645 = vst [vmem:[%s14292_s6 + $0x338] sm:$0xff] %v7040_v10  ;;  %v6662_v10 = vmul.f32 %v13863_v62, %v15341_v9  ;;  %v6663_v34 = vmul.f32 %v13863_v62, %v15342_v50  ;;  %v15343_v19 = vld [vmem:[#allocation105_spill] sm:$0xff] }
 0xf15   :  { %7133 = vst [vmem:[%s14292_s6 + $0x160] sm:$0xff] %v7049_v31  ;;  %v6664_v28 = vmul.f32 %v13863_v62, %v15343_v19 }
 0xf16   :  { %7134 = vst [vmem:[%s14292_s6 + $0x168] sm:$0xff] %v7050_v2 }
 0xf17   :  { %7650 = vst [vmem:[%s14292_s6 + $0x360] sm:$0xff] %v7051_v54 }
 0xf18   :  { %7651 = vst [vmem:[%s14292_s6 + $0x368] sm:$0xff] %v7052_v16  ;;  %v6801_v30 = vpop.permute.xlu0 %6800 }
 0xf19   :  { %v6933_v11 = vadd.f32 %v6801_v30, %v6645_v35  ;;  %v6934_v17 = vadd.f32 %v6801_v30, %v6646_v40  ;;  %v6935_v63 = vadd.f32 %v6801_v30, %v6647_v12  ;;  %v6936_v44 = vadd.f32 %v6801_v30, %v6648_v45  ;;  %v15344_v45 = vld [vmem:[#allocation11_spill] sm:$0xff] }
 0xf1a   :  { %v6653_v30 = vmul.f32 %v13963_v24, %v15344_v45 }
 0xf1b   :  { %v7061_v4 = vmax.f32 %v6933_v11, 0.0  ;;  %v7062_v32 = vmax.f32 %v6934_v17, 0.0  ;;  %v7063_v47 = vmax.f32 %v6935_v63, 0.0  ;;  %v7064_v61 = vmax.f32 %v6936_v44, 0.0  ;;  %v15345_v11 = vld [vmem:[#allocation17_spill] sm:$0xff]  ;;  %v15346_v63 = vld [vmem:[#allocation132_spill] sm:$0xff] }
 0xf1c   :  { %v6796_v41 = vpop.permute.xlu2 %6795  ;;  %v6654_v17 = vmul.f32 %v13963_v24, %v15345_v11  ;;  %v6655_v44 = vmul.f32 %v13963_v24, %v15346_v63 }
 0xf1d   :  { %7139 = vst [vmem:[%s14292_s6 + $0x190] sm:$0xff] %v7061_v4  ;;  %v6929_v43 = vadd.f32 %v6796_v41, %v6641_v57  ;;  %v6930_v14 = vadd.f32 %v6796_v41, %v6642_v60  ;;  %v6931_v8 = vadd.f32 %v6796_v41, %v6643_v39  ;;  %v6932_v38 = vadd.f32 %v6796_v41, %v6644_v6  ;;  %v15349_v41 = vld [vmem:[#allocation106_spill] sm:$0xff] }
 0xf1e   :  { %7140 = vst [vmem:[%s14292_s6 + $0x198] sm:$0xff] %v7062_v32  ;;  %v6656_v57 = vmul.f32 %v13963_v24, %v15347_v36  ;;  %v15348_v24 = vld [vmem:[#allocation104_spill] sm:$0xff] }
 0xf1f   :  { %7656 = vst [vmem:[%s14292_s6 + $0x390] sm:$0xff] %v7063_v47  ;;  %v7057_v49 = vmax.f32 %v6929_v43, 0.0  ;;  %v7058_v20 = vmax.f32 %v6930_v14, 0.0  ;;  %v7059_v27 = vmax.f32 %v6931_v8, 0.0  ;;  %v7060_v58 = vmax.f32 %v6932_v38, 0.0  ;;  %v15350_v14 = vld [vmem:[#allocation29_spill] sm:$0xff] }
 0xf20   :  { %7657 = vst [vmem:[%s14292_s6 + $0x398] sm:$0xff] %v7064_v61  ;;  %v6816_v23 = vpop.permute.xlu0 %6815  ;;  %v6665_v61 = vmul.f32 %v13980_v5, %v15348_v24  ;;  %v6666_v43 = vmul.f32 %v13980_v5, %v15349_v41  ;;  %v6667_v8 = vmul.f32 %v13980_v5, %v15350_v14  ;;  %v15351_v38 = vld [vmem:[#allocation26_spill] sm:$0xff] }
 0xf21   :  { %7137 = vst [vmem:[%s14292_s6 + $0x180] sm:$0xff] %v7057_v49  ;;  %v6945_v53 = vadd.f32 %v6816_v23, %v6657_v22  ;;  %v6946_v3 = vadd.f32 %v6816_v23, %v6658_v15  ;;  %v6947_v33 = vadd.f32 %v6816_v23, %v6659_v26  ;;  %v6948_v1 = vadd.f32 %v6816_v23, %v6660_v46 }
 0xf22   :  { %7138 = vst [vmem:[%s14292_s6 + $0x188] sm:$0xff] %v7058_v20  ;;  %v6821_v16 = vpop.permute.xlu1 %6820  ;;  %v6668_v56 = vmul.f32 %v13980_v5, %v15351_v38  ;;  %v15352_v5 = vld [vmem:[#allocation101_spill] sm:$0xff] }
 0xf23   :  { %7654 = vst [vmem:[%s14292_s6 + $0x380] sm:$0xff] %v7059_v27  ;;  %v7073_v7 = vmax.f32 %v6945_v53, 0.0  ;;  %v7074_v31 = vmax.f32 %v6946_v3, 0.0  ;;  %v7075_v2 = vmax.f32 %v6947_v33, 0.0  ;;  %v7076_v54 = vmax.f32 %v6948_v1, 0.0  ;;  %v15354_v53 = vld [vmem:[#allocation99_spill] sm:$0xff] }
 0xf24   :  { %7655 = vst [vmem:[%s14292_s6 + $0x388] sm:$0xff] %v7060_v58  ;;  %v6949_v55 = vadd.f32 %v6821_v16, %v6661_v29  ;;  %v6950_v35 = vadd.f32 %v6821_v16, %v6662_v10  ;;  %v6951_v48 = vadd.f32 %v6821_v16, %v6663_v34  ;;  %v6952_v40 = vadd.f32 %v6821_v16, %v6664_v28  ;;  %v15353_v58 = vld [vmem:[#allocation102_spill] sm:$0xff]  ;;  %v15355_v33 = vld [vmem:[#allocation100_spill] sm:$0xff] }
 0xf25   :  { %7145 = vst [vmem:[%s14292_s6 + $0x1c0] sm:$0xff] %v7073_v7  ;;  %v6669_v27 = vmul.f32 %v14011_v52, %v15352_v5  ;;  %v6670_v23 = vmul.f32 %v14011_v52, %v15353_v58  ;;  %v6671_v3 = vmul.f32 %v14011_v52, %v15354_v53  ;;  %v6672_v1 = vmul.f32 %v14011_v52, %v15355_v33 }
 0xf26   :  { %7146 = vst [vmem:[%s14292_s6 + $0x1c8] sm:$0xff] %v7074_v31  ;;  %v7077_v62 = vmax.f32 %v6949_v55, 0.0  ;;  %v7078_v37 = vmax.f32 %v6950_v35, 0.0  ;;  %v7079_v12 = vmax.f32 %v6951_v48, 0.0  ;;  %v7080_v21 = vmax.f32 %v6952_v40, 0.0 }
 0xf27   :  { %7662 = vst [vmem:[%s14292_s6 + $0x3c0] sm:$0xff] %v7075_v2 }
 0xf28   :  { %7663 = vst [vmem:[%s14292_s6 + $0x3c8] sm:$0xff] %v7076_v54 }
 0xf29   :  { %7147 = vst [vmem:[%s14292_s6 + $0x1d0] sm:$0xff] %v7077_v62 }
 0xf2a   :  { %7148 = vst [vmem:[%s14292_s6 + $0x1d8] sm:$0xff] %v7078_v37 }
 0xf2b   :  { %7664 = vst [vmem:[%s14292_s6 + $0x3d0] sm:$0xff] %v7079_v12 }
 0xf2c   :  { %7665 = vst [vmem:[%s14292_s6 + $0x3d8] sm:$0xff] %v7080_v21 }
 0xf34   :  { %v6811_v51 = vpop.permute.xlu2 %6810 }
 0xf35   :  { %v6941_v60 = vadd.f32 %v6811_v51, %v6653_v30  ;;  %v6942_v25 = vadd.f32 %v6811_v51, %v6654_v17  ;;  %v6943_v39 = vadd.f32 %v6811_v51, %v6655_v44  ;;  %v6944_v42 = vadd.f32 %v6811_v51, %v6656_v57 }
 0xf37   :  { %v7069_v6 = vmax.f32 %v6941_v60, 0.0  ;;  %v7070_v4 = vmax.f32 %v6942_v25, 0.0  ;;  %v7071_v32 = vmax.f32 %v6943_v39, 0.0  ;;  %v7072_v47 = vmax.f32 %v6944_v42, 0.0 }
 0xf39   :  { %7143 = vst [vmem:[%s14292_s6 + $0x1b0] sm:$0xff] %v7069_v6 }
 0xf3a   :  { %7144 = vst [vmem:[%s14292_s6 + $0x1b8] sm:$0xff] %v7070_v4 }
 0xf3b   :  { %7660 = vst [vmem:[%s14292_s6 + $0x3b0] sm:$0xff] %v7071_v32 }
 0xf3c   :  { %7661 = vst [vmem:[%s14292_s6 + $0x3b8] sm:$0xff] %v7072_v47 }
 0xf45   :  { %v6826_v22 = vpop.permute.xlu2 %6825 }
 0xf46   :  { %v6953_v18 = vadd.f32 %v6826_v22, %v6665_v61  ;;  %v6954_v15 = vadd.f32 %v6826_v22, %v6666_v43  ;;  %v6955_v13 = vadd.f32 %v6826_v22, %v6667_v8  ;;  %v6956_v26 = vadd.f32 %v6826_v22, %v6668_v56 }
 0xf48   :  { %v7081_v59 = vmax.f32 %v6953_v18, 0.0  ;;  %v7082_v46 = vmax.f32 %v6954_v15, 0.0  ;;  %v7083_v49 = vmax.f32 %v6955_v13, 0.0  ;;  %v7084_v20 = vmax.f32 %v6956_v26, 0.0 }
 0xf4a   :  { %7149 = vst [vmem:[%s14292_s6 + $0x1e0] sm:$0xff] %v7081_v59 }
 0xf4b   :  { %7150 = vst [vmem:[%s14292_s6 + $0x1e8] sm:$0xff] %v7082_v46 }
 0xf4c   :  { %7666 = vst [vmem:[%s14292_s6 + $0x3e0] sm:$0xff] %v7083_v49 }
 0xf4d   :  { %7667 = vst [vmem:[%s14292_s6 + $0x3e8] sm:$0xff] %v7084_v20 }
 0xf6d   :  { %v6831_v0 = vpop.permute.xlu0 %6830 }
 0xf6e   :  { %v6957_v29 = vadd.f32 %v6831_v0, %v6669_v27  ;;  %v6958_v9 = vadd.f32 %v6831_v0, %v6670_v23  ;;  %v6959_v10 = vadd.f32 %v6831_v0, %v6671_v3  ;;  %v6960_v50 = vadd.f32 %v6831_v0, %v6672_v1 }
 0xf70   :  { %v7085_v34 = vmax.f32 %v6957_v29, 0.0  ;;  %v7086_v19 = vmax.f32 %v6958_v9, 0.0  ;;  %v7087_v28 = vmax.f32 %v6959_v10, 0.0  ;;  %v7088_v7 = vmax.f32 %v6960_v50, 0.0 }
 0xf72   :  { %7151 = vst [vmem:[%s14292_s6 + $0x1f0] sm:$0xff] %v7085_v34 }
 0xf73   :  { %7152 = vst [vmem:[%s14292_s6 + $0x1f8] sm:$0xff] %v7086_v19 }
 0xf74   :  { %7668 = vst [vmem:[%s14292_s6 + $0x3f0] sm:$0xff] %v7087_v28 }
 0xf75   :  { %7669 = vst [vmem:[%s14292_s6 + $0x3f8] sm:$0xff] %v7088_v7 }

</bundles_post_ra>
